<compile_context>
chip_gen: v7x
topology: tpu7x:2x2x1
jax: 0.10.0
libtpu: 0.0.40
codegen_flags: <defaults>
</compile_context>

<pallas_src>
import jax
import jax.numpy as jnp
from jax.experimental import pallas as pl
from jax.experimental.pallas import tpu as pltpu

EPS = 1e-5  # PyTorch BatchNorm2d default eps


# ----------------------------- Pallas kernel ------------------------------- #
def basic_block_kernel(x_ref, xres_ref, w1_ref, g1_ref, b1_ref,
                       w2_ref, g2_ref, b2_ref, out_ref, pad_ref):
    # x_ref    : (N, H, W, C)      f32 -- unpadded NHWC input (conv1 source)
    # xres_ref : (C, N*H*W)        f32 -- same input, lane-dense, for the residual add
    # w1_ref   : (9*C, C)          f32 -- conv1 taps stacked on the contraction dim
    # g1/b1    : (1, C)            f32 -- bn1 affine
    # w2_ref   : (C, 9*C)          f32 -- conv2 taps, (cout, 9*cin) for the NT matmul
    # g2/b2    : (C, 1)            f32 -- bn2 affine
    # out_ref  : (C, N*H*W)        f32 -- lane-dense output slab
    # pad_ref  : (N, H+2, W+2, C)  f32 -- VMEM halo scratch shared by both convs
    N, H, W, C = x_ref.shape
    Hp, Wp = H + 2, W + 2
    rows = N * H * W

    # Zero only the 1-pixel halo border once. The interior is always overwritten and
    # the border stays zero for both convs (replaces a full jnp.pad in HBM plus a
    # full-buffer VMEM memset).
    pad_ref[:, 0:1, :, :] = jnp.zeros((N, 1, Wp, C), jnp.float32)
    pad_ref[:, Hp - 1:Hp, :, :] = jnp.zeros((N, 1, Wp, C), jnp.float32)
    pad_ref[:, :, 0:1, :] = jnp.zeros((N, Hp, 1, C), jnp.float32)
    pad_ref[:, :, Wp - 1:Wp, :] = jnp.zeros((N, Hp, 1, C), jnp.float32)

    def im2col():
        # Tap-stacked patch matrix (rows, 9*C); taps ordered (kh, kw) row-major to
        # match the weight flattening done in the wrapper.
        taps = [pad_ref[:, kh:kh + H, kw:kw + W, :].reshape(rows, C)
                for kh in range(3) for kw in range(3)]
        return jnp.concatenate(taps, axis=1)

    def bn_scale_shift(y, g, b, axis):
        # BatchNorm2d training stats (batch mean, biased var) folded into one
        # per-channel scale/shift: bn(y) == y * scale + shift.
        mean = jnp.mean(y, axis=axis, keepdims=True)
        ctr = y - mean
        var = jnp.mean(ctr * ctr, axis=axis, keepdims=True)
        scale = g * jax.lax.rsqrt(var + EPS)
        shift = b - mean * scale
        return scale, shift

    # ---------------- conv1 -> bn1 -> relu ----------------
    pad_ref[:, 1:H + 1, 1:W + 1, :] = x_ref[...]
    y = jnp.dot(im2col(), w1_ref[...],
                preferred_element_type=jnp.float32)              # (rows, C)
    s1, t1 = bn_scale_shift(y, g1_ref[...], b1_ref[...], axis=0)
    y = jnp.maximum(y * s1 + t1, 0.0)

    # ---------------- conv2 -> bn2 ----------------
    pad_ref[:, 1:H + 1, 1:W + 1, :] = y.reshape(N, H, W, C)      # halo stays zero
    # NT matmul: (C, 9C) x (rows, 9C)^T -> (C, rows). Output is lane-dense, so the
    # bn2 / residual / relu epilogue and the final store run at full lane width.
    z = jax.lax.dot_general(
        w2_ref[...], im2col(),
        dimension_numbers=(((1,), (1,)), ((), ())),
        preferred_element_type=jnp.float32)                      # (C, rows)
    s2, t2 = bn_scale_shift(z, g2_ref[...], b2_ref[...], axis=1)

    # ---------- residual add (downsample is None) + relu, lane-dense store ----------
    out_ref[...] = jnp.maximum(z * s2 + t2 + xres_ref[...], 0.0)


# ------------------------------- wrapper ------------------------------------ #
def basic_block_forward(x_nchw, w1_oihw, gamma1, beta1, w2_oihw, gamma2, beta2):
    N, C, H, W = x_nchw.shape
    rows = N * H * W
    f32 = jnp.float32

    x_nhwc = jnp.transpose(x_nchw, (0, 2, 3, 1)).astype(f32)                 # conv1 src
    x_res = jnp.transpose(x_nchw, (1, 0, 2, 3)).reshape(C, rows).astype(f32)  # residual

    # conv1 weights: (co,ci,kh,kw) -> (kh,kw,ci,co) -> (9*ci, co)   [NN matmul]
    w1k = jnp.transpose(w1_oihw, (2, 3, 1, 0)).reshape(9 * C, C).astype(f32)
    # conv2 weights: (co,ci,kh,kw) -> (co,kh,kw,ci) -> (co, 9*ci)   [NT matmul]
    w2k = jnp.transpose(w2_oihw, (0, 2, 3, 1)).reshape(C, 9 * C).astype(f32)

    g1 = gamma1.reshape(1, C).astype(f32)
    b1 = beta1.reshape(1, C).astype(f32)
    g2 = gamma2.reshape(C, 1).astype(f32)
    b2 = beta2.reshape(C, 1).astype(f32)

    vmem = pl.BlockSpec(memory_space=pltpu.MemorySpace.VMEM)

    # Scoped-VMEM limit sized from the actual (lane/sublane-padded) buffers with
    # headroom for im2col temporaries / relayouts, clamped to a window that is valid
    # on v5e/v6e (128 MiB physical) and v7x (64 MiB physical) alike.
    def padded_bytes(shape):
        s = list(shape)
        s[-1] = -(-s[-1] // 128) * 128
        if len(s) >= 2:
            s[-2] = -(-s[-2] // 8) * 8
        n = 4
        for d in s:
            n *= d
        return n

    buf_bytes = sum(padded_bytes(s) for s in [
        (N, H, W, C), (C, rows), (9 * C, C), (1, C), (1, C),
        (C, 9 * C), (C, 1), (C, 1), (C, rows), (N, H + 2, W + 2, C),
        (rows, 9 * C), (rows, 9 * C)])            # last two: im2col temporaries
    vmem_limit = int(min(max(8 * buf_bytes, 16 * 2**20), 32 * 2**20))

    out_flat = pl.pallas_call(
        basic_block_kernel,
        out_shape=jax.ShapeDtypeStruct((C, rows), f32),
        in_specs=[vmem] * 8,
        out_specs=vmem,
        scratch_shapes=[pltpu.VMEM((N, H + 2, W + 2, C), f32)],
        compiler_params=pltpu.CompilerParams(vmem_limit_bytes=vmem_limit),
    )(x_nhwc, x_res, w1k, g1, b1, w2k, g2, b2)

    # (C, N*H*W) -> NCHW
    return jnp.transpose(out_flat.reshape(C, N, H, W), (1, 0, 2, 3))


# ------------------------- parameter construction --------------------------- #
def make_asconv_weight(key, c_out, c_in, k=3):
    # Mirrors ASConv2d.initialize() + forward(use_ann=True):
    #   org = weight.reshape(k, k, c_out, c_in); U,s,Vh = svd(org)
    #   weight_ann = (U @ diag(s) @ Vh).permute(2, 3, 0, 1)
    # Since U @ diag(s) @ Vh reconstructs `org` exactly, the effective weight is
    # transpose(weight.reshape(k, k, c_out, c_in), (2, 3, 0, 1)).
    w = 0.1 * jax.random.normal(key, (c_out, c_in, k, k), jnp.float32)
    org = w.reshape(k, k, c_out, c_in)
    return jnp.transpose(org, (2, 3, 0, 1))  # (c_out, c_in, k, k), OIHW


# ----------------------------- pure-JAX reference --------------------------- #
def reference_forward(x, w1, g1, b1, w2, g2, b2):
    def conv(x_, w_):
        return jax.lax.conv_general_dilated(
            x_, w_, window_strides=(1, 1), padding=((1, 1), (1, 1)),
            dimension_numbers=("NCHW", "OIHW", "NCHW"),
            precision=jax.lax.Precision.HIGHEST)

    def bn(y, g, b):
        mean = jnp.mean(y, axis=(0, 2, 3), keepdims=True)
        var = jnp.mean((y - mean) ** 2, axis=(0, 2, 3), keepdims=True)
        return ((y - mean) * jax.lax.rsqrt(var + EPS)
                * g.reshape(1, -1, 1, 1) + b.reshape(1, -1, 1, 1))

    y = jnp.maximum(bn(conv(x, w1), g1, b1), 0.0)
    z = bn(conv(y, w2), g2, b2)
    return jnp.maximum(z + x, 0.0)


if __name__ == "__main__":
    key = jax.random.PRNGKey(0)
    kx, kw1, kw2, kg1, kb1, kg2, kb2 = jax.random.split(key, 7)

    N, C, H, W = 2, 4, 16, 16          # inplanes == planes == 4, stride=1
    x = jax.random.normal(kx, (N, C, H, W), jnp.float32)

    w1 = make_asconv_weight(kw1, C, C)
    w2 = make_asconv_weight(kw2, C, C)
    gamma1 = 1.0 + 0.1 * jax.random.normal(kg1, (C,), jnp.float32)
    beta1 = 0.1 * jax.random.normal(kb1, (C,), jnp.float32)
    gamma2 = 1.0 + 0.1 * jax.random.normal(kg2, (C,), jnp.float32)
    beta2 = 0.1 * jax.random.normal(kb2, (C,), jnp.float32)

    out = basic_block_forward(x, w1, gamma1, beta1, w2, gamma2, beta2)
    out = jax.block_until_ready(out)

    ref = reference_forward(x, w1, gamma1, beta1, w2, gamma2, beta2)
    assert out.shape == (N, C, H, W), out.shape
    max_err = float(jnp.max(jnp.abs(out - ref)))
    assert jnp.allclose(out, ref, atol=2e-3, rtol=2e-3), f"max_err={max_err}"
    print("KERNEL_OK")
</pallas_src>

<mosaic_0001>
module attributes {stable_mosaic.version = 11 : i64} {
  func.func @basic_block_kernel(%arg0: memref<2x16x16x4xf32, #tpu.memory_space<vmem>>, %arg1: memref<4x512xf32, #tpu.memory_space<vmem>>, %arg2: memref<36x4xf32, #tpu.memory_space<vmem>>, %arg3: memref<1x4xf32, #tpu.memory_space<vmem>>, %arg4: memref<1x4xf32, #tpu.memory_space<vmem>>, %arg5: memref<4x36xf32, #tpu.memory_space<vmem>>, %arg6: memref<4x1xf32, #tpu.memory_space<vmem>>, %arg7: memref<4x1xf32, #tpu.memory_space<vmem>>, %arg8: memref<4x512xf32, #tpu.memory_space<vmem>>, %arg9: memref<2x18x18x4xf32, #tpu.memory_space<vmem>>) attributes {dimension_semantics = [], scalar_prefetch = 0 : i64, scratch_operands = 1 : i64, tpu.core_type = #tpu.core_type<tc>} {
    %cst = arith.constant 0.000000e+00 : f32
    %0 = vector.broadcast %cst : f32 to vector<2x1x18x4xf32>
    %c0 = arith.constant 0 : index
    %c0_0 = arith.constant 0 : index
    %c0_1 = arith.constant 0 : index
    %c0_2 = arith.constant 0 : index
    %1 = vector.load %arg9[%c0, %c0_0, %c0_1, %c0_2] : memref<2x18x18x4xf32, #tpu.memory_space<vmem>>, vector<2x1x18x4xf32>
    tpu.vector_store %arg9[%c0, %c0_0, %c0_1, %c0_2], %0 {strides = array<i32>} : memref<2x18x18x4xf32, #tpu.memory_space<vmem>>, vector<2x1x18x4xf32>,
    %cst_3 = arith.constant 0.000000e+00 : f32
    %2 = vector.broadcast %cst_3 : f32 to vector<2x1x18x4xf32>
    %c0_4 = arith.constant 0 : index
    %c17 = arith.constant 17 : index
    %c0_5 = arith.constant 0 : index
    %c0_6 = arith.constant 0 : index
    %3 = vector.load %arg9[%c0_4, %c17, %c0_5, %c0_6] : memref<2x18x18x4xf32, #tpu.memory_space<vmem>>, vector<2x1x18x4xf32>
    tpu.vector_store %arg9[%c0_4, %c17, %c0_5, %c0_6], %2 {strides = array<i32>} : memref<2x18x18x4xf32, #tpu.memory_space<vmem>>, vector<2x1x18x4xf32>,
    %cst_7 = arith.constant 0.000000e+00 : f32
    %4 = vector.broadcast %cst_7 : f32 to vector<2x18x1x4xf32>
    %c0_8 = arith.constant 0 : index
    %c0_9 = arith.constant 0 : index
    %c0_10 = arith.constant 0 : index
    %c0_11 = arith.constant 0 : index
    %5 = vector.load %arg9[%c0_8, %c0_9, %c0_10, %c0_11] : memref<2x18x18x4xf32, #tpu.memory_space<vmem>>, vector<2x18x1x4xf32>
    tpu.vector_store %arg9[%c0_8, %c0_9, %c0_10, %c0_11], %4 {strides = array<i32>} : memref<2x18x18x4xf32, #tpu.memory_space<vmem>>, vector<2x18x1x4xf32>,
    %cst_12 = arith.constant 0.000000e+00 : f32
    %6 = vector.broadcast %cst_12 : f32 to vector<2x18x1x4xf32>
    %c0_13 = arith.constant 0 : index
    %c0_14 = arith.constant 0 : index
    %c17_15 = arith.constant 17 : index
    %c0_16 = arith.constant 0 : index
    %7 = vector.load %arg9[%c0_13, %c0_14, %c17_15, %c0_16] : memref<2x18x18x4xf32, #tpu.memory_space<vmem>>, vector<2x18x1x4xf32>
    tpu.vector_store %arg9[%c0_13, %c0_14, %c17_15, %c0_16], %6 {strides = array<i32>} : memref<2x18x18x4xf32, #tpu.memory_space<vmem>>, vector<2x18x1x4xf32>,
    %c0_17 = arith.constant 0 : index
    %c0_18 = arith.constant 0 : index
    %c0_19 = arith.constant 0 : index
    %c0_20 = arith.constant 0 : index
    %8 = vector.load %arg0[%c0_17, %c0_18, %c0_19, %c0_20] : memref<2x16x16x4xf32, #tpu.memory_space<vmem>>, vector<2x16x16x4xf32>
    %c0_21 = arith.constant 0 : index
    %c1 = arith.constant 1 : index
    %c1_22 = arith.constant 1 : index
    %c0_23 = arith.constant 0 : index
    %9 = vector.load %arg9[%c0_21, %c1, %c1_22, %c0_23] : memref<2x18x18x4xf32, #tpu.memory_space<vmem>>, vector<2x16x16x4xf32>
    tpu.vector_store %arg9[%c0_21, %c1, %c1_22, %c0_23], %8 {strides = array<i32>} : memref<2x18x18x4xf32, #tpu.memory_space<vmem>>, vector<2x16x16x4xf32>,
    %c0_24 = arith.constant 0 : index
    %c0_25 = arith.constant 0 : index
    %c0_26 = arith.constant 0 : index
    %c0_27 = arith.constant 0 : index
    %10 = vector.load %arg9[%c0_24, %c0_25, %c0_26, %c0_27] : memref<2x18x18x4xf32, #tpu.memory_space<vmem>>, vector<2x16x16x4xf32>
    %11 = vector.shape_cast %10 : vector<2x16x16x4xf32> to vector<512x4xf32>
    %c0_28 = arith.constant 0 : index
    %c0_29 = arith.constant 0 : index
    %c1_30 = arith.constant 1 : index
    %c0_31 = arith.constant 0 : index
    %12 = vector.load %arg9[%c0_28, %c0_29, %c1_30, %c0_31] : memref<2x18x18x4xf32, #tpu.memory_space<vmem>>, vector<2x16x16x4xf32>
    %13 = vector.shape_cast %12 : vector<2x16x16x4xf32> to vector<512x4xf32>
    %c0_32 = arith.constant 0 : index
    %c0_33 = arith.constant 0 : index
    %c2 = arith.constant 2 : index
    %c0_34 = arith.constant 0 : index
    %14 = vector.load %arg9[%c0_32, %c0_33, %c2, %c0_34] : memref<2x18x18x4xf32, #tpu.memory_space<vmem>>, vector<2x16x16x4xf32>
    %15 = vector.shape_cast %14 : vector<2x16x16x4xf32> to vector<512x4xf32>
    %c0_35 = arith.constant 0 : index
    %c1_36 = arith.constant 1 : index
    %c0_37 = arith.constant 0 : index
    %c0_38 = arith.constant 0 : index
    %16 = vector.load %arg9[%c0_35, %c1_36, %c0_37, %c0_38] : memref<2x18x18x4xf32, #tpu.memory_space<vmem>>, vector<2x16x16x4xf32>
    %17 = vector.shape_cast %16 : vector<2x16x16x4xf32> to vector<512x4xf32>
    %c0_39 = arith.constant 0 : index
    %c1_40 = arith.constant 1 : index
    %c1_41 = arith.constant 1 : index
    %c0_42 = arith.constant 0 : index
    %18 = vector.load %arg9[%c0_39, %c1_40, %c1_41, %c0_42] : memref<2x18x18x4xf32, #tpu.memory_space<vmem>>, vector<2x16x16x4xf32>
    %19 = vector.shape_cast %18 : vector<2x16x16x4xf32> to vector<512x4xf32>
    %c0_43 = arith.constant 0 : index
    %c1_44 = arith.constant 1 : index
    %c2_45 = arith.constant 2 : index
    %c0_46 = arith.constant 0 : index
    %20 = vector.load %arg9[%c0_43, %c1_44, %c2_45, %c0_46] : memref<2x18x18x4xf32, #tpu.memory_space<vmem>>, vector<2x16x16x4xf32>
    %21 = vector.shape_cast %20 : vector<2x16x16x4xf32> to vector<512x4xf32>
    %c0_47 = arith.constant 0 : index
    %c2_48 = arith.constant 2 : index
    %c0_49 = arith.constant 0 : index
    %c0_50 = arith.constant 0 : index
    %22 = vector.load %arg9[%c0_47, %c2_48, %c0_49, %c0_50] : memref<2x18x18x4xf32, #tpu.memory_space<vmem>>, vector<2x16x16x4xf32>
    %23 = vector.shape_cast %22 : vector<2x16x16x4xf32> to vector<512x4xf32>
    %c0_51 = arith.constant 0 : index
    %c2_52 = arith.constant 2 : index
    %c1_53 = arith.constant 1 : index
    %c0_54 = arith.constant 0 : index
    %24 = vector.load %arg9[%c0_51, %c2_52, %c1_53, %c0_54] : memref<2x18x18x4xf32, #tpu.memory_space<vmem>>, vector<2x16x16x4xf32>
    %25 = vector.shape_cast %24 : vector<2x16x16x4xf32> to vector<512x4xf32>
    %c0_55 = arith.constant 0 : index
    %c2_56 = arith.constant 2 : index
    %c2_57 = arith.constant 2 : index
    %c0_58 = arith.constant 0 : index
    %26 = vector.load %arg9[%c0_55, %c2_56, %c2_57, %c0_58] : memref<2x18x18x4xf32, #tpu.memory_space<vmem>>, vector<2x16x16x4xf32>
    %27 = vector.shape_cast %26 : vector<2x16x16x4xf32> to vector<512x4xf32>
    %28 = tpu.concatenate %11, %13, %15, %17, %19, %21, %23, %25, %27 in 1 : vector<512x4xf32>, vector<512x4xf32>, vector<512x4xf32>, vector<512x4xf32>, vector<512x4xf32>, vector<512x4xf32>, vector<512x4xf32>, vector<512x4xf32>, vector<512x4xf32> -> vector<512x36xf32>
    %c0_59 = arith.constant 0 : index
    %c0_60 = arith.constant 0 : index
    %29 = vector.load %arg2[%c0_59, %c0_60] : memref<36x4xf32, #tpu.memory_space<vmem>>, vector<36x4xf32>
    %cst_61 = arith.constant dense<0.000000e+00> : vector<512x4xf32>
    %30 = tpu.matmul %28, %29, %cst_61 {dimension_numbers = #tpu.dot_dimension_numbers<[1], [0], [0], [1], [0, 0, 1, 1], [], []>} : vector<512x36xf32>, vector<36x4xf32>, vector<512x4xf32> -> vector<512x4xf32>
    %c0_62 = arith.constant 0 : index
    %c0_63 = arith.constant 0 : index
    %31 = vector.load %arg3[%c0_62, %c0_63] : memref<1x4xf32, #tpu.memory_space<vmem>>, vector<1x4xf32>
    %c0_64 = arith.constant 0 : index
    %c0_65 = arith.constant 0 : index
    %32 = vector.load %arg4[%c0_64, %c0_65] : memref<1x4xf32, #tpu.memory_space<vmem>>, vector<1x4xf32>
    %cst_66 = arith.constant dense<0.000000e+00> : vector<4xf32>
    %33 = vector.multi_reduction <add>, %30, %cst_66 [0] : vector<512x4xf32> to vector<4xf32>
    %34 = vector.shape_cast %33 : vector<4xf32> to vector<1x4xf32>
    %cst_67 = arith.constant 5.120000e+02 : f32
    %35 = vector.broadcast %cst_67 : f32 to vector<1x4xf32>
    %36 = arith.divf %34, %35 : vector<1x4xf32>
    %37 = vector.broadcast %36 : vector<1x4xf32> to vector<512x4xf32>
    %38 = arith.subf %30, %37 : vector<512x4xf32>
    %39 = arith.mulf %38, %38 : vector<512x4xf32>
    %cst_68 = arith.constant dense<0.000000e+00> : vector<4xf32>
    %40 = vector.multi_reduction <add>, %39, %cst_68 [0] : vector<512x4xf32> to vector<4xf32>
    %41 = vector.shape_cast %40 : vector<4xf32> to vector<1x4xf32>
    %cst_69 = arith.constant 5.120000e+02 : f32
    %42 = vector.broadcast %cst_69 : f32 to vector<1x4xf32>
    %43 = arith.divf %41, %42 : vector<1x4xf32>
    %cst_70 = arith.constant 9.99999974E-6 : f32
    %44 = vector.broadcast %cst_70 : f32 to vector<1x4xf32>
    %45 = arith.addf %43, %44 : vector<1x4xf32>
    %46 = math.rsqrt %45 : vector<1x4xf32>
    %47 = arith.mulf %31, %46 : vector<1x4xf32>
    %48 = arith.mulf %36, %47 : vector<1x4xf32>
    %49 = arith.subf %32, %48 : vector<1x4xf32>
    %50 = vector.broadcast %47 : vector<1x4xf32> to vector<512x4xf32>
    %51 = arith.mulf %30, %50 : vector<512x4xf32>
    %52 = vector.broadcast %49 : vector<1x4xf32> to vector<512x4xf32>
    %53 = arith.addf %51, %52 : vector<512x4xf32>
    %cst_71 = arith.constant 0.000000e+00 : f32
    %54 = vector.broadcast %cst_71 : f32 to vector<512x4xf32>
    %55 = arith.maximumf %53, %54 : vector<512x4xf32>
    %56 = vector.shape_cast %55 : vector<512x4xf32> to vector<2x16x16x4xf32>
    %c0_72 = arith.constant 0 : index
    %c1_73 = arith.constant 1 : index
    %c1_74 = arith.constant 1 : index
    %c0_75 = arith.constant 0 : index
    %57 = vector.load %arg9[%c0_72, %c1_73, %c1_74, %c0_75] : memref<2x18x18x4xf32, #tpu.memory_space<vmem>>, vector<2x16x16x4xf32>
    tpu.vector_store %arg9[%c0_72, %c1_73, %c1_74, %c0_75], %56 {strides = array<i32>} : memref<2x18x18x4xf32, #tpu.memory_space<vmem>>, vector<2x16x16x4xf32>,
    %c0_76 = arith.constant 0 : index
    %c0_77 = arith.constant 0 : index
    %58 = vector.load %arg5[%c0_76, %c0_77] : memref<4x36xf32, #tpu.memory_space<vmem>>, vector<4x36xf32>
    %c0_78 = arith.constant 0 : index
    %c0_79 = arith.constant 0 : index
    %c0_80 = arith.constant 0 : index
    %c0_81 = arith.constant 0 : index
    %59 = vector.load %arg9[%c0_78, %c0_79, %c0_80, %c0_81] : memref<2x18x18x4xf32, #tpu.memory_space<vmem>>, vector<2x16x16x4xf32>
    %60 = vector.shape_cast %59 : vector<2x16x16x4xf32> to vector<512x4xf32>
    %c0_82 = arith.constant 0 : index
    %c0_83 = arith.constant 0 : index
    %c1_84 = arith.constant 1 : index
    %c0_85 = arith.constant 0 : index
    %61 = vector.load %arg9[%c0_82, %c0_83, %c1_84, %c0_85] : memref<2x18x18x4xf32, #tpu.memory_space<vmem>>, vector<2x16x16x4xf32>
    %62 = vector.shape_cast %61 : vector<2x16x16x4xf32> to vector<512x4xf32>
    %c0_86 = arith.constant 0 : index
    %c0_87 = arith.constant 0 : index
    %c2_88 = arith.constant 2 : index
    %c0_89 = arith.constant 0 : index
    %63 = vector.load %arg9[%c0_86, %c0_87, %c2_88, %c0_89] : memref<2x18x18x4xf32, #tpu.memory_space<vmem>>, vector<2x16x16x4xf32>
    %64 = vector.shape_cast %63 : vector<2x16x16x4xf32> to vector<512x4xf32>
    %c0_90 = arith.constant 0 : index
    %c1_91 = arith.constant 1 : index
    %c0_92 = arith.constant 0 : index
    %c0_93 = arith.constant 0 : index
    %65 = vector.load %arg9[%c0_90, %c1_91, %c0_92, %c0_93] : memref<2x18x18x4xf32, #tpu.memory_space<vmem>>, vector<2x16x16x4xf32>
    %66 = vector.shape_cast %65 : vector<2x16x16x4xf32> to vector<512x4xf32>
    %c0_94 = arith.constant 0 : index
    %c1_95 = arith.constant 1 : index
    %c1_96 = arith.constant 1 : index
    %c0_97 = arith.constant 0 : index
    %67 = vector.load %arg9[%c0_94, %c1_95, %c1_96, %c0_97] : memref<2x18x18x4xf32, #tpu.memory_space<vmem>>, vector<2x16x16x4xf32>
    %68 = vector.shape_cast %67 : vector<2x16x16x4xf32> to vector<512x4xf32>
    %c0_98 = arith.constant 0 : index
    %c1_99 = arith.constant 1 : index
    %c2_100 = arith.constant 2 : index
    %c0_101 = arith.constant 0 : index
    %69 = vector.load %arg9[%c0_98, %c1_99, %c2_100, %c0_101] : memref<2x18x18x4xf32, #tpu.memory_space<vmem>>, vector<2x16x16x4xf32>
    %70 = vector.shape_cast %69 : vector<2x16x16x4xf32> to vector<512x4xf32>
    %c0_102 = arith.constant 0 : index
    %c2_103 = arith.constant 2 : index
    %c0_104 = arith.constant 0 : index
    %c0_105 = arith.constant 0 : index
    %71 = vector.load %arg9[%c0_102, %c2_103, %c0_104, %c0_105] : memref<2x18x18x4xf32, #tpu.memory_space<vmem>>, vector<2x16x16x4xf32>
    %72 = vector.shape_cast %71 : vector<2x16x16x4xf32> to vector<512x4xf32>
    %c0_106 = arith.constant 0 : index
    %c2_107 = arith.constant 2 : index
    %c1_108 = arith.constant 1 : index
    %c0_109 = arith.constant 0 : index
    %73 = vector.load %arg9[%c0_106, %c2_107, %c1_108, %c0_109] : memref<2x18x18x4xf32, #tpu.memory_space<vmem>>, vector<2x16x16x4xf32>
    %74 = vector.shape_cast %73 : vector<2x16x16x4xf32> to vector<512x4xf32>
    %c0_110 = arith.constant 0 : index
    %c2_111 = arith.constant 2 : index
    %c2_112 = arith.constant 2 : index
    %c0_113 = arith.constant 0 : index
    %75 = vector.load %arg9[%c0_110, %c2_111, %c2_112, %c0_113] : memref<2x18x18x4xf32, #tpu.memory_space<vmem>>, vector<2x16x16x4xf32>
    %76 = vector.shape_cast %75 : vector<2x16x16x4xf32> to vector<512x4xf32>
    %77 = tpu.concatenate %60, %62, %64, %66, %68, %70, %72, %74, %76 in 1 : vector<512x4xf32>, vector<512x4xf32>, vector<512x4xf32>, vector<512x4xf32>, vector<512x4xf32>, vector<512x4xf32>, vector<512x4xf32>, vector<512x4xf32>, vector<512x4xf32> -> vector<512x36xf32>
    %cst_114 = arith.constant dense<0.000000e+00> : vector<4x512xf32>
    %78 = tpu.matmul %58, %77, %cst_114 {dimension_numbers = #tpu.dot_dimension_numbers<[1], [1], [0], [0], [0, 0, 1, 0], [], []>} : vector<4x36xf32>, vector<512x36xf32>, vector<4x512xf32> -> vector<4x512xf32>
    %c0_115 = arith.constant 0 : index
    %c0_116 = arith.constant 0 : index
    %79 = vector.load %arg6[%c0_115, %c0_116] : memref<4x1xf32, #tpu.memory_space<vmem>>, vector<4x1xf32>
    %c0_117 = arith.constant 0 : index
    %c0_118 = arith.constant 0 : index
    %80 = vector.load %arg7[%c0_117, %c0_118] : memref<4x1xf32, #tpu.memory_space<vmem>>, vector<4x1xf32>
    %cst_119 = arith.constant dense<0.000000e+00> : vector<4xf32>
    %81 = vector.multi_reduction <add>, %78, %cst_119 [1] : vector<4x512xf32> to vector<4xf32>
    %82 = vector.shape_cast %81 : vector<4xf32> to vector<4x1xf32>
    %cst_120 = arith.constant 5.120000e+02 : f32
    %83 = vector.broadcast %cst_120 : f32 to vector<4x1xf32>
    %84 = arith.divf %82, %83 : vector<4x1xf32>
    %85 = vector.broadcast %84 : vector<4x1xf32> to vector<4x512xf32>
    %86 = arith.subf %78, %85 : vector<4x512xf32>
    %87 = arith.mulf %86, %86 : vector<4x512xf32>
    %cst_121 = arith.constant dense<0.000000e+00> : vector<4xf32>
    %88 = vector.multi_reduction <add>, %87, %cst_121 [1] : vector<4x512xf32> to vector<4xf32>
    %89 = vector.shape_cast %88 : vector<4xf32> to vector<4x1xf32>
    %cst_122 = arith.constant 5.120000e+02 : f32
    %90 = vector.broadcast %cst_122 : f32 to vector<4x1xf32>
    %91 = arith.divf %89, %90 : vector<4x1xf32>
    %cst_123 = arith.constant 9.99999974E-6 : f32
    %92 = vector.broadcast %cst_123 : f32 to vector<4x1xf32>
    %93 = arith.addf %91, %92 : vector<4x1xf32>
    %94 = math.rsqrt %93 : vector<4x1xf32>
    %95 = arith.mulf %79, %94 : vector<4x1xf32>
    %96 = arith.mulf %84, %95 : vector<4x1xf32>
    %97 = arith.subf %80, %96 : vector<4x1xf32>
    %98 = vector.broadcast %95 : vector<4x1xf32> to vector<4x512xf32>
    %99 = arith.mulf %78, %98 : vector<4x512xf32>
    %100 = vector.broadcast %97 : vector<4x1xf32> to vector<4x512xf32>
    %101 = arith.addf %99, %100 : vector<4x512xf32>
    %c0_124 = arith.constant 0 : index
    %c0_125 = arith.constant 0 : index
    %102 = vector.load %arg1[%c0_124, %c0_125] : memref<4x512xf32, #tpu.memory_space<vmem>>, vector<4x512xf32>
    %103 = arith.addf %101, %102 : vector<4x512xf32>
    %cst_126 = arith.constant 0.000000e+00 : f32
    %104 = vector.broadcast %cst_126 : f32 to vector<4x512xf32>
    %105 = arith.maximumf %103, %104 : vector<4x512xf32>
    %c0_127 = arith.constant 0 : index
    %c0_128 = arith.constant 0 : index
    %106 = vector.load %arg8[%c0_127, %c0_128] : memref<4x512xf32, #tpu.memory_space<vmem>>, vector<4x512xf32>
    tpu.vector_store %arg8[%c0_127, %c0_128], %105 {strides = array<i32>} : memref<4x512xf32, #tpu.memory_space<vmem>>, vector<4x512xf32>,
    return
  }
}

</mosaic_0001>

<bundles_post_ra>
// kernel: tpu_custom_call.1
= control target key start
LH: loop header
LB: loop body
LE: loop exit
PB: predicated region body
PF: predicated region fallthrough
CT: control target
= control target key end

     0   :  { %vm30_vm0 = vcmask 31744   ;;  %vm33_vm1 = vcmask 25600   ;;  %v10138_v2 = vmov 0.0   ;;  %vm45_vm2 = vcmask 24576   ;;  %s10139_s29 = smov 4   ;;  %s15864_s0 = inlined_call_operand.vmem [shape: f32[2,16,16,4], index: 0, kind: input, shape index: {}]   ;;  %s15865_s1 = inlined_call_operand.vmem [shape: f32[4,512], index: 1, kind: input, shape index: {}]   ;;  %s15866_s2 = inlined_call_operand.vmem [shape: f32[36,4], index: 2, kind: input, shape index: {}]   ;;  %s15867_s3 = inlined_call_operand.vmem [shape: f32[1,4], index: 3, kind: input, shape index: {}]   ;;  %s15868_s4 = inlined_call_operand.vmem [shape: f32[1,4], index: 4, kind: input, shape index: {}]   ;;  %s15869_s5 = inlined_call_operand.vmem [shape: f32[4,36], index: 5, kind: input, shape index: {}]   ;;  %s15870_s6 = inlined_call_operand.vmem [shape: f32[4,1], index: 6, kind: input, shape index: {}]   ;;  %s15871_s7 = inlined_call_operand.vmem [shape: f32[4,1], index: 7, kind: input, shape index: {}]   ;;  %s15872_s8 = inlined_call_operand.hbm [shape: f32[4,512], index: 8, kind: output, shape index: {}]  }
   0x1   :  { %v118_v0 = vld [vmem:[%s15864_s0] sm:$0xff]  ;;  %v119_v1 = vld [vmem:[%s15864_s0 + $0x8] sm:$0xff]  ;;  %31 = vst.msk [vmem:[#allocation2] sm:$0xff] %vm30_vm0, %v10138_v2  ;;  %32 = vst.msk [vmem:[#allocation2 + $0x8] sm:$0xff] %vm30_vm0, %v10138_v2 }
   0x2   :  { %183 = vst.msk [vmem:[#allocation2 + $0x19] sm:$0xff] %vm30_vm0, %v118_v0  ;;  %35 = vst.msk [vmem:[#allocation2 + $0x1b0] sm:$0xff] %vm30_vm0, %v10138_v2  ;;  %v121_v3 = vld [vmem:[%s15864_s0 + $0x18] sm:$0xff]  ;;  %v120_v4 = vld [vmem:[%s15864_s0 + $0x10] sm:$0xff] }
   0x3   :  { %36 = vst.msk [vmem:[#allocation2 + $0x1b8] sm:$0xff] %vm30_vm0, %v10138_v2  ;;  %39 = vst.msk [vmem:[#allocation2 + $0x198] sm:$0xff] %vm30_vm0, %v10138_v2  ;;  %v123_v5 = vld [vmem:[%s15864_s0 + $0x28] sm:$0xff]  ;;  %v10237_v6 = vld [vmem:[%s15864_s0 + $0x20] sm:$0xff] }
   0x4   :  { %40 = vst.msk [vmem:[#allocation2 + $0x1a0] sm:$0xff] %vm30_vm0, %v10138_v2  ;;  %42 = vst.msk [vmem:[#allocation2 + $0x348] sm:$0xff] %vm30_vm0, %v10138_v2  ;;  %v10242_v7 = vld [vmem:[%s15864_s0 + $0x38] sm:$0xff]  ;;  %v10247_v8 = vld [vmem:[%s15864_s0 + $0x30] sm:$0xff] }
   0x5   :  { %43 = vst.msk [vmem:[#allocation2 + $0x350] sm:$0xff] %vm30_vm0, %v10138_v2  ;;  %184 = vst.msk [vmem:[#allocation2 + $0x21] sm:$0xff] %vm30_vm0, %v119_v1  ;;  %v127_v9 = vld [vmem:[%s15864_s0 + $0x48] sm:$0xff]  ;;  %v126_v10 = vld [vmem:[%s15864_s0 + $0x40] sm:$0xff] }
   0x6   :  { %34 = vst.msk [vmem:[#allocation2 + $0x10] sm:$0x3] %vm33_vm1, %v10138_v2  ;;  %37 = vst.msk [vmem:[#allocation2 + $0x1c0] sm:$0x3] %vm33_vm1, %v10138_v2  ;;  %v129_v11 = vld [vmem:[%s15864_s0 + $0x58] sm:$0xff]  ;;  %v128_v12 = vld [vmem:[%s15864_s0 + $0x50] sm:$0xff] }
   0x7   :  { %41 = vst.msk [vmem:[#allocation2 + $0x1a8] sm:$0x3] %vm33_vm1, %v10138_v2  ;;  %44 = vst.msk [vmem:[#allocation2 + $0x358] sm:$0x3] %vm33_vm1, %v10138_v2  ;;  %v131_v13 = vld [vmem:[%s15864_s0 + $0x68] sm:$0xff]  ;;  %v130_v14 = vld [vmem:[%s15864_s0 + $0x60] sm:$0xff] }
   0x8   :  { %186 = vst.msk [vmem:[#allocation2 + $0x39] sm:$0xff] %vm30_vm0, %v121_v3  ;;  %185 = vst.msk [vmem:[#allocation2 + $0x31] sm:$0xff] %vm30_vm0, %v120_v4  ;;  %v133_v15 = vld [vmem:[%s15864_s0 + $0x78] sm:$0xff]  ;;  %v132_v16 = vld [vmem:[%s15864_s0 + $0x70] sm:$0xff] }
   0x9   :  { %188 = vst.msk [vmem:[#allocation2 + $0x51] sm:$0xff] %vm30_vm0, %v123_v5  ;;  %187 = vst.msk [vmem:[#allocation2 + $0x49] sm:$0xff] %vm30_vm0, %v10237_v6  ;;  %v135_v17 = vld [vmem:[%s15864_s0 + $0x88] sm:$0xff]  ;;  %v134_v18 = vld [vmem:[%s15864_s0 + $0x80] sm:$0xff] }
   0xa   :  { %47 = vst.msk [vmem:[#allocation2 + $0x18] sm:$0x1] %vm45_vm2, %v10138_v2  ;;  %46 = vst.msk [vmem:[#allocation2] sm:$0x1] %vm45_vm2, %v10138_v2  ;;  %v137_v19 = vld [vmem:[%s15864_s0 + $0x98] sm:$0xff]  ;;  %v136_v20 = vld [vmem:[%s15864_s0 + $0x90] sm:$0xff] }
   0xb   :  { %48 = vst.msk [vmem:[#allocation2 + $0x30] sm:$0x1] %vm45_vm2, %v10138_v2  ;;  %49 = vst.msk [vmem:[#allocation2 + $0x48] sm:$0x1] %vm45_vm2, %v10138_v2  ;;  %v139_v21 = vld [vmem:[%s15864_s0 + $0xa8] sm:$0xff]  ;;  %v138_v22 = vld [vmem:[%s15864_s0 + $0xa0] sm:$0xff] }
   0xc   :  { %50 = vst.msk [vmem:[#allocation2 + $0x60] sm:$0x1] %vm45_vm2, %v10138_v2  ;;  %51 = vst.msk [vmem:[#allocation2 + $0x78] sm:$0x1] %vm45_vm2, %v10138_v2  ;;  %v141_v23 = vld [vmem:[%s15864_s0 + $0xb8] sm:$0xff]  ;;  %v311_v25 = vld [vmem:[#allocation2 + $0x1] sm:$0xff] }
   0xd   :  { %52 = vst.msk [vmem:[#allocation2 + $0x90] sm:$0x1] %vm45_vm2, %v10138_v2  ;;  %53 = vst.msk [vmem:[#allocation2 + $0xa8] sm:$0x1] %vm45_vm2, %v10138_v2  ;;  %v313_v24 = vld [vmem:[#allocation2 + $0x19] sm:$0xff]  ;;  %888 = vrot.lane.b32.xlu0 %v311_v25, %s10139_s29  ;;  %v314_v26 = vld [vmem:[#allocation2 + $0x21] sm:$0xff] }
   0xe   :  { %54 = vst.msk [vmem:[#allocation2 + $0xc0] sm:$0x1] %vm45_vm2, %v10138_v2  ;;  %55 = vst.msk [vmem:[#allocation2 + $0xd8] sm:$0x1] %vm45_vm2, %v10138_v2  ;;  %892 = vrot.lane.b32.xlu1 %v313_v24, %s10139_s29  ;;  %v312_v27 = vld [vmem:[#allocation2 + $0x9] sm:$0xff]  ;;  %v142_v34 = vld [vmem:[%s15864_s0 + $0xc0] sm:$0xff] }
   0xf   :  { %56 = vst.msk [vmem:[#allocation2 + $0xf0] sm:$0x1] %vm45_vm2, %v10138_v2  ;;  %57 = vst.msk [vmem:[#allocation2 + $0x108] sm:$0x1] %vm45_vm2, %v10138_v2  ;;  %v316_v28 = vld [vmem:[#allocation2 + $0x39] sm:$0xff]  ;;  %v315_v29 = vld [vmem:[#allocation2 + $0x31] sm:$0xff] }
  0x10   :  { %58 = vst.msk [vmem:[#allocation2 + $0x120] sm:$0x1] %vm45_vm2, %v10138_v2  ;;  %59 = vst.msk [vmem:[#allocation2 + $0x138] sm:$0x1] %vm45_vm2, %v10138_v2  ;;  %v318_v30 = vld [vmem:[#allocation2 + $0x51] sm:$0xff]  ;;  %v143_v32 = vld [vmem:[%s15864_s0 + $0xc8] sm:$0xff] }
  0x11   :  { %60 = vst.msk [vmem:[#allocation2 + $0x150] sm:$0x1] %vm45_vm2, %v10138_v2  ;;  %61 = vst.msk [vmem:[#allocation2 + $0x168] sm:$0x1] %vm45_vm2, %v10138_v2  ;;  %890 = vrot.lane.b32.xlu0 %v312_v27, %s10139_s29  ;;  %v140_v31 = vld [vmem:[%s15864_s0 + $0xb0] sm:$0xff]  ;;  %v145_v35 = vld [vmem:[%s15864_s0 + $0xd8] sm:$0xff] }
  0x12   :  { %62 = vst.msk [vmem:[#allocation2 + $0x180] sm:$0x1] %vm45_vm2, %v10138_v2  ;;  %63 = vst.msk [vmem:[#allocation2 + $0x198] sm:$0x1] %vm45_vm2, %v10138_v2  ;;  %894 = vrot.lane.b32.xlu1 %v314_v26, %s10139_s29  ;;  %v317_v33 = vld [vmem:[#allocation2 + $0x49] sm:$0xff]  ;;  %v146_v38 = vld [vmem:[%s15864_s0 + $0xe0] sm:$0xff] }
  0x13   :  { %64 = vst.msk [vmem:[#allocation2 + $0x1b0] sm:$0x1] %vm45_vm2, %v10138_v2  ;;  %65 = vst.msk [vmem:[#allocation2 + $0x1c8] sm:$0x1] %vm45_vm2, %v10138_v2  ;;  %v144_v36 = vld [vmem:[%s15864_s0 + $0xd0] sm:$0xff]  ;;  %v147_v37 = vld [vmem:[%s15864_s0 + $0xe8] sm:$0xff] }
  0x14   :  { %66 = vst.msk [vmem:[#allocation2 + $0x1e0] sm:$0x1] %vm45_vm2, %v10138_v2  ;;  %67 = vst.msk [vmem:[#allocation2 + $0x1f8] sm:$0x1] %vm45_vm2, %v10138_v2  ;;  %v151_v39 = vld [vmem:[%s15864_s0 + $0x108] sm:$0xff]  ;;  %v150_v40 = vld [vmem:[%s15864_s0 + $0x100] sm:$0xff] }
  0x15   :  { %68 = vst.msk [vmem:[#allocation2 + $0x210] sm:$0x1] %vm45_vm2, %v10138_v2  ;;  %69 = vst.msk [vmem:[#allocation2 + $0x228] sm:$0x1] %vm45_vm2, %v10138_v2  ;;  %896 = vrot.lane.b32.xlu0 %v315_v29, %s10139_s29  ;;  %v153_v42 = vld [vmem:[%s15864_s0 + $0x118] sm:$0xff]  ;;  %v152_v43 = vld [vmem:[%s15864_s0 + $0x110] sm:$0xff] }
  0x16   :  { %70 = vst.msk [vmem:[#allocation2 + $0x240] sm:$0x1] %vm45_vm2, %v10138_v2  ;;  %71 = vst.msk [vmem:[#allocation2 + $0x258] sm:$0x1] %vm45_vm2, %v10138_v2  ;;  %898 = vrot.lane.b32.xlu1 %v316_v28, %s10139_s29  ;;  %v155_v44 = vld [vmem:[%s15864_s0 + $0x128] sm:$0xff]  ;;  %v154_v46 = vld [vmem:[%s15864_s0 + $0x120] sm:$0xff] }
  0x17   :  { %72 = vst.msk [vmem:[#allocation2 + $0x270] sm:$0x1] %vm45_vm2, %v10138_v2  ;;  %73 = vst.msk [vmem:[#allocation2 + $0x288] sm:$0x1] %vm45_vm2, %v10138_v2  ;;  %v157_v47 = vld [vmem:[%s15864_s0 + $0x138] sm:$0xff]  ;;  %v156_v48 = vld [vmem:[%s15864_s0 + $0x130] sm:$0xff] }
  0x18   :  { %74 = vst.msk [vmem:[#allocation2 + $0x2a0] sm:$0x1] %vm45_vm2, %v10138_v2  ;;  %75 = vst.msk [vmem:[#allocation2 + $0x2b8] sm:$0x1] %vm45_vm2, %v10138_v2  ;;  %v159_v49 = vld [vmem:[%s15864_s0 + $0x148] sm:$0xff]  ;;  %v158_v50 = vld [vmem:[%s15864_s0 + $0x140] sm:$0xff] }
  0x19   :  { %76 = vst.msk [vmem:[#allocation2 + $0x2d0] sm:$0x1] %vm45_vm2, %v10138_v2  ;;  %77 = vst.msk [vmem:[#allocation2 + $0x2e8] sm:$0x1] %vm45_vm2, %v10138_v2  ;;  %900 = vrot.lane.b32.xlu0 %v317_v33, %s10139_s29  ;;  %v161_v51 = vld [vmem:[%s15864_s0 + $0x158] sm:$0xff]  ;;  %v160_v52 = vld [vmem:[%s15864_s0 + $0x150] sm:$0xff] }
  0x1a   :  { %78 = vst.msk [vmem:[#allocation2 + $0x300] sm:$0x1] %vm45_vm2, %v10138_v2  ;;  %79 = vst.msk [vmem:[#allocation2 + $0x318] sm:$0x1] %vm45_vm2, %v10138_v2  ;;  %902 = vrot.lane.b32.xlu1 %v318_v30, %s10139_s29  ;;  %v163_v53 = vld [vmem:[%s15864_s0 + $0x168] sm:$0xff]  ;;  %v162_v54 = vld [vmem:[%s15864_s0 + $0x160] sm:$0xff] }
  0x1b   :  { %80 = vst.msk [vmem:[#allocation2 + $0x330] sm:$0x1] %vm45_vm2, %v10138_v2  ;;  %81 = vst.msk [vmem:[#allocation2 + $0x348] sm:$0x1] %vm45_vm2, %v10138_v2  ;;  %v165_v55 = vld [vmem:[%s15864_s0 + $0x178] sm:$0xff]  ;;  %v164_v58 = vld [vmem:[%s15864_s0 + $0x170] sm:$0xff] }
  0x1c   :  { %82 = vst.msk [vmem:[#allocation2 + $0x11] sm:$0x1] %vm45_vm2, %v10138_v2  ;;  %83 = vst.msk [vmem:[#allocation2 + $0x29] sm:$0x1] %vm45_vm2, %v10138_v2  ;;  %v167_v59 = vld [vmem:[%s15864_s0 + $0x188] sm:$0xff]  ;;  %v166_v63 = vld [vmem:[%s15864_s0 + $0x180] sm:$0xff] }
  0x1d   :  { %84 = vst.msk [vmem:[#allocation2 + $0x41] sm:$0x1] %vm45_vm2, %v10138_v2  ;;  %85 = vst.msk [vmem:[#allocation2 + $0x59] sm:$0x1] %vm45_vm2, %v10138_v2  ;;  %v169_v0 = vld [vmem:[%s15864_s0 + $0x198] sm:$0xff]  ;;  %v171_v3 = vld [vmem:[%s15864_s0 + $0x1a8] sm:$0xff] }
  0x1e   :  { %86 = vst.msk [vmem:[#allocation2 + $0x71] sm:$0x1] %vm45_vm2, %v10138_v2  ;;  %87 = vst.msk [vmem:[#allocation2 + $0x89] sm:$0x1] %vm45_vm2, %v10138_v2  ;;  %v170_v4 = vld [vmem:[%s15864_s0 + $0x1a0] sm:$0xff]  ;;  %v173_v5 = vld [vmem:[%s15864_s0 + $0x1b8] sm:$0xff] }
  0x1f   :  { %88 = vst.msk [vmem:[#allocation2 + $0xa1] sm:$0x1] %vm45_vm2, %v10138_v2  ;;  %89 = vst.msk [vmem:[#allocation2 + $0xb9] sm:$0x1] %vm45_vm2, %v10138_v2  ;;  %v172_v6 = vld [vmem:[%s15864_s0 + $0x1b0] sm:$0xff] }
  0x20   :  { %90 = vst.msk [vmem:[#allocation2 + $0xd1] sm:$0x1] %vm45_vm2, %v10138_v2  ;;  %91 = vst.msk [vmem:[#allocation2 + $0xe9] sm:$0x1] %vm45_vm2, %v10138_v2 }
  0x21   :  { %92 = vst.msk [vmem:[#allocation2 + $0x101] sm:$0x1] %vm45_vm2, %v10138_v2  ;;  %93 = vst.msk [vmem:[#allocation2 + $0x119] sm:$0x1] %vm45_vm2, %v10138_v2 }
  0x22   :  { %94 = vst.msk [vmem:[#allocation2 + $0x131] sm:$0x1] %vm45_vm2, %v10138_v2  ;;  %95 = vst.msk [vmem:[#allocation2 + $0x149] sm:$0x1] %vm45_vm2, %v10138_v2 }
  0x23   :  { %96 = vst.msk [vmem:[#allocation2 + $0x161] sm:$0x1] %vm45_vm2, %v10138_v2  ;;  %97 = vst.msk [vmem:[#allocation2 + $0x179] sm:$0x1] %vm45_vm2, %v10138_v2 }
  0x24   :  { %98 = vst.msk [vmem:[#allocation2 + $0x191] sm:$0x1] %vm45_vm2, %v10138_v2  ;;  %99 = vst.msk [vmem:[#allocation2 + $0x1a9] sm:$0x1] %vm45_vm2, %v10138_v2 }
  0x25   :  { %100 = vst.msk [vmem:[#allocation2 + $0x1c1] sm:$0x1] %vm45_vm2, %v10138_v2  ;;  %101 = vst.msk [vmem:[#allocation2 + $0x1d9] sm:$0x1] %vm45_vm2, %v10138_v2 }
  0x26   :  { %102 = vst.msk [vmem:[#allocation2 + $0x1f1] sm:$0x1] %vm45_vm2, %v10138_v2  ;;  %103 = vst.msk [vmem:[#allocation2 + $0x209] sm:$0x1] %vm45_vm2, %v10138_v2 }
  0x27   :  { %104 = vst.msk [vmem:[#allocation2 + $0x221] sm:$0x1] %vm45_vm2, %v10138_v2  ;;  %105 = vst.msk [vmem:[#allocation2 + $0x239] sm:$0x1] %vm45_vm2, %v10138_v2 }
  0x28   :  { %106 = vst.msk [vmem:[#allocation2 + $0x251] sm:$0x1] %vm45_vm2, %v10138_v2  ;;  %107 = vst.msk [vmem:[#allocation2 + $0x269] sm:$0x1] %vm45_vm2, %v10138_v2 }
  0x29   :  { %108 = vst.msk [vmem:[#allocation2 + $0x281] sm:$0x1] %vm45_vm2, %v10138_v2  ;;  %109 = vst.msk [vmem:[#allocation2 + $0x299] sm:$0x1] %vm45_vm2, %v10138_v2 }
  0x2a   :  { %110 = vst.msk [vmem:[#allocation2 + $0x2b1] sm:$0x1] %vm45_vm2, %v10138_v2  ;;  %111 = vst.msk [vmem:[#allocation2 + $0x2c9] sm:$0x1] %vm45_vm2, %v10138_v2 }
  0x2b   :  { %112 = vst.msk [vmem:[#allocation2 + $0x2e1] sm:$0x1] %vm45_vm2, %v10138_v2  ;;  %113 = vst.msk [vmem:[#allocation2 + $0x2f9] sm:$0x1] %vm45_vm2, %v10138_v2 }
  0x2c   :  { %114 = vst.msk [vmem:[#allocation2 + $0x311] sm:$0x1] %vm45_vm2, %v10138_v2  ;;  %115 = vst.msk [vmem:[#allocation2 + $0x329] sm:$0x1] %vm45_vm2, %v10138_v2 }
  0x2d   :  { %116 = vst.msk [vmem:[#allocation2 + $0x341] sm:$0x1] %vm45_vm2, %v10138_v2  ;;  %117 = vst.msk [vmem:[#allocation2 + $0x359] sm:$0x1] %vm45_vm2, %v10138_v2  ;;  %v168_v2 = vld [vmem:[%s15864_s0 + $0x190] sm:$0xff] }
  0x2e   :  { %190 = vst.msk [vmem:[#allocation2 + $0x69] sm:$0xff] %vm30_vm0, %v10242_v7  ;;  %189 = vst.msk [vmem:[#allocation2 + $0x61] sm:$0xff] %vm30_vm0, %v10247_v8  ;;  %v175_v7 = vld [vmem:[%s15864_s0 + $0x1c8] sm:$0xff]  ;;  %v174_v8 = vld [vmem:[%s15864_s0 + $0x1c0] sm:$0xff] }
  0x2f   :  { %192 = vst.msk [vmem:[#allocation2 + $0x81] sm:$0xff] %vm30_vm0, %v127_v9  ;;  %191 = vst.msk [vmem:[#allocation2 + $0x79] sm:$0xff] %vm30_vm0, %v126_v10  ;;  %v177_v9 = vld [vmem:[%s15864_s0 + $0x1d8] sm:$0xff]  ;;  %v176_v10 = vld [vmem:[%s15864_s0 + $0x1d0] sm:$0xff] }
  0x30   :  { %194 = vst.msk [vmem:[#allocation2 + $0x99] sm:$0xff] %vm30_vm0, %v129_v11  ;;  %193 = vst.msk [vmem:[#allocation2 + $0x91] sm:$0xff] %vm30_vm0, %v128_v12 }
  0x31   :  { %196 = vst.msk [vmem:[#allocation2 + $0xb1] sm:$0xff] %vm30_vm0, %v131_v13  ;;  %195 = vst.msk [vmem:[#allocation2 + $0xa9] sm:$0xff] %vm30_vm0, %v130_v14  ;;  %v179_v13 = vld [vmem:[%s15864_s0 + $0x1e8] sm:$0xff]  ;;  %v178_v14 = vld [vmem:[%s15864_s0 + $0x1e0] sm:$0xff] }
  0x32   :  { %198 = vst.msk [vmem:[#allocation2 + $0xc9] sm:$0xff] %vm30_vm0, %v133_v15  ;;  %197 = vst.msk [vmem:[#allocation2 + $0xc1] sm:$0xff] %vm30_vm0, %v132_v16 }
  0x33   :  { %200 = vst.msk [vmem:[#allocation2 + $0xe1] sm:$0xff] %vm30_vm0, %v135_v17  ;;  %199 = vst.msk [vmem:[#allocation2 + $0xd9] sm:$0xff] %vm30_vm0, %v134_v18 }
  0x34   :  { %202 = vst.msk [vmem:[#allocation2 + $0xf9] sm:$0xff] %vm30_vm0, %v137_v19  ;;  %201 = vst.msk [vmem:[#allocation2 + $0xf1] sm:$0xff] %vm30_vm0, %v136_v20 }
  0x35   :  { %204 = vst.msk [vmem:[#allocation2 + $0x111] sm:$0xff] %vm30_vm0, %v139_v21  ;;  %203 = vst.msk [vmem:[#allocation2 + $0x109] sm:$0xff] %vm30_vm0, %v138_v22  ;;  %v320_v41 = vld [vmem:[#allocation2 + $0x69] sm:$0xff]  ;;  %v319_v45 = vld [vmem:[#allocation2 + $0x61] sm:$0xff] }
  0x36   :  { %206 = vst.msk [vmem:[#allocation2 + $0x129] sm:$0xff] %vm30_vm0, %v141_v23  ;;  %205 = vst.msk [vmem:[#allocation2 + $0x121] sm:$0xff] %vm30_vm0, %v140_v31  ;;  %906 = vrot.lane.b32.xlu1 %v320_v41, %s10139_s29  ;;  %904 = vrot.lane.b32.xlu0 %v319_v45, %s10139_s29  ;;  %v322_v56 = vld [vmem:[#allocation2 + $0x81] sm:$0xff]  ;;  %v321_v57 = vld [vmem:[#allocation2 + $0x79] sm:$0xff] }
  0x37   :  { %208 = vst.msk [vmem:[#allocation2 + $0x141] sm:$0xff] %vm30_vm0, %v143_v32  ;;  %207 = vst.msk [vmem:[#allocation2 + $0x139] sm:$0xff] %vm30_vm0, %v142_v34  ;;  %v324_v60 = vld [vmem:[#allocation2 + $0x99] sm:$0xff]  ;;  %v323_v61 = vld [vmem:[#allocation2 + $0x91] sm:$0xff] }
  0x38   :  { %210 = vst.msk [vmem:[#allocation2 + $0x159] sm:$0xff] %vm30_vm0, %v145_v35  ;;  %209 = vst.msk [vmem:[#allocation2 + $0x151] sm:$0xff] %vm30_vm0, %v144_v36  ;;  %v326_v62 = vld [vmem:[#allocation2 + $0xb1] sm:$0xff]  ;;  %v325_v1 = vld [vmem:[#allocation2 + $0xa9] sm:$0xff] }
  0x39   :  { %212 = vst.msk [vmem:[#allocation2 + $0x171] sm:$0xff] %vm30_vm0, %v147_v37  ;;  %211 = vst.msk [vmem:[#allocation2 + $0x169] sm:$0xff] %vm30_vm0, %v146_v38  ;;  %v328_v11 = vld [vmem:[#allocation2 + $0xc9] sm:$0xff]  ;;  %v327_v12 = vld [vmem:[#allocation2 + $0xc1] sm:$0xff] }
  0x3a   :  { %216 = vst.msk [vmem:[#allocation2 + $0x1d1] sm:$0xff] %vm30_vm0, %v151_v39  ;;  %215 = vst.msk [vmem:[#allocation2 + $0x1c9] sm:$0xff] %vm30_vm0, %v150_v40  ;;  %910 = vrot.lane.b32.xlu1 %v322_v56, %s10139_s29  ;;  %908 = vrot.lane.b32.xlu0 %v321_v57, %s10139_s29  ;;  %v330_v15 = vld [vmem:[#allocation2 + $0xe1] sm:$0xff]  ;;  %v329_v16 = vld [vmem:[#allocation2 + $0xd9] sm:$0xff] }
  0x3b   :  { %218 = vst.msk [vmem:[#allocation2 + $0x1e9] sm:$0xff] %vm30_vm0, %v153_v42  ;;  %217 = vst.msk [vmem:[#allocation2 + $0x1e1] sm:$0xff] %vm30_vm0, %v152_v43  ;;  %v332_v17 = vld [vmem:[#allocation2 + $0xf9] sm:$0xff]  ;;  %v331_v18 = vld [vmem:[#allocation2 + $0xf1] sm:$0xff] }
  0x3c   :  { %220 = vst.msk [vmem:[#allocation2 + $0x201] sm:$0xff] %vm30_vm0, %v155_v44  ;;  %219 = vst.msk [vmem:[#allocation2 + $0x1f9] sm:$0xff] %vm30_vm0, %v154_v46  ;;  %v334_v19 = vld [vmem:[#allocation2 + $0x111] sm:$0xff]  ;;  %v333_v20 = vld [vmem:[#allocation2 + $0x109] sm:$0xff] }
  0x3d   :  { %222 = vst.msk [vmem:[#allocation2 + $0x219] sm:$0xff] %vm30_vm0, %v157_v47  ;;  %221 = vst.msk [vmem:[#allocation2 + $0x211] sm:$0xff] %vm30_vm0, %v156_v48  ;;  %v336_v21 = vld [vmem:[#allocation2 + $0x129] sm:$0xff]  ;;  %v335_v22 = vld [vmem:[#allocation2 + $0x121] sm:$0xff] }
  0x3e   :  { %224 = vst.msk [vmem:[#allocation2 + $0x231] sm:$0xff] %vm30_vm0, %v159_v49  ;;  %223 = vst.msk [vmem:[#allocation2 + $0x229] sm:$0xff] %vm30_vm0, %v158_v50  ;;  %914 = vrot.lane.b32.xlu1 %v324_v60, %s10139_s29  ;;  %912 = vrot.lane.b32.xlu0 %v323_v61, %s10139_s29  ;;  %v338_v23 = vld [vmem:[#allocation2 + $0x141] sm:$0xff]  ;;  %v337_v24 = vld [vmem:[#allocation2 + $0x139] sm:$0xff] }
  0x3f   :  { %226 = vst.msk [vmem:[#allocation2 + $0x249] sm:$0xff] %vm30_vm0, %v161_v51  ;;  %225 = vst.msk [vmem:[#allocation2 + $0x241] sm:$0xff] %vm30_vm0, %v160_v52  ;;  %v340_v25 = vld [vmem:[#allocation2 + $0x159] sm:$0xff]  ;;  %v339_v26 = vld [vmem:[#allocation2 + $0x151] sm:$0xff] }
  0x40   :  { %228 = vst.msk [vmem:[#allocation2 + $0x261] sm:$0xff] %vm30_vm0, %v163_v53  ;;  %227 = vst.msk [vmem:[#allocation2 + $0x259] sm:$0xff] %vm30_vm0, %v162_v54 }
  0x41   :  { %230 = vst.msk [vmem:[#allocation2 + $0x279] sm:$0xff] %vm30_vm0, %v165_v55  ;;  %229 = vst.msk [vmem:[#allocation2 + $0x271] sm:$0xff] %vm30_vm0, %v164_v58 }
  0x42   :  { %232 = vst.msk [vmem:[#allocation2 + $0x291] sm:$0xff] %vm30_vm0, %v167_v59  ;;  %231 = vst.msk [vmem:[#allocation2 + $0x289] sm:$0xff] %vm30_vm0, %v166_v63  ;;  %918 = vrot.lane.b32.xlu1 %v326_v62, %s10139_s29  ;;  %916 = vrot.lane.b32.xlu0 %v325_v1, %s10139_s29 }
  0x43   :  { %234 = vst.msk [vmem:[#allocation2 + $0x2a9] sm:$0xff] %vm30_vm0, %v169_v0  ;;  %233 = vst.msk [vmem:[#allocation2 + $0x2a1] sm:$0xff] %vm30_vm0, %v168_v2 }
  0x44   :  { %236 = vst.msk [vmem:[#allocation2 + $0x2c1] sm:$0xff] %vm30_vm0, %v171_v3  ;;  %235 = vst.msk [vmem:[#allocation2 + $0x2b9] sm:$0xff] %vm30_vm0, %v170_v4 }
  0x45   :  { %238 = vst.msk [vmem:[#allocation2 + $0x2d9] sm:$0xff] %vm30_vm0, %v173_v5  ;;  %237 = vst.msk [vmem:[#allocation2 + $0x2d1] sm:$0xff] %vm30_vm0, %v172_v6 }
  0x46   :  { %240 = vst.msk [vmem:[#allocation2 + $0x2f1] sm:$0xff] %vm30_vm0, %v175_v7  ;;  %239 = vst.msk [vmem:[#allocation2 + $0x2e9] sm:$0xff] %vm30_vm0, %v174_v8  ;;  %922 = vrot.lane.b32.xlu1 %v328_v11, %s10139_s29  ;;  %920 = vrot.lane.b32.xlu0 %v327_v12, %s10139_s29 }
  0x47   :  { %242 = vst.msk [vmem:[#allocation2 + $0x309] sm:$0xff] %vm30_vm0, %v177_v9  ;;  %241 = vst.msk [vmem:[#allocation2 + $0x301] sm:$0xff] %vm30_vm0, %v176_v10 }
  0x48   :  { %244 = vst.msk [vmem:[#allocation2 + $0x321] sm:$0xff] %vm30_vm0, %v179_v13  ;;  %243 = vst.msk [vmem:[#allocation2 + $0x319] sm:$0xff] %vm30_vm0, %v178_v14 }
  0x4a   :  { %926 = vrot.lane.b32.xlu1 %v330_v15, %s10139_s29  ;;  %924 = vrot.lane.b32.xlu0 %v329_v16, %s10139_s29 }
  0x4e   :  { %930 = vrot.lane.b32.xlu1 %v332_v17, %s10139_s29  ;;  %928 = vrot.lane.b32.xlu0 %v331_v18, %s10139_s29 }
  0x52   :  { %934 = vrot.lane.b32.xlu1 %v334_v19, %s10139_s29  ;;  %932 = vrot.lane.b32.xlu0 %v333_v20, %s10139_s29 }
  0x56   :  { %938 = vrot.lane.b32.xlu1 %v336_v21, %s10139_s29  ;;  %936 = vrot.lane.b32.xlu0 %v335_v22, %s10139_s29 }
  0x5a   :  { %942 = vrot.lane.b32.xlu1 %v338_v23, %s10139_s29  ;;  %940 = vrot.lane.b32.xlu0 %v337_v24, %s10139_s29 }
  0x5b   :  { %13 = vsyncpa [#allocation4], 0  ;;  %v342_v27 = vld [vmem:[#allocation2 + $0x171] sm:$0xff]  ;;  %v341_v28 = vld [vmem:[#allocation2 + $0x169] sm:$0xff]  ;;  %s10140_s19 = smov 8   ;;  %s10142_s28 = smov 16  }
  0x5c   :  { %v344_v29 = vld [vmem:[#allocation2 + $0x1b9] sm:$0xff]  ;;  %v343_v30 = vld [vmem:[#allocation2 + $0x1b1] sm:$0xff]  ;;  %v345_v32 = vld [vmem:[#allocation2 + $0x1c9] sm:$0xff]  ;;  %s10143_s30 = smov 20   ;;  %s10144_s9 = smov 24   ;;  %vm3589_vm3 = vcmask 1043456  }
  0x5d   :  { %v346_v31 = vld [vmem:[#allocation2 + $0x1d1] sm:$0xff]  ;;  %v348_v33 = vld [vmem:[#allocation2 + $0x1e9] sm:$0xff]  ;;  %v347_v34 = vld [vmem:[#allocation2 + $0x1e1] sm:$0xff]  ;;  %s10145_s10 = smov 28   ;;  %vm2936_vm4 = vcmask 64512   ;;  %vm3001_vm5 = vcmask 97280  }
  0x5e   :  { %946 = vrot.lane.b32.xlu1 %v340_v25, %s10139_s29  ;;  %944 = vrot.lane.b32.xlu0 %v339_v26, %s10139_s29  ;;  %v350_v35 = vld [vmem:[#allocation2 + $0x201] sm:$0xff]  ;;  %v349_v36 = vld [vmem:[#allocation2 + $0x1f9] sm:$0xff]  ;;  %v351_v38 = vld [vmem:[#allocation2 + $0x211] sm:$0xff]  ;;  %vm3066_vm6 = vcmask 130048   ;;  %vm3131_vm7 = vcmask 162816   ;;  %vm3196_vm8 = vcmask 195584  }
  0x5f   :  { %v352_v37 = vld [vmem:[#allocation2 + $0x219] sm:$0xff]  ;;  %v354_v39 = vld [vmem:[#allocation2 + $0x231] sm:$0xff]  ;;  %v353_v40 = vld [vmem:[#allocation2 + $0x229] sm:$0xff]  ;;  %vm3261_vm9 = vcmask 228352   ;;  %vm3326_vm10 = vcmask 261120   ;;  %vm3396_vm11 = vcmask 293888  }
  0x60   :  { %v356_v41 = vld [vmem:[#allocation2 + $0x249] sm:$0xff]  ;;  %v355_v42 = vld [vmem:[#allocation2 + $0x241] sm:$0xff]  ;;  %v357_v44 = vld [vmem:[#allocation2 + $0x259] sm:$0xff] }
  0x61   :  { %v358_v43 = vld [vmem:[#allocation2 + $0x261] sm:$0xff]  ;;  %v360_v45 = vld [vmem:[#allocation2 + $0x279] sm:$0xff]  ;;  %v359_v46 = vld [vmem:[#allocation2 + $0x271] sm:$0xff] }
  0x62   :  { %950 = vrot.lane.b32.xlu1 %v342_v27, %s10139_s29  ;;  %948 = vrot.lane.b32.xlu0 %v341_v28, %s10139_s29  ;;  %v362_v47 = vld [vmem:[#allocation2 + $0x291] sm:$0xff]  ;;  %v361_v48 = vld [vmem:[#allocation2 + $0x289] sm:$0xff]  ;;  %v363_v50 = vld [vmem:[#allocation2 + $0x2a1] sm:$0xff] }
  0x63   :  { %v364_v49 = vld [vmem:[#allocation2 + $0x2a9] sm:$0xff]  ;;  %v366_v51 = vld [vmem:[#allocation2 + $0x2c1] sm:$0xff]  ;;  %v365_v52 = vld [vmem:[#allocation2 + $0x2b9] sm:$0xff] }
  0x64   :  { %v368_v53 = vld [vmem:[#allocation2 + $0x2d9] sm:$0xff]  ;;  %v367_v54 = vld [vmem:[#allocation2 + $0x2d1] sm:$0xff]  ;;  %v369_v56 = vld [vmem:[#allocation2 + $0x2e9] sm:$0xff] }
  0x65   :  { %v370_v55 = vld [vmem:[#allocation2 + $0x2f1] sm:$0xff]  ;;  %v372_v59 = vld [vmem:[#allocation2 + $0x309] sm:$0xff]  ;;  %v371_v60 = vld [vmem:[#allocation2 + $0x301] sm:$0xff] }
  0x66   :  { %954 = vrot.lane.b32.xlu1 %v344_v29, %s10139_s29  ;;  %952 = vrot.lane.b32.xlu0 %v343_v30, %s10139_s29  ;;  %v374_v63 = vld [vmem:[#allocation2 + $0x321] sm:$0xff]  ;;  %v373_v0 = vld [vmem:[#allocation2 + $0x319] sm:$0xff]  ;;  %v376_v3 = vld [vmem:[#allocation2 + $0xa] sm:$0xff] }
  0x67   :  { %v375_v4 = vld [vmem:[#allocation2 + $0x2] sm:$0xff]  ;;  %v377_v8 = vld [vmem:[#allocation2 + $0x1a] sm:$0xff]  ;;  %v379_v12 = vld [vmem:[#allocation2 + $0x32] sm:$0xff] }
  0x68   :  { %v378_v7 = vld [vmem:[#allocation2 + $0x22] sm:$0xff]  ;;  %v380_v11 = vld [vmem:[#allocation2 + $0x3a] sm:$0xff]  ;;  %v382_v15 = vld [vmem:[#allocation2 + $0x52] sm:$0xff] }
  0x69   :  { %v381_v16 = vld [vmem:[#allocation2 + $0x4a] sm:$0xff]  ;;  %v383_v20 = vld [vmem:[#allocation2 + $0x62] sm:$0xff]  ;;  %v385_v24 = vld [vmem:[#allocation2 + $0x7a] sm:$0xff] }
  0x6a   :  { %958 = vrot.lane.b32.xlu1 %v346_v31, %s10139_s29  ;;  %956 = vrot.lane.b32.xlu0 %v345_v32, %s10139_s29  ;;  %v384_v19 = vld [vmem:[#allocation2 + $0x6a] sm:$0xff]  ;;  %v386_v23 = vld [vmem:[#allocation2 + $0x82] sm:$0xff]  ;;  %v388_v27 = vld [vmem:[#allocation2 + $0x9a] sm:$0xff] }
  0x6b   :  { %v387_v28 = vld [vmem:[#allocation2 + $0x92] sm:$0xff]  ;;  %v389_v32 = vld [vmem:[#allocation2 + $0xaa] sm:$0xff]  ;;  %vm14675_vm12 = vmpackc.low %vm3396_vm11, %vm3396_vm11 }
  0x6c   :  { %v390_v31 = vld [vmem:[#allocation2 + $0xb2] sm:$0xff] }
  0x6e   :  { %962 = vrot.lane.b32.xlu1 %v348_v33, %s10139_s29  ;;  %960 = vrot.lane.b32.xlu0 %v347_v34, %s10139_s29 }
  0x72   :  { %966 = vrot.lane.b32.xlu1 %v350_v35, %s10139_s29  ;;  %964 = vrot.lane.b32.xlu0 %v349_v36, %s10139_s29  ;;  %v392_v35 = vld [vmem:[#allocation2 + $0xca] sm:$0xff]  ;;  %v391_v36 = vld [vmem:[#allocation2 + $0xc2] sm:$0xff] }
  0x76   :  { %970 = vrot.lane.b32.xlu1 %v352_v37, %s10139_s29  ;;  %968 = vrot.lane.b32.xlu0 %v351_v38, %s10139_s29 }
  0x7a   :  { %974 = vrot.lane.b32.xlu1 %v354_v39, %s10139_s29  ;;  %972 = vrot.lane.b32.xlu0 %v353_v40, %s10139_s29  ;;  %v394_v39 = vld [vmem:[#allocation2 + $0xe2] sm:$0xff]  ;;  %v393_v40 = vld [vmem:[#allocation2 + $0xda] sm:$0xff] }
  0x7e   :  { %978 = vrot.lane.b32.xlu1 %v356_v41, %s10139_s29  ;;  %976 = vrot.lane.b32.xlu0 %v355_v42, %s10139_s29 }
  0x7f   :  { %v10667_v58 = vpop.permute.xlu0 %888 }
  0x80   :  { %v10665_v57 = vpop.permute.xlu1 %892 }
  0x82   :  { %982 = vrot.lane.b32.xlu1 %v358_v43, %s10139_s29  ;;  %980 = vrot.lane.b32.xlu0 %v357_v44, %s10139_s29  ;;  %v396_v43 = vld [vmem:[#allocation2 + $0xfa] sm:$0xff]  ;;  %v395_v44 = vld [vmem:[#allocation2 + $0xf2] sm:$0xff] }
  0x83   :  { %v10673_v62 = vpop.permute.xlu0 %890 }
  0x84   :  { %v10671_v61 = vpop.permute.xlu1 %894 }
  0x86   :  { %986 = vrot.lane.b32.xlu1 %v360_v45, %s10139_s29  ;;  %984 = vrot.lane.b32.xlu0 %v359_v46, %s10139_s29 }
  0x87   :  { %v10679_v2 = vpop.permute.xlu0 %896 }
  0x88   :  { %v10677_v1 = vpop.permute.xlu1 %898 }
  0x8a   :  { %990 = vrot.lane.b32.xlu1 %v362_v47, %s10139_s29  ;;  %988 = vrot.lane.b32.xlu0 %v361_v48, %s10139_s29  ;;  %v398_v47 = vld [vmem:[#allocation2 + $0x112] sm:$0xff]  ;;  %v397_v48 = vld [vmem:[#allocation2 + $0x10a] sm:$0xff] }
  0x8b   :  { %v10685_v6 = vpop.permute.xlu0 %900 }
  0x8c   :  { %v10683_v5 = vpop.permute.xlu1 %902 }
  0x8e   :  { %994 = vrot.lane.b32.xlu1 %v364_v49, %s10139_s29  ;;  %992 = vrot.lane.b32.xlu0 %v363_v50, %s10139_s29 }
  0x92   :  { %998 = vrot.lane.b32.xlu1 %v366_v51, %s10139_s29  ;;  %996 = vrot.lane.b32.xlu0 %v365_v52, %s10139_s29  ;;  %v400_v51 = vld [vmem:[#allocation2 + $0x12a] sm:$0xff]  ;;  %v399_v52 = vld [vmem:[#allocation2 + $0x122] sm:$0xff] }
  0x96   :  { %1002 = vrot.lane.b32.xlu1 %v368_v53, %s10139_s29  ;;  %1000 = vrot.lane.b32.xlu0 %v367_v54, %s10139_s29 }
  0x9a   :  { %1006 = vrot.lane.b32.xlu1 %v370_v55, %s10139_s29  ;;  %1004 = vrot.lane.b32.xlu0 %v369_v56, %s10139_s29  ;;  %v402_v55 = vld [vmem:[#allocation2 + $0x142] sm:$0xff]  ;;  %v401_v56 = vld [vmem:[#allocation2 + $0x13a] sm:$0xff] }
  0x9e   :  { %1010 = vrot.lane.b32.xlu1 %v372_v59, %s10139_s29  ;;  %1008 = vrot.lane.b32.xlu0 %v371_v60, %s10139_s29 }
  0xa2   :  { %1014 = vrot.lane.b32.xlu1 %v374_v63, %s10139_s29  ;;  %1012 = vrot.lane.b32.xlu0 %v373_v0, %s10139_s29  ;;  %v148_v63 = vld [vmem:[%s15864_s0 + $0xf0] sm:$0xff]  ;;  %v149_v0 = vld [vmem:[%s15864_s0 + $0xf8] sm:$0xff] }
  0xa3   :  { %213 = vst.msk [vmem:[#allocation2 + $0x181] sm:$0xff] %vm30_vm0, %v148_v63  ;;  %214 = vst.msk [vmem:[#allocation2 + $0x189] sm:$0xff] %vm30_vm0, %v149_v0  ;;  %v418_v63 = vld [vmem:[#allocation2 + $0x232] sm:$0xff]  ;;  %v417_v0 = vld [vmem:[#allocation2 + $0x22a] sm:$0xff] }
  0xa6   :  { %1146 = vrot.lane.b32.xlu1 %v376_v3, %s10140_s19  ;;  %1144 = vrot.lane.b32.xlu0 %v375_v4, %s10140_s19  ;;  %v404_v3 = vld [vmem:[#allocation2 + $0x15a] sm:$0xff]  ;;  %v403_v4 = vld [vmem:[#allocation2 + $0x152] sm:$0xff] }
  0xa8   :  { %v10689_v9 = vpop.permute.xlu1 %906  ;;  %v10691_v10 = vpop.permute.xlu0 %904 }
  0xaa   :  { %1150 = vrot.lane.b32.xlu1 %v378_v7, %s10140_s19  ;;  %1148 = vrot.lane.b32.xlu0 %v377_v8, %s10140_s19 }
  0xac   :  { %v10695_v13 = vpop.permute.xlu1 %910  ;;  %v10697_v14 = vpop.permute.xlu0 %908 }
  0xae   :  { %1154 = vrot.lane.b32.xlu1 %v380_v11, %s10140_s19  ;;  %1152 = vrot.lane.b32.xlu0 %v379_v12, %s10140_s19  ;;  %v406_v11 = vld [vmem:[#allocation2 + $0x172] sm:$0xff]  ;;  %v405_v12 = vld [vmem:[#allocation2 + $0x16a] sm:$0xff] }
  0xb0   :  { %v10701_v17 = vpop.permute.xlu1 %914  ;;  %v10703_v18 = vpop.permute.xlu0 %912 }
  0xb2   :  { %1158 = vrot.lane.b32.xlu1 %v382_v15, %s10140_s19  ;;  %1156 = vrot.lane.b32.xlu0 %v381_v16, %s10140_s19 }
  0xb4   :  { %v10707_v21 = vpop.permute.xlu1 %918  ;;  %v10709_v22 = vpop.permute.xlu0 %916 }
  0xb6   :  { %1162 = vrot.lane.b32.xlu1 %v384_v19, %s10140_s19  ;;  %1160 = vrot.lane.b32.xlu0 %v383_v20, %s10140_s19  ;;  %v408_v19 = vld [vmem:[#allocation2 + $0x1ba] sm:$0xff]  ;;  %v407_v20 = vld [vmem:[#allocation2 + $0x1b2] sm:$0xff] }
  0xb8   :  { %v10713_v25 = vpop.permute.xlu1 %922  ;;  %v10715_v26 = vpop.permute.xlu0 %920 }
  0xba   :  { %1166 = vrot.lane.b32.xlu1 %v386_v23, %s10140_s19  ;;  %1164 = vrot.lane.b32.xlu0 %v385_v24, %s10140_s19 }
  0xbc   :  { %v10719_v29 = vpop.permute.xlu1 %926  ;;  %v10721_v30 = vpop.permute.xlu0 %924 }
  0xbd   :  { %15985 = vst [vmem:[#allocation6_spill] sm:$0xff] %v10721_v30 }
  0xbe   :  { %1170 = vrot.lane.b32.xlu1 %v388_v27, %s10140_s19  ;;  %1168 = vrot.lane.b32.xlu0 %v387_v28, %s10140_s19  ;;  %v410_v27 = vld [vmem:[#allocation2 + $0x1d2] sm:$0xff]  ;;  %v409_v28 = vld [vmem:[#allocation2 + $0x1ca] sm:$0xff] }
  0xc0   :  { %v10725_v33 = vpop.permute.xlu1 %930  ;;  %v10727_v34 = vpop.permute.xlu0 %928 }
  0xc1   :  { %15986 = vst [vmem:[#allocation7_spill] sm:$0xff] %v10725_v33  ;;  %15987 = vst [vmem:[#allocation8_spill] sm:$0xff] %v10727_v34 }
  0xc2   :  { %1174 = vrot.lane.b32.xlu1 %v390_v31, %s10140_s19  ;;  %1172 = vrot.lane.b32.xlu0 %v389_v32, %s10140_s19 }
  0xc4   :  { %v10731_v37 = vpop.permute.xlu1 %934  ;;  %v10733_v38 = vpop.permute.xlu0 %932 }
  0xc5   :  { %15988 = vst [vmem:[#allocation9_spill] sm:$0xff] %v10731_v37  ;;  %15989 = vst [vmem:[#allocation10_spill] sm:$0xff] %v10733_v38 }
  0xc6   :  { %1178 = vrot.lane.b32.xlu1 %v392_v35, %s10140_s19  ;;  %1176 = vrot.lane.b32.xlu0 %v391_v36, %s10140_s19  ;;  %v412_v35 = vld [vmem:[#allocation2 + $0x1ea] sm:$0xff]  ;;  %v411_v36 = vld [vmem:[#allocation2 + $0x1e2] sm:$0xff] }
  0xc8   :  { %v10737_v41 = vpop.permute.xlu1 %938  ;;  %v10739_v42 = vpop.permute.xlu0 %936 }
  0xc9   :  { %15990 = vst [vmem:[#allocation11_spill] sm:$0xff] %v10737_v41  ;;  %15991 = vst [vmem:[#allocation12_spill] sm:$0xff] %v10739_v42 }
  0xca   :  { %1182 = vrot.lane.b32.xlu1 %v394_v39, %s10140_s19  ;;  %1180 = vrot.lane.b32.xlu0 %v393_v40, %s10140_s19 }
  0xcc   :  { %v10743_v45 = vpop.permute.xlu1 %942  ;;  %v10745_v46 = vpop.permute.xlu0 %940 }
  0xcd   :  { %15992 = vst [vmem:[#allocation13_spill] sm:$0xff] %v10743_v45  ;;  %15993 = vst [vmem:[#allocation14_spill] sm:$0xff] %v10745_v46 }
  0xce   :  { %1186 = vrot.lane.b32.xlu1 %v396_v43, %s10140_s19  ;;  %1184 = vrot.lane.b32.xlu0 %v395_v44, %s10140_s19  ;;  %v414_v43 = vld [vmem:[#allocation2 + $0x202] sm:$0xff]  ;;  %v413_v44 = vld [vmem:[#allocation2 + $0x1fa] sm:$0xff] }
  0xd0   :  { %v10749_v49 = vpop.permute.xlu1 %946  ;;  %v10751_v50 = vpop.permute.xlu0 %944 }
  0xd1   :  { %15994 = vst [vmem:[#allocation15_spill] sm:$0xff] %v10749_v49  ;;  %15995 = vst [vmem:[#allocation16_spill] sm:$0xff] %v10751_v50  ;;  %v272_v50 = vld [vmem:[#allocation2 + $0x128] sm:$0xff] }
  0xd2   :  { %1190 = vrot.lane.b32.xlu1 %v398_v47, %s10140_s19  ;;  %1188 = vrot.lane.b32.xlu0 %v397_v48, %s10140_s19 }
  0xd4   :  { %v10755_v53 = vpop.permute.xlu1 %950  ;;  %v10757_v54 = vpop.permute.xlu0 %948 }
  0xd5   :  { %15996 = vst [vmem:[#allocation17_spill] sm:$0xff] %v10755_v53  ;;  %15997 = vst [vmem:[#allocation18_spill] sm:$0xff] %v10757_v54  ;;  %v270_v53 = vld [vmem:[#allocation2 + $0x110] sm:$0xff]  ;;  %v269_v54 = vld [vmem:[#allocation2 + $0x108] sm:$0xff] }
  0xd6   :  { %1194 = vrot.lane.b32.xlu1 %v400_v51, %s10140_s19  ;;  %1192 = vrot.lane.b32.xlu0 %v399_v52, %s10140_s19  ;;  %v416_v51 = vld [vmem:[#allocation2 + $0x21a] sm:$0xff]  ;;  %v415_v52 = vld [vmem:[#allocation2 + $0x212] sm:$0xff] }
  0xd8   :  { %v10761_v59 = vpop.permute.xlu1 %954  ;;  %v10763_v60 = vpop.permute.xlu0 %952 }
  0xd9   :  { %15998 = vst [vmem:[#allocation19_spill] sm:$0xff] %v10761_v59  ;;  %15999 = vst [vmem:[#allocation20_spill] sm:$0xff] %v10763_v60  ;;  %v268_v60 = vld [vmem:[#allocation2 + $0xf8] sm:$0xff]  ;;  %v267_v59 = vld [vmem:[#allocation2 + $0xf0] sm:$0xff] }
  0xda   :  { %1198 = vrot.lane.b32.xlu1 %v402_v55, %s10140_s19  ;;  %1196 = vrot.lane.b32.xlu0 %v401_v56, %s10140_s19 }
  0xdc   :  { %v10775_v7 = vpop.permute.xlu1 %958  ;;  %v10777_v8 = vpop.permute.xlu0 %956 }
  0xdd   :  { %16000 = vst [vmem:[#allocation21_spill] sm:$0xff] %v10775_v7  ;;  %16001 = vst [vmem:[#allocation22_spill] sm:$0xff] %v10777_v8  ;;  %v266_v8 = vld [vmem:[#allocation2 + $0xe0] sm:$0xff]  ;;  %v265_v7 = vld [vmem:[#allocation2 + $0xd8] sm:$0xff] }
  0xde   :  { %1202 = vrot.lane.b32.xlu1 %v404_v3, %s10140_s19  ;;  %1200 = vrot.lane.b32.xlu0 %v403_v4, %s10140_s19 }
  0xe0   :  { %v10781_v15 = vpop.permute.xlu1 %962  ;;  %v10783_v16 = vpop.permute.xlu0 %960 }
  0xe1   :  { %16002 = vst [vmem:[#allocation23_spill] sm:$0xff] %v10781_v15  ;;  %16003 = vst [vmem:[#allocation24_spill] sm:$0xff] %v10783_v16  ;;  %v264_v16 = vld [vmem:[#allocation2 + $0xc8] sm:$0xff]  ;;  %v263_v15 = vld [vmem:[#allocation2 + $0xc0] sm:$0xff] }
  0xe2   :  { %1206 = vrot.lane.b32.xlu1 %v406_v11, %s10140_s19  ;;  %1204 = vrot.lane.b32.xlu0 %v405_v12, %s10140_s19  ;;  %v420_v11 = vld [vmem:[#allocation2 + $0x24a] sm:$0xff]  ;;  %v419_v12 = vld [vmem:[#allocation2 + $0x242] sm:$0xff] }
  0xe4   :  { %v10787_v23 = vpop.permute.xlu1 %966  ;;  %v10789_v24 = vpop.permute.xlu0 %964 }
  0xe5   :  { %16004 = vst [vmem:[#allocation25_spill] sm:$0xff] %v10787_v23  ;;  %16005 = vst [vmem:[#allocation26_spill] sm:$0xff] %v10789_v24  ;;  %v262_v24 = vld [vmem:[#allocation2 + $0xb0] sm:$0xff]  ;;  %v261_v23 = vld [vmem:[#allocation2 + $0xa8] sm:$0xff] }
  0xe6   :  { %1210 = vrot.lane.b32.xlu1 %v408_v19, %s10140_s19  ;;  %1208 = vrot.lane.b32.xlu0 %v407_v20, %s10140_s19 }
  0xe8   :  { %v10793_v31 = vpop.permute.xlu1 %970  ;;  %v10795_v32 = vpop.permute.xlu0 %968 }
  0xe9   :  { %16006 = vst [vmem:[#allocation27_spill] sm:$0xff] %v10793_v31  ;;  %16007 = vst [vmem:[#allocation28_spill] sm:$0xff] %v10795_v32  ;;  %v260_v32 = vld [vmem:[#allocation2 + $0x98] sm:$0xff]  ;;  %v259_v31 = vld [vmem:[#allocation2 + $0x90] sm:$0xff] }
  0xea   :  { %1214 = vrot.lane.b32.xlu1 %v410_v27, %s10140_s19  ;;  %1212 = vrot.lane.b32.xlu0 %v409_v28, %s10140_s19  ;;  %v422_v27 = vld [vmem:[#allocation2 + $0x262] sm:$0xff]  ;;  %v421_v28 = vld [vmem:[#allocation2 + $0x25a] sm:$0xff] }
  0xec   :  { %v10799_v39 = vpop.permute.xlu1 %974  ;;  %v10801_v40 = vpop.permute.xlu0 %972 }
  0xed   :  { %16008 = vst [vmem:[#allocation29_spill] sm:$0xff] %v10799_v39  ;;  %16009 = vst [vmem:[#allocation30_spill] sm:$0xff] %v10801_v40  ;;  %v258_v40 = vld [vmem:[#allocation2 + $0x80] sm:$0xff]  ;;  %v257_v39 = vld [vmem:[#allocation2 + $0x78] sm:$0xff] }
  0xee   :  { %1218 = vrot.lane.b32.xlu1 %v412_v35, %s10140_s19  ;;  %1216 = vrot.lane.b32.xlu0 %v411_v36, %s10140_s19 }
  0xf0   :  { %v10805_v47 = vpop.permute.xlu1 %978  ;;  %v10807_v48 = vpop.permute.xlu0 %976 }
  0xf1   :  { %16010 = vst [vmem:[#allocation31_spill] sm:$0xff] %v10805_v47  ;;  %16011 = vst [vmem:[#allocation32_spill] sm:$0xff] %v10807_v48  ;;  %v256_v48 = vld [vmem:[#allocation2 + $0x68] sm:$0xff]  ;;  %v255_v47 = vld [vmem:[#allocation2 + $0x60] sm:$0xff] }
  0xf2   :  { %1222 = vrot.lane.b32.xlu1 %v414_v43, %s10140_s19  ;;  %1220 = vrot.lane.b32.xlu0 %v413_v44, %s10140_s19  ;;  %v424_v43 = vld [vmem:[#allocation2 + $0x27a] sm:$0xff]  ;;  %v423_v44 = vld [vmem:[#allocation2 + $0x272] sm:$0xff] }
  0xf4   :  { %v10811_v55 = vpop.permute.xlu1 %982  ;;  %v10813_v56 = vpop.permute.xlu0 %980 }
  0xf5   :  { %16012 = vst [vmem:[#allocation33_spill] sm:$0xff] %v10811_v55  ;;  %16013 = vst [vmem:[#allocation34_spill] sm:$0xff] %v10813_v56  ;;  %v254_v56 = vld [vmem:[#allocation2 + $0x50] sm:$0xff]  ;;  %v253_v55 = vld [vmem:[#allocation2 + $0x48] sm:$0xff] }
  0xf6   :  { %1226 = vrot.lane.b32.xlu1 %v416_v51, %s10140_s19  ;;  %1224 = vrot.lane.b32.xlu0 %v415_v52, %s10140_s19 }
  0xf8   :  { %v10817_v3 = vpop.permute.xlu1 %986  ;;  %v10819_v4 = vpop.permute.xlu0 %984 }
  0xf9   :  { %16014 = vst [vmem:[#allocation35_spill] sm:$0xff] %v10817_v3  ;;  %16015 = vst [vmem:[#allocation36_spill] sm:$0xff] %v10819_v4  ;;  %v252_v4 = vld [vmem:[#allocation2 + $0x38] sm:$0xff]  ;;  %v251_v3 = vld [vmem:[#allocation2 + $0x30] sm:$0xff] }
  0xfa   :  { %1230 = vrot.lane.b32.xlu1 %v418_v63, %s10140_s19  ;;  %1228 = vrot.lane.b32.xlu0 %v417_v0, %s10140_s19  ;;  %v426_v63 = vld [vmem:[#allocation2 + $0x292] sm:$0xff]  ;;  %v425_v0 = vld [vmem:[#allocation2 + $0x28a] sm:$0xff] }
  0xfc   :  { %v10823_v19 = vpop.permute.xlu1 %990  ;;  %v10825_v20 = vpop.permute.xlu0 %988 }
  0xfd   :  { %16016 = vst [vmem:[#allocation37_spill] sm:$0xff] %v10823_v19  ;;  %16017 = vst [vmem:[#allocation38_spill] sm:$0xff] %v10825_v20  ;;  %v250_v19 = vld [vmem:[#allocation2 + $0x20] sm:$0xff] }
  0xfe   :  { %1234 = vrot.lane.b32.xlu1 %v420_v11, %s10140_s19  ;;  %1232 = vrot.lane.b32.xlu0 %v419_v12, %s10140_s19 }
 0x100   :  { %v10829_v35 = vpop.permute.xlu1 %994  ;;  %v10831_v36 = vpop.permute.xlu0 %992 }
 0x101   :  { %16018 = vst [vmem:[#allocation39_spill] sm:$0xff] %v10829_v35  ;;  %16019 = vst [vmem:[#allocation40_spill] sm:$0xff] %v10831_v36  ;;  %v437_v35 = vld [vmem:[#allocation2 + $0x31a] sm:$0xff] }
 0x102   :  { %1238 = vrot.lane.b32.xlu1 %v422_v27, %s10140_s19  ;;  %1236 = vrot.lane.b32.xlu0 %v421_v28, %s10140_s19  ;;  %v428_v27 = vld [vmem:[#allocation2 + $0x2aa] sm:$0xff]  ;;  %v427_v28 = vld [vmem:[#allocation2 + $0x2a2] sm:$0xff] }
 0x104   :  { %v10835_v51 = vpop.permute.xlu1 %998  ;;  %v10837_v52 = vpop.permute.xlu0 %996 }
 0x105   :  { %16020 = vst [vmem:[#allocation41_spill] sm:$0xff] %v10835_v51  ;;  %16021 = vst [vmem:[#allocation42_spill] sm:$0xff] %v10837_v52 }
 0x106   :  { %1242 = vrot.lane.b32.xlu1 %v424_v43, %s10140_s19  ;;  %1240 = vrot.lane.b32.xlu0 %v423_v44, %s10140_s19  ;;  %v430_v43 = vld [vmem:[#allocation2 + $0x2c2] sm:$0xff]  ;;  %v429_v44 = vld [vmem:[#allocation2 + $0x2ba] sm:$0xff] }
 0x108   :  { %v10841_v11 = vpop.permute.xlu1 %1002  ;;  %v10843_v12 = vpop.permute.xlu0 %1000 }
 0x109   :  { %16022 = vst [vmem:[#allocation43_spill] sm:$0xff] %v10841_v11  ;;  %16023 = vst [vmem:[#allocation44_spill] sm:$0xff] %v10843_v12 }
 0x10a   :  { %1246 = vrot.lane.b32.xlu1 %v426_v63, %s10140_s19  ;;  %1244 = vrot.lane.b32.xlu0 %v425_v0, %s10140_s19  ;;  %v432_v63 = vld [vmem:[#allocation2 + $0x2da] sm:$0xff]  ;;  %v431_v0 = vld [vmem:[#allocation2 + $0x2d2] sm:$0xff] }
 0x10c   :  { %v10847_v36 = vpop.permute.xlu1 %1006  ;;  %v10849_v51 = vpop.permute.xlu0 %1004 }
 0x10d   :  { %16024 = vst [vmem:[#allocation45_spill] sm:$0xff] %v10847_v36  ;;  %16025 = vst [vmem:[#allocation46_spill] sm:$0xff] %v10849_v51 }
 0x10e   :  { %1250 = vrot.lane.b32.xlu1 %v428_v27, %s10140_s19  ;;  %1248 = vrot.lane.b32.xlu0 %v427_v28, %s10140_s19  ;;  %v434_v27 = vld [vmem:[#allocation2 + $0x2f2] sm:$0xff]  ;;  %v433_v28 = vld [vmem:[#allocation2 + $0x2ea] sm:$0xff] }
 0x110   :  { %v10853_v52 = vpop.permute.xlu1 %1010  ;;  %v10855_v11 = vpop.permute.xlu0 %1008 }
 0x111   :  { %16026 = vst [vmem:[#allocation47_spill] sm:$0xff] %v10853_v52  ;;  %16027 = vst [vmem:[#allocation48_spill] sm:$0xff] %v10855_v11  ;;  %v438_v11 = vld [vmem:[#allocation2 + $0x322] sm:$0xff] }
 0x112   :  { %1254 = vrot.lane.b32.xlu1 %v430_v43, %s10140_s19  ;;  %1252 = vrot.lane.b32.xlu0 %v429_v44, %s10140_s19  ;;  %v180_v43 = vld [vmem:[%s15864_s0 + $0x1f0] sm:$0xff]  ;;  %v181_v44 = vld [vmem:[%s15864_s0 + $0x1f8] sm:$0xff]  ;;  %s10141_s0 = smov 12  }
 0x113   :  { %245 = vst.msk [vmem:[#allocation2 + $0x331] sm:$0xff] %vm30_vm0, %v180_v43  ;;  %246 = vst.msk [vmem:[#allocation2 + $0x339] sm:$0xff] %vm30_vm0, %v181_v44  ;;  %v249_v44 = vld [vmem:[#allocation2 + $0x18] sm:$0xff] }
 0x114   :  { %v10859_v12 = vpop.permute.xlu1 %1014  ;;  %v10861_v36 = vpop.permute.xlu0 %1012 }
 0x115   :  { %16028 = vst [vmem:[#allocation49_spill] sm:$0xff] %v10859_v12  ;;  %16029 = vst [vmem:[#allocation50_spill] sm:$0xff] %v10861_v36 }
 0x116   :  { %1258 = vrot.lane.b32.xlu1 %v432_v63, %s10140_s19  ;;  %1256 = vrot.lane.b32.xlu0 %v431_v0, %s10140_s19  ;;  %v436_v63 = vld [vmem:[#allocation2 + $0x30a] sm:$0xff]  ;;  %v435_v0 = vld [vmem:[#allocation2 + $0x302] sm:$0xff] }
 0x118   :  { %v10865_v51 = vpop.permute.xlu1 %1146  ;;  %v10867_v52 = vpop.permute.xlu0 %1144 }
 0x11a   :  { %1262 = vrot.lane.b32.xlu1 %v434_v27, %s10140_s19  ;;  %1260 = vrot.lane.b32.xlu0 %v433_v28, %s10140_s19 }
 0x11c   :  { %v10879_v36 = vpop.permute.xlu1 %1150  ;;  %v10881_v12 = vpop.permute.xlu0 %1148 }
 0x11e   :  { %1266 = vrot.lane.b32.xlu1 %v436_v63, %s10140_s19  ;;  %1264 = vrot.lane.b32.xlu0 %v435_v0, %s10140_s19 }
 0x120   :  { %v10885_v20 = vpop.permute.xlu1 %1154  ;;  %v10887_v27 = vpop.permute.xlu0 %1152 }
 0x122   :  { %1270 = vrot.lane.b32.xlu1 %v438_v11, %s10140_s19  ;;  %1268 = vrot.lane.b32.xlu0 %v437_v35, %s10140_s19 }
 0x124   :  { %v10891_v28 = vpop.permute.xlu1 %1158  ;;  %v10893_v43 = vpop.permute.xlu0 %1156 }
 0x125   :  { %16030 = vst [vmem:[#allocation51_spill] sm:$0xff] %v10891_v28 }
 0x126   :  { %1402 = vrot.lane.b32.xlu1 %v250_v19, %s10141_s0  ;;  %1400 = vrot.lane.b32.xlu0 %v249_v44, %s10141_s0 }
 0x128   :  { %v10897_v63 = vpop.permute.xlu1 %1162  ;;  %v10899_v0 = vpop.permute.xlu0 %1160 }
 0x129   :  { %16031 = vst [vmem:[#allocation52_spill] sm:$0xff] %v10897_v63  ;;  %16032 = vst [vmem:[#allocation53_spill] sm:$0xff] %v10899_v0 }
 0x12a   :  { %1406 = vrot.lane.b32.xlu1 %v252_v4, %s10141_s0  ;;  %1404 = vrot.lane.b32.xlu0 %v251_v3, %s10141_s0 }
 0x12c   :  { %v10903_v35 = vpop.permute.xlu1 %1166  ;;  %v10905_v11 = vpop.permute.xlu0 %1164 }
 0x12d   :  { %16033 = vst [vmem:[#allocation54_spill] sm:$0xff] %v10903_v35  ;;  %16034 = vst [vmem:[#allocation55_spill] sm:$0xff] %v10905_v11 }
 0x12e   :  { %1410 = vrot.lane.b32.xlu1 %v254_v56, %s10141_s0  ;;  %1408 = vrot.lane.b32.xlu0 %v253_v55, %s10141_s0 }
 0x130   :  { %v10909_v19 = vpop.permute.xlu1 %1170  ;;  %v10911_v44 = vpop.permute.xlu0 %1168 }
 0x131   :  { %16035 = vst [vmem:[#allocation56_spill] sm:$0xff] %v10909_v19  ;;  %16036 = vst [vmem:[#allocation57_spill] sm:$0xff] %v10911_v44 }
 0x132   :  { %1414 = vrot.lane.b32.xlu1 %v256_v48, %s10141_s0  ;;  %1412 = vrot.lane.b32.xlu0 %v255_v47, %s10141_s0 }
 0x134   :  { %v10915_v3 = vpop.permute.xlu1 %1174  ;;  %v10917_v4 = vpop.permute.xlu0 %1172 }
 0x135   :  { %16037 = vst [vmem:[#allocation58_spill] sm:$0xff] %v10915_v3  ;;  %16038 = vst [vmem:[#allocation59_spill] sm:$0xff] %v10917_v4 }
 0x136   :  { %1418 = vrot.lane.b32.xlu1 %v258_v40, %s10141_s0  ;;  %1416 = vrot.lane.b32.xlu0 %v257_v39, %s10141_s0 }
 0x138   :  { %v10921_v55 = vpop.permute.xlu1 %1178  ;;  %v10923_v56 = vpop.permute.xlu0 %1176 }
 0x139   :  { %16039 = vst [vmem:[#allocation60_spill] sm:$0xff] %v10921_v55  ;;  %16040 = vst [vmem:[#allocation61_spill] sm:$0xff] %v10923_v56 }
 0x13a   :  { %1422 = vrot.lane.b32.xlu1 %v260_v32, %s10141_s0  ;;  %1420 = vrot.lane.b32.xlu0 %v259_v31, %s10141_s0 }
 0x13c   :  { %v10927_v47 = vpop.permute.xlu1 %1182  ;;  %v10929_v48 = vpop.permute.xlu0 %1180 }
 0x13d   :  { %16041 = vst [vmem:[#allocation62_spill] sm:$0xff] %v10927_v47  ;;  %16042 = vst [vmem:[#allocation63_spill] sm:$0xff] %v10929_v48 }
 0x13e   :  { %1426 = vrot.lane.b32.xlu1 %v262_v24, %s10141_s0  ;;  %1424 = vrot.lane.b32.xlu0 %v261_v23, %s10141_s0 }
 0x140   :  { %v10933_v39 = vpop.permute.xlu1 %1186  ;;  %v10935_v40 = vpop.permute.xlu0 %1184 }
 0x141   :  { %16043 = vst [vmem:[#allocation64_spill] sm:$0xff] %v10933_v39  ;;  %16044 = vst [vmem:[#allocation65_spill] sm:$0xff] %v10935_v40 }
 0x142   :  { %1430 = vrot.lane.b32.xlu1 %v264_v16, %s10141_s0  ;;  %1428 = vrot.lane.b32.xlu0 %v263_v15, %s10141_s0 }
 0x144   :  { %v10939_v31 = vpop.permute.xlu1 %1190  ;;  %v10941_v32 = vpop.permute.xlu0 %1188 }
 0x145   :  { %16045 = vst [vmem:[#allocation66_spill] sm:$0xff] %v10939_v31  ;;  %16046 = vst [vmem:[#allocation67_spill] sm:$0xff] %v10941_v32 }
 0x146   :  { %1434 = vrot.lane.b32.xlu1 %v266_v8, %s10141_s0  ;;  %1432 = vrot.lane.b32.xlu0 %v265_v7, %s10141_s0 }
 0x148   :  { %v10945_v23 = vpop.permute.xlu1 %1194  ;;  %v10947_v24 = vpop.permute.xlu0 %1192 }
 0x149   :  { %16047 = vst [vmem:[#allocation68_spill] sm:$0xff] %v10945_v23  ;;  %16048 = vst [vmem:[#allocation69_spill] sm:$0xff] %v10947_v24  ;;  %v271_v23 = vld [vmem:[#allocation2 + $0x120] sm:$0xff] }
 0x14a   :  { %1438 = vrot.lane.b32.xlu1 %v268_v60, %s10141_s0  ;;  %1436 = vrot.lane.b32.xlu0 %v267_v59, %s10141_s0 }
 0x14c   :  { %v10951_v15 = vpop.permute.xlu1 %1198  ;;  %v10953_v16 = vpop.permute.xlu0 %1196 }
 0x14d   :  { %16049 = vst [vmem:[#allocation70_spill] sm:$0xff] %v10951_v15  ;;  %16050 = vst [vmem:[#allocation71_spill] sm:$0xff] %v10953_v16  ;;  %v274_v15 = vld [vmem:[#allocation2 + $0x140] sm:$0xff]  ;;  %v273_v16 = vld [vmem:[#allocation2 + $0x138] sm:$0xff] }
 0x14e   :  { %1442 = vrot.lane.b32.xlu1 %v270_v53, %s10141_s0  ;;  %1440 = vrot.lane.b32.xlu0 %v269_v54, %s10141_s0 }
 0x150   :  { %v10957_v7 = vpop.permute.xlu1 %1202  ;;  %v10959_v8 = vpop.permute.xlu0 %1200 }
 0x151   :  { %16051 = vst [vmem:[#allocation72_spill] sm:$0xff] %v10957_v7  ;;  %16052 = vst [vmem:[#allocation73_spill] sm:$0xff] %v10959_v8  ;;  %v276_v7 = vld [vmem:[#allocation2 + $0x158] sm:$0xff]  ;;  %v275_v8 = vld [vmem:[#allocation2 + $0x150] sm:$0xff] }
 0x152   :  { %1446 = vrot.lane.b32.xlu1 %v272_v50, %s10141_s0  ;;  %1444 = vrot.lane.b32.xlu0 %v271_v23, %s10141_s0 }
 0x154   :  { %v10963_v59 = vpop.permute.xlu1 %1206  ;;  %v10965_v60 = vpop.permute.xlu0 %1204 }
 0x155   :  { %16053 = vst [vmem:[#allocation74_spill] sm:$0xff] %v10963_v59  ;;  %16054 = vst [vmem:[#allocation75_spill] sm:$0xff] %v10965_v60  ;;  %v278_v59 = vld [vmem:[#allocation2 + $0x170] sm:$0xff]  ;;  %v277_v60 = vld [vmem:[#allocation2 + $0x168] sm:$0xff] }
 0x156   :  { %1450 = vrot.lane.b32.xlu1 %v274_v15, %s10141_s0  ;;  %1448 = vrot.lane.b32.xlu0 %v273_v16, %s10141_s0  ;;  %v470_v15 = vld [vmem:[#allocation2 + $0x188] sm:$0xff]  ;;  %v469_v16 = vld [vmem:[#allocation2 + $0x180] sm:$0xff] }
 0x158   :  { %v10969_v53 = vpop.permute.xlu1 %1210  ;;  %v10971_v54 = vpop.permute.xlu0 %1208 }
 0x159   :  { %16055 = vst [vmem:[#allocation76_spill] sm:$0xff] %v10969_v53  ;;  %16056 = vst [vmem:[#allocation77_spill] sm:$0xff] %v10971_v54 }
 0x15a   :  { %1454 = vrot.lane.b32.xlu1 %v276_v7, %s10141_s0  ;;  %1452 = vrot.lane.b32.xlu0 %v275_v8, %s10141_s0 }
 0x15c   :  { %v10975_v50 = vpop.permute.xlu1 %1214  ;;  %v10977_v23 = vpop.permute.xlu0 %1212 }
 0x15d   :  { %16057 = vst [vmem:[#allocation78_spill] sm:$0xff] %v10975_v50  ;;  %16058 = vst [vmem:[#allocation79_spill] sm:$0xff] %v10977_v23  ;;  %v282_v23 = vld [vmem:[#allocation2 + $0x1d0] sm:$0xff]  ;;  %v281_v50 = vld [vmem:[#allocation2 + $0x1c8] sm:$0xff] }
 0x15e   :  { %1458 = vrot.lane.b32.xlu1 %v278_v59, %s10141_s0  ;;  %1456 = vrot.lane.b32.xlu0 %v277_v60, %s10141_s0 }
 0x160   :  { %v10981_v53 = vpop.permute.xlu1 %1218  ;;  %v10983_v54 = vpop.permute.xlu0 %1216 }
 0x161   :  { %16059 = vst [vmem:[#allocation80_spill] sm:$0xff] %v10981_v53  ;;  %16060 = vst [vmem:[#allocation81_spill] sm:$0xff] %v10983_v54  ;;  %v284_v53 = vld [vmem:[#allocation2 + $0x1e8] sm:$0xff]  ;;  %v283_v54 = vld [vmem:[#allocation2 + $0x1e0] sm:$0xff] }
 0x162   :  { %1462 = vrot.lane.b32.xlu1 %v470_v15, %s10141_s0  ;;  %1460 = vrot.lane.b32.xlu0 %v469_v16, %s10141_s0 }
 0x164   :  { %v10987_v7 = vpop.permute.xlu1 %1222  ;;  %v10989_v8 = vpop.permute.xlu0 %1220 }
 0x165   :  { %16061 = vst [vmem:[#allocation82_spill] sm:$0xff] %v10987_v7  ;;  %16062 = vst [vmem:[#allocation83_spill] sm:$0xff] %v10989_v8  ;;  %v286_v8 = vld [vmem:[#allocation2 + $0x200] sm:$0xff]  ;;  %v285_v7 = vld [vmem:[#allocation2 + $0x1f8] sm:$0xff] }
 0x166   :  { %1466 = vrot.lane.b32.xlu1 %v282_v23, %s10141_s0  ;;  %1464 = vrot.lane.b32.xlu0 %v281_v50, %s10141_s0 }
 0x168   :  { %v10993_v59 = vpop.permute.xlu1 %1226  ;;  %v10995_v60 = vpop.permute.xlu0 %1224 }
 0x169   :  { %16063 = vst [vmem:[#allocation84_spill] sm:$0xff] %v10993_v59  ;;  %16064 = vst [vmem:[#allocation85_spill] sm:$0xff] %v10995_v60  ;;  %v288_v60 = vld [vmem:[#allocation2 + $0x218] sm:$0xff]  ;;  %v287_v59 = vld [vmem:[#allocation2 + $0x210] sm:$0xff] }
 0x16a   :  { %1470 = vrot.lane.b32.xlu1 %v284_v53, %s10141_s0  ;;  %1468 = vrot.lane.b32.xlu0 %v283_v54, %s10141_s0 }
 0x16c   :  { %v10999_v15 = vpop.permute.xlu1 %1230  ;;  %v11001_v16 = vpop.permute.xlu0 %1228 }
 0x16d   :  { %16065 = vst [vmem:[#allocation86_spill] sm:$0xff] %v10999_v15  ;;  %16066 = vst [vmem:[#allocation87_spill] sm:$0xff] %v11001_v16  ;;  %v290_v16 = vld [vmem:[#allocation2 + $0x230] sm:$0xff]  ;;  %v289_v15 = vld [vmem:[#allocation2 + $0x228] sm:$0xff] }
 0x16e   :  { %1474 = vrot.lane.b32.xlu1 %v286_v8, %s10141_s0  ;;  %1472 = vrot.lane.b32.xlu0 %v285_v7, %s10141_s0 }
 0x170   :  { %v11005_v50 = vpop.permute.xlu1 %1234  ;;  %v11007_v23 = vpop.permute.xlu0 %1232 }
 0x171   :  { %16067 = vst [vmem:[#allocation88_spill] sm:$0xff] %v11005_v50  ;;  %16068 = vst [vmem:[#allocation89_spill] sm:$0xff] %v11007_v23  ;;  %v292_v23 = vld [vmem:[#allocation2 + $0x248] sm:$0xff]  ;;  %v291_v50 = vld [vmem:[#allocation2 + $0x240] sm:$0xff] }
 0x172   :  { %1478 = vrot.lane.b32.xlu1 %v288_v60, %s10141_s0  ;;  %1476 = vrot.lane.b32.xlu0 %v287_v59, %s10141_s0 }
 0x174   :  { %v11011_v53 = vpop.permute.xlu1 %1238  ;;  %v11013_v54 = vpop.permute.xlu0 %1236 }
 0x175   :  { %16069 = vst [vmem:[#allocation90_spill] sm:$0xff] %v11011_v53  ;;  %16070 = vst [vmem:[#allocation91_spill] sm:$0xff] %v11013_v54  ;;  %v294_v54 = vld [vmem:[#allocation2 + $0x260] sm:$0xff]  ;;  %v293_v53 = vld [vmem:[#allocation2 + $0x258] sm:$0xff] }
 0x176   :  { %1482 = vrot.lane.b32.xlu1 %v290_v16, %s10141_s0  ;;  %1480 = vrot.lane.b32.xlu0 %v289_v15, %s10141_s0 }
 0x178   :  { %v11017_v7 = vpop.permute.xlu1 %1242  ;;  %v11019_v8 = vpop.permute.xlu0 %1240 }
 0x179   :  { %16071 = vst [vmem:[#allocation92_spill] sm:$0xff] %v11017_v7  ;;  %16072 = vst [vmem:[#allocation93_spill] sm:$0xff] %v11019_v8  ;;  %v296_v8 = vld [vmem:[#allocation2 + $0x278] sm:$0xff]  ;;  %v295_v7 = vld [vmem:[#allocation2 + $0x270] sm:$0xff] }
 0x17a   :  { %1486 = vrot.lane.b32.xlu1 %v292_v23, %s10141_s0  ;;  %1484 = vrot.lane.b32.xlu0 %v291_v50, %s10141_s0 }
 0x17c   :  { %v11023_v59 = vpop.permute.xlu1 %1246  ;;  %v11025_v60 = vpop.permute.xlu0 %1244 }
 0x17d   :  { %16073 = vst [vmem:[#allocation94_spill] sm:$0xff] %v11023_v59  ;;  %16074 = vst [vmem:[#allocation95_spill] sm:$0xff] %v11025_v60  ;;  %v298_v60 = vld [vmem:[#allocation2 + $0x290] sm:$0xff]  ;;  %v297_v59 = vld [vmem:[#allocation2 + $0x288] sm:$0xff] }
 0x17e   :  { %1490 = vrot.lane.b32.xlu1 %v294_v54, %s10141_s0  ;;  %1488 = vrot.lane.b32.xlu0 %v293_v53, %s10141_s0 }
 0x180   :  { %v11029_v15 = vpop.permute.xlu1 %1250  ;;  %v11031_v16 = vpop.permute.xlu0 %1248 }
 0x181   :  { %16075 = vst [vmem:[#allocation96_spill] sm:$0xff] %v11029_v15  ;;  %16076 = vst [vmem:[#allocation97_spill] sm:$0xff] %v11031_v16  ;;  %v300_v16 = vld [vmem:[#allocation2 + $0x2a8] sm:$0xff]  ;;  %v299_v15 = vld [vmem:[#allocation2 + $0x2a0] sm:$0xff] }
 0x182   :  { %1494 = vrot.lane.b32.xlu1 %v296_v8, %s10141_s0  ;;  %1492 = vrot.lane.b32.xlu0 %v295_v7, %s10141_s0 }
 0x184   :  { %v11035_v50 = vpop.permute.xlu1 %1254  ;;  %v11037_v23 = vpop.permute.xlu0 %1252 }
 0x185   :  { %16077 = vst [vmem:[#allocation98_spill] sm:$0xff] %v11035_v50  ;;  %16078 = vst [vmem:[#allocation99_spill] sm:$0xff] %v11037_v23  ;;  %v302_v23 = vld [vmem:[#allocation2 + $0x2c0] sm:$0xff]  ;;  %v301_v50 = vld [vmem:[#allocation2 + $0x2b8] sm:$0xff] }
 0x186   :  { %1498 = vrot.lane.b32.xlu1 %v298_v60, %s10141_s0  ;;  %1496 = vrot.lane.b32.xlu0 %v297_v59, %s10141_s0 }
 0x188   :  { %v11041_v53 = vpop.permute.xlu1 %1258  ;;  %v11043_v54 = vpop.permute.xlu0 %1256 }
 0x189   :  { %16079 = vst [vmem:[#allocation100_spill] sm:$0xff] %v11041_v53  ;;  %16080 = vst [vmem:[#allocation101_spill] sm:$0xff] %v11043_v54  ;;  %v304_v54 = vld [vmem:[#allocation2 + $0x2d8] sm:$0xff]  ;;  %v303_v53 = vld [vmem:[#allocation2 + $0x2d0] sm:$0xff] }
 0x18a   :  { %1502 = vrot.lane.b32.xlu1 %v300_v16, %s10141_s0  ;;  %1500 = vrot.lane.b32.xlu0 %v299_v15, %s10141_s0 }
 0x18c   :  { %v11047_v7 = vpop.permute.xlu1 %1262  ;;  %v11049_v8 = vpop.permute.xlu0 %1260 }
 0x18d   :  { %16081 = vst [vmem:[#allocation102_spill] sm:$0xff] %v11047_v7  ;;  %16082 = vst [vmem:[#allocation103_spill] sm:$0xff] %v11049_v8  ;;  %v306_v8 = vld [vmem:[#allocation2 + $0x2f0] sm:$0xff]  ;;  %v305_v7 = vld [vmem:[#allocation2 + $0x2e8] sm:$0xff] }
 0x18e   :  { %1506 = vrot.lane.b32.xlu1 %v302_v23, %s10141_s0  ;;  %1504 = vrot.lane.b32.xlu0 %v301_v50, %s10141_s0 }
 0x190   :  { %v11053_v59 = vpop.permute.xlu1 %1266  ;;  %v11055_v60 = vpop.permute.xlu0 %1264 }
 0x191   :  { %16083 = vst [vmem:[#allocation104_spill] sm:$0xff] %v11053_v59  ;;  %16084 = vst [vmem:[#allocation105_spill] sm:$0xff] %v11055_v60  ;;  %v308_v60 = vld [vmem:[#allocation2 + $0x308] sm:$0xff]  ;;  %v307_v59 = vld [vmem:[#allocation2 + $0x300] sm:$0xff] }
 0x192   :  { %1510 = vrot.lane.b32.xlu1 %v304_v54, %s10141_s0  ;;  %1508 = vrot.lane.b32.xlu0 %v303_v53, %s10141_s0 }
 0x194   :  { %v11059_v15 = vpop.permute.xlu1 %1270  ;;  %v11061_v16 = vpop.permute.xlu0 %1268 }
 0x195   :  { %16085 = vst [vmem:[#allocation106_spill] sm:$0xff] %v11059_v15  ;;  %16086 = vst [vmem:[#allocation107_spill] sm:$0xff] %v11061_v16  ;;  %v310_v16 = vld [vmem:[#allocation2 + $0x320] sm:$0xff]  ;;  %v309_v15 = vld [vmem:[#allocation2 + $0x318] sm:$0xff] }
 0x196   :  { %1514 = vrot.lane.b32.xlu1 %v306_v8, %s10141_s0  ;;  %1512 = vrot.lane.b32.xlu0 %v305_v7, %s10141_s0  ;;  %v502_v7 = vld [vmem:[#allocation2 + $0x338] sm:$0xff]  ;;  %v501_v8 = vld [vmem:[#allocation2 + $0x330] sm:$0xff] }
 0x198   :  { %v11065_v50 = vpop.permute.xlu1 %1402  ;;  %v11067_v23 = vpop.permute.xlu0 %1400 }
 0x19a   :  { %1518 = vrot.lane.b32.xlu1 %v308_v60, %s10141_s0  ;;  %1516 = vrot.lane.b32.xlu0 %v307_v59, %s10141_s0  ;;  %v504_v59 = vld [vmem:[#allocation2 + $0x21] sm:$0xff]  ;;  %v503_v60 = vld [vmem:[#allocation2 + $0x19] sm:$0xff] }
 0x19c   :  { %v11071_v53 = vpop.permute.xlu1 %1406  ;;  %v11073_v54 = vpop.permute.xlu0 %1404 }
 0x19e   :  { %1522 = vrot.lane.b32.xlu1 %v310_v16, %s10141_s0  ;;  %1520 = vrot.lane.b32.xlu0 %v309_v15, %s10141_s0  ;;  %v506_v15 = vld [vmem:[#allocation2 + $0x39] sm:$0xff]  ;;  %v505_v16 = vld [vmem:[#allocation2 + $0x31] sm:$0xff] }
 0x1a0   :  { %v11077_v49 = vpop.permute.xlu1 %1410  ;;  %v11079_v24 = vpop.permute.xlu0 %1408 }
 0x1a2   :  { %1526 = vrot.lane.b32.xlu1 %v502_v7, %s10141_s0  ;;  %1524 = vrot.lane.b32.xlu0 %v501_v8, %s10141_s0  ;;  %v508_v7 = vld [vmem:[#allocation2 + $0x51] sm:$0xff]  ;;  %v507_v8 = vld [vmem:[#allocation2 + $0x49] sm:$0xff] }
 0x1a4   :  { %v11083_v31 = vpop.permute.xlu1 %1414  ;;  %v11085_v46 = vpop.permute.xlu0 %1412 }
 0x1a5   :  { %16087 = vst [vmem:[#allocation108_spill] sm:$0xff] %v11083_v31 }
 0x1a6   :  { %1658 = vrot.lane.b32.xlu1 %v504_v59, %s10142_s28  ;;  %1656 = vrot.lane.b32.xlu0 %v503_v60, %s10142_s28  ;;  %v510_v59 = vld [vmem:[#allocation2 + $0x69] sm:$0xff]  ;;  %v509_v60 = vld [vmem:[#allocation2 + $0x61] sm:$0xff] }
 0x1a8   :  { %v11089_v32 = vpop.permute.xlu1 %1418  ;;  %v11091_v39 = vpop.permute.xlu0 %1416 }
 0x1a9   :  { %16088 = vst [vmem:[#allocation109_spill] sm:$0xff] %v11089_v32  ;;  %16089 = vst [vmem:[#allocation110_spill] sm:$0xff] %v11091_v39 }
 0x1aa   :  { %1662 = vrot.lane.b32.xlu1 %v506_v15, %s10142_s28  ;;  %1660 = vrot.lane.b32.xlu0 %v505_v16, %s10142_s28  ;;  %v512_v15 = vld [vmem:[#allocation2 + $0x81] sm:$0xff]  ;;  %v511_v16 = vld [vmem:[#allocation2 + $0x79] sm:$0xff] }
 0x1ac   :  { %v11095_v45 = vpop.permute.xlu1 %1422  ;;  %v11097_v40 = vpop.permute.xlu0 %1420 }
 0x1ad   :  { %16090 = vst [vmem:[#allocation111_spill] sm:$0xff] %v11095_v45  ;;  %16091 = vst [vmem:[#allocation112_spill] sm:$0xff] %v11097_v40 }
 0x1ae   :  { %1666 = vrot.lane.b32.xlu1 %v508_v7, %s10142_s28  ;;  %1664 = vrot.lane.b32.xlu0 %v507_v8, %s10142_s28  ;;  %v514_v7 = vld [vmem:[#allocation2 + $0x99] sm:$0xff]  ;;  %v513_v8 = vld [vmem:[#allocation2 + $0x91] sm:$0xff] }
 0x1b0   :  { %v11101_v47 = vpop.permute.xlu1 %1426  ;;  %v11103_v42 = vpop.permute.xlu0 %1424 }
 0x1b1   :  { %16092 = vst [vmem:[#allocation113_spill] sm:$0xff] %v11101_v47  ;;  %16093 = vst [vmem:[#allocation114_spill] sm:$0xff] %v11103_v42 }
 0x1b2   :  { %1670 = vrot.lane.b32.xlu1 %v510_v59, %s10142_s28  ;;  %1668 = vrot.lane.b32.xlu0 %v509_v60, %s10142_s28  ;;  %v516_v59 = vld [vmem:[#allocation2 + $0xb1] sm:$0xff]  ;;  %v515_v60 = vld [vmem:[#allocation2 + $0xa9] sm:$0xff] }
 0x1b4   :  { %v11107_v48 = vpop.permute.xlu1 %1430  ;;  %v11109_v55 = vpop.permute.xlu0 %1428 }
 0x1b5   :  { %16094 = vst [vmem:[#allocation115_spill] sm:$0xff] %v11107_v48  ;;  %16095 = vst [vmem:[#allocation116_spill] sm:$0xff] %v11109_v55 }
 0x1b6   :  { %1674 = vrot.lane.b32.xlu1 %v512_v15, %s10142_s28  ;;  %1672 = vrot.lane.b32.xlu0 %v511_v16, %s10142_s28  ;;  %v518_v15 = vld [vmem:[#allocation2 + $0xc9] sm:$0xff]  ;;  %v517_v16 = vld [vmem:[#allocation2 + $0xc1] sm:$0xff] }
 0x1b8   :  { %v11113_v41 = vpop.permute.xlu1 %1434  ;;  %v11115_v56 = vpop.permute.xlu0 %1432 }
 0x1b9   :  { %16096 = vst [vmem:[#allocation117_spill] sm:$0xff] %v11113_v41  ;;  %16097 = vst [vmem:[#allocation118_spill] sm:$0xff] %v11115_v56 }
 0x1ba   :  { %1678 = vrot.lane.b32.xlu1 %v514_v7, %s10142_s28  ;;  %1676 = vrot.lane.b32.xlu0 %v513_v8, %s10142_s28  ;;  %v520_v7 = vld [vmem:[#allocation2 + $0xe1] sm:$0xff]  ;;  %v519_v8 = vld [vmem:[#allocation2 + $0xd9] sm:$0xff] }
 0x1bc   :  { %v11119_v3 = vpop.permute.xlu1 %1438  ;;  %v11121_v48 = vpop.permute.xlu0 %1436 }
 0x1bd   :  { %16098 = vst [vmem:[#allocation119_spill] sm:$0xff] %v11119_v3  ;;  %16099 = vst [vmem:[#allocation120_spill] sm:$0xff] %v11121_v48 }
 0x1be   :  { %1682 = vrot.lane.b32.xlu1 %v516_v59, %s10142_s28  ;;  %1680 = vrot.lane.b32.xlu0 %v515_v60, %s10142_s28  ;;  %v522_v59 = vld [vmem:[#allocation2 + $0xf9] sm:$0xff]  ;;  %v521_v60 = vld [vmem:[#allocation2 + $0xf1] sm:$0xff] }
 0x1c0   :  { %v11125_v38 = vpop.permute.xlu1 %1442  ;;  %v11127_v41 = vpop.permute.xlu0 %1440 }
 0x1c1   :  { %16100 = vst [vmem:[#allocation121_spill] sm:$0xff] %v11125_v38  ;;  %16101 = vst [vmem:[#allocation122_spill] sm:$0xff] %v11127_v41 }
 0x1c2   :  { %1686 = vrot.lane.b32.xlu1 %v518_v15, %s10142_s28  ;;  %1684 = vrot.lane.b32.xlu0 %v517_v16, %s10142_s28  ;;  %v524_v15 = vld [vmem:[#allocation2 + $0x111] sm:$0xff]  ;;  %v523_v16 = vld [vmem:[#allocation2 + $0x109] sm:$0xff] }
 0x1c4   :  { %v11131_v56 = vpop.permute.xlu1 %1446  ;;  %v11133_v3 = vpop.permute.xlu0 %1444 }
 0x1c5   :  { %16102 = vst [vmem:[#allocation123_spill] sm:$0xff] %v11131_v56  ;;  %16103 = vst [vmem:[#allocation124_spill] sm:$0xff] %v11133_v3 }
 0x1c6   :  { %1690 = vrot.lane.b32.xlu1 %v520_v7, %s10142_s28  ;;  %1688 = vrot.lane.b32.xlu0 %v519_v8, %s10142_s28  ;;  %v526_v7 = vld [vmem:[#allocation2 + $0x129] sm:$0xff]  ;;  %v525_v8 = vld [vmem:[#allocation2 + $0x121] sm:$0xff] }
 0x1c8   :  { %v11137_v48 = vpop.permute.xlu1 %1450  ;;  %v11139_v38 = vpop.permute.xlu0 %1448 }
 0x1c9   :  { %16104 = vst [vmem:[#allocation125_spill] sm:$0xff] %v11137_v48  ;;  %16105 = vst [vmem:[#allocation126_spill] sm:$0xff] %v11139_v38 }
 0x1ca   :  { %1694 = vrot.lane.b32.xlu1 %v522_v59, %s10142_s28  ;;  %1692 = vrot.lane.b32.xlu0 %v521_v60, %s10142_s28  ;;  %v528_v59 = vld [vmem:[#allocation2 + $0x141] sm:$0xff]  ;;  %v527_v60 = vld [vmem:[#allocation2 + $0x139] sm:$0xff] }
 0x1cc   :  { %v11143_v41 = vpop.permute.xlu1 %1454  ;;  %v11145_v56 = vpop.permute.xlu0 %1452 }
 0x1cd   :  { %16106 = vst [vmem:[#allocation127_spill] sm:$0xff] %v11143_v41  ;;  %16107 = vst [vmem:[#allocation128_spill] sm:$0xff] %v11145_v56 }
 0x1ce   :  { %1698 = vrot.lane.b32.xlu1 %v524_v15, %s10142_s28  ;;  %1696 = vrot.lane.b32.xlu0 %v523_v16, %s10142_s28  ;;  %v530_v15 = vld [vmem:[#allocation2 + $0x159] sm:$0xff]  ;;  %v529_v16 = vld [vmem:[#allocation2 + $0x151] sm:$0xff] }
 0x1d0   :  { %v11149_v3 = vpop.permute.xlu1 %1458  ;;  %v11151_v48 = vpop.permute.xlu0 %1456 }
 0x1d1   :  { %16108 = vst [vmem:[#allocation129_spill] sm:$0xff] %v11149_v3  ;;  %16109 = vst [vmem:[#allocation130_spill] sm:$0xff] %v11151_v48 }
 0x1d2   :  { %1702 = vrot.lane.b32.xlu1 %v526_v7, %s10142_s28  ;;  %1700 = vrot.lane.b32.xlu0 %v525_v8, %s10142_s28  ;;  %v532_v7 = vld [vmem:[#allocation2 + $0x171] sm:$0xff]  ;;  %v531_v8 = vld [vmem:[#allocation2 + $0x169] sm:$0xff] }
 0x1d4   :  { %v11155_v38 = vpop.permute.xlu1 %1462  ;;  %v11157_v41 = vpop.permute.xlu0 %1460 }
 0x1d5   :  { %16110 = vst [vmem:[#allocation131_spill] sm:$0xff] %v11155_v38  ;;  %16111 = vst [vmem:[#allocation132_spill] sm:$0xff] %v11157_v41 }
 0x1d6   :  { %1706 = vrot.lane.b32.xlu1 %v528_v59, %s10142_s28  ;;  %1704 = vrot.lane.b32.xlu0 %v527_v60, %s10142_s28  ;;  %v534_v59 = vld [vmem:[#allocation2 + $0x189] sm:$0xff]  ;;  %v533_v60 = vld [vmem:[#allocation2 + $0x181] sm:$0xff] }
 0x1d8   :  { %v11161_v56 = vpop.permute.xlu1 %1466  ;;  %v11163_v3 = vpop.permute.xlu0 %1464 }
 0x1d9   :  { %16112 = vst [vmem:[#allocation133_spill] sm:$0xff] %v11161_v56  ;;  %16113 = vst [vmem:[#allocation134_spill] sm:$0xff] %v11163_v3 }
 0x1da   :  { %1710 = vrot.lane.b32.xlu1 %v530_v15, %s10142_s28  ;;  %1708 = vrot.lane.b32.xlu0 %v529_v16, %s10142_s28  ;;  %v536_v15 = vld [vmem:[#allocation2 + $0x1d1] sm:$0xff]  ;;  %v535_v16 = vld [vmem:[#allocation2 + $0x1c9] sm:$0xff] }
 0x1dc   :  { %v11167_v48 = vpop.permute.xlu1 %1470  ;;  %v11169_v38 = vpop.permute.xlu0 %1468 }
 0x1dd   :  { %16114 = vst [vmem:[#allocation135_spill] sm:$0xff] %v11167_v48  ;;  %16115 = vst [vmem:[#allocation136_spill] sm:$0xff] %v11169_v38 }
 0x1de   :  { %1714 = vrot.lane.b32.xlu1 %v532_v7, %s10142_s28  ;;  %1712 = vrot.lane.b32.xlu0 %v531_v8, %s10142_s28  ;;  %v538_v7 = vld [vmem:[#allocation2 + $0x1e9] sm:$0xff]  ;;  %v537_v8 = vld [vmem:[#allocation2 + $0x1e1] sm:$0xff] }
 0x1e0   :  { %v11173_v41 = vpop.permute.xlu1 %1474  ;;  %v11175_v56 = vpop.permute.xlu0 %1472 }
 0x1e1   :  { %16116 = vst [vmem:[#allocation137_spill] sm:$0xff] %v11173_v41  ;;  %16117 = vst [vmem:[#allocation138_spill] sm:$0xff] %v11175_v56 }
 0x1e2   :  { %1718 = vrot.lane.b32.xlu1 %v534_v59, %s10142_s28  ;;  %1716 = vrot.lane.b32.xlu0 %v533_v60, %s10142_s28  ;;  %v540_v59 = vld [vmem:[#allocation2 + $0x201] sm:$0xff]  ;;  %v539_v60 = vld [vmem:[#allocation2 + $0x1f9] sm:$0xff] }
 0x1e4   :  { %v11179_v3 = vpop.permute.xlu1 %1478  ;;  %v11181_v48 = vpop.permute.xlu0 %1476 }
 0x1e5   :  { %16118 = vst [vmem:[#allocation139_spill] sm:$0xff] %v11179_v3  ;;  %16119 = vst [vmem:[#allocation140_spill] sm:$0xff] %v11181_v48 }
 0x1e6   :  { %1722 = vrot.lane.b32.xlu1 %v536_v15, %s10142_s28  ;;  %1720 = vrot.lane.b32.xlu0 %v535_v16, %s10142_s28  ;;  %v542_v15 = vld [vmem:[#allocation2 + $0x219] sm:$0xff]  ;;  %v541_v16 = vld [vmem:[#allocation2 + $0x211] sm:$0xff] }
 0x1e8   :  { %v11185_v38 = vpop.permute.xlu1 %1482  ;;  %v11187_v41 = vpop.permute.xlu0 %1480 }
 0x1e9   :  { %16120 = vst [vmem:[#allocation141_spill] sm:$0xff] %v11185_v38  ;;  %16121 = vst [vmem:[#allocation142_spill] sm:$0xff] %v11187_v41 }
 0x1ea   :  { %1726 = vrot.lane.b32.xlu1 %v538_v7, %s10142_s28  ;;  %1724 = vrot.lane.b32.xlu0 %v537_v8, %s10142_s28  ;;  %v544_v7 = vld [vmem:[#allocation2 + $0x231] sm:$0xff]  ;;  %v543_v8 = vld [vmem:[#allocation2 + $0x229] sm:$0xff] }
 0x1ec   :  { %v11191_v56 = vpop.permute.xlu1 %1486  ;;  %v11193_v3 = vpop.permute.xlu0 %1484 }
 0x1ed   :  { %16122 = vst [vmem:[#allocation143_spill] sm:$0xff] %v11191_v56  ;;  %16123 = vst [vmem:[#allocation144_spill] sm:$0xff] %v11193_v3 }
 0x1ee   :  { %1730 = vrot.lane.b32.xlu1 %v540_v59, %s10142_s28  ;;  %1728 = vrot.lane.b32.xlu0 %v539_v60, %s10142_s28  ;;  %v546_v59 = vld [vmem:[#allocation2 + $0x249] sm:$0xff]  ;;  %v545_v60 = vld [vmem:[#allocation2 + $0x241] sm:$0xff] }
 0x1f0   :  { %v11197_v48 = vpop.permute.xlu1 %1490  ;;  %v11199_v38 = vpop.permute.xlu0 %1488 }
 0x1f1   :  { %16124 = vst [vmem:[#allocation145_spill] sm:$0xff] %v11197_v48  ;;  %16125 = vst [vmem:[#allocation146_spill] sm:$0xff] %v11199_v38 }
 0x1f2   :  { %1734 = vrot.lane.b32.xlu1 %v542_v15, %s10142_s28  ;;  %1732 = vrot.lane.b32.xlu0 %v541_v16, %s10142_s28  ;;  %v548_v15 = vld [vmem:[#allocation2 + $0x261] sm:$0xff]  ;;  %v547_v16 = vld [vmem:[#allocation2 + $0x259] sm:$0xff] }
 0x1f4   :  { %v11203_v41 = vpop.permute.xlu1 %1494  ;;  %v11205_v56 = vpop.permute.xlu0 %1492 }
 0x1f5   :  { %16126 = vst [vmem:[#allocation147_spill] sm:$0xff] %v11203_v41  ;;  %16127 = vst [vmem:[#allocation148_spill] sm:$0xff] %v11205_v56 }
 0x1f6   :  { %1738 = vrot.lane.b32.xlu1 %v544_v7, %s10142_s28  ;;  %1736 = vrot.lane.b32.xlu0 %v543_v8, %s10142_s28  ;;  %v550_v7 = vld [vmem:[#allocation2 + $0x279] sm:$0xff]  ;;  %v549_v8 = vld [vmem:[#allocation2 + $0x271] sm:$0xff] }
 0x1f8   :  { %v11209_v3 = vpop.permute.xlu1 %1498  ;;  %v11211_v48 = vpop.permute.xlu0 %1496 }
 0x1f9   :  { %16128 = vst [vmem:[#allocation149_spill] sm:$0xff] %v11209_v3  ;;  %16129 = vst [vmem:[#allocation150_spill] sm:$0xff] %v11211_v48 }
 0x1fa   :  { %1742 = vrot.lane.b32.xlu1 %v546_v59, %s10142_s28  ;;  %1740 = vrot.lane.b32.xlu0 %v545_v60, %s10142_s28  ;;  %v552_v59 = vld [vmem:[#allocation2 + $0x291] sm:$0xff]  ;;  %v551_v60 = vld [vmem:[#allocation2 + $0x289] sm:$0xff] }
 0x1fc   :  { %v11215_v38 = vpop.permute.xlu1 %1502  ;;  %v11217_v41 = vpop.permute.xlu0 %1500 }
 0x1fd   :  { %16130 = vst [vmem:[#allocation151_spill] sm:$0xff] %v11215_v38  ;;  %16131 = vst [vmem:[#allocation152_spill] sm:$0xff] %v11217_v41 }
 0x1fe   :  { %1746 = vrot.lane.b32.xlu1 %v548_v15, %s10142_s28  ;;  %1744 = vrot.lane.b32.xlu0 %v547_v16, %s10142_s28  ;;  %v554_v15 = vld [vmem:[#allocation2 + $0x2a9] sm:$0xff]  ;;  %v553_v16 = vld [vmem:[#allocation2 + $0x2a1] sm:$0xff] }
 0x200   :  { %v11221_v56 = vpop.permute.xlu1 %1506  ;;  %v11223_v3 = vpop.permute.xlu0 %1504 }
 0x201   :  { %16132 = vst [vmem:[#allocation153_spill] sm:$0xff] %v11221_v56  ;;  %16133 = vst [vmem:[#allocation154_spill] sm:$0xff] %v11223_v3 }
 0x202   :  { %1750 = vrot.lane.b32.xlu1 %v550_v7, %s10142_s28  ;;  %1748 = vrot.lane.b32.xlu0 %v549_v8, %s10142_s28  ;;  %v556_v7 = vld [vmem:[#allocation2 + $0x2c1] sm:$0xff]  ;;  %v555_v8 = vld [vmem:[#allocation2 + $0x2b9] sm:$0xff] }
 0x204   :  { %v11227_v48 = vpop.permute.xlu1 %1510  ;;  %v11229_v38 = vpop.permute.xlu0 %1508 }
 0x205   :  { %16134 = vst [vmem:[#allocation155_spill] sm:$0xff] %v11227_v48  ;;  %16135 = vst [vmem:[#allocation156_spill] sm:$0xff] %v11229_v38 }
 0x206   :  { %1754 = vrot.lane.b32.xlu1 %v552_v59, %s10142_s28  ;;  %1752 = vrot.lane.b32.xlu0 %v551_v60, %s10142_s28  ;;  %v558_v59 = vld [vmem:[#allocation2 + $0x2d9] sm:$0xff]  ;;  %v557_v60 = vld [vmem:[#allocation2 + $0x2d1] sm:$0xff] }
 0x208   :  { %v11233_v41 = vpop.permute.xlu1 %1514  ;;  %v11235_v56 = vpop.permute.xlu0 %1512 }
 0x209   :  { %16136 = vst [vmem:[#allocation157_spill] sm:$0xff] %v11233_v41  ;;  %16137 = vst [vmem:[#allocation158_spill] sm:$0xff] %v11235_v56 }
 0x20a   :  { %1758 = vrot.lane.b32.xlu1 %v554_v15, %s10142_s28  ;;  %1756 = vrot.lane.b32.xlu0 %v553_v16, %s10142_s28  ;;  %v560_v15 = vld [vmem:[#allocation2 + $0x2f1] sm:$0xff]  ;;  %v559_v16 = vld [vmem:[#allocation2 + $0x2e9] sm:$0xff] }
 0x20c   :  { %v11239_v3 = vpop.permute.xlu1 %1518  ;;  %v11241_v48 = vpop.permute.xlu0 %1516 }
 0x20d   :  { %16138 = vst [vmem:[#allocation159_spill] sm:$0xff] %v11239_v3  ;;  %16139 = vst [vmem:[#allocation160_spill] sm:$0xff] %v11241_v48 }
 0x20e   :  { %1762 = vrot.lane.b32.xlu1 %v556_v7, %s10142_s28  ;;  %1760 = vrot.lane.b32.xlu0 %v555_v8, %s10142_s28  ;;  %v562_v7 = vld [vmem:[#allocation2 + $0x309] sm:$0xff]  ;;  %v561_v8 = vld [vmem:[#allocation2 + $0x301] sm:$0xff] }
 0x210   :  { %v11245_v38 = vpop.permute.xlu1 %1522  ;;  %v11247_v41 = vpop.permute.xlu0 %1520 }
 0x211   :  { %16140 = vst [vmem:[#allocation161_spill] sm:$0xff] %v11245_v38  ;;  %16141 = vst [vmem:[#allocation162_spill] sm:$0xff] %v11247_v41 }
 0x212   :  { %1766 = vrot.lane.b32.xlu1 %v558_v59, %s10142_s28  ;;  %1764 = vrot.lane.b32.xlu0 %v557_v60, %s10142_s28  ;;  %v564_v59 = vld [vmem:[#allocation2 + $0x321] sm:$0xff]  ;;  %v563_v60 = vld [vmem:[#allocation2 + $0x319] sm:$0xff] }
 0x214   :  { %v11251_v56 = vpop.permute.xlu1 %1526  ;;  %v11253_v3 = vpop.permute.xlu0 %1524 }
 0x215   :  { %16142 = vst [vmem:[#allocation163_spill] sm:$0xff] %v11251_v56  ;;  %16143 = vst [vmem:[#allocation164_spill] sm:$0xff] %v11253_v3 }
 0x216   :  { %1770 = vrot.lane.b32.xlu1 %v560_v15, %s10142_s28  ;;  %1768 = vrot.lane.b32.xlu0 %v559_v16, %s10142_s28  ;;  %v566_v15 = vld [vmem:[#allocation2 + $0x339] sm:$0xff]  ;;  %v565_v16 = vld [vmem:[#allocation2 + $0x331] sm:$0xff] }
 0x218   :  { %v11257_v48 = vpop.permute.xlu1 %1658  ;;  %v11259_v38 = vpop.permute.xlu0 %1656 }
 0x21a   :  { %1774 = vrot.lane.b32.xlu1 %v562_v7, %s10142_s28  ;;  %1772 = vrot.lane.b32.xlu0 %v561_v8, %s10142_s28  ;;  %v568_v7 = vld [vmem:[#allocation2 + $0x22] sm:$0xff]  ;;  %v567_v8 = vld [vmem:[#allocation2 + $0x1a] sm:$0xff] }
 0x21c   :  { %v11263_v41 = vpop.permute.xlu1 %1662  ;;  %v11265_v56 = vpop.permute.xlu0 %1660 }
 0x21e   :  { %1778 = vrot.lane.b32.xlu1 %v564_v59, %s10142_s28  ;;  %1776 = vrot.lane.b32.xlu0 %v563_v60, %s10142_s28  ;;  %v570_v59 = vld [vmem:[#allocation2 + $0x3a] sm:$0xff]  ;;  %v569_v60 = vld [vmem:[#allocation2 + $0x32] sm:$0xff] }
 0x220   :  { %v11269_v3 = vpop.permute.xlu1 %1666  ;;  %v11271_v55 = vpop.permute.xlu0 %1664 }
 0x221   :  { %16144 = vst [vmem:[#allocation165_spill] sm:$0xff] %v11269_v3 }
 0x222   :  { %1782 = vrot.lane.b32.xlu1 %v566_v15, %s10142_s28  ;;  %1780 = vrot.lane.b32.xlu0 %v565_v16, %s10142_s28  ;;  %v572_v15 = vld [vmem:[#allocation2 + $0x52] sm:$0xff]  ;;  %v571_v16 = vld [vmem:[#allocation2 + $0x4a] sm:$0xff] }
 0x224   :  { %v11275_v47 = vpop.permute.xlu1 %1670  ;;  %v11277_v4 = vpop.permute.xlu0 %1668 }
 0x225   :  { %16145 = vst [vmem:[#allocation166_spill] sm:$0xff] %v11275_v47  ;;  %16146 = vst [vmem:[#allocation167_spill] sm:$0xff] %v11277_v4 }
 0x226   :  { %1914 = vrot.lane.b32.xlu1 %v568_v7, %s10143_s30  ;;  %1912 = vrot.lane.b32.xlu0 %v567_v8, %s10143_s30  ;;  %v574_v7 = vld [vmem:[#allocation2 + $0x6a] sm:$0xff]  ;;  %v573_v8 = vld [vmem:[#allocation2 + $0x62] sm:$0xff] }
 0x228   :  { %v11281_v19 = vpop.permute.xlu1 %1674  ;;  %v11283_v37 = vpop.permute.xlu0 %1672 }
 0x229   :  { %16147 = vst [vmem:[#allocation168_spill] sm:$0xff] %v11281_v19  ;;  %16148 = vst [vmem:[#allocation169_spill] sm:$0xff] %v11283_v37 }
 0x22a   :  { %1918 = vrot.lane.b32.xlu1 %v570_v59, %s10143_s30  ;;  %1916 = vrot.lane.b32.xlu0 %v569_v60, %s10143_s30  ;;  %v576_v59 = vld [vmem:[#allocation2 + $0x82] sm:$0xff]  ;;  %v575_v60 = vld [vmem:[#allocation2 + $0x7a] sm:$0xff] }
 0x22c   :  { %v11287_v42 = vpop.permute.xlu1 %1678  ;;  %v11289_v45 = vpop.permute.xlu0 %1676 }
 0x22d   :  { %16149 = vst [vmem:[#allocation170_spill] sm:$0xff] %v11287_v42  ;;  %16150 = vst [vmem:[#allocation171_spill] sm:$0xff] %v11289_v45 }
 0x22e   :  { %1922 = vrot.lane.b32.xlu1 %v572_v15, %s10143_s30  ;;  %1920 = vrot.lane.b32.xlu0 %v571_v16, %s10143_s30  ;;  %v578_v15 = vld [vmem:[#allocation2 + $0x9a] sm:$0xff]  ;;  %v577_v16 = vld [vmem:[#allocation2 + $0x92] sm:$0xff] }
 0x230   :  { %v11293_v44 = vpop.permute.xlu1 %1682  ;;  %v11295_v35 = vpop.permute.xlu0 %1680 }
 0x231   :  { %16151 = vst [vmem:[#allocation172_spill] sm:$0xff] %v11293_v44  ;;  %16152 = vst [vmem:[#allocation173_spill] sm:$0xff] %v11295_v35 }
 0x232   :  { %1926 = vrot.lane.b32.xlu1 %v574_v7, %s10143_s30  ;;  %1924 = vrot.lane.b32.xlu0 %v573_v8, %s10143_s30  ;;  %v580_v7 = vld [vmem:[#allocation2 + $0xb2] sm:$0xff]  ;;  %v579_v8 = vld [vmem:[#allocation2 + $0xaa] sm:$0xff] }
 0x234   :  { %v11299_v34 = vpop.permute.xlu1 %1686  ;;  %v11301_v42 = vpop.permute.xlu0 %1684 }
 0x235   :  { %16153 = vst [vmem:[#allocation174_spill] sm:$0xff] %v11299_v34  ;;  %16154 = vst [vmem:[#allocation175_spill] sm:$0xff] %v11301_v42 }
 0x236   :  { %1930 = vrot.lane.b32.xlu1 %v576_v59, %s10143_s30  ;;  %1928 = vrot.lane.b32.xlu0 %v575_v60, %s10143_s30  ;;  %v582_v59 = vld [vmem:[#allocation2 + $0xca] sm:$0xff]  ;;  %v581_v60 = vld [vmem:[#allocation2 + $0xc2] sm:$0xff] }
 0x238   :  { %v11305_v45 = vpop.permute.xlu1 %1690  ;;  %v11307_v44 = vpop.permute.xlu0 %1688 }
 0x239   :  { %16155 = vst [vmem:[#allocation176_spill] sm:$0xff] %v11305_v45  ;;  %16156 = vst [vmem:[#allocation177_spill] sm:$0xff] %v11307_v44 }
 0x23a   :  { %1934 = vrot.lane.b32.xlu1 %v578_v15, %s10143_s30  ;;  %1932 = vrot.lane.b32.xlu0 %v577_v16, %s10143_s30  ;;  %v584_v15 = vld [vmem:[#allocation2 + $0xe2] sm:$0xff]  ;;  %v583_v16 = vld [vmem:[#allocation2 + $0xda] sm:$0xff] }
 0x23c   :  { %v11311_v35 = vpop.permute.xlu1 %1694  ;;  %v11313_v34 = vpop.permute.xlu0 %1692 }
 0x23d   :  { %16157 = vst [vmem:[#allocation178_spill] sm:$0xff] %v11311_v35  ;;  %16158 = vst [vmem:[#allocation179_spill] sm:$0xff] %v11313_v34 }
 0x23e   :  { %1938 = vrot.lane.b32.xlu1 %v580_v7, %s10143_s30  ;;  %1936 = vrot.lane.b32.xlu0 %v579_v8, %s10143_s30  ;;  %v586_v7 = vld [vmem:[#allocation2 + $0xfa] sm:$0xff]  ;;  %v585_v8 = vld [vmem:[#allocation2 + $0xf2] sm:$0xff] }
 0x240   :  { %v11317_v42 = vpop.permute.xlu1 %1698  ;;  %v11319_v45 = vpop.permute.xlu0 %1696 }
 0x241   :  { %16159 = vst [vmem:[#allocation180_spill] sm:$0xff] %v11317_v42  ;;  %16160 = vst [vmem:[#allocation181_spill] sm:$0xff] %v11319_v45 }
 0x242   :  { %1942 = vrot.lane.b32.xlu1 %v582_v59, %s10143_s30  ;;  %1940 = vrot.lane.b32.xlu0 %v581_v60, %s10143_s30  ;;  %v588_v59 = vld [vmem:[#allocation2 + $0x112] sm:$0xff]  ;;  %v587_v60 = vld [vmem:[#allocation2 + $0x10a] sm:$0xff] }
 0x244   :  { %v11323_v44 = vpop.permute.xlu1 %1702  ;;  %v11325_v35 = vpop.permute.xlu0 %1700 }
 0x245   :  { %16161 = vst [vmem:[#allocation182_spill] sm:$0xff] %v11323_v44  ;;  %16162 = vst [vmem:[#allocation183_spill] sm:$0xff] %v11325_v35 }
 0x246   :  { %1946 = vrot.lane.b32.xlu1 %v584_v15, %s10143_s30  ;;  %1944 = vrot.lane.b32.xlu0 %v583_v16, %s10143_s30  ;;  %v590_v15 = vld [vmem:[#allocation2 + $0x12a] sm:$0xff]  ;;  %v589_v16 = vld [vmem:[#allocation2 + $0x122] sm:$0xff] }
 0x248   :  { %v11329_v34 = vpop.permute.xlu1 %1706  ;;  %v11331_v42 = vpop.permute.xlu0 %1704 }
 0x249   :  { %16163 = vst [vmem:[#allocation184_spill] sm:$0xff] %v11329_v34  ;;  %16164 = vst [vmem:[#allocation185_spill] sm:$0xff] %v11331_v42 }
 0x24a   :  { %1950 = vrot.lane.b32.xlu1 %v586_v7, %s10143_s30  ;;  %1948 = vrot.lane.b32.xlu0 %v585_v8, %s10143_s30  ;;  %v592_v7 = vld [vmem:[#allocation2 + $0x142] sm:$0xff]  ;;  %v591_v8 = vld [vmem:[#allocation2 + $0x13a] sm:$0xff] }
 0x24c   :  { %v11335_v45 = vpop.permute.xlu1 %1710  ;;  %v11337_v44 = vpop.permute.xlu0 %1708 }
 0x24d   :  { %16165 = vst [vmem:[#allocation186_spill] sm:$0xff] %v11335_v45  ;;  %16166 = vst [vmem:[#allocation187_spill] sm:$0xff] %v11337_v44 }
 0x24e   :  { %1954 = vrot.lane.b32.xlu1 %v588_v59, %s10143_s30  ;;  %1952 = vrot.lane.b32.xlu0 %v587_v60, %s10143_s30  ;;  %v594_v59 = vld [vmem:[#allocation2 + $0x15a] sm:$0xff]  ;;  %v593_v60 = vld [vmem:[#allocation2 + $0x152] sm:$0xff] }
 0x250   :  { %v11341_v35 = vpop.permute.xlu1 %1714  ;;  %v11343_v34 = vpop.permute.xlu0 %1712 }
 0x251   :  { %16167 = vst [vmem:[#allocation188_spill] sm:$0xff] %v11341_v35  ;;  %16168 = vst [vmem:[#allocation189_spill] sm:$0xff] %v11343_v34 }
 0x252   :  { %1958 = vrot.lane.b32.xlu1 %v590_v15, %s10143_s30  ;;  %1956 = vrot.lane.b32.xlu0 %v589_v16, %s10143_s30  ;;  %v596_v15 = vld [vmem:[#allocation2 + $0x172] sm:$0xff]  ;;  %v595_v16 = vld [vmem:[#allocation2 + $0x16a] sm:$0xff] }
 0x254   :  { %v11347_v42 = vpop.permute.xlu1 %1718  ;;  %v11349_v45 = vpop.permute.xlu0 %1716 }
 0x255   :  { %16169 = vst [vmem:[#allocation190_spill] sm:$0xff] %v11347_v42  ;;  %16170 = vst [vmem:[#allocation191_spill] sm:$0xff] %v11349_v45 }
 0x256   :  { %1962 = vrot.lane.b32.xlu1 %v592_v7, %s10143_s30  ;;  %1960 = vrot.lane.b32.xlu0 %v591_v8, %s10143_s30  ;;  %v598_v7 = vld [vmem:[#allocation2 + $0x18a] sm:$0xff]  ;;  %v597_v8 = vld [vmem:[#allocation2 + $0x182] sm:$0xff] }
 0x258   :  { %v11353_v44 = vpop.permute.xlu1 %1722  ;;  %v11355_v35 = vpop.permute.xlu0 %1720 }
 0x259   :  { %16171 = vst [vmem:[#allocation192_spill] sm:$0xff] %v11353_v44  ;;  %16172 = vst [vmem:[#allocation193_spill] sm:$0xff] %v11355_v35 }
 0x25a   :  { %1966 = vrot.lane.b32.xlu1 %v594_v59, %s10143_s30  ;;  %1964 = vrot.lane.b32.xlu0 %v593_v60, %s10143_s30  ;;  %v600_v59 = vld [vmem:[#allocation2 + $0x1d2] sm:$0xff]  ;;  %v599_v60 = vld [vmem:[#allocation2 + $0x1ca] sm:$0xff] }
 0x25c   :  { %v11359_v34 = vpop.permute.xlu1 %1726  ;;  %v11361_v42 = vpop.permute.xlu0 %1724 }
 0x25d   :  { %16173 = vst [vmem:[#allocation194_spill] sm:$0xff] %v11359_v34  ;;  %16174 = vst [vmem:[#allocation195_spill] sm:$0xff] %v11361_v42 }
 0x25e   :  { %1970 = vrot.lane.b32.xlu1 %v596_v15, %s10143_s30  ;;  %1968 = vrot.lane.b32.xlu0 %v595_v16, %s10143_s30  ;;  %v602_v15 = vld [vmem:[#allocation2 + $0x1ea] sm:$0xff]  ;;  %v601_v16 = vld [vmem:[#allocation2 + $0x1e2] sm:$0xff] }
 0x260   :  { %v11365_v45 = vpop.permute.xlu1 %1730  ;;  %v11367_v44 = vpop.permute.xlu0 %1728 }
 0x261   :  { %16175 = vst [vmem:[#allocation196_spill] sm:$0xff] %v11365_v45  ;;  %16176 = vst [vmem:[#allocation197_spill] sm:$0xff] %v11367_v44 }
 0x262   :  { %1974 = vrot.lane.b32.xlu1 %v598_v7, %s10143_s30  ;;  %1972 = vrot.lane.b32.xlu0 %v597_v8, %s10143_s30  ;;  %v604_v7 = vld [vmem:[#allocation2 + $0x202] sm:$0xff]  ;;  %v603_v8 = vld [vmem:[#allocation2 + $0x1fa] sm:$0xff] }
 0x264   :  { %v11371_v35 = vpop.permute.xlu1 %1734  ;;  %v11373_v34 = vpop.permute.xlu0 %1732 }
 0x265   :  { %16177 = vst [vmem:[#allocation198_spill] sm:$0xff] %v11371_v35  ;;  %16178 = vst [vmem:[#allocation199_spill] sm:$0xff] %v11373_v34 }
 0x266   :  { %1978 = vrot.lane.b32.xlu1 %v600_v59, %s10143_s30  ;;  %1976 = vrot.lane.b32.xlu0 %v599_v60, %s10143_s30  ;;  %v606_v59 = vld [vmem:[#allocation2 + $0x21a] sm:$0xff]  ;;  %v605_v60 = vld [vmem:[#allocation2 + $0x212] sm:$0xff] }
 0x268   :  { %v11377_v42 = vpop.permute.xlu1 %1738  ;;  %v11379_v45 = vpop.permute.xlu0 %1736 }
 0x269   :  { %16179 = vst [vmem:[#allocation200_spill] sm:$0xff] %v11377_v42  ;;  %16180 = vst [vmem:[#allocation201_spill] sm:$0xff] %v11379_v45 }
 0x26a   :  { %1982 = vrot.lane.b32.xlu1 %v602_v15, %s10143_s30  ;;  %1980 = vrot.lane.b32.xlu0 %v601_v16, %s10143_s30  ;;  %v608_v15 = vld [vmem:[#allocation2 + $0x232] sm:$0xff]  ;;  %v607_v16 = vld [vmem:[#allocation2 + $0x22a] sm:$0xff] }
 0x26c   :  { %v11383_v44 = vpop.permute.xlu1 %1742  ;;  %v11385_v35 = vpop.permute.xlu0 %1740 }
 0x26d   :  { %16181 = vst [vmem:[#allocation202_spill] sm:$0xff] %v11383_v44  ;;  %16182 = vst [vmem:[#allocation203_spill] sm:$0xff] %v11385_v35 }
 0x26e   :  { %1986 = vrot.lane.b32.xlu1 %v604_v7, %s10143_s30  ;;  %1984 = vrot.lane.b32.xlu0 %v603_v8, %s10143_s30  ;;  %v610_v7 = vld [vmem:[#allocation2 + $0x24a] sm:$0xff]  ;;  %v609_v8 = vld [vmem:[#allocation2 + $0x242] sm:$0xff] }
 0x270   :  { %v11389_v34 = vpop.permute.xlu1 %1746  ;;  %v11391_v42 = vpop.permute.xlu0 %1744 }
 0x271   :  { %16183 = vst [vmem:[#allocation204_spill] sm:$0xff] %v11389_v34  ;;  %16184 = vst [vmem:[#allocation205_spill] sm:$0xff] %v11391_v42 }
 0x272   :  { %1990 = vrot.lane.b32.xlu1 %v606_v59, %s10143_s30  ;;  %1988 = vrot.lane.b32.xlu0 %v605_v60, %s10143_s30  ;;  %v612_v59 = vld [vmem:[#allocation2 + $0x262] sm:$0xff]  ;;  %v611_v60 = vld [vmem:[#allocation2 + $0x25a] sm:$0xff] }
 0x274   :  { %v11395_v45 = vpop.permute.xlu1 %1750  ;;  %v11397_v44 = vpop.permute.xlu0 %1748 }
 0x275   :  { %16185 = vst [vmem:[#allocation206_spill] sm:$0xff] %v11395_v45  ;;  %16186 = vst [vmem:[#allocation207_spill] sm:$0xff] %v11397_v44 }
 0x276   :  { %1994 = vrot.lane.b32.xlu1 %v608_v15, %s10143_s30  ;;  %1992 = vrot.lane.b32.xlu0 %v607_v16, %s10143_s30  ;;  %v614_v15 = vld [vmem:[#allocation2 + $0x27a] sm:$0xff]  ;;  %v613_v16 = vld [vmem:[#allocation2 + $0x272] sm:$0xff] }
 0x278   :  { %v11401_v35 = vpop.permute.xlu1 %1754  ;;  %v11403_v34 = vpop.permute.xlu0 %1752 }
 0x279   :  { %16187 = vst [vmem:[#allocation208_spill] sm:$0xff] %v11401_v35  ;;  %16188 = vst [vmem:[#allocation209_spill] sm:$0xff] %v11403_v34 }
 0x27a   :  { %1998 = vrot.lane.b32.xlu1 %v610_v7, %s10143_s30  ;;  %1996 = vrot.lane.b32.xlu0 %v609_v8, %s10143_s30  ;;  %v616_v7 = vld [vmem:[#allocation2 + $0x292] sm:$0xff]  ;;  %v615_v8 = vld [vmem:[#allocation2 + $0x28a] sm:$0xff] }
 0x27c   :  { %v11407_v42 = vpop.permute.xlu1 %1758  ;;  %v11409_v45 = vpop.permute.xlu0 %1756 }
 0x27d   :  { %16189 = vst [vmem:[#allocation210_spill] sm:$0xff] %v11407_v42  ;;  %16190 = vst [vmem:[#allocation211_spill] sm:$0xff] %v11409_v45 }
 0x27e   :  { %2002 = vrot.lane.b32.xlu1 %v612_v59, %s10143_s30  ;;  %2000 = vrot.lane.b32.xlu0 %v611_v60, %s10143_s30  ;;  %v618_v59 = vld [vmem:[#allocation2 + $0x2aa] sm:$0xff]  ;;  %v617_v60 = vld [vmem:[#allocation2 + $0x2a2] sm:$0xff] }
 0x280   :  { %v11413_v44 = vpop.permute.xlu1 %1762  ;;  %v11415_v35 = vpop.permute.xlu0 %1760 }
 0x281   :  { %16191 = vst [vmem:[#allocation212_spill] sm:$0xff] %v11413_v44  ;;  %16192 = vst [vmem:[#allocation213_spill] sm:$0xff] %v11415_v35 }
 0x282   :  { %2006 = vrot.lane.b32.xlu1 %v614_v15, %s10143_s30  ;;  %2004 = vrot.lane.b32.xlu0 %v613_v16, %s10143_s30  ;;  %v620_v15 = vld [vmem:[#allocation2 + $0x2c2] sm:$0xff]  ;;  %v619_v16 = vld [vmem:[#allocation2 + $0x2ba] sm:$0xff] }
 0x284   :  { %v11419_v34 = vpop.permute.xlu1 %1766  ;;  %v11421_v42 = vpop.permute.xlu0 %1764 }
 0x285   :  { %16193 = vst [vmem:[#allocation214_spill] sm:$0xff] %v11419_v34  ;;  %16194 = vst [vmem:[#allocation215_spill] sm:$0xff] %v11421_v42 }
 0x286   :  { %2010 = vrot.lane.b32.xlu1 %v616_v7, %s10143_s30  ;;  %2008 = vrot.lane.b32.xlu0 %v615_v8, %s10143_s30  ;;  %v622_v7 = vld [vmem:[#allocation2 + $0x2da] sm:$0xff]  ;;  %v621_v8 = vld [vmem:[#allocation2 + $0x2d2] sm:$0xff] }
 0x288   :  { %v11425_v45 = vpop.permute.xlu1 %1770  ;;  %v11427_v44 = vpop.permute.xlu0 %1768 }
 0x289   :  { %16195 = vst [vmem:[#allocation216_spill] sm:$0xff] %v11425_v45  ;;  %16196 = vst [vmem:[#allocation217_spill] sm:$0xff] %v11427_v44 }
 0x28a   :  { %2014 = vrot.lane.b32.xlu1 %v618_v59, %s10143_s30  ;;  %2012 = vrot.lane.b32.xlu0 %v617_v60, %s10143_s30  ;;  %v624_v59 = vld [vmem:[#allocation2 + $0x2f2] sm:$0xff]  ;;  %v623_v60 = vld [vmem:[#allocation2 + $0x2ea] sm:$0xff] }
 0x28c   :  { %v11431_v35 = vpop.permute.xlu1 %1774  ;;  %v11433_v34 = vpop.permute.xlu0 %1772 }
 0x28d   :  { %16197 = vst [vmem:[#allocation218_spill] sm:$0xff] %v11431_v35  ;;  %16198 = vst [vmem:[#allocation219_spill] sm:$0xff] %v11433_v34 }
 0x28e   :  { %2018 = vrot.lane.b32.xlu1 %v620_v15, %s10143_s30  ;;  %2016 = vrot.lane.b32.xlu0 %v619_v16, %s10143_s30  ;;  %v626_v15 = vld [vmem:[#allocation2 + $0x30a] sm:$0xff]  ;;  %v625_v16 = vld [vmem:[#allocation2 + $0x302] sm:$0xff] }
 0x290   :  { %v11437_v42 = vpop.permute.xlu1 %1778  ;;  %v11439_v45 = vpop.permute.xlu0 %1776 }
 0x291   :  { %16199 = vst [vmem:[#allocation220_spill] sm:$0xff] %v11437_v42  ;;  %16200 = vst [vmem:[#allocation221_spill] sm:$0xff] %v11439_v45 }
 0x292   :  { %2022 = vrot.lane.b32.xlu1 %v622_v7, %s10143_s30  ;;  %2020 = vrot.lane.b32.xlu0 %v621_v8, %s10143_s30  ;;  %v628_v7 = vld [vmem:[#allocation2 + $0x322] sm:$0xff]  ;;  %v627_v8 = vld [vmem:[#allocation2 + $0x31a] sm:$0xff] }
 0x294   :  { %v11443_v44 = vpop.permute.xlu1 %1782  ;;  %v11445_v35 = vpop.permute.xlu0 %1780 }
 0x295   :  { %16201 = vst [vmem:[#allocation222_spill] sm:$0xff] %v11443_v44  ;;  %16202 = vst [vmem:[#allocation223_spill] sm:$0xff] %v11445_v35 }
 0x296   :  { %2026 = vrot.lane.b32.xlu1 %v624_v59, %s10143_s30  ;;  %2024 = vrot.lane.b32.xlu0 %v623_v60, %s10143_s30  ;;  %v630_v59 = vld [vmem:[#allocation2 + $0x33a] sm:$0xff]  ;;  %v629_v60 = vld [vmem:[#allocation2 + $0x332] sm:$0xff] }
 0x298   :  { %v11449_v34 = vpop.permute.xlu1 %1914  ;;  %v11451_v42 = vpop.permute.xlu0 %1912 }
 0x29a   :  { %2030 = vrot.lane.b32.xlu1 %v626_v15, %s10143_s30  ;;  %2028 = vrot.lane.b32.xlu0 %v625_v16, %s10143_s30  ;;  %v633_v15 = vld [vmem:[#allocation2 + $0x38] sm:$0xff]  ;;  %v632_v16 = vld [vmem:[#allocation2 + $0x30] sm:$0xff] }
 0x29c   :  { %v11455_v45 = vpop.permute.xlu1 %1918  ;;  %v11457_v44 = vpop.permute.xlu0 %1916 }
 0x29e   :  { %2034 = vrot.lane.b32.xlu1 %v628_v7, %s10143_s30  ;;  %2032 = vrot.lane.b32.xlu0 %v627_v8, %s10143_s30  ;;  %v635_v7 = vld [vmem:[#allocation2 + $0x50] sm:$0xff]  ;;  %v634_v8 = vld [vmem:[#allocation2 + $0x48] sm:$0xff] }
 0x2a0   :  { %v11461_v35 = vpop.permute.xlu1 %1922  ;;  %v11463_v19 = vpop.permute.xlu0 %1920 }
 0x2a1   :  { %16203 = vst [vmem:[#allocation224_spill] sm:$0xff] %v11461_v35 }
 0x2a2   :  { %2038 = vrot.lane.b32.xlu1 %v630_v59, %s10143_s30  ;;  %2036 = vrot.lane.b32.xlu0 %v629_v60, %s10143_s30  ;;  %v637_v59 = vld [vmem:[#allocation2 + $0x68] sm:$0xff]  ;;  %v636_v60 = vld [vmem:[#allocation2 + $0x60] sm:$0xff] }
 0x2a4   :  { %v11467_v40 = vpop.permute.xlu1 %1926  ;;  %v11469_v32 = vpop.permute.xlu0 %1924 }
 0x2a5   :  { %16204 = vst [vmem:[#allocation225_spill] sm:$0xff] %v11467_v40  ;;  %16205 = vst [vmem:[#allocation226_spill] sm:$0xff] %v11469_v32 }
 0x2a6   :  { %2170 = vrot.lane.b32.xlu1 %v633_v15, %s10144_s9  ;;  %2168 = vrot.lane.b32.xlu0 %v632_v16, %s10144_s9  ;;  %v639_v15 = vld [vmem:[#allocation2 + $0x80] sm:$0xff]  ;;  %v638_v16 = vld [vmem:[#allocation2 + $0x78] sm:$0xff] }
 0x2a8   :  { %v11473_v11 = vpop.permute.xlu1 %1930  ;;  %v11475_v63 = vpop.permute.xlu0 %1928 }
 0x2a9   :  { %16206 = vst [vmem:[#allocation227_spill] sm:$0xff] %v11473_v11  ;;  %16207 = vst [vmem:[#allocation228_spill] sm:$0xff] %v11475_v63 }
 0x2aa   :  { %2174 = vrot.lane.b32.xlu1 %v635_v7, %s10144_s9  ;;  %2172 = vrot.lane.b32.xlu0 %v634_v8, %s10144_s9  ;;  %v641_v7 = vld [vmem:[#allocation2 + $0x98] sm:$0xff]  ;;  %v640_v8 = vld [vmem:[#allocation2 + $0x90] sm:$0xff] }
 0x2ac   :  { %v11479_v40 = vpop.permute.xlu1 %1934  ;;  %v11481_v33 = vpop.permute.xlu0 %1932 }
 0x2ad   :  { %16208 = vst [vmem:[#allocation229_spill] sm:$0xff] %v11479_v40  ;;  %16209 = vst [vmem:[#allocation230_spill] sm:$0xff] %v11481_v33 }
 0x2ae   :  { %2178 = vrot.lane.b32.xlu1 %v637_v59, %s10144_s9  ;;  %2176 = vrot.lane.b32.xlu0 %v636_v60, %s10144_s9  ;;  %v643_v59 = vld [vmem:[#allocation2 + $0xb0] sm:$0xff]  ;;  %v642_v60 = vld [vmem:[#allocation2 + $0xa8] sm:$0xff] }
 0x2b0   :  { %v11485_v37 = vpop.permute.xlu1 %1938  ;;  %v11487_v11 = vpop.permute.xlu0 %1936 }
 0x2b1   :  { %16210 = vst [vmem:[#allocation231_spill] sm:$0xff] %v11485_v37  ;;  %16211 = vst [vmem:[#allocation232_spill] sm:$0xff] %v11487_v11 }
 0x2b2   :  { %2182 = vrot.lane.b32.xlu1 %v639_v15, %s10144_s9  ;;  %2180 = vrot.lane.b32.xlu0 %v638_v16, %s10144_s9  ;;  %v645_v15 = vld [vmem:[#allocation2 + $0xc8] sm:$0xff]  ;;  %v644_v16 = vld [vmem:[#allocation2 + $0xc0] sm:$0xff] }
 0x2b4   :  { %v11491_v63 = vpop.permute.xlu1 %1942  ;;  %v11493_v40 = vpop.permute.xlu0 %1940 }
 0x2b5   :  { %16212 = vst [vmem:[#allocation233_spill] sm:$0xff] %v11491_v63  ;;  %16213 = vst [vmem:[#allocation234_spill] sm:$0xff] %v11493_v40 }
 0x2b6   :  { %2186 = vrot.lane.b32.xlu1 %v641_v7, %s10144_s9  ;;  %2184 = vrot.lane.b32.xlu0 %v640_v8, %s10144_s9  ;;  %v647_v7 = vld [vmem:[#allocation2 + $0xe0] sm:$0xff]  ;;  %v646_v8 = vld [vmem:[#allocation2 + $0xd8] sm:$0xff] }
 0x2b8   :  { %v11497_v33 = vpop.permute.xlu1 %1946  ;;  %v11499_v37 = vpop.permute.xlu0 %1944 }
 0x2b9   :  { %16214 = vst [vmem:[#allocation235_spill] sm:$0xff] %v11497_v33  ;;  %16215 = vst [vmem:[#allocation236_spill] sm:$0xff] %v11499_v37 }
 0x2ba   :  { %2190 = vrot.lane.b32.xlu1 %v643_v59, %s10144_s9  ;;  %2188 = vrot.lane.b32.xlu0 %v642_v60, %s10144_s9  ;;  %v649_v59 = vld [vmem:[#allocation2 + $0xf8] sm:$0xff]  ;;  %v648_v60 = vld [vmem:[#allocation2 + $0xf0] sm:$0xff] }
 0x2bc   :  { %v11503_v11 = vpop.permute.xlu1 %1950  ;;  %v11505_v63 = vpop.permute.xlu0 %1948 }
 0x2bd   :  { %16216 = vst [vmem:[#allocation237_spill] sm:$0xff] %v11503_v11  ;;  %16217 = vst [vmem:[#allocation238_spill] sm:$0xff] %v11505_v63 }
 0x2be   :  { %2194 = vrot.lane.b32.xlu1 %v645_v15, %s10144_s9  ;;  %2192 = vrot.lane.b32.xlu0 %v644_v16, %s10144_s9  ;;  %v651_v15 = vld [vmem:[#allocation2 + $0x110] sm:$0xff]  ;;  %v650_v16 = vld [vmem:[#allocation2 + $0x108] sm:$0xff] }
 0x2c0   :  { %v11509_v40 = vpop.permute.xlu1 %1954  ;;  %v11511_v33 = vpop.permute.xlu0 %1952 }
 0x2c1   :  { %16218 = vst [vmem:[#allocation239_spill] sm:$0xff] %v11509_v40  ;;  %16219 = vst [vmem:[#allocation240_spill] sm:$0xff] %v11511_v33 }
 0x2c2   :  { %2198 = vrot.lane.b32.xlu1 %v647_v7, %s10144_s9  ;;  %2196 = vrot.lane.b32.xlu0 %v646_v8, %s10144_s9  ;;  %v653_v7 = vld [vmem:[#allocation2 + $0x128] sm:$0xff]  ;;  %v652_v8 = vld [vmem:[#allocation2 + $0x120] sm:$0xff] }
 0x2c4   :  { %v11515_v37 = vpop.permute.xlu1 %1958  ;;  %v11517_v11 = vpop.permute.xlu0 %1956 }
 0x2c5   :  { %16220 = vst [vmem:[#allocation241_spill] sm:$0xff] %v11515_v37  ;;  %16221 = vst [vmem:[#allocation242_spill] sm:$0xff] %v11517_v11 }
 0x2c6   :  { %2202 = vrot.lane.b32.xlu1 %v649_v59, %s10144_s9  ;;  %2200 = vrot.lane.b32.xlu0 %v648_v60, %s10144_s9  ;;  %v655_v59 = vld [vmem:[#allocation2 + $0x140] sm:$0xff]  ;;  %v654_v60 = vld [vmem:[#allocation2 + $0x138] sm:$0xff] }
 0x2c8   :  { %v11521_v63 = vpop.permute.xlu1 %1962  ;;  %v11523_v40 = vpop.permute.xlu0 %1960 }
 0x2c9   :  { %16222 = vst [vmem:[#allocation243_spill] sm:$0xff] %v11521_v63  ;;  %16223 = vst [vmem:[#allocation244_spill] sm:$0xff] %v11523_v40 }
 0x2ca   :  { %2206 = vrot.lane.b32.xlu1 %v651_v15, %s10144_s9  ;;  %2204 = vrot.lane.b32.xlu0 %v650_v16, %s10144_s9  ;;  %v657_v15 = vld [vmem:[#allocation2 + $0x158] sm:$0xff]  ;;  %v656_v16 = vld [vmem:[#allocation2 + $0x150] sm:$0xff] }
 0x2cc   :  { %v11527_v33 = vpop.permute.xlu1 %1966  ;;  %v11529_v37 = vpop.permute.xlu0 %1964 }
 0x2cd   :  { %16224 = vst [vmem:[#allocation245_spill] sm:$0xff] %v11527_v33  ;;  %16225 = vst [vmem:[#allocation246_spill] sm:$0xff] %v11529_v37 }
 0x2ce   :  { %2210 = vrot.lane.b32.xlu1 %v653_v7, %s10144_s9  ;;  %2208 = vrot.lane.b32.xlu0 %v652_v8, %s10144_s9  ;;  %v659_v7 = vld [vmem:[#allocation2 + $0x170] sm:$0xff]  ;;  %v658_v8 = vld [vmem:[#allocation2 + $0x168] sm:$0xff] }
 0x2d0   :  { %v11533_v11 = vpop.permute.xlu1 %1970  ;;  %v11535_v63 = vpop.permute.xlu0 %1968 }
 0x2d1   :  { %16226 = vst [vmem:[#allocation247_spill] sm:$0xff] %v11533_v11  ;;  %16227 = vst [vmem:[#allocation248_spill] sm:$0xff] %v11535_v63 }
 0x2d2   :  { %2214 = vrot.lane.b32.xlu1 %v655_v59, %s10144_s9  ;;  %2212 = vrot.lane.b32.xlu0 %v654_v60, %s10144_s9  ;;  %v661_v59 = vld [vmem:[#allocation2 + $0x188] sm:$0xff]  ;;  %v660_v60 = vld [vmem:[#allocation2 + $0x180] sm:$0xff] }
 0x2d4   :  { %v11539_v40 = vpop.permute.xlu1 %1974  ;;  %v11541_v33 = vpop.permute.xlu0 %1972 }
 0x2d5   :  { %16228 = vst [vmem:[#allocation249_spill] sm:$0xff] %v11539_v40  ;;  %16229 = vst [vmem:[#allocation250_spill] sm:$0xff] %v11541_v33 }
 0x2d6   :  { %2218 = vrot.lane.b32.xlu1 %v657_v15, %s10144_s9  ;;  %2216 = vrot.lane.b32.xlu0 %v656_v16, %s10144_s9  ;;  %v663_v15 = vld [vmem:[#allocation2 + $0x1a0] sm:$0xff]  ;;  %v662_v16 = vld [vmem:[#allocation2 + $0x198] sm:$0xff] }
 0x2d8   :  { %v11545_v37 = vpop.permute.xlu1 %1978  ;;  %v11547_v11 = vpop.permute.xlu0 %1976 }
 0x2d9   :  { %16230 = vst [vmem:[#allocation251_spill] sm:$0xff] %v11545_v37  ;;  %16231 = vst [vmem:[#allocation252_spill] sm:$0xff] %v11547_v11 }
 0x2da   :  { %2222 = vrot.lane.b32.xlu1 %v659_v7, %s10144_s9  ;;  %2220 = vrot.lane.b32.xlu0 %v658_v8, %s10144_s9  ;;  %v665_v7 = vld [vmem:[#allocation2 + $0x1e8] sm:$0xff]  ;;  %v664_v8 = vld [vmem:[#allocation2 + $0x1e0] sm:$0xff] }
 0x2dc   :  { %v11551_v63 = vpop.permute.xlu1 %1982  ;;  %v11553_v40 = vpop.permute.xlu0 %1980 }
 0x2dd   :  { %16232 = vst [vmem:[#allocation253_spill] sm:$0xff] %v11551_v63  ;;  %16233 = vst [vmem:[#allocation254_spill] sm:$0xff] %v11553_v40 }
 0x2de   :  { %2226 = vrot.lane.b32.xlu1 %v661_v59, %s10144_s9  ;;  %2224 = vrot.lane.b32.xlu0 %v660_v60, %s10144_s9  ;;  %v667_v59 = vld [vmem:[#allocation2 + $0x200] sm:$0xff]  ;;  %v666_v60 = vld [vmem:[#allocation2 + $0x1f8] sm:$0xff] }
 0x2e0   :  { %v11557_v33 = vpop.permute.xlu1 %1986  ;;  %v11559_v37 = vpop.permute.xlu0 %1984 }
 0x2e1   :  { %16234 = vst [vmem:[#allocation255_spill] sm:$0xff] %v11557_v33  ;;  %16235 = vst [vmem:[#allocation256_spill] sm:$0xff] %v11559_v37 }
 0x2e2   :  { %2230 = vrot.lane.b32.xlu1 %v663_v15, %s10144_s9  ;;  %2228 = vrot.lane.b32.xlu0 %v662_v16, %s10144_s9  ;;  %v669_v15 = vld [vmem:[#allocation2 + $0x218] sm:$0xff]  ;;  %v668_v16 = vld [vmem:[#allocation2 + $0x210] sm:$0xff] }
 0x2e4   :  { %v11563_v11 = vpop.permute.xlu1 %1990  ;;  %v11565_v63 = vpop.permute.xlu0 %1988 }
 0x2e5   :  { %16236 = vst [vmem:[#allocation257_spill] sm:$0xff] %v11563_v11  ;;  %16237 = vst [vmem:[#allocation258_spill] sm:$0xff] %v11565_v63 }
 0x2e6   :  { %2234 = vrot.lane.b32.xlu1 %v665_v7, %s10144_s9  ;;  %2232 = vrot.lane.b32.xlu0 %v664_v8, %s10144_s9  ;;  %v671_v7 = vld [vmem:[#allocation2 + $0x230] sm:$0xff]  ;;  %v670_v8 = vld [vmem:[#allocation2 + $0x228] sm:$0xff] }
 0x2e8   :  { %v11569_v40 = vpop.permute.xlu1 %1994  ;;  %v11571_v33 = vpop.permute.xlu0 %1992 }
 0x2e9   :  { %16238 = vst [vmem:[#allocation259_spill] sm:$0xff] %v11569_v40  ;;  %16239 = vst [vmem:[#allocation260_spill] sm:$0xff] %v11571_v33 }
 0x2ea   :  { %2238 = vrot.lane.b32.xlu1 %v667_v59, %s10144_s9  ;;  %2236 = vrot.lane.b32.xlu0 %v666_v60, %s10144_s9  ;;  %v673_v59 = vld [vmem:[#allocation2 + $0x248] sm:$0xff]  ;;  %v672_v60 = vld [vmem:[#allocation2 + $0x240] sm:$0xff] }
 0x2ec   :  { %v11575_v37 = vpop.permute.xlu1 %1998  ;;  %v11577_v11 = vpop.permute.xlu0 %1996 }
 0x2ed   :  { %16240 = vst [vmem:[#allocation261_spill] sm:$0xff] %v11575_v37  ;;  %16241 = vst [vmem:[#allocation262_spill] sm:$0xff] %v11577_v11 }
 0x2ee   :  { %2242 = vrot.lane.b32.xlu1 %v669_v15, %s10144_s9  ;;  %2240 = vrot.lane.b32.xlu0 %v668_v16, %s10144_s9  ;;  %v675_v15 = vld [vmem:[#allocation2 + $0x260] sm:$0xff]  ;;  %v674_v16 = vld [vmem:[#allocation2 + $0x258] sm:$0xff] }
 0x2f0   :  { %v11581_v63 = vpop.permute.xlu1 %2002  ;;  %v11583_v40 = vpop.permute.xlu0 %2000 }
 0x2f1   :  { %16242 = vst [vmem:[#allocation263_spill] sm:$0xff] %v11581_v63  ;;  %16243 = vst [vmem:[#allocation264_spill] sm:$0xff] %v11583_v40 }
 0x2f2   :  { %2246 = vrot.lane.b32.xlu1 %v671_v7, %s10144_s9  ;;  %2244 = vrot.lane.b32.xlu0 %v670_v8, %s10144_s9  ;;  %v677_v7 = vld [vmem:[#allocation2 + $0x278] sm:$0xff]  ;;  %v676_v8 = vld [vmem:[#allocation2 + $0x270] sm:$0xff] }
 0x2f4   :  { %v11587_v33 = vpop.permute.xlu1 %2006  ;;  %v11589_v37 = vpop.permute.xlu0 %2004 }
 0x2f5   :  { %16244 = vst [vmem:[#allocation265_spill] sm:$0xff] %v11587_v33  ;;  %16245 = vst [vmem:[#allocation266_spill] sm:$0xff] %v11589_v37 }
 0x2f6   :  { %2250 = vrot.lane.b32.xlu1 %v673_v59, %s10144_s9  ;;  %2248 = vrot.lane.b32.xlu0 %v672_v60, %s10144_s9  ;;  %v679_v59 = vld [vmem:[#allocation2 + $0x290] sm:$0xff]  ;;  %v678_v60 = vld [vmem:[#allocation2 + $0x288] sm:$0xff] }
 0x2f8   :  { %v11593_v11 = vpop.permute.xlu1 %2010  ;;  %v11595_v63 = vpop.permute.xlu0 %2008 }
 0x2f9   :  { %16246 = vst [vmem:[#allocation267_spill] sm:$0xff] %v11593_v11  ;;  %16247 = vst [vmem:[#allocation268_spill] sm:$0xff] %v11595_v63 }
 0x2fa   :  { %2254 = vrot.lane.b32.xlu1 %v675_v15, %s10144_s9  ;;  %2252 = vrot.lane.b32.xlu0 %v674_v16, %s10144_s9  ;;  %v681_v15 = vld [vmem:[#allocation2 + $0x2a8] sm:$0xff]  ;;  %v680_v16 = vld [vmem:[#allocation2 + $0x2a0] sm:$0xff] }
 0x2fc   :  { %v11599_v40 = vpop.permute.xlu1 %2014  ;;  %v11601_v33 = vpop.permute.xlu0 %2012 }
 0x2fd   :  { %16248 = vst [vmem:[#allocation269_spill] sm:$0xff] %v11599_v40  ;;  %16249 = vst [vmem:[#allocation270_spill] sm:$0xff] %v11601_v33 }
 0x2fe   :  { %2258 = vrot.lane.b32.xlu1 %v677_v7, %s10144_s9  ;;  %2256 = vrot.lane.b32.xlu0 %v676_v8, %s10144_s9  ;;  %v683_v7 = vld [vmem:[#allocation2 + $0x2c0] sm:$0xff]  ;;  %v682_v8 = vld [vmem:[#allocation2 + $0x2b8] sm:$0xff] }
 0x300   :  { %v11605_v37 = vpop.permute.xlu1 %2018  ;;  %v11607_v11 = vpop.permute.xlu0 %2016 }
 0x301   :  { %16250 = vst [vmem:[#allocation271_spill] sm:$0xff] %v11605_v37  ;;  %16251 = vst [vmem:[#allocation272_spill] sm:$0xff] %v11607_v11 }
 0x302   :  { %2262 = vrot.lane.b32.xlu1 %v679_v59, %s10144_s9  ;;  %2260 = vrot.lane.b32.xlu0 %v678_v60, %s10144_s9  ;;  %v685_v59 = vld [vmem:[#allocation2 + $0x2d8] sm:$0xff]  ;;  %v684_v60 = vld [vmem:[#allocation2 + $0x2d0] sm:$0xff] }
 0x304   :  { %v11611_v63 = vpop.permute.xlu1 %2022  ;;  %v11613_v40 = vpop.permute.xlu0 %2020 }
 0x305   :  { %16252 = vst [vmem:[#allocation273_spill] sm:$0xff] %v11611_v63  ;;  %16253 = vst [vmem:[#allocation274_spill] sm:$0xff] %v11613_v40 }
 0x306   :  { %2266 = vrot.lane.b32.xlu1 %v681_v15, %s10144_s9  ;;  %2264 = vrot.lane.b32.xlu0 %v680_v16, %s10144_s9  ;;  %v687_v15 = vld [vmem:[#allocation2 + $0x2f0] sm:$0xff]  ;;  %v686_v16 = vld [vmem:[#allocation2 + $0x2e8] sm:$0xff] }
 0x308   :  { %v11617_v33 = vpop.permute.xlu1 %2026  ;;  %v11619_v37 = vpop.permute.xlu0 %2024 }
 0x309   :  { %16254 = vst [vmem:[#allocation275_spill] sm:$0xff] %v11617_v33  ;;  %16255 = vst [vmem:[#allocation276_spill] sm:$0xff] %v11619_v37 }
 0x30a   :  { %2270 = vrot.lane.b32.xlu1 %v683_v7, %s10144_s9  ;;  %2268 = vrot.lane.b32.xlu0 %v682_v8, %s10144_s9  ;;  %v689_v7 = vld [vmem:[#allocation2 + $0x308] sm:$0xff]  ;;  %v688_v8 = vld [vmem:[#allocation2 + $0x300] sm:$0xff] }
 0x30c   :  { %v11623_v11 = vpop.permute.xlu1 %2030  ;;  %v11625_v63 = vpop.permute.xlu0 %2028 }
 0x30d   :  { %16256 = vst [vmem:[#allocation277_spill] sm:$0xff] %v11623_v11  ;;  %16257 = vst [vmem:[#allocation278_spill] sm:$0xff] %v11625_v63 }
 0x30e   :  { %2274 = vrot.lane.b32.xlu1 %v685_v59, %s10144_s9  ;;  %2272 = vrot.lane.b32.xlu0 %v684_v60, %s10144_s9  ;;  %v691_v59 = vld [vmem:[#allocation2 + $0x320] sm:$0xff]  ;;  %v690_v60 = vld [vmem:[#allocation2 + $0x318] sm:$0xff] }
 0x310   :  { %v11629_v40 = vpop.permute.xlu1 %2034  ;;  %v11631_v33 = vpop.permute.xlu0 %2032 }
 0x311   :  { %16258 = vst [vmem:[#allocation279_spill] sm:$0xff] %v11629_v40  ;;  %16259 = vst [vmem:[#allocation280_spill] sm:$0xff] %v11631_v33 }
 0x312   :  { %2278 = vrot.lane.b32.xlu1 %v687_v15, %s10144_s9  ;;  %2276 = vrot.lane.b32.xlu0 %v686_v16, %s10144_s9  ;;  %v693_v15 = vld [vmem:[#allocation2 + $0x338] sm:$0xff]  ;;  %v692_v16 = vld [vmem:[#allocation2 + $0x330] sm:$0xff] }
 0x314   :  { %v11635_v37 = vpop.permute.xlu1 %2038  ;;  %v11637_v11 = vpop.permute.xlu0 %2036 }
 0x315   :  { %16260 = vst [vmem:[#allocation281_spill] sm:$0xff] %v11635_v37  ;;  %16261 = vst [vmem:[#allocation282_spill] sm:$0xff] %v11637_v11 }
 0x316   :  { %2282 = vrot.lane.b32.xlu1 %v689_v7, %s10144_s9  ;;  %2280 = vrot.lane.b32.xlu0 %v688_v8, %s10144_s9  ;;  %v695_v7 = vld [vmem:[#allocation2 + $0x350] sm:$0xff]  ;;  %v694_v8 = vld [vmem:[#allocation2 + $0x348] sm:$0xff] }
 0x318   :  { %v11641_v63 = vpop.permute.xlu1 %2170  ;;  %v11643_v40 = vpop.permute.xlu0 %2168 }
 0x31a   :  { %2286 = vrot.lane.b32.xlu1 %v691_v59, %s10144_s9  ;;  %2284 = vrot.lane.b32.xlu0 %v690_v60, %s10144_s9  ;;  %v697_v59 = vld [vmem:[#allocation2 + $0x39] sm:$0xff]  ;;  %v696_v60 = vld [vmem:[#allocation2 + $0x31] sm:$0xff] }
 0x31c   :  { %v11647_v33 = vpop.permute.xlu1 %2174  ;;  %v11649_v37 = vpop.permute.xlu0 %2172 }
 0x31e   :  { %2290 = vrot.lane.b32.xlu1 %v693_v15, %s10144_s9  ;;  %2288 = vrot.lane.b32.xlu0 %v692_v16, %s10144_s9  ;;  %v699_v15 = vld [vmem:[#allocation2 + $0x51] sm:$0xff]  ;;  %v698_v16 = vld [vmem:[#allocation2 + $0x49] sm:$0xff] }
 0x320   :  { %v11653_v11 = vpop.permute.xlu1 %2178  ;;  %v11655_v47 = vpop.permute.xlu0 %2176 }
 0x321   :  { %16262 = vst [vmem:[#allocation283_spill] sm:$0xff] %v11653_v11 }
 0x322   :  { %2294 = vrot.lane.b32.xlu1 %v695_v7, %s10144_s9  ;;  %2292 = vrot.lane.b32.xlu0 %v694_v8, %s10144_s9  ;;  %v701_v7 = vld [vmem:[#allocation2 + $0x69] sm:$0xff]  ;;  %v700_v8 = vld [vmem:[#allocation2 + $0x61] sm:$0xff] }
 0x324   :  { %v11659_v39 = vpop.permute.xlu1 %2182  ;;  %v11661_v31 = vpop.permute.xlu0 %2180 }
 0x325   :  { %16263 = vst [vmem:[#allocation284_spill] sm:$0xff] %v11659_v39  ;;  %16264 = vst [vmem:[#allocation285_spill] sm:$0xff] %v11661_v31 }
 0x326   :  { %2426 = vrot.lane.b32.xlu1 %v697_v59, %s10145_s10  ;;  %2424 = vrot.lane.b32.xlu0 %v696_v60, %s10145_s10  ;;  %v703_v59 = vld [vmem:[#allocation2 + $0x81] sm:$0xff]  ;;  %v702_v60 = vld [vmem:[#allocation2 + $0x79] sm:$0xff] }
 0x328   :  { %v11665_v11 = vpop.permute.xlu1 %2186  ;;  %v11667_v0 = vpop.permute.xlu0 %2184 }
 0x329   :  { %16265 = vst [vmem:[#allocation286_spill] sm:$0xff] %v11665_v11  ;;  %16266 = vst [vmem:[#allocation287_spill] sm:$0xff] %v11667_v0 }
 0x32a   :  { %2430 = vrot.lane.b32.xlu1 %v699_v15, %s10145_s10  ;;  %2428 = vrot.lane.b32.xlu0 %v698_v16, %s10145_s10  ;;  %v705_v15 = vld [vmem:[#allocation2 + $0x99] sm:$0xff]  ;;  %v704_v16 = vld [vmem:[#allocation2 + $0x91] sm:$0xff] }
 0x32c   :  { %v11671_v39 = vpop.permute.xlu1 %2190  ;;  %v11673_v31 = vpop.permute.xlu0 %2188 }
 0x32d   :  { %16267 = vst [vmem:[#allocation288_spill] sm:$0xff] %v11671_v39  ;;  %16268 = vst [vmem:[#allocation289_spill] sm:$0xff] %v11673_v31 }
 0x32e   :  { %2434 = vrot.lane.b32.xlu1 %v701_v7, %s10145_s10  ;;  %2432 = vrot.lane.b32.xlu0 %v700_v8, %s10145_s10  ;;  %v707_v7 = vld [vmem:[#allocation2 + $0xb1] sm:$0xff]  ;;  %v706_v8 = vld [vmem:[#allocation2 + $0xa9] sm:$0xff] }
 0x330   :  { %v11677_v28 = vpop.permute.xlu1 %2194  ;;  %v11679_v11 = vpop.permute.xlu0 %2192 }
 0x331   :  { %16269 = vst [vmem:[#allocation290_spill] sm:$0xff] %v11677_v28  ;;  %16270 = vst [vmem:[#allocation291_spill] sm:$0xff] %v11679_v11 }
 0x332   :  { %2438 = vrot.lane.b32.xlu1 %v703_v59, %s10145_s10  ;;  %2436 = vrot.lane.b32.xlu0 %v702_v60, %s10145_s10  ;;  %v709_v59 = vld [vmem:[#allocation2 + $0xc9] sm:$0xff]  ;;  %v708_v60 = vld [vmem:[#allocation2 + $0xc1] sm:$0xff] }
 0x334   :  { %v11683_v0 = vpop.permute.xlu1 %2198  ;;  %v11685_v39 = vpop.permute.xlu0 %2196 }
 0x335   :  { %16271 = vst [vmem:[#allocation292_spill] sm:$0xff] %v11683_v0  ;;  %16272 = vst [vmem:[#allocation293_spill] sm:$0xff] %v11685_v39 }
 0x336   :  { %2442 = vrot.lane.b32.xlu1 %v705_v15, %s10145_s10  ;;  %2440 = vrot.lane.b32.xlu0 %v704_v16, %s10145_s10  ;;  %v711_v15 = vld [vmem:[#allocation2 + $0xe1] sm:$0xff]  ;;  %v710_v16 = vld [vmem:[#allocation2 + $0xd9] sm:$0xff] }
 0x338   :  { %v11689_v31 = vpop.permute.xlu1 %2202  ;;  %v11691_v28 = vpop.permute.xlu0 %2200 }
 0x339   :  { %16273 = vst [vmem:[#allocation294_spill] sm:$0xff] %v11689_v31  ;;  %16274 = vst [vmem:[#allocation295_spill] sm:$0xff] %v11691_v28 }
 0x33a   :  { %2446 = vrot.lane.b32.xlu1 %v707_v7, %s10145_s10  ;;  %2444 = vrot.lane.b32.xlu0 %v706_v8, %s10145_s10  ;;  %v713_v7 = vld [vmem:[#allocation2 + $0xf9] sm:$0xff]  ;;  %v712_v8 = vld [vmem:[#allocation2 + $0xf1] sm:$0xff] }
 0x33c   :  { %v11695_v11 = vpop.permute.xlu1 %2206  ;;  %v11697_v0 = vpop.permute.xlu0 %2204 }
 0x33d   :  { %16275 = vst [vmem:[#allocation296_spill] sm:$0xff] %v11695_v11  ;;  %16276 = vst [vmem:[#allocation297_spill] sm:$0xff] %v11697_v0 }
 0x33e   :  { %2450 = vrot.lane.b32.xlu1 %v709_v59, %s10145_s10  ;;  %2448 = vrot.lane.b32.xlu0 %v708_v60, %s10145_s10  ;;  %v715_v59 = vld [vmem:[#allocation2 + $0x111] sm:$0xff]  ;;  %v714_v60 = vld [vmem:[#allocation2 + $0x109] sm:$0xff] }
 0x340   :  { %v11701_v39 = vpop.permute.xlu1 %2210  ;;  %v11703_v31 = vpop.permute.xlu0 %2208 }
 0x341   :  { %16277 = vst [vmem:[#allocation298_spill] sm:$0xff] %v11701_v39  ;;  %16278 = vst [vmem:[#allocation299_spill] sm:$0xff] %v11703_v31 }
 0x342   :  { %2454 = vrot.lane.b32.xlu1 %v711_v15, %s10145_s10  ;;  %2452 = vrot.lane.b32.xlu0 %v710_v16, %s10145_s10  ;;  %v717_v15 = vld [vmem:[#allocation2 + $0x129] sm:$0xff]  ;;  %v716_v16 = vld [vmem:[#allocation2 + $0x121] sm:$0xff] }
 0x344   :  { %v11707_v28 = vpop.permute.xlu1 %2214  ;;  %v11709_v11 = vpop.permute.xlu0 %2212 }
 0x345   :  { %16279 = vst [vmem:[#allocation300_spill] sm:$0xff] %v11707_v28  ;;  %16280 = vst [vmem:[#allocation301_spill] sm:$0xff] %v11709_v11 }
 0x346   :  { %2458 = vrot.lane.b32.xlu1 %v713_v7, %s10145_s10  ;;  %2456 = vrot.lane.b32.xlu0 %v712_v8, %s10145_s10  ;;  %v719_v7 = vld [vmem:[#allocation2 + $0x141] sm:$0xff]  ;;  %v718_v8 = vld [vmem:[#allocation2 + $0x139] sm:$0xff] }
 0x348   :  { %v11713_v0 = vpop.permute.xlu1 %2218  ;;  %v11715_v39 = vpop.permute.xlu0 %2216 }
 0x349   :  { %16281 = vst [vmem:[#allocation302_spill] sm:$0xff] %v11713_v0  ;;  %16282 = vst [vmem:[#allocation303_spill] sm:$0xff] %v11715_v39  ;;  %v722_v39 = vld [vmem:[#allocation2 + $0x169] sm:$0xff] }
 0x34a   :  { %2462 = vrot.lane.b32.xlu1 %v715_v59, %s10145_s10  ;;  %2460 = vrot.lane.b32.xlu0 %v714_v60, %s10145_s10  ;;  %v3391_v59 = vld [vmem:[%s15866_s2] sm:$0xff]  ;;  %v3392_v60 = vld [vmem:[%s15866_s2 + $0x8] sm:$0xff] }
 0x34c   :  { %v11719_v31 = vpop.permute.xlu1 %2222  ;;  %v11721_v28 = vpop.permute.xlu0 %2220 }
 0x34d   :  { %16283 = vst [vmem:[#allocation304_spill] sm:$0xff] %v11719_v31  ;;  %16284 = vst [vmem:[#allocation305_spill] sm:$0xff] %v11721_v28  ;;  %v8591_v31 = vpack.c.bf16 %v3392_v60, %v3391_v59 }
 0x34e   :  { %2466 = vrot.lane.b32.xlu1 %v717_v15, %s10145_s10  ;;  %2464 = vrot.lane.b32.xlu0 %v716_v16, %s10145_s10  ;;  %v721_v15 = vld [vmem:[#allocation2 + $0x159] sm:$0xff]  ;;  %v720_v16 = vld [vmem:[#allocation2 + $0x151] sm:$0xff] }
 0x34f   :  { %8592 = vmatprep.subr.bf16.mxu0 %v8591_v31 }
 0x350   :  { %v11725_v11 = vpop.permute.xlu1 %2226  ;;  %v11727_v0 = vpop.permute.xlu0 %2224  ;;  %8594 = vmatpush3.bf16.msra.mxu0 %v8591_v31  ;;  %v727_v31 = vld [vmem:[#allocation2 + $0x1a1] sm:$0xff] }
 0x351   :  { %16285 = vst [vmem:[#allocation306_spill] sm:$0xff] %v11725_v11  ;;  %16286 = vst [vmem:[#allocation307_spill] sm:$0xff] %v11727_v0  ;;  %v3393_v0 = vld [vmem:[%s15866_s2 + $0x10] sm:$0xff] }
 0x352   :  { %2470 = vrot.lane.b32.xlu1 %v719_v7, %s10145_s10  ;;  %2468 = vrot.lane.b32.xlu0 %v718_v8, %s10145_s10  ;;  %v3394_v7 = vld [vmem:[%s15866_s2 + $0x18] sm:$0xff] }
 0x353   :  { %v723_v8 = vld [vmem:[#allocation2 + $0x171] sm:$0xff]  ;;  %v8595_v59 = vpack.c.bf16 %v3394_v7, %v3393_v0 }
 0x354   :  { %v11737_v28 = vpop.permute.xlu1 %2230  ;;  %v11739_v11 = vpop.permute.xlu0 %2228 }
 0x355   :  { %16287 = vst [vmem:[#allocation308_spill] sm:$0xff] %v11737_v28  ;;  %16288 = vst [vmem:[#allocation309_spill] sm:$0xff] %v11739_v11  ;;  %8596 = vmatprep.subr.bf16.mxu0 %v8595_v59  ;;  %v724_v11 = vld [vmem:[#allocation2 + $0x181] sm:$0xff] }
 0x356   :  { %2474 = vrot.lane.b32.xlu1 %v721_v15, %s10145_s10  ;;  %2472 = vrot.lane.b32.xlu0 %v720_v16, %s10145_s10  ;;  %v725_v15 = vld [vmem:[#allocation2 + $0x189] sm:$0xff]  ;;  %v3395_v16 = vld [vmem:[%s15866_s2 + $0x20] sm:$0xf]  ;;  %s10146_s2 = smov 32  }
 0x357   :  { %8598 = vmatpush3.bf16.msra.mxu0 %v8595_v59  ;;  %v760_v59 = vld [vmem:[#allocation2 + $0x32] sm:$0xff] }
 0x358   :  { %v11749_v60 = vpop.permute.xlu1 %2234  ;;  %v11751_v28 = vpop.permute.xlu0 %2232  ;;  %8493 = vmatprep.subr.msk.mxu0 %vm3589_vm3, %v3395_v16 }
 0x359   :  { %16289 = vst [vmem:[#allocation310_spill] sm:$0xff] %v11749_v60  ;;  %16290 = vst [vmem:[#allocation311_spill] sm:$0xff] %v11751_v28 }
 0x35a   :  { %2478 = vrot.lane.b32.xlu1 %v723_v8, %s10145_s10  ;;  %2476 = vrot.lane.b32.xlu0 %v722_v39, %s10145_s10  ;;  %v726_v39 = vld [vmem:[#allocation2 + $0x199] sm:$0xff] }
 0x35b   :  { %8494 = vmatpush3.msk.msra.mxu0 %vm3589_vm3, %v3395_v16 }
 0x35c   :  { %v11758_v32 = vpop.permute.xlu1 %2238  ;;  %v11760_v0 = vpop.permute.xlu0 %2236 }
 0x35d   :  { %16291 = vst [vmem:[#allocation312_spill] sm:$0xff] %v11758_v32  ;;  %16292 = vst [vmem:[#allocation313_spill] sm:$0xff] %v11760_v0  ;;  %v728_v0 = vld [vmem:[#allocation2 + $0x1e1] sm:$0xff] }
 0x35e   :  { %2482 = vrot.lane.b32.xlu1 %v725_v15, %s10145_s10  ;;  %2480 = vrot.lane.b32.xlu0 %v724_v11, %s10145_s10  ;;  %v762_v11 = vld [vmem:[#allocation2 + $0x4a] sm:$0xff]  ;;  %v761_v15 = vld [vmem:[#allocation2 + $0x3a] sm:$0xff] }
 0x360   :  { %v11766_v7 = vpop.permute.xlu1 %2242  ;;  %v11768_v8 = vpop.permute.xlu0 %2240 }
 0x361   :  { %16293 = vst [vmem:[#allocation314_spill] sm:$0xff] %v11766_v7  ;;  %16294 = vst [vmem:[#allocation315_spill] sm:$0xff] %v11768_v8 }
 0x362   :  { %2486 = vrot.lane.b32.xlu1 %v727_v31, %s10145_s10  ;;  %2484 = vrot.lane.b32.xlu0 %v726_v39, %s10145_s10  ;;  %v764_v31 = vld [vmem:[#allocation2 + $0x62] sm:$0xff]  ;;  %v763_v39 = vld [vmem:[#allocation2 + $0x52] sm:$0xff] }
 0x364   :  { %v11772_v32 = vpop.permute.xlu1 %2246  ;;  %v11774_v28 = vpop.permute.xlu0 %2244 }
 0x365   :  { %16295 = vst [vmem:[#allocation316_spill] sm:$0xff] %v11772_v32  ;;  %16296 = vst [vmem:[#allocation317_spill] sm:$0xff] %v11774_v28 }
 0x366   :  { %2680 = vrot.lane.b32.xlu1 %v760_v59, %s10146_s2  ;;  %2488 = vrot.lane.b32.xlu0 %v728_v0, %s10145_s10  ;;  %v766_v0 = vld [vmem:[#allocation2 + $0x7a] sm:$0xff]  ;;  %v765_v59 = vld [vmem:[#allocation2 + $0x6a] sm:$0xff] }
 0x368   :  { %v11778_v16 = vpop.permute.xlu1 %2250  ;;  %v11780_v8 = vpop.permute.xlu0 %2248 }
 0x369   :  { %16297 = vst [vmem:[#allocation318_spill] sm:$0xff] %v11778_v16  ;;  %16298 = vst [vmem:[#allocation319_spill] sm:$0xff] %v11780_v8 }
 0x36a   :  { %2684 = vrot.lane.b32.xlu1 %v762_v11, %s10146_s2  ;;  %2682 = vrot.lane.b32.xlu0 %v761_v15, %s10146_s2  ;;  %v768_v11 = vld [vmem:[#allocation2 + $0x92] sm:$0xff]  ;;  %v767_v15 = vld [vmem:[#allocation2 + $0x82] sm:$0xff] }
 0x36c   :  { %v11784_v32 = vpop.permute.xlu1 %2254  ;;  %v11786_v28 = vpop.permute.xlu0 %2252 }
 0x36d   :  { %16299 = vst [vmem:[#allocation320_spill] sm:$0xff] %v11784_v32  ;;  %16300 = vst [vmem:[#allocation321_spill] sm:$0xff] %v11786_v28 }
 0x36e   :  { %2688 = vrot.lane.b32.xlu1 %v764_v31, %s10146_s2  ;;  %2686 = vrot.lane.b32.xlu0 %v763_v39, %s10146_s2  ;;  %v770_v31 = vld [vmem:[#allocation2 + $0xaa] sm:$0xff]  ;;  %v769_v39 = vld [vmem:[#allocation2 + $0x9a] sm:$0xff] }
 0x370   :  { %v11790_v7 = vpop.permute.xlu1 %2258  ;;  %v11792_v16 = vpop.permute.xlu0 %2256 }
 0x371   :  { %16301 = vst [vmem:[#allocation322_spill] sm:$0xff] %v11790_v7  ;;  %16302 = vst [vmem:[#allocation323_spill] sm:$0xff] %v11792_v16 }
 0x372   :  { %2692 = vrot.lane.b32.xlu1 %v766_v0, %s10146_s2  ;;  %2690 = vrot.lane.b32.xlu0 %v765_v59, %s10146_s2  ;;  %v772_v0 = vld [vmem:[#allocation2 + $0xc2] sm:$0xff]  ;;  %v771_v59 = vld [vmem:[#allocation2 + $0xb2] sm:$0xff] }
 0x374   :  { %v11796_v8 = vpop.permute.xlu1 %2262  ;;  %v11798_v32 = vpop.permute.xlu0 %2260 }
 0x375   :  { %16303 = vst [vmem:[#allocation324_spill] sm:$0xff] %v11796_v8  ;;  %16304 = vst [vmem:[#allocation325_spill] sm:$0xff] %v11798_v32 }
 0x376   :  { %2696 = vrot.lane.b32.xlu1 %v768_v11, %s10146_s2  ;;  %2694 = vrot.lane.b32.xlu0 %v767_v15, %s10146_s2  ;;  %v774_v11 = vld [vmem:[#allocation2 + $0xda] sm:$0xff]  ;;  %v773_v15 = vld [vmem:[#allocation2 + $0xca] sm:$0xff] }
 0x378   :  { %v11802_v28 = vpop.permute.xlu1 %2266  ;;  %v11804_v7 = vpop.permute.xlu0 %2264 }
 0x379   :  { %16305 = vst [vmem:[#allocation326_spill] sm:$0xff] %v11802_v28  ;;  %16306 = vst [vmem:[#allocation327_spill] sm:$0xff] %v11804_v7 }
 0x37a   :  { %2700 = vrot.lane.b32.xlu1 %v770_v31, %s10146_s2  ;;  %2698 = vrot.lane.b32.xlu0 %v769_v39, %s10146_s2  ;;  %v776_v31 = vld [vmem:[#allocation2 + $0xf2] sm:$0xff]  ;;  %v775_v39 = vld [vmem:[#allocation2 + $0xe2] sm:$0xff] }
 0x37c   :  { %v11808_v16 = vpop.permute.xlu1 %2270  ;;  %v11810_v8 = vpop.permute.xlu0 %2268 }
 0x37d   :  { %16307 = vst [vmem:[#allocation328_spill] sm:$0xff] %v11808_v16  ;;  %16308 = vst [vmem:[#allocation329_spill] sm:$0xff] %v11810_v8 }
 0x37e   :  { %2704 = vrot.lane.b32.xlu1 %v772_v0, %s10146_s2  ;;  %2702 = vrot.lane.b32.xlu0 %v771_v59, %s10146_s2  ;;  %v778_v0 = vld [vmem:[#allocation2 + $0x10a] sm:$0xff]  ;;  %v777_v59 = vld [vmem:[#allocation2 + $0xfa] sm:$0xff] }
 0x380   :  { %v11814_v32 = vpop.permute.xlu1 %2274  ;;  %v11816_v28 = vpop.permute.xlu0 %2272 }
 0x381   :  { %16309 = vst [vmem:[#allocation330_spill] sm:$0xff] %v11814_v32  ;;  %16310 = vst [vmem:[#allocation331_spill] sm:$0xff] %v11816_v28 }
 0x382   :  { %2708 = vrot.lane.b32.xlu1 %v774_v11, %s10146_s2  ;;  %2706 = vrot.lane.b32.xlu0 %v773_v15, %s10146_s2  ;;  %v780_v11 = vld [vmem:[#allocation2 + $0x122] sm:$0xff]  ;;  %v779_v15 = vld [vmem:[#allocation2 + $0x112] sm:$0xff] }
 0x384   :  { %v11820_v7 = vpop.permute.xlu1 %2278  ;;  %v11822_v16 = vpop.permute.xlu0 %2276 }
 0x385   :  { %16311 = vst [vmem:[#allocation332_spill] sm:$0xff] %v11820_v7  ;;  %16312 = vst [vmem:[#allocation333_spill] sm:$0xff] %v11822_v16 }
 0x386   :  { %2712 = vrot.lane.b32.xlu1 %v776_v31, %s10146_s2  ;;  %2710 = vrot.lane.b32.xlu0 %v775_v39, %s10146_s2  ;;  %v782_v31 = vld [vmem:[#allocation2 + $0x13a] sm:$0xff]  ;;  %v781_v39 = vld [vmem:[#allocation2 + $0x12a] sm:$0xff] }
 0x388   :  { %v11826_v8 = vpop.permute.xlu1 %2282  ;;  %v11828_v32 = vpop.permute.xlu0 %2280 }
 0x389   :  { %16313 = vst [vmem:[#allocation334_spill] sm:$0xff] %v11826_v8  ;;  %16314 = vst [vmem:[#allocation335_spill] sm:$0xff] %v11828_v32 }
 0x38a   :  { %2716 = vrot.lane.b32.xlu1 %v778_v0, %s10146_s2  ;;  %2714 = vrot.lane.b32.xlu0 %v777_v59, %s10146_s2  ;;  %v784_v0 = vld [vmem:[#allocation2 + $0x152] sm:$0xff]  ;;  %v783_v59 = vld [vmem:[#allocation2 + $0x142] sm:$0xff] }
 0x38c   :  { %v11832_v28 = vpop.permute.xlu1 %2286  ;;  %v11834_v7 = vpop.permute.xlu0 %2284 }
 0x38d   :  { %16315 = vst [vmem:[#allocation336_spill] sm:$0xff] %v11832_v28  ;;  %16316 = vst [vmem:[#allocation337_spill] sm:$0xff] %v11834_v7 }
 0x38e   :  { %2720 = vrot.lane.b32.xlu1 %v780_v11, %s10146_s2  ;;  %2718 = vrot.lane.b32.xlu0 %v779_v15, %s10146_s2  ;;  %v786_v11 = vld [vmem:[#allocation2 + $0x16a] sm:$0xff]  ;;  %v785_v15 = vld [vmem:[#allocation2 + $0x15a] sm:$0xff] }
 0x390   :  { %v11838_v16 = vpop.permute.xlu1 %2290  ;;  %v11840_v8 = vpop.permute.xlu0 %2288 }
 0x391   :  { %16317 = vst [vmem:[#allocation338_spill] sm:$0xff] %v11838_v16  ;;  %16318 = vst [vmem:[#allocation339_spill] sm:$0xff] %v11840_v8 }
 0x392   :  { %2724 = vrot.lane.b32.xlu1 %v782_v31, %s10146_s2  ;;  %2722 = vrot.lane.b32.xlu0 %v781_v39, %s10146_s2  ;;  %v788_v31 = vld [vmem:[#allocation2 + $0x182] sm:$0xff]  ;;  %v787_v39 = vld [vmem:[#allocation2 + $0x172] sm:$0xff] }
 0x394   :  { %v11844_v32 = vpop.permute.xlu1 %2294  ;;  %v11846_v28 = vpop.permute.xlu0 %2292 }
 0x395   :  { %16319 = vst [vmem:[#allocation340_spill] sm:$0xff] %v11844_v32  ;;  %16320 = vst [vmem:[#allocation341_spill] sm:$0xff] %v11846_v28 }
 0x396   :  { %2728 = vrot.lane.b32.xlu1 %v784_v0, %s10146_s2  ;;  %2726 = vrot.lane.b32.xlu0 %v783_v59, %s10146_s2  ;;  %v790_v0 = vld [vmem:[#allocation2 + $0x19a] sm:$0xff]  ;;  %v789_v59 = vld [vmem:[#allocation2 + $0x18a] sm:$0xff] }
 0x398   :  { %v11850_v7 = vpop.permute.xlu1 %2426  ;;  %v11852_v16 = vpop.permute.xlu0 %2424 }
 0x39a   :  { %2732 = vrot.lane.b32.xlu1 %v786_v11, %s10146_s2  ;;  %2730 = vrot.lane.b32.xlu0 %v785_v15, %s10146_s2  ;;  %v729_v11 = vld [vmem:[#allocation2 + $0x1e9] sm:$0xff] }
 0x39b   :  { %v791_v15 = vld [vmem:[#allocation2 + $0x1a2] sm:$0xff] }
 0x39c   :  { %v11856_v8 = vpop.permute.xlu1 %2430  ;;  %v11858_v32 = vpop.permute.xlu0 %2428 }
 0x39d   :  { %16321 = vst [vmem:[#allocation342_spill] sm:$0xff] %v11856_v8  ;;  %v9996_v8 = vld [vmem:[#allocation2 + $0x38] sm:$0xff] }
 0x39e   :  { %2736 = vrot.lane.b32.xlu1 %v788_v31, %s10146_s2  ;;  %2734 = vrot.lane.b32.xlu0 %v787_v39, %s10146_s2  ;;  %v793_v31 = vld [vmem:[#allocation2 + $0x1ea] sm:$0xff]  ;;  %v792_v39 = vld [vmem:[#allocation2 + $0x1e2] sm:$0xff] }
 0x3a0   :  { %v11862_v28 = vpop.permute.xlu1 %2434  ;;  %v11864_v60 = vpop.permute.xlu0 %2432 }
 0x3a1   :  { %16322 = vst [vmem:[#allocation343_spill] sm:$0xff] %v11862_v28  ;;  %16323 = vst [vmem:[#allocation344_spill] sm:$0xff] %v11864_v60  ;;  %v9994_v60 = vld [vmem:[#allocation2 + $0x18] sm:$0xff] }
 0x3a2   :  { %2740 = vrot.lane.b32.xlu1 %v790_v0, %s10146_s2  ;;  %2738 = vrot.lane.b32.xlu0 %v789_v59, %s10146_s2  ;;  %v731_v0 = vld [vmem:[#allocation2 + $0x201] sm:$0xff]  ;;  %v730_v59 = vld [vmem:[#allocation2 + $0x1f9] sm:$0xff] }
 0x3a4   :  { %v11868_v35 = vpop.permute.xlu1 %2438  ;;  %v11870_v30 = vpop.permute.xlu0 %2436 }
 0x3a5   :  { %16324 = vst [vmem:[#allocation345_spill] sm:$0xff] %v11868_v35  ;;  %16325 = vst [vmem:[#allocation346_spill] sm:$0xff] %v11870_v30 }
 0x3a6   :  { %2490 = vrot.lane.b32.xlu1 %v729_v11, %s10145_s10  ;;  %2742 = vrot.lane.b32.xlu0 %v791_v15, %s10146_s2  ;;  %v795_v11 = vld [vmem:[#allocation2 + $0x202] sm:$0xff]  ;;  %v794_v15 = vld [vmem:[#allocation2 + $0x1fa] sm:$0xff] }
 0x3a8   :  { %v11874_v4 = vpop.permute.xlu1 %2442  ;;  %v11876_v28 = vpop.permute.xlu0 %2440 }
 0x3a9   :  { %16326 = vst [vmem:[#allocation347_spill] sm:$0xff] %v11874_v4  ;;  %16327 = vst [vmem:[#allocation348_spill] sm:$0xff] %v11876_v28 }
 0x3aa   :  { %2746 = vrot.lane.b32.xlu1 %v793_v31, %s10146_s2  ;;  %2744 = vrot.lane.b32.xlu0 %v792_v39, %s10146_s2  ;;  %v733_v31 = vld [vmem:[#allocation2 + $0x219] sm:$0xff]  ;;  %v732_v39 = vld [vmem:[#allocation2 + $0x211] sm:$0xff] }
 0x3ac   :  { %v11880_v3 = vpop.permute.xlu1 %2446  ;;  %v11882_v35 = vpop.permute.xlu0 %2444 }
 0x3ad   :  { %16328 = vst [vmem:[#allocation349_spill] sm:$0xff] %v11880_v3  ;;  %16329 = vst [vmem:[#allocation350_spill] sm:$0xff] %v11882_v35 }
 0x3ae   :  { %2494 = vrot.lane.b32.xlu1 %v731_v0, %s10145_s10  ;;  %2492 = vrot.lane.b32.xlu0 %v730_v59, %s10145_s10  ;;  %v797_v0 = vld [vmem:[#allocation2 + $0x21a] sm:$0xff]  ;;  %v796_v59 = vld [vmem:[#allocation2 + $0x212] sm:$0xff] }
 0x3b0   :  { %v11886_v30 = vpop.permute.xlu1 %2450  ;;  %v11888_v4 = vpop.permute.xlu0 %2448 }
 0x3b1   :  { %16330 = vst [vmem:[#allocation351_spill] sm:$0xff] %v11886_v30  ;;  %16331 = vst [vmem:[#allocation352_spill] sm:$0xff] %v11888_v4 }
 0x3b2   :  { %2750 = vrot.lane.b32.xlu1 %v795_v11, %s10146_s2  ;;  %2748 = vrot.lane.b32.xlu0 %v794_v15, %s10146_s2  ;;  %v735_v11 = vld [vmem:[#allocation2 + $0x231] sm:$0xff]  ;;  %v734_v15 = vld [vmem:[#allocation2 + $0x229] sm:$0xff] }
 0x3b4   :  { %v11892_v28 = vpop.permute.xlu1 %2454  ;;  %v11894_v3 = vpop.permute.xlu0 %2452 }
 0x3b5   :  { %16332 = vst [vmem:[#allocation353_spill] sm:$0xff] %v11892_v28  ;;  %16333 = vst [vmem:[#allocation354_spill] sm:$0xff] %v11894_v3 }
 0x3b6   :  { %2498 = vrot.lane.b32.xlu1 %v733_v31, %s10145_s10  ;;  %2496 = vrot.lane.b32.xlu0 %v732_v39, %s10145_s10  ;;  %v799_v31 = vld [vmem:[#allocation2 + $0x232] sm:$0xff]  ;;  %v798_v39 = vld [vmem:[#allocation2 + $0x22a] sm:$0xff] }
 0x3b8   :  { %v11898_v35 = vpop.permute.xlu1 %2458  ;;  %v11900_v30 = vpop.permute.xlu0 %2456 }
 0x3b9   :  { %16334 = vst [vmem:[#allocation355_spill] sm:$0xff] %v11898_v35  ;;  %16335 = vst [vmem:[#allocation356_spill] sm:$0xff] %v11900_v30 }
 0x3ba   :  { %2754 = vrot.lane.b32.xlu1 %v797_v0, %s10146_s2  ;;  %2752 = vrot.lane.b32.xlu0 %v796_v59, %s10146_s2  ;;  %v737_v0 = vld [vmem:[#allocation2 + $0x249] sm:$0xff]  ;;  %v736_v59 = vld [vmem:[#allocation2 + $0x241] sm:$0xff] }
 0x3bc   :  { %v11904_v4 = vpop.permute.xlu1 %2462  ;;  %v11906_v28 = vpop.permute.xlu0 %2460 }
 0x3bd   :  { %16336 = vst [vmem:[#allocation357_spill] sm:$0xff] %v11904_v4  ;;  %16337 = vst [vmem:[#allocation358_spill] sm:$0xff] %v11906_v28 }
 0x3be   :  { %2502 = vrot.lane.b32.xlu1 %v735_v11, %s10145_s10  ;;  %2500 = vrot.lane.b32.xlu0 %v734_v15, %s10145_s10  ;;  %v801_v11 = vld [vmem:[#allocation2 + $0x24a] sm:$0xff]  ;;  %v800_v15 = vld [vmem:[#allocation2 + $0x242] sm:$0xff] }
 0x3c0   :  { %v11910_v3 = vpop.permute.xlu1 %2466  ;;  %v11912_v35 = vpop.permute.xlu0 %2464 }
 0x3c1   :  { %16338 = vst [vmem:[#allocation359_spill] sm:$0xff] %v11910_v3  ;;  %16339 = vst [vmem:[#allocation360_spill] sm:$0xff] %v11912_v35 }
 0x3c2   :  { %2758 = vrot.lane.b32.xlu1 %v799_v31, %s10146_s2  ;;  %2756 = vrot.lane.b32.xlu0 %v798_v39, %s10146_s2  ;;  %v739_v31 = vld [vmem:[#allocation2 + $0x261] sm:$0xff]  ;;  %v738_v39 = vld [vmem:[#allocation2 + $0x259] sm:$0xff] }
 0x3c4   :  { %v11916_v30 = vpop.permute.xlu1 %2470  ;;  %v11918_v4 = vpop.permute.xlu0 %2468 }
 0x3c5   :  { %16340 = vst [vmem:[#allocation361_spill] sm:$0xff] %v11916_v30  ;;  %16341 = vst [vmem:[#allocation362_spill] sm:$0xff] %v11918_v4  ;;  %v247_v4 = vld [vmem:[#allocation2] sm:$0xff] }
 0x3c6   :  { %2506 = vrot.lane.b32.xlu1 %v737_v0, %s10145_s10  ;;  %2504 = vrot.lane.b32.xlu0 %v736_v59, %s10145_s10  ;;  %v248_v0 = vld [vmem:[#allocation2 + $0x8] sm:$0xff] }
 0x3c7   :  { %v803_v59 = vld [vmem:[#allocation2 + $0x262] sm:$0xff] }
 0x3c8   :  { %v11922_v28 = vpop.permute.xlu1 %2474  ;;  %v11924_v3 = vpop.permute.xlu0 %2472 }
 0x3c9   :  { %16342 = vst [vmem:[#allocation363_spill] sm:$0xff] %v11922_v28  ;;  %16343 = vst [vmem:[#allocation364_spill] sm:$0xff] %v11924_v3  ;;  %v802_v28 = vld [vmem:[#allocation2 + $0x25a] sm:$0xff] }
 0x3ca   :  { %2762 = vrot.lane.b32.xlu1 %v801_v11, %s10146_s2  ;;  %2760 = vrot.lane.b32.xlu0 %v800_v15, %s10146_s2  ;;  %v2874_v11 = vsel %vm30_vm0, %v9994_v60, %v10665_v57  ;;  %v11950_v57 = vsel %vm30_vm0, %v9996_v8, %v10677_v1  ;;  %v9997_v60 = vld [vmem:[#allocation2 + $0x30] sm:$0xff]  ;;  %v10000_v1 = vld [vmem:[#allocation2 + $0x68] sm:$0xff]  ;;  %v10002_v8 = vld [vmem:[#allocation2 + $0x80] sm:$0xff] }
 0x3cc   :  { %v11928_v35 = vpop.permute.xlu1 %2478  ;;  %v11930_v30 = vpop.permute.xlu0 %2476 }
 0x3cd   :  { %16344 = vst [vmem:[#allocation365_spill] sm:$0xff] %v11928_v35  ;;  %16345 = vst [vmem:[#allocation366_spill] sm:$0xff] %v11930_v30  ;;  %v2872_v35 = vsel %vm30_vm0, %v247_v4, %v10667_v58  ;;  %v9995_v30 = vld [vmem:[#allocation2 + $0x20] sm:$0xff] }
 0x3ce   :  { %2510 = vrot.lane.b32.xlu1 %v739_v31, %s10145_s10  ;;  %2508 = vrot.lane.b32.xlu0 %v738_v39, %s10145_s10  ;;  %v11944_v31 = vsel %vm30_vm0, %v9995_v30, %v10671_v61  ;;  %v2873_v39 = vsel %vm30_vm0, %v248_v0, %v10673_v62  ;;  %v9999_v61 = vld [vmem:[#allocation2 + $0x48] sm:$0xff]  ;;  %v11966_v30 = vsel %vm30_vm0, %v10000_v1, %v10689_v9  ;;  %v10001_v4 = vld [vmem:[#allocation2 + $0x60] sm:$0xff]  ;;  %v10006_v1 = vld [vmem:[#allocation2 + $0xb0] sm:$0xff] }
 0x3cf   :  { %v11962_v62 = vsel %vm30_vm0, %v9999_v61, %v10685_v6  ;;  %v11976_v6 = vsel %vm30_vm0, %v10002_v8, %v10695_v13  ;;  %v804_v8 = vld [vmem:[#allocation2 + $0x272] sm:$0xff] }
 0x3d0   :  { %v11936_v15 = vpop.permute.xlu1 %2482  ;;  %v11938_v3 = vpop.permute.xlu0 %2480 }
 0x3d1   :  { %16346 = vst [vmem:[#allocation367_spill] sm:$0xff] %v11936_v15  ;;  %16347 = vst [vmem:[#allocation368_spill] sm:$0xff] %v11938_v3  ;;  %v2876_v15 = vsel %vm30_vm0, %v9997_v60, %v10679_v2  ;;  %v9998_v3 = vld [vmem:[#allocation2 + $0x50] sm:$0xff]  ;;  %v2937_v2 = vsel %vm2936_vm4, %v2872_v35, %v10867_v52  ;;  %v10003_v35 = vld [vmem:[#allocation2 + $0x78] sm:$0xff] }
 0x3d2   :  { %v11956_v58 = vsel %vm30_vm0, %v9998_v3, %v10683_v5  ;;  %2766 = vrot.lane.b32.xlu1 %v803_v59, %s10146_s2  ;;  %2764 = vrot.lane.b32.xlu0 %v802_v28, %s10146_s2  ;;  %v741_v5 = vld [vmem:[#allocation2 + $0x279] sm:$0xff]  ;;  %v740_v3 = vld [vmem:[#allocation2 + $0x271] sm:$0xff]  ;;  %v11972_v28 = vsel %vm30_vm0, %v10001_v4, %v10691_v10  ;;  %v3002_v9 = vsel %vm3001_vm5, %v2937_v2, %v11067_v23 }
 0x3d3   :  { %v11986_v59 = vsel %vm30_vm0, %v10003_v35, %v10697_v14  ;;  %v10004_v10 = vld [vmem:[#allocation2 + $0x98] sm:$0xff]  ;;  %v3067_v13 = vsel %vm3066_vm6, %v3002_v9, %v11259_v38  ;;  %v10005_v23 = vld [vmem:[#allocation2 + $0x90] sm:$0xff]  ;;  %v12000_v2 = vsel %vm30_vm0, %v10006_v1, %v10707_v21  ;;  %v2939_v21 = vsel %vm2936_vm4, %v2874_v11, %v10881_v12  ;;  %v10009_v11 = vld [vmem:[#allocation2 + $0xc0] sm:$0xff] }
 0x3d4   :  { %v11980_v0 = vpop.permute.xlu1 %2486  ;;  %v11982_v52 = vpop.permute.xlu0 %2484  ;;  %v11990_v60 = vsel %vm30_vm0, %v10004_v10, %v10701_v17  ;;  %v11996_v61 = vsel %vm30_vm0, %v10005_v23, %v10703_v18  ;;  %v3132_v14 = vsel %vm3131_vm7, %v3067_v13, %v11451_v42  ;;  %v10007_v17 = vld [vmem:[#allocation2 + $0xa8] sm:$0xff]  ;;  %v2938_v18 = vsel %vm2936_vm4, %v2873_v39, %v10865_v51  ;;  %v805_v42 = vld [vmem:[#allocation2 + $0x27a] sm:$0xff] }
 0x3d5   :  { %v12008_v38 = vsel %vm30_vm0, %v10007_v17, %v10709_v22  ;;  %v3197_v4 = vsel %vm3196_vm8, %v3132_v14, %v11643_v40  ;;  %v10008_v51 = vld [vmem:[#allocation2 + $0xc8] sm:$0xff]  ;;  %v10010_v14 = vld [vmem:[#allocation2 + $0xe0] sm:$0xff] }
 0x3d6   :  { %2514 = vrot.lane.b32.xlu1 %v741_v5, %s10145_s10  ;;  %2512 = vrot.lane.b32.xlu0 %v740_v3, %s10145_s10  ;;  %v3003_v5 = vsel %vm3001_vm5, %v2938_v18, %v11065_v50  ;;  %v3004_v3 = vsel %vm3001_vm5, %v2939_v21, %v11073_v54  ;;  %v3262_v22 = vsel %vm3261_vm9, %v3197_v4, %v11852_v16  ;;  %v742_v10 = vld [vmem:[#allocation2 + $0x289] sm:$0xff] }
 0x3d7   :  { %v12026_v12 = vsel %vm30_vm0, %v10008_v51, %v10713_v25  ;;  %v3068_v40 = vsel %vm3066_vm6, %v3003_v5, %v11257_v48  ;;  %v3069_v50 = vsel %vm3066_vm6, %v3004_v3, %v11265_v56  ;;  %v12035_v16 = vsel %vm30_vm0, %v10009_v11, %v10715_v26  ;;  %v806_v17 = vld [vmem:[#allocation2 + $0x28a] sm:$0xff]  ;;  %v10011_v3 = vld [vmem:[#allocation2 + $0xd8] sm:$0xff]  ;;  %v16353_v51 = vld [vmem:[#allocation224_spill] sm:$0xff] }
 0x3d8   :  { %v2681_v9 = vpop.permute.xlu1 %2680  ;;  %v12022_v35 = vpop.permute.xlu0 %2488  ;;  %v3133_v39 = vsel %vm3131_vm7, %v3068_v40, %v11449_v34  ;;  %v3134_v25 = vsel %vm3131_vm7, %v3069_v50, %v11457_v44  ;;  %v2940_v56 = vsel %vm2936_vm4, %v11944_v31, %v10879_v36  ;;  %v2941_v48 = vsel %vm2936_vm4, %v2876_v15, %v10887_v27  ;;  %v743_v44 = vld [vmem:[#allocation2 + $0x291] sm:$0xff]  ;;  %v16350_v4 = vld [vmem:[#allocation165_spill] sm:$0xff] }
 0x3d9   :  { %v3327_v54 = vsel %vm3326_vm10, %v3262_v22, %v2681_v9  ;;  %v3198_v26 = vsel %vm3196_vm8, %v3133_v39, %v11641_v63  ;;  %v3199_v34 = vsel %vm3196_vm8, %v3134_v25, %v11649_v37  ;;  %v3005_v13 = vsel %vm3001_vm5, %v2940_v56, %v11071_v53  ;;  %v16352_v22 = vld [vmem:[#allocation6_spill] sm:$0xff]  ;;  %v16355_v11 = vld [vmem:[#allocation51_spill] sm:$0xff]  ;;  %v16356_v25 = vld [vmem:[#allocation53_spill] sm:$0xff] }
 0x3da   :  { %2770 = vrot.lane.b32.xlu1 %v805_v42, %s10146_s2  ;;  %2768 = vrot.lane.b32.xlu0 %v804_v8, %s10146_s2  ;;  %v3006_v23 = vsel %vm3001_vm5, %v2941_v48, %v11079_v24  ;;  %v3263_v36 = vsel %vm3261_vm9, %v3198_v26, %v11850_v7  ;;  %v3264_v27 = vsel %vm3261_vm9, %v3199_v34, %v11858_v32  ;;  %v16351_v8 = vld [vmem:[#allocation167_spill] sm:$0xff]  ;;  %v16354_v50 = vld [vmem:[#allocation226_spill] sm:$0xff]  ;;  %v16358_v34 = vld [vmem:[#allocation285_spill] sm:$0xff] }
 0x3db   :  { %8495 = vmatprep.mubr.msk.f32.mxu0 %vm3396_vm11, %v3327_v54  ;;  %v3070_v37 = vsel %vm3066_vm6, %v3005_v13, %v11263_v41  ;;  %v3071_v31 = vsel %vm3066_vm6, %v3006_v23, %v11271_v55  ;;  %v12069_v24 = vsel %vm30_vm0, %v10010_v14, %v10719_v29  ;;  %v2942_v41 = vsel %vm2936_vm4, %v11950_v57, %v10885_v20  ;;  %v16348_v57 = vld [vmem:[#allocation342_spill] sm:$0xff]  ;;  %v16357_v48 = vld [vmem:[#allocation283_spill] sm:$0xff]  ;;  %v744_v13 = vld [vmem:[#allocation2 + $0x2a1] sm:$0xff] }
 0x3dc   :  { %v2685_v63 = vpop.permute.xlu1 %2684  ;;  %v2683_v15 = vpop.permute.xlu0 %2682  ;;  %v3135_v32 = vsel %vm3131_vm7, %v3070_v37, %v11455_v45  ;;  %v3136_v7 = vsel %vm3131_vm7, %v3071_v31, %v11463_v19  ;;  %v2943_v55 = vsel %vm2936_vm4, %v11962_v62, %v10893_v43  ;;  %v807_v19 = vld [vmem:[#allocation2 + $0x292] sm:$0xff]  ;;  %v3007_v18 = vsel %vm3001_vm5, %v2942_v41, %v11077_v49  ;;  %v16349_v43 = vld [vmem:[#allocation344_spill] sm:$0xff] }
 0x3dd   :  { %v3329_v1 = vsel %vm3326_vm10, %v3264_v27, %v2685_v63  ;;  %v3328_v53 = vsel %vm3326_vm10, %v3263_v36, %v2683_v15  ;;  %v3200_v29 = vsel %vm3196_vm8, %v3135_v32, %v11647_v33  ;;  %v3201_v45 = vsel %vm3196_vm8, %v3136_v7, %v11655_v47  ;;  %v16359_v23 = vld [vmem:[#allocation108_spill] sm:$0xff]  ;;  %v16360_v27 = vld [vmem:[#allocation110_spill] sm:$0xff]  ;;  %v16361_v63 = vld [vmem:[#allocation343_spill] sm:$0xff] }
 0x3de   :  { %2518 = vrot.lane.b32.xlu1 %v743_v44, %s10145_s10  ;;  %2516 = vrot.lane.b32.xlu0 %v742_v10, %s10145_s10  ;;  %v3008_v20 = vsel %vm3001_vm5, %v2943_v55, %v11085_v46  ;;  %v3265_v21 = vsel %vm3261_vm9, %v3200_v29, %v16348_v57  ;;  %v3266_v62 = vsel %vm3261_vm9, %v3201_v45, %v16349_v43  ;;  %v745_v10 = vld [vmem:[#allocation2 + $0x2a9] sm:$0xff]  ;;  %v10012_v29 = vld [vmem:[#allocation2 + $0xf8] sm:$0xff] }
 0x3df   :  { %8496 = vmatmul.mubr.msk.f32.vlgmr.msra.gmra.mrb[0].mxu0 %vm3396_vm11, %v3328_v53  ;;  %v3072_v42 = vsel %vm3066_vm6, %v3007_v18, %v16350_v4  ;;  %v3073_v5 = vsel %vm3066_vm6, %v3008_v20, %v16351_v8  ;;  %v12105_v9 = vsel %vm30_vm0, %v10011_v3, %v16352_v22  ;;  %v2944_v39 = vsel %vm2936_vm4, %v11956_v58, %v16355_v11  ;;  %v16363_v53 = vld [vmem:[#allocation166_spill] sm:$0xff]  ;;  %v16364_v32 = vld [vmem:[#allocation169_spill] sm:$0xff]  ;;  %v16365_v45 = vld [vmem:[#allocation7_spill] sm:$0xff] }
 0x3e0   :  { %8498 = vmatprep.mubr.msk.f32.mxu0 %vm3396_vm11, %v3329_v1  ;;  %v2689_v33 = vpop.permute.xlu1 %2688  ;;  %v2687_v47 = vpop.permute.xlu0 %2686  ;;  %v3137_v40 = vsel %vm3131_vm7, %v3072_v42, %v16353_v51  ;;  %v3138_v54 = vsel %vm3131_vm7, %v3073_v5, %v16354_v50  ;;  %v2945_v56 = vsel %vm2936_vm4, %v11972_v28, %v16356_v25  ;;  %v3009_v36 = vsel %vm3001_vm5, %v2944_v39, %v16359_v23  ;;  %v16362_v28 = vld [vmem:[#allocation346_spill] sm:$0xff]  ;;  %v16367_v20 = vld [vmem:[#allocation228_spill] sm:$0xff]  ;;  %v16371_v42 = vld [vmem:[#allocation287_spill] sm:$0xff] }
 0x3e1   :  { %v3331_v49 = vsel %vm3326_vm10, %v3266_v62, %v2689_v33  ;;  %v3330_v46 = vsel %vm3326_vm10, %v3265_v21, %v2687_v47  ;;  %v3202_v26 = vsel %vm3196_vm8, %v3137_v40, %v16357_v48  ;;  %v3203_v44 = vsel %vm3196_vm8, %v3138_v54, %v16358_v34  ;;  %v16368_v21 = vld [vmem:[#allocation52_spill] sm:$0xff]  ;;  %v16369_v62 = vld [vmem:[#allocation55_spill] sm:$0xff]  ;;  %v809_v5 = vld [vmem:[#allocation2 + $0x2aa] sm:$0xff] }
 0x3e2   :  { %2774 = vrot.lane.b32.xlu1 %v807_v19, %s10146_s2  ;;  %2772 = vrot.lane.b32.xlu0 %v806_v17, %s10146_s2  ;;  %v3010_v58 = vsel %vm3001_vm5, %v2945_v56, %v16360_v27  ;;  %v3267_v15 = vsel %vm3261_vm9, %v3202_v26, %v16361_v63  ;;  %v3268_v37 = vsel %vm3261_vm9, %v3203_v44, %v16362_v28  ;;  %v16366_v17 = vld [vmem:[#allocation225_spill] sm:$0xff]  ;;  %v16370_v47 = vld [vmem:[#allocation284_spill] sm:$0xff]  ;;  %v16377_v56 = vld [vmem:[#allocation171_spill] sm:$0xff] }
 0x3e3   :  { %8499 = vmatmul.mubr.msk.f32.gmra.mrb[2].mxu0 %vm3396_vm11, %v3330_v46  ;;  %v3074_v14 = vsel %vm3066_vm6, %v3009_v36, %v16363_v53  ;;  %v3075_v7 = vsel %vm3066_vm6, %v3010_v58, %v16364_v32  ;;  %v12141_v19 = vsel %vm30_vm0, %v10012_v29, %v16365_v45  ;;  %v2946_v43 = vsel %vm2936_vm4, %v11966_v30, %v16368_v21  ;;  %v16372_v46 = vld [vmem:[#allocation109_spill] sm:$0xff]  ;;  %v16373_v22 = vld [vmem:[#allocation112_spill] sm:$0xff]  ;;  %v10013_v44 = vld [vmem:[#allocation2 + $0xf0] sm:$0xff] }
 0x3e4   :  { %8501 = vmatprep.mubr.msk.f32.mxu0 %vm3396_vm11, %v3331_v49  ;;  %v2693_v31 = vpop.permute.xlu1 %2692  ;;  %v2691_v1 = vpop.permute.xlu0 %2690  ;;  %v3139_v18 = vsel %vm3131_vm7, %v3074_v14, %v16366_v17  ;;  %v3140_v57 = vsel %vm3131_vm7, %v3075_v7, %v16367_v20  ;;  %v2947_v33 = vsel %vm2936_vm4, %v11986_v59, %v16369_v62  ;;  %v808_v49 = vld [vmem:[#allocation2 + $0x2a2] sm:$0xff]  ;;  %v3011_v3 = vsel %vm3001_vm5, %v2946_v43, %v16372_v46  ;;  %v16379_v23 = vld [vmem:[#allocation227_spill] sm:$0xff]  ;;  %v16380_v27 = vld [vmem:[#allocation230_spill] sm:$0xff] }
 0x3e5   :  { %v3333_v41 = vsel %vm3326_vm10, %v3268_v37, %v2693_v31  ;;  %v3332_v55 = vsel %vm3326_vm10, %v3267_v15, %v2691_v1  ;;  %v3204_v4 = vsel %vm3196_vm8, %v3139_v18, %v16370_v47  ;;  %v3205_v8 = vsel %vm3196_vm8, %v3140_v57, %v16371_v42  ;;  %v16374_v51 = vld [vmem:[#allocation345_spill] sm:$0xff]  ;;  %v16375_v59 = vld [vmem:[#allocation348_spill] sm:$0xff]  ;;  %v16381_v63 = vld [vmem:[#allocation54_spill] sm:$0xff] }
 0x3e6   :  { %2522 = vrot.lane.b32.xlu1 %v745_v10, %s10145_s10  ;;  %2520 = vrot.lane.b32.xlu0 %v744_v13, %s10145_s10  ;;  %v3012_v30 = vsel %vm3001_vm5, %v2947_v33, %v16373_v22  ;;  %v3269_v40 = vsel %vm3261_vm9, %v3204_v4, %v16374_v51  ;;  %v3270_v50 = vsel %vm3261_vm9, %v3205_v8, %v16375_v59  ;;  %v16376_v39 = vld [vmem:[#allocation168_spill] sm:$0xff]  ;;  %v16382_v28 = vld [vmem:[#allocation57_spill] sm:$0xff]  ;;  %v16383_v31 = vld [vmem:[#allocation286_spill] sm:$0xff] }
 0x3e7   :  { %8502 = vmatmul.mubr.msk.f32.gmra.mrb[4].mxu0 %vm3396_vm11, %v3332_v55  ;;  %v3076_v25 = vsel %vm3066_vm6, %v3011_v3, %v16376_v39  ;;  %v3077_v48 = vsel %vm3066_vm6, %v3012_v30, %v16377_v56  ;;  %v16378_v10 = vld [vmem:[#allocation8_spill] sm:$0xff]  ;;  %v2948_v15 = vsel %vm2936_vm4, %v11976_v6, %v16381_v63  ;;  %v2949_v37 = vsel %vm2936_vm4, %v11996_v61, %v16382_v28  ;;  %v16384_v53 = vld [vmem:[#allocation289_spill] sm:$0xff]  ;;  %v16386_v29 = vld [vmem:[#allocation114_spill] sm:$0xff] }
 0x3e8   :  { %8504 = vmatprep.mubr.msk.f32.mxu0 %vm3396_vm11, %v3333_v41  ;;  %v2697_v54 = vpop.permute.xlu1 %2696  ;;  %v2695_v11 = vpop.permute.xlu0 %2694  ;;  %v12177_v13 = vsel %vm30_vm0, %v10013_v44, %v16378_v10  ;;  %v3141_v36 = vsel %vm3131_vm7, %v3076_v25, %v16379_v23  ;;  %v3142_v58 = vsel %vm3131_vm7, %v3077_v48, %v16380_v27  ;;  %v747_v32 = vld [vmem:[#allocation2 + $0x2c1] sm:$0xff]  ;;  %v746_v7 = vld [vmem:[#allocation2 + $0x2b9] sm:$0xff]  ;;  %v3014_v6 = vsel %vm3001_vm5, %v2949_v37, %v16386_v29  ;;  %v16388_v61 = vld [vmem:[#allocation350_spill] sm:$0xff] }
 0x3e9   :  { %v3335_v26 = vsel %vm3326_vm10, %v3270_v50, %v2697_v54  ;;  %v3334_v34 = vsel %vm3326_vm10, %v3269_v40, %v2695_v11  ;;  %v3206_v1 = vsel %vm3196_vm8, %v3141_v36, %v16383_v31  ;;  %v3207_v14 = vsel %vm3196_vm8, %v3142_v58, %v16384_v53  ;;  %v16385_v41 = vld [vmem:[#allocation111_spill] sm:$0xff]  ;;  %v16389_v21 = vld [vmem:[#allocation170_spill] sm:$0xff]  ;;  %v16390_v62 = vld [vmem:[#allocation173_spill] sm:$0xff] }
 0x3ea   :  { %2778 = vrot.lane.b32.xlu1 %v809_v5, %s10146_s2  ;;  %2776 = vrot.lane.b32.xlu0 %v808_v49, %s10146_s2  ;;  %v3013_v55 = vsel %vm3001_vm5, %v2948_v15, %v16385_v41  ;;  %v16387_v45 = vld [vmem:[#allocation347_spill] sm:$0xff]  ;;  %v3272_v18 = vsel %vm3261_vm9, %v3207_v14, %v16388_v61  ;;  %v3079_v33 = vsel %vm3066_vm6, %v3014_v6, %v16390_v62  ;;  %v10014_v42 = vld [vmem:[#allocation2 + $0x110] sm:$0xff]  ;;  %v16391_v8 = vld [vmem:[#allocation9_spill] sm:$0xff] }
 0x3eb   :  { %8505 = vmatmul.mubr.msk.f32.gmra.mrb[6].mxu0 %vm3396_vm11, %v3334_v34  ;;  %v3271_v17 = vsel %vm3261_vm9, %v3206_v1, %v16387_v45  ;;  %v3078_v43 = vsel %vm3066_vm6, %v3013_v55, %v16389_v21  ;;  %v12213_v5 = vsel %vm30_vm0, %v10014_v42, %v16391_v8  ;;  %v16392_v49 = vld [vmem:[#allocation229_spill] sm:$0xff]  ;;  %v16393_v3 = vld [vmem:[#allocation232_spill] sm:$0xff]  ;;  %v16395_v40 = vld [vmem:[#allocation59_spill] sm:$0xff] }
 0x3ec   :  { %8507 = vmatprep.mubr.msk.f32.mxu0 %vm3396_vm11, %v3335_v26  ;;  %v2701_v20 = vpop.permute.xlu1 %2700  ;;  %v2699_v57 = vpop.permute.xlu0 %2698  ;;  %v3143_v46 = vsel %vm3131_vm7, %v3078_v43, %v16392_v49  ;;  %v3144_v22 = vsel %vm3131_vm7, %v3079_v33, %v16393_v3  ;;  %v16394_v30 = vld [vmem:[#allocation56_spill] sm:$0xff]  ;;  %v2951_v59 = vsel %vm2936_vm4, %v12008_v38, %v16395_v40  ;;  %v16397_v11 = vld [vmem:[#allocation291_spill] sm:$0xff]  ;;  %v16398_v48 = vld [vmem:[#allocation113_spill] sm:$0xff] }
 0x3ed   :  { %v3337_v47 = vsel %vm3326_vm10, %v3272_v18, %v2701_v20  ;;  %v3336_v4 = vsel %vm3326_vm10, %v3271_v17, %v2699_v57  ;;  %v2950_v51 = vsel %vm2936_vm4, %v11990_v60, %v16394_v30  ;;  %v16396_v50 = vld [vmem:[#allocation288_spill] sm:$0xff]  ;;  %v3209_v39 = vsel %vm3196_vm8, %v3144_v22, %v16397_v11  ;;  %v16400_v44 = vld [vmem:[#allocation349_spill] sm:$0xff]  ;;  %v16403_v15 = vld [vmem:[#allocation175_spill] sm:$0xff] }
 0x3ee   :  { %2526 = vrot.lane.b32.xlu1 %v747_v32, %s10145_s10  ;;  %2524 = vrot.lane.b32.xlu0 %v746_v7, %s10145_s10  ;;  %v3208_v54 = vsel %vm3196_vm8, %v3143_v46, %v16396_v50  ;;  %v811_v25 = vld [vmem:[#allocation2 + $0x2c2] sm:$0xff]  ;;  %v810_v56 = vld [vmem:[#allocation2 + $0x2ba] sm:$0xff]  ;;  %v3015_v26 = vsel %vm3001_vm5, %v2950_v51, %v16398_v48  ;;  %v16404_v53 = vld [vmem:[#allocation10_spill] sm:$0xff] }
 0x3ef   :  { %8508 = vmatmul.mubr.msk.f32.gmra.mrb[8].mxu0 %vm3396_vm11, %v3336_v4  ;;  %v16399_v34 = vld [vmem:[#allocation116_spill] sm:$0xff]  ;;  %v3273_v10 = vsel %vm3261_vm9, %v3208_v54, %v16400_v44  ;;  %v10015_v1 = vld [vmem:[#allocation2 + $0x108] sm:$0xff]  ;;  %v16405_v32 = vld [vmem:[#allocation231_spill] sm:$0xff] }
 0x3f0   :  { %v3016_v60 = vsel %vm3001_vm5, %v2951_v59, %v16399_v34  ;;  %v16401_v38 = vld [vmem:[#allocation352_spill] sm:$0xff]  ;;  %8510 = vmatprep.mubr.msk.f32.mxu0 %vm3396_vm11, %v3337_v47  ;;  %v2705_v36 = vpop.permute.xlu1 %2704  ;;  %v2703_v27 = vpop.permute.xlu0 %2702  ;;  %v12249_v14 = vsel %vm30_vm0, %v10015_v1, %v16404_v53  ;;  %v16406_v41 = vld [vmem:[#allocation234_spill] sm:$0xff]  ;;  %v16408_v45 = vld [vmem:[#allocation61_spill] sm:$0xff] }
 0x3f1   :  { %v3274_v23 = vsel %vm3261_vm9, %v3209_v39, %v16401_v38  ;;  %v16402_v58 = vld [vmem:[#allocation172_spill] sm:$0xff]  ;;  %v3081_v28 = vsel %vm3066_vm6, %v3016_v60, %v16403_v15  ;;  %v3338_v31 = vsel %vm3326_vm10, %v3273_v10, %v2703_v27  ;;  %v16407_v29 = vld [vmem:[#allocation58_spill] sm:$0xff]  ;;  %v2953_v17 = vsel %vm2936_vm4, %v12035_v16, %v16408_v45  ;;  %v16410_v20 = vld [vmem:[#allocation293_spill] sm:$0xff] }
 0x3f2   :  { %v3080_v63 = vsel %vm3066_vm6, %v3015_v26, %v16402_v58  ;;  %v3339_v37 = vsel %vm3326_vm10, %v3274_v23, %v2705_v36  ;;  %v3146_v55 = vsel %vm3131_vm7, %v3081_v28, %v16406_v41  ;;  %2782 = vrot.lane.b32.xlu1 %v811_v25, %s10146_s2  ;;  %2780 = vrot.lane.b32.xlu0 %v810_v56, %s10146_s2  ;;  %v16409_v61 = vld [vmem:[#allocation290_spill] sm:$0xff]  ;;  %v749_v21 = vld [vmem:[#allocation2 + $0x2d9] sm:$0xff]  ;;  %v16416_v30 = vld [vmem:[#allocation177_spill] sm:$0xff] }
 0x3f3   :  { %v3145_v7 = vsel %vm3131_vm7, %v3080_v63, %v16405_v32  ;;  %v2952_v6 = vsel %vm2936_vm4, %v12000_v2, %v16407_v29  ;;  %v3211_v57 = vsel %vm3196_vm8, %v3146_v55, %v16410_v20  ;;  %8511 = vmatmul.mubr.msk.f32.gmra.mrb[10].mxu0 %vm3396_vm11, %v3338_v31  ;;  %v748_v43 = vld [vmem:[#allocation2 + $0x2d1] sm:$0xff]  ;;  %v10016_v50 = vld [vmem:[#allocation2 + $0x128] sm:$0xff]  ;;  %v16419_v56 = vld [vmem:[#allocation236_spill] sm:$0xff] }
 0x3f4   :  { %v3210_v18 = vsel %vm3196_vm8, %v3145_v7, %v16409_v61  ;;  %v16411_v62 = vld [vmem:[#allocation115_spill] sm:$0xff]  ;;  %v16412_v47 = vld [vmem:[#allocation118_spill] sm:$0xff]  ;;  %8513 = vmatprep.mubr.msk.f32.mxu0 %vm3396_vm11, %v3339_v37  ;;  %v2709_v49 = vpop.permute.xlu1 %2708  ;;  %v2707_v46 = vpop.permute.xlu0 %2706  ;;  %v16418_v39 = vld [vmem:[#allocation233_spill] sm:$0xff] }
 0x3f5   :  { %v3017_v33 = vsel %vm3001_vm5, %v2952_v6, %v16411_v62  ;;  %v3018_v2 = vsel %vm3001_vm5, %v2953_v17, %v16412_v47  ;;  %v16413_v4 = vld [vmem:[#allocation351_spill] sm:$0xff]  ;;  %v16414_v16 = vld [vmem:[#allocation354_spill] sm:$0xff]  ;;  %v16420_v26 = vld [vmem:[#allocation60_spill] sm:$0xff] }
 0x3f6   :  { %v3275_v42 = vsel %vm3261_vm9, %v3210_v18, %v16413_v4  ;;  %v3276_v8 = vsel %vm3261_vm9, %v3211_v57, %v16414_v16  ;;  %v16415_v3 = vld [vmem:[#allocation174_spill] sm:$0xff]  ;;  %v3083_v51 = vsel %vm3066_vm6, %v3018_v2, %v16416_v30  ;;  %v16417_v54 = vld [vmem:[#allocation11_spill] sm:$0xff]  ;;  %2530 = vrot.lane.b32.xlu1 %v749_v21, %s10145_s10  ;;  %2528 = vrot.lane.b32.xlu0 %v748_v43, %s10145_s10  ;;  %v16422_v10 = vld [vmem:[#allocation292_spill] sm:$0xff] }
 0x3f7   :  { %v3082_v22 = vsel %vm3066_vm6, %v3017_v33, %v16415_v3  ;;  %v3341_v40 = vsel %vm3326_vm10, %v3276_v8, %v2709_v49  ;;  %v3340_v59 = vsel %vm3326_vm10, %v3275_v42, %v2707_v46  ;;  %v12285_v11 = vsel %vm30_vm0, %v10016_v50, %v16417_v54  ;;  %v16421_v60 = vld [vmem:[#allocation63_spill] sm:$0xff]  ;;  %v16424_v63 = vld [vmem:[#allocation117_spill] sm:$0xff]  ;;  %v16425_v28 = vld [vmem:[#allocation120_spill] sm:$0xff] }
 0x3f8   :  { %v3147_v25 = vsel %vm3131_vm7, %v3082_v22, %v16418_v39  ;;  %v3148_v48 = vsel %vm3131_vm7, %v3083_v51, %v16419_v56  ;;  %v2954_v34 = vsel %vm2936_vm4, %v12026_v12, %v16420_v26  ;;  %v2955_v44 = vsel %vm2936_vm4, %v12105_v9, %v16421_v60  ;;  %v16423_v23 = vld [vmem:[#allocation295_spill] sm:$0xff]  ;;  %8514 = vmatmul.mubr.msk.f32.gmra.mrb[12].mxu0 %vm3396_vm11, %v3340_v59  ;;  %v16426_v37 = vld [vmem:[#allocation353_spill] sm:$0xff]  ;;  %v16427_v9 = vld [vmem:[#allocation356_spill] sm:$0xff]  ;;  %v2713_v53 = vpop.permute.xlu1 %2712  ;;  %v2711_v32 = vpop.permute.xlu0 %2710 }
 0x3f9   :  { %v3212_v38 = vsel %vm3196_vm8, %v3147_v25, %v16422_v10  ;;  %v3213_v36 = vsel %vm3196_vm8, %v3148_v48, %v16423_v23  ;;  %v813_v27 = vld [vmem:[#allocation2 + $0x2da] sm:$0xff]  ;;  %v812_v58 = vld [vmem:[#allocation2 + $0x2d2] sm:$0xff]  ;;  %v3019_v15 = vsel %vm3001_vm5, %v2954_v34, %v16424_v63  ;;  %v3020_v12 = vsel %vm3001_vm5, %v2955_v44, %v16425_v28  ;;  %8516 = vmatprep.mubr.msk.f32.mxu0 %vm3396_vm11, %v3341_v40  ;;  %v16434_v47 = vld [vmem:[#allocation65_spill] sm:$0xff] }
 0x3fa   :  { %v3277_v31 = vsel %vm3261_vm9, %v3212_v38, %v16426_v37  ;;  %v3278_v1 = vsel %vm3261_vm9, %v3213_v36, %v16427_v9  ;;  %v16428_v7 = vld [vmem:[#allocation176_spill] sm:$0xff]  ;;  %v16429_v55 = vld [vmem:[#allocation179_spill] sm:$0xff]  ;;  %v16432_v21 = vld [vmem:[#allocation238_spill] sm:$0xff]  ;;  %2786 = vrot.lane.b32.xlu1 %v813_v27, %s10146_s2  ;;  %2784 = vrot.lane.b32.xlu0 %v812_v58, %s10146_s2  ;;  %v2957_v2 = vsel %vm2936_vm4, %v12177_v13, %v16434_v47 }
 0x3fb   :  { %v3084_v41 = vsel %vm3066_vm6, %v3019_v15, %v16428_v7  ;;  %v3085_v29 = vsel %vm3066_vm6, %v3020_v12, %v16429_v55  ;;  %v3343_v6 = vsel %vm3326_vm10, %v3278_v1, %v2713_v53  ;;  %v3342_v45 = vsel %vm3326_vm10, %v3277_v31, %v2711_v32  ;;  %v10017_v17 = vld [vmem:[#allocation2 + $0x120] sm:$0xff]  ;;  %v16431_v20 = vld [vmem:[#allocation235_spill] sm:$0xff]  ;;  %v16433_v62 = vld [vmem:[#allocation62_spill] sm:$0xff] }
 0x3fc   :  { %v16430_v61 = vld [vmem:[#allocation12_spill] sm:$0xff]  ;;  %v3149_v57 = vsel %vm3131_vm7, %v3084_v41, %v16431_v20  ;;  %v3150_v43 = vsel %vm3131_vm7, %v3085_v29, %v16432_v21  ;;  %v2956_v33 = vsel %vm2936_vm4, %v12069_v24, %v16433_v62  ;;  %v16435_v4 = vld [vmem:[#allocation294_spill] sm:$0xff]  ;;  %v16436_v16 = vld [vmem:[#allocation297_spill] sm:$0xff]  ;;  %8517 = vmatmul.mubr.msk.f32.gmra.mrb[14].mxu0 %vm3396_vm11, %v3342_v45  ;;  %v2717_v50 = vpop.permute.xlu1 %2716  ;;  %v2715_v54 = vpop.permute.xlu0 %2714 }
 0x3fd   :  { %v2896_v18 = vsel %vm30_vm0, %v10017_v17, %v16430_v61  ;;  %v3214_v42 = vsel %vm3196_vm8, %v3149_v57, %v16435_v4  ;;  %v3215_v8 = vsel %vm3196_vm8, %v3150_v43, %v16436_v16  ;;  %v751_v49 = vld [vmem:[#allocation2 + $0x2f1] sm:$0xff]  ;;  %v750_v46 = vld [vmem:[#allocation2 + $0x2e9] sm:$0xff]  ;;  %8519 = vmatprep.mubr.msk.f32.mxu0 %vm3396_vm11, %v3343_v6  ;;  %v10018_v60 = vld [vmem:[#allocation2 + $0x140] sm:$0xff] }
 0x3fe   :  { %v16437_v3 = vld [vmem:[#allocation119_spill] sm:$0xff]  ;;  %v16438_v30 = vld [vmem:[#allocation122_spill] sm:$0xff]  ;;  %v16442_v56 = vld [vmem:[#allocation181_spill] sm:$0xff]  ;;  %2534 = vrot.lane.b32.xlu1 %v751_v49, %s10145_s10  ;;  %2532 = vrot.lane.b32.xlu0 %v750_v46, %s10145_s10 }
 0x3ff   :  { %v3021_v22 = vsel %vm3001_vm5, %v2956_v33, %v16437_v3  ;;  %v3022_v24 = vsel %vm3001_vm5, %v2957_v2, %v16438_v30  ;;  %v16439_v51 = vld [vmem:[#allocation355_spill] sm:$0xff]  ;;  %v16440_v13 = vld [vmem:[#allocation358_spill] sm:$0xff]  ;;  %v16443_v44 = vld [vmem:[#allocation13_spill] sm:$0xff] }
 0x400   :  { %v3279_v40 = vsel %vm3261_vm9, %v3214_v42, %v16439_v51  ;;  %v3280_v59 = vsel %vm3261_vm9, %v3215_v8, %v16440_v13  ;;  %v16441_v39 = vld [vmem:[#allocation178_spill] sm:$0xff]  ;;  %v3087_v48 = vsel %vm3066_vm6, %v3022_v24, %v16442_v56  ;;  %v12355_v10 = vsel %vm30_vm0, %v10018_v60, %v16443_v44  ;;  %v16444_v38 = vld [vmem:[#allocation237_spill] sm:$0xff]  ;;  %v16445_v36 = vld [vmem:[#allocation240_spill] sm:$0xff]  ;;  %v2721_v45 = vpop.permute.xlu1 %2720  ;;  %v2719_v17 = vpop.permute.xlu0 %2718 }
 0x401   :  { %v3086_v25 = vsel %vm3066_vm6, %v3021_v22, %v16441_v39  ;;  %v3345_v26 = vsel %vm3326_vm10, %v3280_v59, %v2717_v50  ;;  %v3344_v34 = vsel %vm3326_vm10, %v3279_v40, %v2715_v54  ;;  %v3152_v27 = vsel %vm3131_vm7, %v3087_v48, %v16445_v36  ;;  %v16446_v58 = vld [vmem:[#allocation64_spill] sm:$0xff]  ;;  %v16447_v15 = vld [vmem:[#allocation67_spill] sm:$0xff]  ;;  %v814_v53 = vld [vmem:[#allocation2 + $0x2ea] sm:$0xff] }
 0x402   :  { %v3151_v23 = vsel %vm3131_vm7, %v3086_v25, %v16444_v38  ;;  %v2958_v63 = vsel %vm2936_vm4, %v12141_v19, %v16446_v58  ;;  %v2959_v28 = vsel %vm2936_vm4, %v12249_v14, %v16447_v15  ;;  %v16448_v12 = vld [vmem:[#allocation296_spill] sm:$0xff]  ;;  %v16449_v31 = vld [vmem:[#allocation299_spill] sm:$0xff]  ;;  %8520 = vmatmul.mubr.msk.f32.gmra.mrb[16].mxu0 %vm3396_vm11, %v3344_v34  ;;  %v16450_v32 = vld [vmem:[#allocation121_spill] sm:$0xff]  ;;  %2788 = vrot.lane.b32.xlu0 %v814_v53, %s10146_s2 }
 0x403   :  { %v3216_v37 = vsel %vm3196_vm8, %v3151_v23, %v16448_v12  ;;  %v3217_v9 = vsel %vm3196_vm8, %v3152_v27, %v16449_v31  ;;  %v815_v1 = vld [vmem:[#allocation2 + $0x2f2] sm:$0xff]  ;;  %v3023_v7 = vsel %vm3001_vm5, %v2958_v63, %v16450_v32  ;;  %v16451_v41 = vld [vmem:[#allocation124_spill] sm:$0xff]  ;;  %v16452_v55 = vld [vmem:[#allocation357_spill] sm:$0xff]  ;;  %8522 = vmatprep.mubr.msk.f32.mxu0 %vm3396_vm11, %v3345_v26 }
 0x404   :  { %v3024_v19 = vsel %vm3001_vm5, %v2959_v28, %v16451_v41  ;;  %v3281_v29 = vsel %vm3261_vm9, %v3216_v37, %v16452_v55  ;;  %v16453_v14 = vld [vmem:[#allocation360_spill] sm:$0xff]  ;;  %v16455_v57 = vld [vmem:[#allocation183_spill] sm:$0xff]  ;;  %v16456_v47 = vld [vmem:[#allocation14_spill] sm:$0xff]  ;;  %2790 = vrot.lane.b32.xlu1 %v815_v1, %s10146_s2  ;;  %v2725_v26 = vpop.permute.xlu1 %2724  ;;  %v2723_v34 = vpop.permute.xlu0 %2722 }
 0x405   :  { %v3282_v6 = vsel %vm3261_vm9, %v3217_v9, %v16453_v14  ;;  %v16454_v61 = vld [vmem:[#allocation180_spill] sm:$0xff]  ;;  %v3089_v21 = vsel %vm3066_vm6, %v3024_v19, %v16455_v57  ;;  %v3346_v62 = vsel %vm3326_vm10, %v3281_v29, %v2719_v17  ;;  %v10019_v33 = vld [vmem:[#allocation2 + $0x138] sm:$0xff]  ;;  %v16458_v16 = vld [vmem:[#allocation242_spill] sm:$0xff] }
 0x406   :  { %v3088_v20 = vsel %vm3066_vm6, %v3023_v7, %v16454_v61  ;;  %v3347_v43 = vsel %vm3326_vm10, %v3282_v6, %v2721_v45  ;;  %v2898_v2 = vsel %vm30_vm0, %v10019_v33, %v16456_v47  ;;  %v16457_v4 = vld [vmem:[#allocation239_spill] sm:$0xff]  ;;  %v3154_v8 = vsel %vm3131_vm7, %v3089_v21, %v16458_v16  ;;  %v16459_v49 = vld [vmem:[#allocation66_spill] sm:$0xff]  ;;  %v16460_v3 = vld [vmem:[#allocation69_spill] sm:$0xff]  ;;  %8523 = vmatmul.mubr.msk.f32.gmra.mrb[18].mxu0 %vm3396_vm11, %v3346_v62 }
 0x407   :  { %v3153_v42 = vsel %vm3131_vm7, %v3088_v20, %v16457_v4  ;;  %v2960_v46 = vsel %vm2936_vm4, %v12213_v5, %v16459_v49  ;;  %v2961_v22 = vsel %vm2936_vm4, %v2896_v18, %v16460_v3  ;;  %v16461_v30 = vld [vmem:[#allocation298_spill] sm:$0xff]  ;;  %v16462_v51 = vld [vmem:[#allocation301_spill] sm:$0xff]  ;;  %v16463_v50 = vld [vmem:[#allocation123_spill] sm:$0xff]  ;;  %8525 = vmatprep.mubr.msk.f32.mxu0 %vm3396_vm11, %v3347_v43 }
 0x408   :  { %v3218_v24 = vsel %vm3196_vm8, %v3153_v42, %v16461_v30  ;;  %v3219_v40 = vsel %vm3196_vm8, %v3154_v8, %v16462_v51  ;;  %v753_v13 = vld [vmem:[#allocation2 + $0x309] sm:$0xff]  ;;  %v752_v59 = vld [vmem:[#allocation2 + $0x301] sm:$0xff]  ;;  %v3025_v54 = vsel %vm3001_vm5, %v2960_v46, %v16463_v50  ;;  %v16465_v5 = vld [vmem:[#allocation359_spill] sm:$0xff]  ;;  %v2729_v43 = vpop.permute.xlu1 %2728  ;;  %v2727_v62 = vpop.permute.xlu0 %2726 }
 0x409   :  { %v16464_v39 = vld [vmem:[#allocation126_spill] sm:$0xff]  ;;  %v3283_v56 = vsel %vm3261_vm9, %v3218_v24, %v16465_v5  ;;  %v16468_v38 = vld [vmem:[#allocation185_spill] sm:$0xff]  ;;  %v10020_v58 = vld [vmem:[#allocation2 + $0x158] sm:$0xff]  ;;  %2538 = vrot.lane.b32.xlu1 %v753_v13, %s10145_s10  ;;  %2536 = vrot.lane.b32.xlu0 %v752_v59, %s10145_s10 }
 0x40a   :  { %v3026_v25 = vsel %vm3001_vm5, %v2961_v22, %v16464_v39  ;;  %v16466_v18 = vld [vmem:[#allocation362_spill] sm:$0xff]  ;;  %v3348_v27 = vsel %vm3326_vm10, %v3283_v56, %v2723_v34  ;;  %v16469_v63 = vld [vmem:[#allocation15_spill] sm:$0xff]  ;;  %v16470_v28 = vld [vmem:[#allocation241_spill] sm:$0xff] }
 0x40b   :  { %v3284_v48 = vsel %vm3261_vm9, %v3219_v40, %v16466_v18  ;;  %v16467_v60 = vld [vmem:[#allocation182_spill] sm:$0xff]  ;;  %v3091_v23 = vsel %vm3066_vm6, %v3026_v25, %v16468_v38  ;;  %v2901_v15 = vsel %vm30_vm0, %v10020_v58, %v16469_v63  ;;  %v16471_v37 = vld [vmem:[#allocation244_spill] sm:$0xff]  ;;  %v16473_v53 = vld [vmem:[#allocation71_spill] sm:$0xff]  ;;  %8526 = vmatmul.mubr.msk.f32.gmra.mrb[20].mxu0 %vm3396_vm11, %v3348_v27 }
 0x40c   :  { %v3090_v44 = vsel %vm3066_vm6, %v3025_v54, %v16467_v60  ;;  %v3349_v36 = vsel %vm3326_vm10, %v3284_v48, %v2725_v26  ;;  %v3156_v31 = vsel %vm3131_vm7, %v3091_v23, %v16471_v37  ;;  %v16472_v9 = vld [vmem:[#allocation68_spill] sm:$0xff]  ;;  %v2963_v32 = vsel %vm2936_vm4, %v2898_v2, %v16473_v53  ;;  %v16475_v19 = vld [vmem:[#allocation303_spill] sm:$0xff]  ;;  %v817_v29 = vld [vmem:[#allocation2 + $0x30a] sm:$0xff]  ;;  %v2733_v23 = vpop.permute.xlu1 %2732 }
 0x40d   :  { %v3155_v12 = vsel %vm3131_vm7, %v3090_v44, %v16470_v28  ;;  %v2962_v1 = vsel %vm2936_vm4, %v12285_v11, %v16472_v9  ;;  %v16474_v7 = vld [vmem:[#allocation300_spill] sm:$0xff]  ;;  %v3221_v55 = vsel %vm3196_vm8, %v3156_v31, %v16475_v19  ;;  %v16476_v6 = vld [vmem:[#allocation125_spill] sm:$0xff]  ;;  %8528 = vmatprep.mubr.msk.f32.mxu0 %vm3396_vm11, %v3349_v36  ;;  %v16481_v2 = vld [vmem:[#allocation187_spill] sm:$0xff]  ;;  %2794 = vrot.lane.b32.xlu1 %v817_v29, %s10146_s2  ;;  %v2731_v36 = vpop.permute.xlu0 %2730 }
 0x40e   :  { %v3220_v41 = vsel %vm3196_vm8, %v3155_v12, %v16474_v7  ;;  %v816_v14 = vld [vmem:[#allocation2 + $0x302] sm:$0xff]  ;;  %v3027_v45 = vsel %vm3001_vm5, %v2962_v1, %v16476_v6  ;;  %v10021_v8 = vld [vmem:[#allocation2 + $0x150] sm:$0xff]  ;;  %v16483_v3 = vld [vmem:[#allocation243_spill] sm:$0xff] }
 0x40f   :  { %v16477_v17 = vld [vmem:[#allocation128_spill] sm:$0xff]  ;;  %v16478_v11 = vld [vmem:[#allocation361_spill] sm:$0xff]  ;;  %v16484_v30 = vld [vmem:[#allocation246_spill] sm:$0xff]  ;;  %2792 = vrot.lane.b32.xlu0 %v816_v14, %s10146_s2 }
 0x410   :  { %v3028_v61 = vsel %vm3001_vm5, %v2963_v32, %v16477_v17  ;;  %v3285_v20 = vsel %vm3261_vm9, %v3220_v41, %v16478_v11  ;;  %v16479_v57 = vld [vmem:[#allocation364_spill] sm:$0xff]  ;;  %v16485_v51 = vld [vmem:[#allocation70_spill] sm:$0xff]  ;;  %v16486_v13 = vld [vmem:[#allocation73_spill] sm:$0xff] }
 0x411   :  { %v3286_v21 = vsel %vm3261_vm9, %v3221_v55, %v16479_v57  ;;  %v16480_v33 = vld [vmem:[#allocation184_spill] sm:$0xff]  ;;  %v3093_v4 = vsel %vm3066_vm6, %v3028_v61, %v16481_v2  ;;  %v3350_v16 = vsel %vm3326_vm10, %v3285_v20, %v2727_v62  ;;  %v2964_v40 = vsel %vm2936_vm4, %v12355_v10, %v16485_v51  ;;  %v16487_v50 = vld [vmem:[#allocation302_spill] sm:$0xff]  ;;  %v16488_v39 = vld [vmem:[#allocation305_spill] sm:$0xff] }
 0x412   :  { %v3092_v47 = vsel %vm3066_vm6, %v3027_v45, %v16480_v33  ;;  %v3351_v42 = vsel %vm3326_vm10, %v3286_v21, %v2729_v43  ;;  %v16482_v49 = vld [vmem:[#allocation16_spill] sm:$0xff]  ;;  %v3158_v24 = vsel %vm3131_vm7, %v3093_v4, %v16484_v30  ;;  %8529 = vmatmul.mubr.msk.f32.gmra.mrb[22].mxu0 %vm3396_vm11, %v3350_v16  ;;  %v16489_v18 = vld [vmem:[#allocation127_spill] sm:$0xff]  ;;  %v16490_v26 = vld [vmem:[#allocation130_spill] sm:$0xff]  ;;  %v2737_v4 = vpop.permute.xlu1 %2736 }
 0x413   :  { %v2900_v46 = vsel %vm30_vm0, %v10021_v8, %v16482_v49  ;;  %v3157_v22 = vsel %vm3131_vm7, %v3092_v47, %v16483_v3  ;;  %v3223_v25 = vsel %vm3196_vm8, %v3158_v24, %v16488_v39  ;;  %v755_v5 = vld [vmem:[#allocation2 + $0x321] sm:$0xff]  ;;  %v754_v56 = vld [vmem:[#allocation2 + $0x319] sm:$0xff]  ;;  %v3029_v48 = vsel %vm3001_vm5, %v2964_v40, %v16489_v18  ;;  %v16492_v44 = vld [vmem:[#allocation366_spill] sm:$0xff]  ;;  %8531 = vmatprep.mubr.msk.f32.mxu0 %vm3396_vm11, %v3351_v42  ;;  %v2735_v42 = vpop.permute.xlu0 %2734 }
 0x414   :  { %v2965_v59 = vsel %vm2936_vm4, %v2900_v46, %v16486_v13  ;;  %v3222_v54 = vsel %vm3196_vm8, %v3157_v22, %v16487_v50  ;;  %v16491_v10 = vld [vmem:[#allocation363_spill] sm:$0xff]  ;;  %v3288_v38 = vsel %vm3261_vm9, %v3223_v25, %v16492_v44  ;;  %v16493_v27 = vld [vmem:[#allocation186_spill] sm:$0xff]  ;;  %v16494_v63 = vld [vmem:[#allocation189_spill] sm:$0xff]  ;;  %2542 = vrot.lane.b32.xlu1 %v755_v5, %s10145_s10  ;;  %2540 = vrot.lane.b32.xlu0 %v754_v56, %s10145_s10 }
 0x415   :  { %v3030_v34 = vsel %vm3001_vm5, %v2965_v59, %v16490_v26  ;;  %v3287_v60 = vsel %vm3261_vm9, %v3222_v54, %v16491_v10  ;;  %v3094_v58 = vsel %vm3066_vm6, %v3029_v48, %v16493_v27  ;;  %v3353_v12 = vsel %vm3326_vm10, %v3288_v38, %v2733_v23  ;;  %v10022_v31 = vld [vmem:[#allocation2 + $0x168] sm:$0xff]  ;;  %v16495_v9 = vld [vmem:[#allocation18_spill] sm:$0xff]  ;;  %v16497_v7 = vld [vmem:[#allocation248_spill] sm:$0xff] }
 0x416   :  { %v3095_v28 = vsel %vm3066_vm6, %v3030_v34, %v16494_v63  ;;  %v3352_v37 = vsel %vm3326_vm10, %v3287_v60, %v2731_v36  ;;  %v2902_v1 = vsel %vm30_vm0, %v10022_v31, %v16495_v9  ;;  %v16496_v53 = vld [vmem:[#allocation245_spill] sm:$0xff]  ;;  %v16498_v19 = vld [vmem:[#allocation72_spill] sm:$0xff]  ;;  %v16499_v29 = vld [vmem:[#allocation75_spill] sm:$0xff]  ;;  %v2741_v27 = vpop.permute.xlu1 %2740 }
 0x417   :  { %v3159_v32 = vsel %vm3131_vm7, %v3094_v58, %v16496_v53  ;;  %v3160_v41 = vsel %vm3131_vm7, %v3095_v28, %v16497_v7  ;;  %v2966_v55 = vsel %vm2936_vm4, %v2901_v15, %v16498_v19  ;;  %v2967_v14 = vsel %vm2936_vm4, %v2902_v1, %v16499_v29  ;;  %v16500_v6 = vld [vmem:[#allocation304_spill] sm:$0xff]  ;;  %v16501_v17 = vld [vmem:[#allocation307_spill] sm:$0xff]  ;;  %8532 = vmatmul.mubr.msk.f32.gmra.mrb[24].mxu0 %vm3396_vm11, %v3352_v37  ;;  %v16502_v57 = vld [vmem:[#allocation129_spill] sm:$0xff]  ;;  %v2739_v58 = vpop.permute.xlu0 %2738 }
 0x418   :  { %v3224_v45 = vsel %vm3196_vm8, %v3159_v32, %v16500_v6  ;;  %v3225_v61 = vsel %vm3196_vm8, %v3160_v41, %v16501_v17  ;;  %v819_v11 = vld [vmem:[#allocation2 + $0x322] sm:$0xff]  ;;  %v818_v20 = vld [vmem:[#allocation2 + $0x31a] sm:$0xff]  ;;  %v3031_v21 = vsel %vm3001_vm5, %v2966_v55, %v16502_v57  ;;  %8534 = vmatprep.mubr.msk.f32.mxu0 %vm3396_vm11, %v3353_v12  ;;  %v10023_v30 = vld [vmem:[#allocation2 + $0x170] sm:$0xff] }
 0x419   :  { %v16503_v43 = vld [vmem:[#allocation132_spill] sm:$0xff]  ;;  %v16504_v15 = vld [vmem:[#allocation365_spill] sm:$0xff]  ;;  %v16507_v49 = vld [vmem:[#allocation191_spill] sm:$0xff]  ;;  %2798 = vrot.lane.b32.xlu1 %v819_v11, %s10146_s2  ;;  %2796 = vrot.lane.b32.xlu0 %v818_v20, %s10146_s2 }
 0x41a   :  { %v3032_v62 = vsel %vm3001_vm5, %v2967_v14, %v16503_v43  ;;  %v3289_v33 = vsel %vm3261_vm9, %v3224_v45, %v16504_v15  ;;  %v16505_v47 = vld [vmem:[#allocation368_spill] sm:$0xff]  ;;  %v16508_v24 = vld [vmem:[#allocation17_spill] sm:$0xff]  ;;  %v280_v40 = vld [vmem:[#allocation2 + $0x1b8] sm:$0xff] }
 0x41b   :  { %v3290_v2 = vsel %vm3261_vm9, %v3225_v61, %v16505_v47  ;;  %v16506_v16 = vld [vmem:[#allocation188_spill] sm:$0xff]  ;;  %v3097_v46 = vsel %vm3066_vm6, %v3032_v62, %v16507_v49  ;;  %v3354_v22 = vsel %vm3326_vm10, %v3289_v33, %v2735_v42  ;;  %v2903_v51 = vsel %vm30_vm0, %v10023_v30, %v16508_v24  ;;  %v16509_v13 = vld [vmem:[#allocation247_spill] sm:$0xff]  ;;  %v16510_v50 = vld [vmem:[#allocation250_spill] sm:$0xff]  ;;  %v2743_v43 = vpop.permute.xlu0 %2742 }
 0x41c   :  { %v3096_v8 = vsel %vm3066_vm6, %v3031_v21, %v16506_v16  ;;  %v3355_v3 = vsel %vm3326_vm10, %v3290_v2, %v2737_v4  ;;  %v3162_v54 = vsel %vm3131_vm7, %v3097_v46, %v16510_v50  ;;  %v279_v39 = vld [vmem:[#allocation2 + $0x1b0] sm:$0xff]  ;;  %v16513_v48 = vld [vmem:[#allocation309_spill] sm:$0xff]  ;;  %8535 = vmatmul.mubr.msk.f32.gmra.mrb[26].mxu0 %vm3396_vm11, %v3354_v22  ;;  %v757_v34 = vld [vmem:[#allocation2 + $0x339] sm:$0xff]  ;;  %v2491_v21 = vpop.permute.xlu1 %2490 }
 0x41d   :  { %v3161_v59 = vsel %vm3131_vm7, %v3096_v8, %v16509_v13  ;;  %v16511_v25 = vld [vmem:[#allocation74_spill] sm:$0xff]  ;;  %v3227_v26 = vsel %vm3196_vm8, %v3162_v54, %v16513_v48  ;;  %v16514_v60 = vld [vmem:[#allocation131_spill] sm:$0xff]  ;;  %8537 = vmatprep.mubr.msk.f32.mxu0 %vm3396_vm11, %v3355_v3  ;;  %v16518_v1 = vld [vmem:[#allocation20_spill] sm:$0xff]  ;;  %2546 = vrot.lane.b32.xlu1 %v757_v34, %s10145_s10 }
 0x41e   :  { %v2968_v5 = vsel %vm2936_vm4, %v2903_v51, %v16511_v25  ;;  %v16512_v56 = vld [vmem:[#allocation306_spill] sm:$0xff]  ;;  %v16515_v38 = vld [vmem:[#allocation367_spill] sm:$0xff]  ;;  %v3292_v36 = vsel %vm3261_vm9, %v3227_v26, %v11982_v52  ;;  %v2904_v53 = vsel %vm30_vm0, %v279_v39, %v16518_v1  ;;  %v16519_v32 = vld [vmem:[#allocation249_spill] sm:$0xff] }
 0x41f   :  { %v3226_v18 = vsel %vm3196_vm8, %v3161_v59, %v16512_v56  ;;  %v756_v10 = vld [vmem:[#allocation2 + $0x331] sm:$0xff]  ;;  %v3033_v44 = vsel %vm3001_vm5, %v2968_v5, %v16514_v60  ;;  %v3357_v12 = vsel %vm3326_vm10, %v3292_v36, %v2741_v27  ;;  %v16520_v7 = vld [vmem:[#allocation76_spill] sm:$0xff]  ;;  %v16521_v19 = vld [vmem:[#allocation77_spill] sm:$0xff]  ;;  %v2745_v13 = vpop.permute.xlu0 %2744 }
 0x420   :  { %v3291_v23 = vsel %vm3261_vm9, %v3226_v18, %v16515_v38  ;;  %v16516_v63 = vld [vmem:[#allocation190_spill] sm:$0xff]  ;;  %v16517_v31 = vld [vmem:[#allocation19_spill] sm:$0xff]  ;;  %2544 = vrot.lane.b32.xlu0 %v756_v10, %s10145_s10  ;;  %v2969_v55 = vsel %vm2936_vm4, %v2904_v53, %v16521_v19  ;;  %v16522_v29 = vld [vmem:[#allocation308_spill] sm:$0xff] }
 0x421   :  { %v3098_v28 = vsel %vm3066_vm6, %v3033_v44, %v16516_v63  ;;  %v3356_v37 = vsel %vm3326_vm10, %v3291_v23, %v2739_v58  ;;  %v2905_v9 = vsel %vm30_vm0, %v280_v40, %v16517_v31  ;;  %v821_v6 = vld [vmem:[#allocation2 + $0x33a] sm:$0xff]  ;;  %v820_v45 = vld [vmem:[#allocation2 + $0x332] sm:$0xff]  ;;  %v16523_v17 = vld [vmem:[#allocation133_spill] sm:$0xff]  ;;  %v2747_v40 = vpop.permute.xlu1 %2746 }
 0x422   :  { %v3163_v52 = vsel %vm3131_vm7, %v3098_v28, %v16519_v32  ;;  %v2970_v41 = vsel %vm2936_vm4, %v2905_v9, %v16520_v7  ;;  %8538 = vmatmul.mubr.msk.f32.gmra.mrb[28].mxu0 %vm3396_vm11, %v3356_v37  ;;  %v16524_v11 = vld [vmem:[#allocation134_spill] sm:$0xff]  ;;  %v16525_v62 = vld [vmem:[#allocation192_spill] sm:$0xff]  ;;  %v16526_v33 = vld [vmem:[#allocation193_spill] sm:$0xff]  ;;  %2802 = vrot.lane.b32.xlu1 %v821_v6, %s10146_s2 }
 0x423   :  { %v3228_v14 = vsel %vm3196_vm8, %v3163_v52, %v16522_v29  ;;  %v3035_v61 = vsel %vm3001_vm5, %v2970_v41, %v16523_v17  ;;  %v3034_v20 = vsel %vm3001_vm5, %v2969_v55, %v16524_v11  ;;  %8540 = vmatprep.mubr.msk.f32.mxu0 %vm3396_vm11, %v3357_v12  ;;  %v16527_v4 = vld [vmem:[#allocation251_spill] sm:$0xff]  ;;  %v16528_v16 = vld [vmem:[#allocation252_spill] sm:$0xff]  ;;  %v758_v30 = vld [vmem:[#allocation2 + $0x349] sm:$0xff]  ;;  %v2493_v58 = vpop.permute.xlu0 %2492 }
 0x424   :  { %v3293_v57 = vsel %vm3261_vm9, %v3228_v14, %v11980_v0  ;;  %v3100_v15 = vsel %vm3066_vm6, %v3035_v61, %v16525_v62  ;;  %v3099_v47 = vsel %vm3066_vm6, %v3034_v20, %v16526_v33  ;;  %2800 = vrot.lane.b32.xlu0 %v820_v45, %s10146_s2  ;;  %v16529_v0 = vld [vmem:[#allocation310_spill] sm:$0xff]  ;;  %v16530_v46 = vld [vmem:[#allocation311_spill] sm:$0xff]  ;;  %v16531_v39 = vld [vmem:[#allocation21_spill] sm:$0xff] }
 0x425   :  { %v3358_v2 = vsel %vm3326_vm10, %v3293_v57, %v2743_v43  ;;  %v3165_v42 = vsel %vm3131_vm7, %v3100_v15, %v16527_v4  ;;  %v3164_v8 = vsel %vm3131_vm7, %v3099_v47, %v16528_v16  ;;  %v759_v22 = vld [vmem:[#allocation2 + $0x351] sm:$0xff]  ;;  %v10025_v5 = vld [vmem:[#allocation2 + $0x1c8] sm:$0xff]  ;;  %v16536_v23 = vld [vmem:[#allocation136_spill] sm:$0xff]  ;;  %v2495_v27 = vpop.permute.xlu1 %2494 }
 0x426   :  { %v3230_v49 = vsel %vm3196_vm8, %v3165_v42, %v16529_v0  ;;  %v3229_v3 = vsel %vm3196_vm8, %v3164_v8, %v16530_v46  ;;  %8541 = vmatmul.mubr.msk.f32.gmra.mrb[30].mxu0 %vm3396_vm11, %v3358_v2  ;;  %v10024_v54 = vld [vmem:[#allocation2 + $0x1d0] sm:$0xff]  ;;  %2550 = vrot.lane.b32.xlu1 %v759_v22, %s10145_s10  ;;  %v16534_v26 = vld [vmem:[#allocation79_spill] sm:$0xff]  ;;  %v16539_v31 = vld [vmem:[#allocation253_spill] sm:$0xff] }
 0x427   :  { %v3294_v24 = vsel %vm3261_vm9, %v3229_v3, %v12022_v35  ;;  %v3295_v51 = vsel %vm3261_vm9, %v3230_v49, %v2491_v21  ;;  %v2907_v25 = vsel %vm30_vm0, %v10024_v54, %v16531_v39  ;;  %v16532_v56 = vld [vmem:[#allocation22_spill] sm:$0xff]  ;;  %v16535_v44 = vld [vmem:[#allocation135_spill] sm:$0xff]  ;;  %v16541_v32 = vld [vmem:[#allocation312_spill] sm:$0xff]  ;;  %v2749_v14 = vpop.permute.xlu0 %2748 }
 0x428   :  { %v3360_v59 = vsel %vm3326_vm10, %v3295_v51, %v2747_v40  ;;  %v3359_v50 = vsel %vm3326_vm10, %v3294_v24, %v2745_v13  ;;  %v2906_v18 = vsel %vm30_vm0, %v10025_v5, %v16532_v56  ;;  %2548 = vrot.lane.b32.xlu0 %v758_v30, %s10145_s10  ;;  %v16533_v35 = vld [vmem:[#allocation78_spill] sm:$0xff]  ;;  %v16538_v12 = vld [vmem:[#allocation195_spill] sm:$0xff]  ;;  %v16542_v7 = vld [vmem:[#allocation313_spill] sm:$0xff] }
 0x429   :  { %v2972_v48 = vsel %vm2936_vm4, %v2907_v25, %v16533_v35  ;;  %v2971_v34 = vsel %vm2936_vm4, %v2906_v18, %v16534_v26  ;;  %8543 = vmatprep.mubr.msk.f32.mxu0 %vm3396_vm11, %v3359_v50  ;;  %v823_v10 = vld [vmem:[#allocation2 + $0x352] sm:$0xff]  ;;  %v822_v60 = vld [vmem:[#allocation2 + $0x34a] sm:$0xff]  ;;  %v2751_v29 = vpop.permute.xlu1 %2750  ;;  %v10027_v20 = vld [vmem:[#allocation2 + $0x1e0] sm:$0xff] }
 0x42a   :  { %v3037_v38 = vsel %vm3001_vm5, %v2972_v48, %v16535_v44  ;;  %v3036_v36 = vsel %vm3001_vm5, %v2971_v34, %v16536_v23  ;;  %8544 = vmatmul.mubr.msk.f32.gmra.mrb[32].mxu0 %vm3396_vm11, %v3360_v59  ;;  %v16537_v63 = vld [vmem:[#allocation194_spill] sm:$0xff]  ;;  %2806 = vrot.lane.b32.xlu1 %v823_v10, %s10146_s2  ;;  %v10026_v17 = vld [vmem:[#allocation2 + $0x1e8] sm:$0xff]  ;;  %v16543_v61 = vld [vmem:[#allocation23_spill] sm:$0xff] }
 0x42b   :  { %v3102_v28 = vsel %vm3066_vm6, %v3037_v38, %v16537_v63  ;;  %v3101_v37 = vsel %vm3066_vm6, %v3036_v36, %v16538_v12  ;;  %v16540_v1 = vld [vmem:[#allocation254_spill] sm:$0xff]  ;;  %v2909_v11 = vsel %vm30_vm0, %v10026_v17, %v16543_v61  ;;  %v16544_v57 = vld [vmem:[#allocation24_spill] sm:$0xff]  ;;  %v16546_v15 = vld [vmem:[#allocation81_spill] sm:$0xff]  ;;  %v2497_v8 = vpop.permute.xlu0 %2496 }
 0x42c   :  { %v3167_v9 = vsel %vm3131_vm7, %v3102_v28, %v16539_v31  ;;  %v3166_v53 = vsel %vm3131_vm7, %v3101_v37, %v16540_v1  ;;  %2804 = vrot.lane.b32.xlu0 %v822_v60, %s10146_s2  ;;  %v2908_v21 = vsel %vm30_vm0, %v10027_v20, %v16544_v57  ;;  %v16545_v43 = vld [vmem:[#allocation80_spill] sm:$0xff]  ;;  %v16547_v47 = vld [vmem:[#allocation137_spill] sm:$0xff]  ;;  %v16548_v4 = vld [vmem:[#allocation138_spill] sm:$0xff] }
 0x42d   :  { %v3232_v52 = vsel %vm3196_vm8, %v3167_v9, %v16541_v32  ;;  %v3231_v41 = vsel %vm3196_vm8, %v3166_v53, %v16542_v7  ;;  %v2974_v62 = vsel %vm2936_vm4, %v2909_v11, %v16545_v43  ;;  %v2973_v33 = vsel %vm2936_vm4, %v2908_v21, %v16546_v15  ;;  %v2499_v16 = vpop.permute.xlu1 %2498  ;;  %v16549_v0 = vld [vmem:[#allocation196_spill] sm:$0xff]  ;;  %v16550_v46 = vld [vmem:[#allocation197_spill] sm:$0xff]  ;;  %v16551_v22 = vld [vmem:[#allocation255_spill] sm:$0xff] }
 0x42e   :  { %v3297_v19 = vsel %vm3261_vm9, %v3232_v52, %v2495_v27  ;;  %v3296_v55 = vsel %vm3261_vm9, %v3231_v41, %v2493_v58  ;;  %v3039_v2 = vsel %vm3001_vm5, %v2974_v62, %v16547_v47  ;;  %v3038_v42 = vsel %vm3001_vm5, %v2973_v33, %v16548_v4  ;;  %v16552_v24 = vld [vmem:[#allocation256_spill] sm:$0xff]  ;;  %v16553_v40 = vld [vmem:[#allocation314_spill] sm:$0xff]  ;;  %v16554_v59 = vld [vmem:[#allocation315_spill] sm:$0xff] }
 0x42f   :  { %v3362_v6 = vsel %vm3326_vm10, %v3297_v19, %v2751_v29  ;;  %v3361_v45 = vsel %vm3326_vm10, %v3296_v55, %v2749_v14  ;;  %v3104_v49 = vsel %vm3066_vm6, %v3039_v2, %v16549_v0  ;;  %v3103_v3 = vsel %vm3066_vm6, %v3038_v42, %v16550_v46  ;;  %v2753_v5 = vpop.permute.xlu0 %2752  ;;  %v10028_v35 = vld [vmem:[#allocation2 + $0x200] sm:$0xff]  ;;  %v16555_v48 = vld [vmem:[#allocation25_spill] sm:$0xff]  ;;  %v10029_v34 = vld [vmem:[#allocation2 + $0x1f8] sm:$0xff] }
 0x430   :  { %8546 = vmatprep.mubr.msk.f32.mxu0 %vm3396_vm11, %v3361_v45  ;;  %v3169_v30 = vsel %vm3131_vm7, %v3104_v49, %v16551_v22  ;;  %v3168_v51 = vsel %vm3131_vm7, %v3103_v3, %v16552_v24  ;;  %v2911_v26 = vsel %vm30_vm0, %v10028_v35, %v16555_v48  ;;  %v16556_v10 = vld [vmem:[#allocation26_spill] sm:$0xff]  ;;  %v16558_v23 = vld [vmem:[#allocation83_spill] sm:$0xff]  ;;  %v16560_v63 = vld [vmem:[#allocation140_spill] sm:$0xff] }
 0x431   :  { %8547 = vmatmul.mubr.msk.f32.gmra.mrb[34].mxu0 %vm3396_vm11, %v3362_v6  ;;  %v3234_v13 = vsel %vm3196_vm8, %v3169_v30, %v16553_v40  ;;  %v3233_v50 = vsel %vm3196_vm8, %v3168_v51, %v16554_v59  ;;  %v2755_v25 = vpop.permute.xlu1 %2754  ;;  %v2910_v60 = vsel %vm30_vm0, %v10029_v34, %v16556_v10  ;;  %v16557_v44 = vld [vmem:[#allocation82_spill] sm:$0xff]  ;;  %v16559_v27 = vld [vmem:[#allocation139_spill] sm:$0xff]  ;;  %v16563_v32 = vld [vmem:[#allocation257_spill] sm:$0xff] }
 0x432   :  { %v3299_v54 = vsel %vm3261_vm9, %v3234_v13, %v2499_v16  ;;  %v3298_v39 = vsel %vm3261_vm9, %v3233_v50, %v2497_v8  ;;  %v2976_v38 = vsel %vm2936_vm4, %v2911_v26, %v16557_v44  ;;  %v2975_v36 = vsel %vm2936_vm4, %v2910_v60, %v16558_v23  ;;  %v16561_v31 = vld [vmem:[#allocation198_spill] sm:$0xff]  ;;  %v16562_v1 = vld [vmem:[#allocation199_spill] sm:$0xff]  ;;  %v16565_v19 = vld [vmem:[#allocation316_spill] sm:$0xff] }
 0x433   :  { %v3364_v56 = vsel %vm3326_vm10, %v3299_v54, %v2755_v25  ;;  %v3363_v18 = vsel %vm3326_vm10, %v3298_v39, %v2753_v5  ;;  %v3041_v58 = vsel %vm3001_vm5, %v2976_v38, %v16559_v27  ;;  %v3040_v28 = vsel %vm3001_vm5, %v2975_v36, %v16560_v63  ;;  %v2501_v37 = vpop.permute.xlu0 %2500  ;;  %v16564_v7 = vld [vmem:[#allocation258_spill] sm:$0xff]  ;;  %v16566_v29 = vld [vmem:[#allocation317_spill] sm:$0xff]  ;;  %v10030_v57 = vld [vmem:[#allocation2 + $0x218] sm:$0xff] }
 0x434   :  { %8549 = vmatprep.mubr.msk.f32.mxu0 %vm3396_vm11, %v3363_v18  ;;  %v3106_v9 = vsel %vm3066_vm6, %v3041_v58, %v16561_v31  ;;  %v3105_v53 = vsel %vm3066_vm6, %v3040_v28, %v16562_v1  ;;  %v16567_v21 = vld [vmem:[#allocation27_spill] sm:$0xff]  ;;  %v10031_v62 = vld [vmem:[#allocation2 + $0x210] sm:$0xff]  ;;  %v16568_v15 = vld [vmem:[#allocation28_spill] sm:$0xff] }
 0x435   :  { %8550 = vmatmul.mubr.msk.f32.gmra.mrb[36].mxu0 %vm3396_vm11, %v3364_v56  ;;  %v2503_v12 = vpop.permute.xlu1 %2502  ;;  %v3171_v52 = vsel %vm3131_vm7, %v3106_v9, %v16563_v32  ;;  %v3170_v41 = vsel %vm3131_vm7, %v3105_v53, %v16564_v7  ;;  %v2913_v43 = vsel %vm30_vm0, %v10030_v57, %v16567_v21  ;;  %v2912_v33 = vsel %vm30_vm0, %v10031_v62, %v16568_v15  ;;  %v16569_v47 = vld [vmem:[#allocation84_spill] sm:$0xff]  ;;  %v16570_v4 = vld [vmem:[#allocation85_spill] sm:$0xff]  ;;  %v16572_v0 = vld [vmem:[#allocation142_spill] sm:$0xff] }
 0x436   :  { %v3236_v55 = vsel %vm3196_vm8, %v3171_v52, %v16565_v19  ;;  %v3235_v14 = vsel %vm3196_vm8, %v3170_v41, %v16566_v29  ;;  %v2978_v2 = vsel %vm2936_vm4, %v2913_v43, %v16569_v47  ;;  %v2977_v42 = vsel %vm2936_vm4, %v2912_v33, %v16570_v4  ;;  %v16571_v16 = vld [vmem:[#allocation141_spill] sm:$0xff]  ;;  %v16573_v22 = vld [vmem:[#allocation200_spill] sm:$0xff]  ;;  %v16575_v40 = vld [vmem:[#allocation259_spill] sm:$0xff] }
 0x437   :  { %v3301_v6 = vsel %vm3261_vm9, %v3236_v55, %v2503_v12  ;;  %v3300_v45 = vsel %vm3261_vm9, %v3235_v14, %v2501_v37  ;;  %v2757_v61 = vpop.permute.xlu0 %2756  ;;  %v3043_v8 = vsel %vm3001_vm5, %v2978_v2, %v16571_v16  ;;  %v3042_v49 = vsel %vm3001_vm5, %v2977_v42, %v16572_v0  ;;  %v16574_v24 = vld [vmem:[#allocation201_spill] sm:$0xff]  ;;  %v16576_v59 = vld [vmem:[#allocation260_spill] sm:$0xff]  ;;  %v16577_v54 = vld [vmem:[#allocation318_spill] sm:$0xff] }
 0x438   :  { %v3365_v20 = vsel %vm3326_vm10, %v3300_v45, %v2757_v61  ;;  %v3108_v30 = vsel %vm3066_vm6, %v3043_v8, %v16573_v22  ;;  %v3107_v51 = vsel %vm3066_vm6, %v3042_v49, %v16574_v24  ;;  %v16578_v25 = vld [vmem:[#allocation319_spill] sm:$0xff]  ;;  %v10032_v10 = vld [vmem:[#allocation2 + $0x230] sm:$0xff]  ;;  %v16579_v60 = vld [vmem:[#allocation29_spill] sm:$0xff] }
 0x439   :  { %v2759_v17 = vpop.permute.xlu1 %2758  ;;  %8552 = vmatprep.mubr.msk.f32.mxu0 %vm3396_vm11, %v3365_v20  ;;  %v3173_v13 = vsel %vm3131_vm7, %v3108_v30, %v16575_v40  ;;  %v3172_v50 = vsel %vm3131_vm7, %v3107_v51, %v16576_v59  ;;  %v2915_v44 = vsel %vm30_vm0, %v10032_v10, %v16579_v60  ;;  %v10033_v38 = vld [vmem:[#allocation2 + $0x228] sm:$0xff]  ;;  %v16580_v23 = vld [vmem:[#allocation30_spill] sm:$0xff]  ;;  %v16582_v63 = vld [vmem:[#allocation87_spill] sm:$0xff] }
 0x43a   :  { %v3366_v11 = vsel %vm3326_vm10, %v3301_v6, %v2759_v17  ;;  %v3238_v39 = vsel %vm3196_vm8, %v3173_v13, %v16577_v54  ;;  %v3237_v5 = vsel %vm3196_vm8, %v3172_v50, %v16578_v25  ;;  %v2914_v36 = vsel %vm30_vm0, %v10033_v38, %v16580_v23  ;;  %v16581_v27 = vld [vmem:[#allocation86_spill] sm:$0xff]  ;;  %v16583_v12 = vld [vmem:[#allocation143_spill] sm:$0xff]  ;;  %v16584_v31 = vld [vmem:[#allocation144_spill] sm:$0xff] }
 0x43b   :  { %8553 = vmatmul.mubr.msk.f32.gmra.mrb[38].mxu0 %vm3396_vm11, %v3366_v11  ;;  %v2505_v3 = vpop.permute.xlu0 %2504  ;;  %v2980_v58 = vsel %vm2936_vm4, %v2915_v44, %v16581_v27  ;;  %v2979_v28 = vsel %vm2936_vm4, %v2914_v36, %v16582_v63  ;;  %v16585_v32 = vld [vmem:[#allocation202_spill] sm:$0xff]  ;;  %v16586_v7 = vld [vmem:[#allocation203_spill] sm:$0xff]  ;;  %v16587_v19 = vld [vmem:[#allocation261_spill] sm:$0xff] }
 0x43c   :  { %v3302_v18 = vsel %vm3261_vm9, %v3237_v5, %v2505_v3  ;;  %v3045_v37 = vsel %vm3001_vm5, %v2980_v58, %v16583_v12  ;;  %v3044_v9 = vsel %vm3001_vm5, %v2979_v28, %v16584_v31  ;;  %v16588_v29 = vld [vmem:[#allocation262_spill] sm:$0xff]  ;;  %v16589_v6 = vld [vmem:[#allocation320_spill] sm:$0xff]  ;;  %v16590_v17 = vld [vmem:[#allocation321_spill] sm:$0xff] }
 0x43d   :  { %v2507_v46 = vpop.permute.xlu1 %2506  ;;  %v3110_v52 = vsel %vm3066_vm6, %v3045_v37, %v16585_v32  ;;  %v3109_v41 = vsel %vm3066_vm6, %v3044_v9, %v16586_v7  ;;  %v10034_v15 = vld [vmem:[#allocation2 + $0x248] sm:$0xff]  ;;  %v16591_v33 = vld [vmem:[#allocation31_spill] sm:$0xff]  ;;  %v10035_v2 = vld [vmem:[#allocation2 + $0x240] sm:$0xff] }
 0x43e   :  { %v3303_v56 = vsel %vm3261_vm9, %v3238_v39, %v2507_v46  ;;  %v3175_v55 = vsel %vm3131_vm7, %v3110_v52, %v16587_v19  ;;  %v3174_v14 = vsel %vm3131_vm7, %v3109_v41, %v16588_v29  ;;  %v2917_v47 = vsel %vm30_vm0, %v10034_v15, %v16591_v33  ;;  %v16592_v4 = vld [vmem:[#allocation32_spill] sm:$0xff]  ;;  %v16594_v0 = vld [vmem:[#allocation89_spill] sm:$0xff]  ;;  %v16596_v22 = vld [vmem:[#allocation146_spill] sm:$0xff] }
 0x43f   :  { %v2761_v48 = vpop.permute.xlu0 %2760  ;;  %v3240_v45 = vsel %vm3196_vm8, %v3175_v55, %v16589_v6  ;;  %v3239_v61 = vsel %vm3196_vm8, %v3174_v14, %v16590_v17  ;;  %v2916_v42 = vsel %vm30_vm0, %v10035_v2, %v16592_v4  ;;  %v16593_v16 = vld [vmem:[#allocation88_spill] sm:$0xff]  ;;  %v16595_v46 = vld [vmem:[#allocation145_spill] sm:$0xff]  ;;  %v16599_v54 = vld [vmem:[#allocation263_spill] sm:$0xff] }
 0x440   :  { %v3367_v34 = vsel %vm3326_vm10, %v3302_v18, %v2761_v48  ;;  %v2982_v8 = vsel %vm2936_vm4, %v2917_v47, %v16593_v16  ;;  %v2981_v49 = vsel %vm2936_vm4, %v2916_v42, %v16594_v0  ;;  %v16597_v40 = vld [vmem:[#allocation204_spill] sm:$0xff]  ;;  %v16598_v59 = vld [vmem:[#allocation205_spill] sm:$0xff]  ;;  %v10037_v58 = vld [vmem:[#allocation2 + $0x258] sm:$0xff] }
 0x441   :  { %v2763_v35 = vpop.permute.xlu1 %2762  ;;  %8555 = vmatprep.mubr.msk.f32.mxu0 %vm3396_vm11, %v3367_v34  ;;  %v3047_v3 = vsel %vm3001_vm5, %v2982_v8, %v16595_v46  ;;  %v3046_v30 = vsel %vm3001_vm5, %v2981_v49, %v16596_v22  ;;  %v16600_v25 = vld [vmem:[#allocation264_spill] sm:$0xff]  ;;  %v16603_v36 = vld [vmem:[#allocation33_spill] sm:$0xff]  ;;  %v16604_v63 = vld [vmem:[#allocation34_spill] sm:$0xff] }
 0x442   :  { %v3368_v26 = vsel %vm3326_vm10, %v3303_v56, %v2763_v35  ;;  %v3112_v13 = vsel %vm3066_vm6, %v3047_v3, %v16597_v40  ;;  %v3111_v50 = vsel %vm3066_vm6, %v3046_v30, %v16598_v59  ;;  %v16601_v56 = vld [vmem:[#allocation322_spill] sm:$0xff]  ;;  %v16602_v35 = vld [vmem:[#allocation323_spill] sm:$0xff]  ;;  %v10036_v23 = vld [vmem:[#allocation2 + $0x260] sm:$0xff]  ;;  %v2918_v28 = vsel %vm30_vm0, %v10037_v58, %v16604_v63 }
 0x443   :  { %8556 = vmatmul.mubr.msk.f32.gmra.mrb[40].mxu0 %vm3396_vm11, %v3368_v26  ;;  %v2509_v53 = vpop.permute.xlu0 %2508  ;;  %v3177_v39 = vsel %vm3131_vm7, %v3112_v13, %v16599_v54  ;;  %v3176_v5 = vsel %vm3131_vm7, %v3111_v50, %v16600_v25  ;;  %v2919_v27 = vsel %vm30_vm0, %v10036_v23, %v16603_v36  ;;  %v16605_v12 = vld [vmem:[#allocation90_spill] sm:$0xff]  ;;  %v16606_v31 = vld [vmem:[#allocation91_spill] sm:$0xff]  ;;  %v16608_v32 = vld [vmem:[#allocation148_spill] sm:$0xff] }
 0x444   :  { %v3304_v20 = vsel %vm3261_vm9, %v3239_v61, %v2509_v53  ;;  %v3242_v18 = vsel %vm3196_vm8, %v3177_v39, %v16601_v56  ;;  %v3241_v48 = vsel %vm3196_vm8, %v3176_v5, %v16602_v35  ;;  %v2984_v37 = vsel %vm2936_vm4, %v2919_v27, %v16605_v12  ;;  %v16609_v19 = vld [vmem:[#allocation206_spill] sm:$0xff]  ;;  %v16610_v29 = vld [vmem:[#allocation207_spill] sm:$0xff]  ;;  %v16611_v6 = vld [vmem:[#allocation265_spill] sm:$0xff] }
 0x445   :  { %v2511_v1 = vpop.permute.xlu1 %2510  ;;  %v2983_v9 = vsel %vm2936_vm4, %v2918_v28, %v16606_v31  ;;  %v16612_v17 = vld [vmem:[#allocation266_spill] sm:$0xff]  ;;  %v10038_v4 = vld [vmem:[#allocation2 + $0x278] sm:$0xff]  ;;  %v16616_v0 = vld [vmem:[#allocation36_spill] sm:$0xff] }
 0x446   :  { %v3305_v11 = vsel %vm3261_vm9, %v3240_v45, %v2511_v1  ;;  %v16607_v1 = vld [vmem:[#allocation147_spill] sm:$0xff]  ;;  %v3048_v52 = vsel %vm3001_vm5, %v2983_v9, %v16608_v32  ;;  %v10039_v8 = vld [vmem:[#allocation2 + $0x270] sm:$0xff]  ;;  %v16617_v46 = vld [vmem:[#allocation92_spill] sm:$0xff] }
 0x447   :  { %v2765_v21 = vpop.permute.xlu0 %2764  ;;  %v3049_v53 = vsel %vm3001_vm5, %v2984_v37, %v16607_v1  ;;  %v3113_v14 = vsel %vm3066_vm6, %v3048_v52, %v16610_v29  ;;  %v16615_v42 = vld [vmem:[#allocation35_spill] sm:$0xff]  ;;  %v2920_v49 = vsel %vm30_vm0, %v10039_v8, %v16616_v0  ;;  %v16618_v22 = vld [vmem:[#allocation93_spill] sm:$0xff]  ;;  %v16620_v40 = vld [vmem:[#allocation150_spill] sm:$0xff] }
 0x448   :  { %v3369_v62 = vsel %vm3326_vm10, %v3304_v20, %v2765_v21  ;;  %v3114_v55 = vsel %vm3066_vm6, %v3049_v53, %v16609_v19  ;;  %v3178_v61 = vsel %vm3131_vm7, %v3113_v14, %v16612_v17  ;;  %v2921_v16 = vsel %vm30_vm0, %v10038_v4, %v16615_v42  ;;  %v16621_v54 = vld [vmem:[#allocation208_spill] sm:$0xff]  ;;  %v16622_v25 = vld [vmem:[#allocation209_spill] sm:$0xff]  ;;  %v16623_v56 = vld [vmem:[#allocation267_spill] sm:$0xff] }
 0x449   :  { %v2767_v57 = vpop.permute.xlu1 %2766  ;;  %8558 = vmatprep.mubr.msk.f32.mxu0 %vm3396_vm11, %v3369_v62  ;;  %v3179_v45 = vsel %vm3131_vm7, %v3114_v55, %v16611_v6  ;;  %v2986_v3 = vsel %vm2936_vm4, %v2921_v16, %v16617_v46  ;;  %v2985_v30 = vsel %vm2936_vm4, %v2920_v49, %v16618_v22  ;;  %v16624_v35 = vld [vmem:[#allocation268_spill] sm:$0xff]  ;;  %v10040_v63 = vld [vmem:[#allocation2 + $0x290] sm:$0xff]  ;;  %v16627_v28 = vld [vmem:[#allocation37_spill] sm:$0xff] }
 0x44a   :  { %v3370_v43 = vsel %vm3326_vm10, %v3305_v11, %v2767_v57  ;;  %v16613_v11 = vld [vmem:[#allocation324_spill] sm:$0xff]  ;;  %v16614_v57 = vld [vmem:[#allocation325_spill] sm:$0xff]  ;;  %v3050_v13 = vsel %vm3001_vm5, %v2985_v30, %v16620_v40  ;;  %v2923_v12 = vsel %vm30_vm0, %v10040_v63, %v16627_v28  ;;  %v16628_v31 = vld [vmem:[#allocation38_spill] sm:$0xff] }
 0x44b   :  { %8559 = vmatmul.mubr.msk.f32.gmra.mrb[42].mxu0 %vm3396_vm11, %v3370_v43  ;;  %v2513_v51 = vpop.permute.xlu0 %2512  ;;  %v3244_v20 = vsel %vm3196_vm8, %v3179_v45, %v16613_v11  ;;  %v3243_v21 = vsel %vm3196_vm8, %v3178_v61, %v16614_v57  ;;  %v3115_v5 = vsel %vm3066_vm6, %v3050_v13, %v16622_v25  ;;  %v10041_v37 = vld [vmem:[#allocation2 + $0x288] sm:$0xff]  ;;  %v16629_v1 = vld [vmem:[#allocation94_spill] sm:$0xff]  ;;  %v16630_v32 = vld [vmem:[#allocation95_spill] sm:$0xff] }
 0x44c   :  { %v3306_v34 = vsel %vm3261_vm9, %v3241_v48, %v2513_v51  ;;  %v3180_v48 = vsel %vm3131_vm7, %v3115_v5, %v16624_v35  ;;  %v2922_v9 = vsel %vm30_vm0, %v10041_v37, %v16628_v31  ;;  %v2988_v53 = vsel %vm2936_vm4, %v2923_v12, %v16629_v1  ;;  %v16632_v19 = vld [vmem:[#allocation152_spill] sm:$0xff]  ;;  %v16633_v6 = vld [vmem:[#allocation210_spill] sm:$0xff]  ;;  %v16634_v17 = vld [vmem:[#allocation211_spill] sm:$0xff] }
 0x44d   :  { %v2515_v24 = vpop.permute.xlu1 %2514  ;;  %v2987_v52 = vsel %vm2936_vm4, %v2922_v9, %v16630_v32  ;;  %v16635_v11 = vld [vmem:[#allocation269_spill] sm:$0xff]  ;;  %v16636_v57 = vld [vmem:[#allocation270_spill] sm:$0xff]  ;;  %v16639_v49 = vld [vmem:[#allocation39_spill] sm:$0xff] }
 0x44e   :  { %v3307_v26 = vsel %vm3261_vm9, %v3242_v18, %v2515_v24  ;;  %v16619_v24 = vld [vmem:[#allocation149_spill] sm:$0xff]  ;;  %v3052_v55 = vsel %vm3001_vm5, %v2987_v52, %v16632_v19  ;;  %v16640_v22 = vld [vmem:[#allocation40_spill] sm:$0xff]  ;;  %v16652_v32 = vld [vmem:[#allocation42_spill] sm:$0xff] }
 0x44f   :  { %v2769_v60 = vpop.permute.xlu0 %2768  ;;  %v3051_v51 = vsel %vm3001_vm5, %v2986_v3, %v16619_v24  ;;  %v3117_v61 = vsel %vm3066_vm6, %v3052_v55, %v16634_v17  ;;  %v10042_v0 = vld [vmem:[#allocation2 + $0x2a8] sm:$0xff]  ;;  %v10043_v3 = vld [vmem:[#allocation2 + $0x2a0] sm:$0xff]  ;;  %v16654_v19 = vld [vmem:[#allocation99_spill] sm:$0xff] }
 0x450   :  { %v3371_v38 = vsel %vm3326_vm10, %v3306_v34, %v2769_v60  ;;  %v3116_v39 = vsel %vm3066_vm6, %v3051_v51, %v16621_v54  ;;  %v2925_v46 = vsel %vm30_vm0, %v10042_v0, %v16639_v49  ;;  %v2924_v30 = vsel %vm30_vm0, %v10043_v3, %v16640_v22  ;;  %v16641_v24 = vld [vmem:[#allocation96_spill] sm:$0xff]  ;;  %v16642_v40 = vld [vmem:[#allocation97_spill] sm:$0xff]  ;;  %v16644_v54 = vld [vmem:[#allocation154_spill] sm:$0xff] }
 0x451   :  { %v2771_v10 = vpop.permute.xlu1 %2770  ;;  %8561 = vmatprep.mubr.msk.f32.mxu0 %vm3396_vm11, %v3371_v38  ;;  %v3181_v18 = vsel %vm3131_vm7, %v3116_v39, %v16623_v56  ;;  %v2990_v51 = vsel %vm2936_vm4, %v2925_v46, %v16641_v24  ;;  %v2989_v13 = vsel %vm2936_vm4, %v2924_v30, %v16642_v40  ;;  %v16645_v56 = vld [vmem:[#allocation212_spill] sm:$0xff]  ;;  %v16646_v35 = vld [vmem:[#allocation213_spill] sm:$0xff]  ;;  %v10046_v22 = vld [vmem:[#allocation2 + $0x2d8] sm:$0xff] }
 0x452   :  { %v3372_v44 = vsel %vm3326_vm10, %v3307_v26, %v2771_v10  ;;  %v16625_v26 = vld [vmem:[#allocation326_spill] sm:$0xff]  ;;  %v16626_v10 = vld [vmem:[#allocation327_spill] sm:$0xff]  ;;  %v3054_v39 = vsel %vm3001_vm5, %v2989_v13, %v16644_v54  ;;  %v10044_v31 = vld [vmem:[#allocation2 + $0x2c0] sm:$0xff] }
 0x453   :  { %8562 = vmatmul.mubr.msk.f32.gmra.mrb[44].mxu0 %vm3396_vm11, %v3372_v44  ;;  %v2517_v41 = vpop.permute.xlu0 %2516  ;;  %v3246_v34 = vsel %vm3196_vm8, %v3181_v18, %v16625_v26  ;;  %v3245_v60 = vsel %vm3196_vm8, %v3180_v48, %v16626_v10  ;;  %v3119_v48 = vsel %vm3066_vm6, %v3054_v39, %v16646_v35  ;;  %v16647_v26 = vld [vmem:[#allocation271_spill] sm:$0xff]  ;;  %v16648_v10 = vld [vmem:[#allocation272_spill] sm:$0xff]  ;;  %v16651_v9 = vld [vmem:[#allocation41_spill] sm:$0xff] }
 0x454   :  { %v3308_v62 = vsel %vm3261_vm9, %v3243_v21, %v2517_v41  ;;  %v3182_v21 = vsel %vm3131_vm7, %v3117_v61, %v16636_v57  ;;  %v2927_v1 = vsel %vm30_vm0, %v10044_v31, %v16651_v9  ;;  %v16658_v57 = vld [vmem:[#allocation215_spill] sm:$0xff]  ;;  %v16664_v40 = vld [vmem:[#allocation44_spill] sm:$0xff]  ;;  %v16666_v54 = vld [vmem:[#allocation101_spill] sm:$0xff] }
 0x455   :  { %v2519_v7 = vpop.permute.xlu1 %2518  ;;  %v16663_v30 = vld [vmem:[#allocation43_spill] sm:$0xff] }
 0x456   :  { %v3309_v43 = vsel %vm3261_vm9, %v3244_v20, %v2519_v7  ;;  %v16631_v7 = vld [vmem:[#allocation151_spill] sm:$0xff]  ;;  %v2929_v24 = vsel %vm30_vm0, %v10046_v22, %v16663_v30 }
 0x457   :  { %v2773_v33 = vpop.permute.xlu0 %2772  ;;  %v3053_v41 = vsel %vm3001_vm5, %v2988_v53, %v16631_v7  ;;  %v10045_v53 = vld [vmem:[#allocation2 + $0x2b8] sm:$0xff]  ;;  %v16653_v7 = vld [vmem:[#allocation98_spill] sm:$0xff] }
 0x458   :  { %v3373_v2 = vsel %vm3326_vm10, %v3308_v62, %v2773_v33  ;;  %v3118_v45 = vsel %vm3066_vm6, %v3053_v41, %v16633_v6  ;;  %v2926_v52 = vsel %vm30_vm0, %v10045_v53, %v16652_v32  ;;  %v2992_v41 = vsel %vm2936_vm4, %v2927_v1, %v16653_v7  ;;  %v16656_v6 = vld [vmem:[#allocation156_spill] sm:$0xff]  ;;  %v10048_v32 = vld [vmem:[#allocation2 + $0x2f0] sm:$0xff] }
 0x459   :  { %v2775_v15 = vpop.permute.xlu1 %2774  ;;  %8564 = vmatprep.mubr.msk.f32.mxu0 %vm3396_vm11, %v3373_v2  ;;  %v3183_v20 = vsel %vm3131_vm7, %v3118_v45, %v16635_v11  ;;  %v2991_v55 = vsel %vm2936_vm4, %v2926_v52, %v16654_v19  ;;  %v16657_v11 = vld [vmem:[#allocation214_spill] sm:$0xff]  ;;  %v16675_v52 = vld [vmem:[#allocation45_spill] sm:$0xff] }
 0x45a   :  { %v3374_v47 = vsel %vm3326_vm10, %v3309_v43, %v2775_v15  ;;  %v16637_v43 = vld [vmem:[#allocation328_spill] sm:$0xff]  ;;  %v16638_v15 = vld [vmem:[#allocation329_spill] sm:$0xff]  ;;  %v3056_v45 = vsel %vm3001_vm5, %v2991_v55, %v16656_v6  ;;  %v2931_v7 = vsel %vm30_vm0, %v10048_v32, %v16675_v52  ;;  %v16676_v19 = vld [vmem:[#allocation46_spill] sm:$0xff] }
 0x45b   :  { %8565 = vmatmul.mubr.msk.f32.gmra.mrb[46].mxu0 %vm3396_vm11, %v3374_v47  ;;  %v2521_v50 = vpop.permute.xlu0 %2520  ;;  %v3248_v62 = vsel %vm3196_vm8, %v3183_v20, %v16637_v43  ;;  %v3247_v33 = vsel %vm3196_vm8, %v3182_v21, %v16638_v15  ;;  %v3121_v21 = vsel %vm3066_vm6, %v3056_v45, %v16658_v57  ;;  %v16659_v43 = vld [vmem:[#allocation273_spill] sm:$0xff]  ;;  %v16660_v15 = vld [vmem:[#allocation274_spill] sm:$0xff]  ;;  %v16678_v6 = vld [vmem:[#allocation103_spill] sm:$0xff] }
 0x45c   :  { %v3310_v38 = vsel %vm3261_vm9, %v3245_v60, %v2521_v50  ;;  %v3184_v60 = vsel %vm3131_vm7, %v3119_v48, %v16648_v10  ;;  %v16670_v10 = vld [vmem:[#allocation217_spill] sm:$0xff] }
 0x45d   :  { %v2523_v59 = vpop.permute.xlu1 %2522 }
 0x45e   :  { %v3311_v44 = vsel %vm3261_vm9, %v3246_v34, %v2523_v59  ;;  %v16643_v59 = vld [vmem:[#allocation153_spill] sm:$0xff] }
 0x45f   :  { %v2777_v36 = vpop.permute.xlu0 %2776  ;;  %v3055_v50 = vsel %vm3001_vm5, %v2990_v51, %v16643_v59  ;;  %v10047_v51 = vld [vmem:[#allocation2 + $0x2d0] sm:$0xff]  ;;  %v16665_v59 = vld [vmem:[#allocation100_spill] sm:$0xff] }
 0x460   :  { %v3375_v58 = vsel %vm3326_vm10, %v3310_v38, %v2777_v36  ;;  %v3120_v18 = vsel %vm3066_vm6, %v3055_v50, %v16645_v56  ;;  %v2928_v13 = vsel %vm30_vm0, %v10047_v51, %v16664_v40  ;;  %v2994_v50 = vsel %vm2936_vm4, %v2929_v24, %v16665_v59  ;;  %v16668_v56 = vld [vmem:[#allocation158_spill] sm:$0xff]  ;;  %v10050_v40 = vld [vmem:[#allocation2 + $0x308] sm:$0xff] }
 0x461   :  { %v2779_v23 = vpop.permute.xlu1 %2778  ;;  %8567 = vmatprep.mubr.msk.f32.mxu0 %vm3396_vm11, %v3375_v58  ;;  %v3185_v34 = vsel %vm3131_vm7, %v3120_v18, %v16647_v26  ;;  %v2993_v39 = vsel %vm2936_vm4, %v2928_v13, %v16666_v54  ;;  %v16669_v26 = vld [vmem:[#allocation216_spill] sm:$0xff]  ;;  %v16687_v13 = vld [vmem:[#allocation47_spill] sm:$0xff] }
 0x462   :  { %v3376_v27 = vsel %vm3326_vm10, %v3311_v44, %v2779_v23  ;;  %v16649_v44 = vld [vmem:[#allocation330_spill] sm:$0xff]  ;;  %v16650_v23 = vld [vmem:[#allocation331_spill] sm:$0xff]  ;;  %v3058_v18 = vsel %vm3001_vm5, %v2993_v39, %v16668_v56  ;;  %v2933_v59 = vsel %vm30_vm0, %v10050_v40, %v16687_v13  ;;  %v16688_v54 = vld [vmem:[#allocation48_spill] sm:$0xff] }
 0x463   :  { %8568 = vmatmul.mubr.msk.f32.gmra.mrb[48].mxu0 %vm3396_vm11, %v3376_v27  ;;  %v2525_v14 = vpop.permute.xlu0 %2524  ;;  %v3250_v38 = vsel %vm3196_vm8, %v3185_v34, %v16649_v44  ;;  %v3249_v36 = vsel %vm3196_vm8, %v3184_v60, %v16650_v23  ;;  %v3123_v60 = vsel %vm3066_vm6, %v3058_v18, %v16670_v10  ;;  %v16671_v44 = vld [vmem:[#allocation275_spill] sm:$0xff]  ;;  %v16672_v23 = vld [vmem:[#allocation276_spill] sm:$0xff]  ;;  %v16690_v56 = vld [vmem:[#allocation105_spill] sm:$0xff] }
 0x464   :  { %v3312_v2 = vsel %vm3261_vm9, %v3247_v33, %v2525_v14  ;;  %v3186_v33 = vsel %vm3131_vm7, %v3121_v21, %v16660_v15  ;;  %v16682_v15 = vld [vmem:[#allocation219_spill] sm:$0xff] }
 0x465   :  { %v2527_v29 = vpop.permute.xlu1 %2526 }
 0x466   :  { %v3313_v47 = vsel %vm3261_vm9, %v3248_v62, %v2527_v29  ;;  %v16655_v29 = vld [vmem:[#allocation155_spill] sm:$0xff] }
 0x467   :  { %v2781_v42 = vpop.permute.xlu0 %2780  ;;  %v3057_v14 = vsel %vm3001_vm5, %v2992_v41, %v16655_v29  ;;  %v10049_v41 = vld [vmem:[#allocation2 + $0x2e8] sm:$0xff]  ;;  %v16677_v29 = vld [vmem:[#allocation102_spill] sm:$0xff] }
 0x468   :  { %v3377_v8 = vsel %vm3326_vm10, %v3312_v2, %v2781_v42  ;;  %v3122_v20 = vsel %vm3066_vm6, %v3057_v14, %v16657_v11  ;;  %v2930_v55 = vsel %vm30_vm0, %v10049_v41, %v16676_v19  ;;  %v2996_v14 = vsel %vm2936_vm4, %v2931_v7, %v16677_v29  ;;  %v16680_v11 = vld [vmem:[#allocation160_spill] sm:$0xff] }
 0x469   :  { %v2783_v4 = vpop.permute.xlu1 %2782  ;;  %8570 = vmatprep.mubr.msk.f32.mxu0 %vm3396_vm11, %v3377_v8  ;;  %v3187_v62 = vsel %vm3131_vm7, %v3122_v20, %v16659_v43  ;;  %v2995_v45 = vsel %vm2936_vm4, %v2930_v55, %v16678_v6  ;;  %v16681_v43 = vld [vmem:[#allocation218_spill] sm:$0xff]  ;;  %v10052_v19 = vld [vmem:[#allocation2 + $0x320] sm:$0xff]  ;;  %v16699_v55 = vld [vmem:[#allocation49_spill] sm:$0xff] }
 0x46a   :  { %v3378_v16 = vsel %vm3326_vm10, %v3313_v47, %v2783_v4  ;;  %v16661_v47 = vld [vmem:[#allocation332_spill] sm:$0xff]  ;;  %v16662_v4 = vld [vmem:[#allocation333_spill] sm:$0xff]  ;;  %v3060_v20 = vsel %vm3001_vm5, %v2995_v45, %v16680_v11  ;;  %v2935_v29 = vsel %vm30_vm0, %v10052_v19, %v16699_v55  ;;  %v16700_v6 = vld [vmem:[#allocation50_spill] sm:$0xff] }
 0x46b   :  { %8571 = vmatmul.mubr.msk.f32.gmra.mrb[50].mxu0 %vm3396_vm11, %v3378_v16  ;;  %v2529_v5 = vpop.permute.xlu0 %2528  ;;  %v3252_v2 = vsel %vm3196_vm8, %v3187_v62, %v16661_v47  ;;  %v3251_v42 = vsel %vm3196_vm8, %v3186_v33, %v16662_v4  ;;  %v3125_v33 = vsel %vm3066_vm6, %v3060_v20, %v16682_v15  ;;  %v16683_v47 = vld [vmem:[#allocation277_spill] sm:$0xff]  ;;  %v16684_v4 = vld [vmem:[#allocation278_spill] sm:$0xff]  ;;  %v16702_v11 = vld [vmem:[#allocation107_spill] sm:$0xff] }
 0x46c   :  { %v3314_v58 = vsel %vm3261_vm9, %v3249_v36, %v2529_v5  ;;  %v3188_v36 = vsel %vm3131_vm7, %v3123_v60, %v16672_v23  ;;  %v16694_v23 = vld [vmem:[#allocation221_spill] sm:$0xff] }
 0x46d   :  { %v2531_v25 = vpop.permute.xlu1 %2530 }
 0x46e   :  { %v3315_v27 = vsel %vm3261_vm9, %v3250_v38, %v2531_v25  ;;  %v16667_v25 = vld [vmem:[#allocation157_spill] sm:$0xff] }
 0x46f   :  { %v2785_v28 = vpop.permute.xlu0 %2784  ;;  %v3059_v5 = vsel %vm3001_vm5, %v2994_v50, %v16667_v25  ;;  %v10051_v50 = vld [vmem:[#allocation2 + $0x300] sm:$0xff] }
 0x470   :  { %v3379_v37 = vsel %vm3326_vm10, %v3314_v58, %v2785_v28  ;;  %v3124_v34 = vsel %vm3066_vm6, %v3059_v5, %v16669_v26  ;;  %v2932_v39 = vsel %vm30_vm0, %v10051_v50, %v16688_v54  ;;  %v16689_v25 = vld [vmem:[#allocation104_spill] sm:$0xff]  ;;  %v16692_v26 = vld [vmem:[#allocation162_spill] sm:$0xff] }
 0x471   :  { %v2787_v63 = vpop.permute.xlu1 %2786  ;;  %8573 = vmatprep.mubr.msk.f32.mxu0 %vm3396_vm11, %v3379_v37  ;;  %v3189_v38 = vsel %vm3131_vm7, %v3124_v34, %v16671_v44  ;;  %v2998_v5 = vsel %vm2936_vm4, %v2933_v59, %v16689_v25  ;;  %v2997_v18 = vsel %vm2936_vm4, %v2932_v39, %v16690_v56  ;;  %v16693_v44 = vld [vmem:[#allocation220_spill] sm:$0xff] }
 0x472   :  { %v3380_v12 = vsel %vm3326_vm10, %v3315_v27, %v2787_v63  ;;  %v16673_v27 = vld [vmem:[#allocation334_spill] sm:$0xff]  ;;  %v16674_v63 = vld [vmem:[#allocation335_spill] sm:$0xff]  ;;  %v3062_v34 = vsel %vm3001_vm5, %v2997_v18, %v16692_v26 }
 0x473   :  { %8574 = vmatmul.mubr.msk.f32.gmra.mrb[52].mxu0 %vm3396_vm11, %v3380_v12  ;;  %v2533_v61 = vpop.permute.xlu0 %2532  ;;  %v3254_v58 = vsel %vm3196_vm8, %v3189_v38, %v16673_v27  ;;  %v3253_v28 = vsel %vm3196_vm8, %v3188_v36, %v16674_v63  ;;  %v3127_v36 = vsel %vm3066_vm6, %v3062_v34, %v16694_v23  ;;  %v16695_v27 = vld [vmem:[#allocation279_spill] sm:$0xff]  ;;  %v16696_v63 = vld [vmem:[#allocation280_spill] sm:$0xff] }
 0x474   :  { %v3316_v8 = vsel %vm3261_vm9, %v3251_v42, %v2533_v61  ;;  %v3190_v42 = vsel %vm3131_vm7, %v3125_v33, %v16684_v4  ;;  %v16706_v4 = vld [vmem:[#allocation223_spill] sm:$0xff] }
 0x475   :  { %v2535_v17 = vpop.permute.xlu1 %2534 }
 0x476   :  { %v3317_v16 = vsel %vm3261_vm9, %v3252_v2, %v2535_v17  ;;  %v16679_v17 = vld [vmem:[#allocation159_spill] sm:$0xff] }
 0x477   :  { %v2789_v49 = vpop.permute.xlu0 %2788  ;;  %v3061_v61 = vsel %vm3001_vm5, %v2996_v14, %v16679_v17  ;;  %v10053_v14 = vld [vmem:[#allocation2 + $0x318] sm:$0xff]  ;;  %v16701_v17 = vld [vmem:[#allocation106_spill] sm:$0xff] }
 0x478   :  { %v3381_v3 = vsel %vm3326_vm10, %v3316_v8, %v2789_v49  ;;  %v3126_v62 = vsel %vm3066_vm6, %v3061_v61, %v16681_v43  ;;  %v2934_v45 = vsel %vm30_vm0, %v10053_v14, %v16700_v6  ;;  %v3000_v61 = vsel %vm2936_vm4, %v2935_v29, %v16701_v17  ;;  %v16704_v43 = vld [vmem:[#allocation164_spill] sm:$0xff] }
 0x479   :  { %v2791_v0 = vpop.permute.xlu1 %2790  ;;  %8576 = vmatprep.mubr.msk.f32.mxu0 %vm3396_vm11, %v3381_v3  ;;  %v3191_v2 = vsel %vm3131_vm7, %v3126_v62, %v16683_v47  ;;  %v2999_v20 = vsel %vm2936_vm4, %v2934_v45, %v16702_v11  ;;  %v16705_v47 = vld [vmem:[#allocation222_spill] sm:$0xff] }
 0x47a   :  { %v3382_v46 = vsel %vm3326_vm10, %v3317_v16, %v2791_v0  ;;  %v16685_v16 = vld [vmem:[#allocation336_spill] sm:$0xff]  ;;  %v16686_v0 = vld [vmem:[#allocation337_spill] sm:$0xff]  ;;  %v3064_v62 = vsel %vm3001_vm5, %v2999_v20, %v16704_v43 }
 0x47b   :  { %8577 = vmatmul.mubr.msk.f32.gmra.mrb[54].mxu0 %vm3396_vm11, %v3382_v46  ;;  %v2537_v48 = vpop.permute.xlu0 %2536  ;;  %v3256_v8 = vsel %vm3196_vm8, %v3191_v2, %v16685_v16  ;;  %v3255_v49 = vsel %vm3196_vm8, %v3190_v42, %v16686_v0  ;;  %v3129_v42 = vsel %vm3066_vm6, %v3064_v62, %v16706_v4  ;;  %v16707_v16 = vld [vmem:[#allocation281_spill] sm:$0xff]  ;;  %v16708_v0 = vld [vmem:[#allocation282_spill] sm:$0xff] }
 0x47c   :  { %v3318_v37 = vsel %vm3261_vm9, %v3253_v28, %v2537_v48  ;;  %v3192_v28 = vsel %vm3131_vm7, %v3127_v36, %v16696_v63 }
 0x47d   :  { %v2539_v35 = vpop.permute.xlu1 %2538 }
 0x47e   :  { %v3319_v12 = vsel %vm3261_vm9, %v3254_v58, %v2539_v35  ;;  %v16691_v35 = vld [vmem:[#allocation161_spill] sm:$0xff] }
 0x47f   :  { %v3063_v48 = vsel %vm3001_vm5, %v2998_v5, %v16691_v35 }
 0x480   :  { %v3128_v38 = vsel %vm3066_vm6, %v3063_v48, %v16693_v44 }
 0x481   :  { %v2795_v31 = vpop.permute.xlu1 %2794  ;;  %v2793_v9 = vpop.permute.xlu0 %2792  ;;  %v3193_v58 = vsel %vm3131_vm7, %v3128_v38, %v16695_v27 }
 0x482   :  { %v3384_v1 = vsel %vm3326_vm10, %v3319_v12, %v2795_v31  ;;  %v3383_v53 = vsel %vm3326_vm10, %v3318_v37, %v2793_v9  ;;  %v16697_v12 = vld [vmem:[#allocation338_spill] sm:$0xff]  ;;  %v16698_v31 = vld [vmem:[#allocation339_spill] sm:$0xff] }
 0x483   :  { %8579 = vmatprep.mubr.msk.f32.mxu0 %vm3396_vm11, %v3383_v53  ;;  %v3258_v37 = vsel %vm3196_vm8, %v3193_v58, %v16697_v12  ;;  %v3257_v9 = vsel %vm3196_vm8, %v3192_v28, %v16698_v31 }
 0x484   :  { %8580 = vmatmul.mubr.msk.f32.gmra.mrb[56].mxu0 %vm3396_vm11, %v3384_v1 }
 0x486   :  { %v2543_v57 = vpop.permute.xlu1 %2542  ;;  %v2541_v21 = vpop.permute.xlu0 %2540 }
 0x487   :  { %v3321_v46 = vsel %vm3261_vm9, %v3256_v8, %v2543_v57  ;;  %v3320_v3 = vsel %vm3261_vm9, %v3255_v49, %v2541_v21  ;;  %v16703_v57 = vld [vmem:[#allocation163_spill] sm:$0xff]  ;;  %v3194_v49 = vsel %vm3131_vm7, %v3129_v42, %v16708_v0 }
 0x488   :  { %v3065_v21 = vsel %vm3001_vm5, %v3000_v61, %v16703_v57 }
 0x489   :  { %v3130_v2 = vsel %vm3066_vm6, %v3065_v21, %v16705_v47 }
 0x48a   :  { %v3195_v8 = vsel %vm3131_vm7, %v3130_v2, %v16707_v16 }
 0x48b   :  { %v2799_v22 = vpop.permute.xlu1 %2798  ;;  %v2797_v30 = vpop.permute.xlu0 %2796 }
 0x48c   :  { %v3386_v24 = vsel %vm3326_vm10, %v3321_v46, %v2799_v22  ;;  %v3385_v51 = vsel %vm3326_vm10, %v3320_v3, %v2797_v30  ;;  %v16709_v46 = vld [vmem:[#allocation340_spill] sm:$0xff]  ;;  %v16710_v22 = vld [vmem:[#allocation341_spill] sm:$0xff] }
 0x48d   :  { %8582 = vmatprep.mubr.msk.f32.mxu0 %vm3396_vm11, %v3385_v51  ;;  %v3260_v3 = vsel %vm3196_vm8, %v3195_v8, %v16709_v46  ;;  %v3259_v30 = vsel %vm3196_vm8, %v3194_v49, %v16710_v22 }
 0x48e   :  { %8583 = vmatmul.mubr.msk.f32.gmra.mrb[58].mxu0 %vm3396_vm11, %v3386_v24 }
 0x48f   :  { %v2547_v10 = vpop.permute.xlu1 %2546 }
 0x490   :  { %v3323_v1 = vsel %vm3261_vm9, %v3258_v37, %v2547_v10 }
 0x492   :  { %v2545_v60 = vpop.permute.xlu0 %2544 }
 0x493   :  { %v3322_v53 = vsel %vm3261_vm9, %v3257_v9, %v2545_v60 }
 0x494   :  { %v2803_v32 = vpop.permute.xlu1 %2802 }
 0x495   :  { %v3388_v7 = vsel %vm3326_vm10, %v3323_v1, %v2803_v32 }
 0x496   :  { %v2801_v52 = vpop.permute.xlu0 %2800 }
 0x497   :  { %v3387_v41 = vsel %vm3326_vm10, %v3322_v53, %v2801_v52 }
 0x498   :  { %8585 = vmatprep.mubr.msk.f32.mxu0 %vm3396_vm11, %v3387_v41  ;;  %v2551_v15 = vpop.permute.xlu1 %2550 }
 0x499   :  { %8586 = vmatmul.mubr.msk.f32.gmra.mrb[60].mxu0 %vm3396_vm11, %v3388_v7  ;;  %v3325_v24 = vsel %vm3261_vm9, %v3260_v3, %v2551_v15 }
 0x49a   :  { %v2549_v33 = vpop.permute.xlu0 %2548 }
 0x49b   :  { %v3324_v51 = vsel %vm3261_vm9, %v3259_v30, %v2549_v33 }
 0x49c   :  { %v2807_v40 = vpop.permute.xlu1 %2806 }
 0x49d   :  { %v3390_v59 = vsel %vm3326_vm10, %v3325_v24, %v2807_v40 }
 0x49e   :  { %v2805_v13 = vpop.permute.xlu0 %2804 }
 0x49f   :  { %v3389_v50 = vsel %vm3326_vm10, %v3324_v51, %v2805_v13 }
 0x4a0   :  { %8588 = vmatprep.mubr.msk.f32.mxu0 %vm3396_vm11, %v3389_v50 }
 0x4a1   :  { %8589 = vmatmul.mubr.msk.f32.gmra.mrb[62].mxu0 %vm3396_vm11, %v3390_v59 }
 0x4b2   :  { %v13045_v54 = vpop.f32.mrb[0].mxu0 }
 0x4b3   :  { %16711 = vst [vmem:[#allocation342_spill] sm:$0xff] %v13045_v54  ;;  %v3981_v39 = vsel %vm30_vm0, %v13045_v54, 0.0  ;;  %v13049_v25 = vpop.f32.mrb[1].mxu0 }
 0x4b4   :  { %v3980_v5 = vsel %vm30_vm0, %v13049_v25, 0.0 }
 0x4b5   :  { %v3982_v56 = vadd.f32 %v3981_v39, %v3980_v5 }
 0x4b6   :  { %v13053_v18 = vpop.f32.mrb[2].mxu0 }
 0x4b7   :  { %16712 = vst [vmem:[#allocation344_spill] sm:$0xff] %v13053_v18  ;;  %v13055_v35 = vpop.f32.mrb[3].mxu0  ;;  %v3985_v34 = vsel %vm30_vm0, %v13053_v18, 0.0 }
 0x4b8   :  { %16713 = vst [vmem:[#allocation165_spill] sm:$0xff] %v13055_v35  ;;  %v3983_v48 = vsel %vm30_vm0, %v13055_v35, 0.0 }
 0x4b9   :  { %v3984_v26 = vadd.f32 %v3983_v48, %v3982_v56 }
 0x4ba   :  { %v13061_v10 = vpop.f32.mrb[4].mxu0 }
 0x4bb   :  { %16714 = vst [vmem:[#allocation167_spill] sm:$0xff] %v13061_v10  ;;  %v3986_v60 = vadd.f32 %v3985_v34, %v3984_v26  ;;  %v13063_v44 = vpop.f32.mrb[5].mxu0  ;;  %v3989_v36 = vsel %vm30_vm0, %v13061_v10, 0.0 }
 0x4bc   :  { %16715 = vst [vmem:[#allocation6_spill] sm:$0xff] %v13063_v44  ;;  %v3987_v38 = vsel %vm30_vm0, %v13063_v44, 0.0 }
 0x4bd   :  { %v3988_v23 = vadd.f32 %v3987_v38, %v3986_v60 }
 0x4be   :  { %v13069_v27 = vpop.f32.mrb[6].mxu0 }
 0x4bf   :  { %v13071_v58 = vpop.f32.mrb[7].mxu0  ;;  %v3990_v63 = vadd.f32 %v3989_v36, %v3988_v23  ;;  %v3993_v37 = vsel %vm30_vm0, %v13069_v27, 0.0 }
 0x4c0   :  { %v3991_v28 = vsel %vm30_vm0, %v13071_v58, 0.0 }
 0x4c1   :  { %v3992_v12 = vadd.f32 %v3991_v28, %v3990_v63 }
 0x4c2   :  { %v13077_v31 = vpop.f32.mrb[8].mxu0 }
 0x4c3   :  { %v13079_v9 = vpop.f32.mrb[9].mxu0  ;;  %v3994_v1 = vadd.f32 %v3993_v37, %v3992_v12  ;;  %v3997_v52 = vsel %vm30_vm0, %v13077_v31, 0.0 }
 0x4c4   :  { %v3995_v53 = vsel %vm30_vm0, %v13079_v9, 0.0 }
 0x4c5   :  { %v3996_v32 = vadd.f32 %v3995_v53, %v3994_v1 }
 0x4c6   :  { %v13085_v7 = vpop.f32.mrb[10].mxu0 }
 0x4c7   :  { %v13087_v41 = vpop.f32.mrb[11].mxu0  ;;  %v3998_v19 = vadd.f32 %v3997_v52, %v3996_v32  ;;  %v4001_v14 = vsel %vm30_vm0, %v13085_v7, 0.0 }
 0x4c8   :  { %v3999_v55 = vsel %vm30_vm0, %v13087_v41, 0.0 }
 0x4c9   :  { %v4000_v29 = vadd.f32 %v3999_v55, %v3998_v19 }
 0x4cb   :  { %v13093_v6 = vpop.f32.mrb[12].mxu0  ;;  %v4002_v17 = vadd.f32 %v4001_v14, %v4000_v29 }
 0x4cc   :  { %v13095_v45 = vpop.f32.mrb[13].mxu0  ;;  %v4005_v20 = vsel %vm30_vm0, %v13093_v6, 0.0 }
 0x4cd   :  { %v4003_v61 = vsel %vm30_vm0, %v13095_v45, 0.0 }
 0x4ce   :  { %v4004_v11 = vadd.f32 %v4003_v61, %v4002_v17 }
 0x4cf   :  { %v13101_v57 = vpop.f32.mrb[14].mxu0 }
 0x4d0   :  { %v13103_v21 = vpop.f32.mrb[15].mxu0  ;;  %v4006_v43 = vadd.f32 %v4005_v20, %v4004_v11  ;;  %v4009_v33 = vsel %vm30_vm0, %v13101_v57, 0.0 }
 0x4d1   :  { %v4007_v62 = vsel %vm30_vm0, %v13103_v21, 0.0 }
 0x4d2   :  { %v4008_v15 = vadd.f32 %v4007_v62, %v4006_v43 }
 0x4d4   :  { %v4010_v4 = vadd.f32 %v4009_v33, %v4008_v15 }
 0x4d5   :  { %v13109_v47 = vpop.f32.mrb[16].mxu0 }
 0x4d6   :  { %v13111_v2 = vpop.f32.mrb[17].mxu0  ;;  %v4013_v8 = vsel %vm30_vm0, %v13109_v47, 0.0 }
 0x4d7   :  { %v4011_v42 = vsel %vm30_vm0, %v13111_v2, 0.0 }
 0x4d8   :  { %v4012_v16 = vadd.f32 %v4011_v42, %v4010_v4 }
 0x4d9   :  { %v13117_v0 = vpop.f32.mrb[18].mxu0 }
 0x4da   :  { %v13119_v49 = vpop.f32.mrb[19].mxu0  ;;  %v4014_v46 = vadd.f32 %v4013_v8, %v4012_v16  ;;  %v4017_v30 = vsel %vm30_vm0, %v13117_v0, 0.0 }
 0x4db   :  { %v4015_v3 = vsel %vm30_vm0, %v13119_v49, 0.0 }
 0x4dc   :  { %v4016_v22 = vadd.f32 %v4015_v3, %v4014_v46 }
 0x4de   :  { %v13125_v24 = vpop.f32.mrb[20].mxu0  ;;  %v4018_v40 = vadd.f32 %v4017_v30, %v4016_v22 }
 0x4df   :  { %v13127_v51 = vpop.f32.mrb[21].mxu0  ;;  %v4021_v50 = vsel %vm30_vm0, %v13125_v24, 0.0 }
 0x4e0   :  { %v4019_v13 = vsel %vm30_vm0, %v13127_v51, 0.0 }
 0x4e1   :  { %v4020_v59 = vadd.f32 %v4019_v13, %v4018_v40 }
 0x4e3   :  { %v4022_v56 = vadd.f32 %v4021_v50, %v4020_v59 }
 0x4e5   :  { %v13133_v39 = vpop.f32.mrb[22].mxu0 }
 0x4e6   :  { %v13135_v5 = vpop.f32.mrb[23].mxu0  ;;  %v4025_v34 = vsel %vm30_vm0, %v13133_v39, 0.0 }
 0x4e7   :  { %v4023_v48 = vsel %vm30_vm0, %v13135_v5, 0.0 }
 0x4e8   :  { %v4024_v26 = vadd.f32 %v4023_v48, %v4022_v56 }
 0x4ea   :  { %v13141_v60 = vpop.f32.mrb[24].mxu0  ;;  %v4026_v23 = vadd.f32 %v4025_v34, %v4024_v26 }
 0x4eb   :  { %v13143_v38 = vpop.f32.mrb[25].mxu0  ;;  %v4029_v28 = vsel %vm30_vm0, %v13141_v60, 0.0 }
 0x4ec   :  { %v4027_v36 = vsel %vm30_vm0, %v13143_v38, 0.0 }
 0x4ed   :  { %v4028_v63 = vadd.f32 %v4027_v36, %v4026_v23 }
 0x4ef   :  { %v13149_v12 = vpop.f32.mrb[26].mxu0  ;;  %v4030_v1 = vadd.f32 %v4029_v28, %v4028_v63 }
 0x4f0   :  { %v13151_v37 = vpop.f32.mrb[27].mxu0  ;;  %v4033_v52 = vsel %vm30_vm0, %v13149_v12, 0.0 }
 0x4f1   :  { %16716 = vst [vmem:[#allocation224_spill] sm:$0xff] %v13151_v37  ;;  %v4031_v53 = vsel %vm30_vm0, %v13151_v37, 0.0 }
 0x4f2   :  { %v4032_v32 = vadd.f32 %v4031_v53, %v4030_v1 }
 0x4f4   :  { %v4034_v29 = vadd.f32 %v4033_v52, %v4032_v32 }
 0x4f5   :  { %v13157_v19 = vpop.f32.mrb[28].mxu0 }
 0x4f6   :  { %v13159_v55 = vpop.f32.mrb[29].mxu0  ;;  %v4037_v61 = vsel %vm30_vm0, %v13157_v19, 0.0 }
 0x4f7   :  { %v4035_v14 = vsel %vm30_vm0, %v13159_v55, 0.0 }
 0x4f8   :  { %v4036_v17 = vadd.f32 %v4035_v14, %v4034_v29 }
 0x4f9   :  { %v13165_v11 = vpop.f32.mrb[30].mxu0 }
 0x4fa   :  { %v13167_v20 = vpop.f32.mrb[31].mxu0  ;;  %v4038_v43 = vadd.f32 %v4037_v61, %v4036_v17  ;;  %v4041_v33 = vsel %vm30_vm0, %v13165_v11, 0.0 }
 0x4fb   :  { %v4039_v62 = vsel %vm30_vm0, %v13167_v20, 0.0 }
 0x4fc   :  { %v4040_v15 = vadd.f32 %v4039_v62, %v4038_v43 }
 0x4fd   :  { %v13173_v4 = vpop.f32.mrb[32].mxu0 }
 0x4fe   :  { %v4042_v42 = vadd.f32 %v4041_v33, %v4040_v15  ;;  %v13175_v16 = vpop.f32.mrb[33].mxu0  ;;  %v4045_v3 = vsel %vm30_vm0, %v13173_v4, 0.0 }
 0x4ff   :  { %v4043_v8 = vsel %vm30_vm0, %v13175_v16, 0.0 }
 0x500   :  { %v4044_v46 = vadd.f32 %v4043_v8, %v4042_v42 }
 0x502   :  { %v4046_v22 = vadd.f32 %v4045_v3, %v4044_v46 }
 0x504   :  { %v13181_v30 = vpop.f32.mrb[34].mxu0 }
 0x505   :  { %v13183_v40 = vpop.f32.mrb[35].mxu0  ;;  %v4049_v50 = vsel %vm30_vm0, %v13181_v30, 0.0 }
 0x506   :  { %v4047_v13 = vsel %vm30_vm0, %v13183_v40, 0.0 }
 0x507   :  { %v4048_v59 = vadd.f32 %v4047_v13, %v4046_v22 }
 0x508   :  { %v13189_v48 = vpop.f32.mrb[36].mxu0 }
 0x509   :  { %v4050_v56 = vadd.f32 %v4049_v50, %v4048_v59  ;;  %v13191_v26 = vpop.f32.mrb[37].mxu0  ;;  %v4053_v36 = vsel %vm30_vm0, %v13189_v48, 0.0 }
 0x50a   :  { %v4051_v34 = vsel %vm30_vm0, %v13191_v26, 0.0 }
 0x50b   :  { %v4052_v23 = vadd.f32 %v4051_v34, %v4050_v56 }
 0x50d   :  { %v4054_v63 = vadd.f32 %v4053_v36, %v4052_v23 }
 0x50e   :  { %v13197_v28 = vpop.f32.mrb[38].mxu0 }
 0x50f   :  { %v13199_v1 = vpop.f32.mrb[39].mxu0  ;;  %v4057_v52 = vsel %vm30_vm0, %v13197_v28, 0.0 }
 0x510   :  { %v4055_v53 = vsel %vm30_vm0, %v13199_v1, 0.0 }
 0x511   :  { %v4056_v32 = vadd.f32 %v4055_v53, %v4054_v63 }
 0x513   :  { %v4058_v29 = vadd.f32 %v4057_v52, %v4056_v32 }
 0x516   :  { %v13205_v14 = vpop.f32.mrb[40].mxu0 }
 0x517   :  { %v13207_v17 = vpop.f32.mrb[41].mxu0  ;;  %v4061_v62 = vsel %vm30_vm0, %v13205_v14, 0.0 }
 0x518   :  { %v4059_v61 = vsel %vm30_vm0, %v13207_v17, 0.0 }
 0x519   :  { %v4060_v43 = vadd.f32 %v4059_v61, %v4058_v29 }
 0x51b   :  { %v4062_v15 = vadd.f32 %v4061_v62, %v4060_v43 }
 0x51e   :  { %v13213_v33 = vpop.f32.mrb[42].mxu0 }
 0x51f   :  { %v13215_v42 = vpop.f32.mrb[43].mxu0  ;;  %v4065_v3 = vsel %vm30_vm0, %v13213_v33, 0.0 }
 0x520   :  { %v4063_v8 = vsel %vm30_vm0, %v13215_v42, 0.0 }
 0x521   :  { %v4064_v46 = vadd.f32 %v4063_v8, %v4062_v15 }
 0x523   :  { %v4066_v22 = vadd.f32 %v4065_v3, %v4064_v46 }
 0x526   :  { %v13221_v13 = vpop.f32.mrb[44].mxu0 }
 0x527   :  { %v13223_v59 = vpop.f32.mrb[45].mxu0  ;;  %v4069_v34 = vsel %vm30_vm0, %v13221_v13, 0.0 }
 0x528   :  { %v4067_v50 = vsel %vm30_vm0, %v13223_v59, 0.0 }
 0x529   :  { %v4068_v56 = vadd.f32 %v4067_v50, %v4066_v22 }
 0x52b   :  { %v4070_v23 = vadd.f32 %v4069_v34, %v4068_v56 }
 0x52e   :  { %v13229_v36 = vpop.f32.mrb[46].mxu0 }
 0x52f   :  { %16717 = vst [vmem:[#allocation226_spill] sm:$0xff] %v13229_v36  ;;  %v13231_v63 = vpop.f32.mrb[47].mxu0  ;;  %v4073_v52 = vsel %vm30_vm0, %v13229_v36, 0.0 }
 0x530   :  { %16718 = vst [vmem:[#allocation51_spill] sm:$0xff] %v13231_v63  ;;  %v4071_v53 = vsel %vm30_vm0, %v13231_v63, 0.0 }
 0x531   :  { %v4072_v32 = vadd.f32 %v4071_v53, %v4070_v23 }
 0x533   :  { %v4074_v29 = vadd.f32 %v4073_v52, %v4072_v32 }
 0x536   :  { %v13237_v61 = vpop.f32.mrb[48].mxu0 }
 0x537   :  { %16719 = vst [vmem:[#allocation53_spill] sm:$0xff] %v13237_v61  ;;  %v13239_v43 = vpop.f32.mrb[49].mxu0  ;;  %v4077_v8 = vsel %vm30_vm0, %v13237_v61, 0.0 }
 0x538   :  { %16720 = vst [vmem:[#allocation283_spill] sm:$0xff] %v13239_v43  ;;  %v4075_v62 = vsel %vm30_vm0, %v13239_v43, 0.0 }
 0x539   :  { %v4076_v15 = vadd.f32 %v4075_v62, %v4074_v29 }
 0x53b   :  { %v4078_v46 = vadd.f32 %v4077_v8, %v4076_v15 }
 0x53e   :  { %v13245_v3 = vpop.f32.mrb[50].mxu0 }
 0x53f   :  { %16721 = vst [vmem:[#allocation285_spill] sm:$0xff] %v13245_v3  ;;  %v13247_v22 = vpop.f32.mrb[51].mxu0  ;;  %v4081_v34 = vsel %vm30_vm0, %v13245_v3, 0.0 }
 0x540   :  { %16722 = vst [vmem:[#allocation108_spill] sm:$0xff] %v13247_v22  ;;  %v4079_v50 = vsel %vm30_vm0, %v13247_v22, 0.0 }
 0x541   :  { %v4080_v56 = vadd.f32 %v4079_v50, %v4078_v46 }
 0x543   :  { %v4082_v23 = vadd.f32 %v4081_v34, %v4080_v56 }
 0x546   :  { %v13253_v53 = vpop.f32.mrb[52].mxu0 }
 0x547   :  { %16723 = vst [vmem:[#allocation110_spill] sm:$0xff] %v13253_v53  ;;  %v13255_v32 = vpop.f32.mrb[53].mxu0  ;;  %v4085_v62 = vsel %vm30_vm0, %v13253_v53, 0.0 }
 0x548   :  { %16724 = vst [vmem:[#allocation343_spill] sm:$0xff] %v13255_v32  ;;  %v4083_v52 = vsel %vm30_vm0, %v13255_v32, 0.0 }
 0x549   :  { %v4084_v29 = vadd.f32 %v4083_v52, %v4082_v23 }
 0x54b   :  { %v4086_v15 = vadd.f32 %v4085_v62, %v4084_v29 }
 0x54e   :  { %v13261_v8 = vpop.f32.mrb[54].mxu0 }
 0x54f   :  { %16725 = vst [vmem:[#allocation346_spill] sm:$0xff] %v13261_v8  ;;  %v13263_v22 = vpop.f32.mrb[55].mxu0  ;;  %v4089_v56 = vsel %vm30_vm0, %v13261_v8, 0.0 }
 0x550   :  { %16726 = vst [vmem:[#allocation166_spill] sm:$0xff] %v13263_v22  ;;  %v4087_v46 = vsel %vm30_vm0, %v13263_v22, 0.0 }
 0x551   :  { %v4088_v50 = vadd.f32 %v4087_v46, %v4086_v15 }
 0x553   :  { %v4090_v34 = vadd.f32 %v4089_v56, %v4088_v50 }
 0x557   :  { %v13269_v3 = vpop.f32.mrb[56].mxu0 }
 0x558   :  { %16727 = vst [vmem:[#allocation169_spill] sm:$0xff] %v13269_v3  ;;  %v13271_v32 = vpop.f32.mrb[57].mxu0  ;;  %v4093_v29 = vsel %vm30_vm0, %v13269_v3, 0.0 }
 0x559   :  { %16728 = vst [vmem:[#allocation7_spill] sm:$0xff] %v13271_v32  ;;  %v4091_v23 = vsel %vm30_vm0, %v13271_v32, 0.0 }
 0x55a   :  { %v4092_v52 = vadd.f32 %v4091_v23, %v4090_v34 }
 0x55c   :  { %v4094_v62 = vadd.f32 %v4093_v29, %v4092_v52 }
 0x561   :  { %v13277_v53 = vpop.f32.mrb[58].mxu0 }
 0x562   :  { %16729 = vst [vmem:[#allocation225_spill] sm:$0xff] %v13277_v53  ;;  %v13279_v22 = vpop.f32.mrb[59].mxu0  ;;  %v4097_v50 = vsel %vm30_vm0, %v13277_v53, 0.0 }
 0x563   :  { %16730 = vst [vmem:[#allocation228_spill] sm:$0xff] %v13279_v22  ;;  %v4095_v15 = vsel %vm30_vm0, %v13279_v22, 0.0 }
 0x564   :  { %v4096_v46 = vadd.f32 %v4095_v15, %v4094_v62 }
 0x566   :  { %v4098_v56 = vadd.f32 %v4097_v50, %v4096_v46 }
 0x56c   :  { %v13285_v8 = vpop.f32.mrb[60].mxu0 }
 0x56d   :  { %16731 = vst [vmem:[#allocation52_spill] sm:$0xff] %v13285_v8  ;;  %v13287_v32 = vpop.f32.mrb[61].mxu0  ;;  %v4101_v52 = vsel %vm30_vm0, %v13285_v8, 0.0 }
 0x56e   :  { %16732 = vst [vmem:[#allocation55_spill] sm:$0xff] %v13287_v32  ;;  %v4099_v34 = vsel %vm30_vm0, %v13287_v32, 0.0 }
 0x56f   :  { %v4100_v23 = vadd.f32 %v4099_v34, %v4098_v56 }
 0x571   :  { %v4102_v29 = vadd.f32 %v4101_v52, %v4100_v23 }
 0x574   :  { %v13293_v3 = vpop.f32.mrb[62].mxu0 }
 0x575   :  { %16733 = vst [vmem:[#allocation284_spill] sm:$0xff] %v13293_v3  ;;  %v13295_v22 = vpop.f32.mrb[63].mxu0  ;;  %v4105_v46 = vsel %vm30_vm0, %v13293_v3, 0.0 }
 0x576   :  { %v4103_v62 = vsel %vm30_vm0, %v13295_v22, 0.0 }
 0x577   :  { %v4104_v15 = vadd.f32 %v4103_v62, %v4102_v29 }
 0x579   :  { %v4106_v50 = vadd.f32 %v4105_v46, %v4104_v15 }
 0x57b   :  { %v4107_v53 = vrot.slane %v4106_v50, 4 }
 0x57d   :  { %v4108_v61 = vadd.f32 %v4107_v53, %v4106_v50 }
 0x57f   :  { %v4109_v32 = vrot.slane %v4108_v61, 2 }
 0x581   :  { %v4110_v56 = vadd.f32 %v4109_v32, %v4108_v61 }
 0x583   :  { %v4111_v34 = vrot.slane %v4110_v56, 1 }
 0x585   :  { %v4112_v43 = vadd.f32 %v4111_v34, %v4110_v56 }
 0x587   :  { %v13301_v8 = vmul.f32 0.001953125, %v4112_v43 }
 0x589   :  { %v4115_v23 = vsub.f32 %v13049_v25, %v13301_v8  ;;  %v4116_v52 = vsub.f32 %v13045_v54, %v13301_v8  ;;  %v4117_v29 = vsub.f32 %v13055_v35, %v13301_v8  ;;  %v4118_v62 = vsub.f32 %v13053_v18, %v13301_v8 }
 0x58a   :  { %v4119_v61 = vsub.f32 %v13063_v44, %v13301_v8  ;;  %v4120_v43 = vsub.f32 %v13061_v10, %v13301_v8  ;;  %v4121_v35 = vsub.f32 %v13071_v58, %v13301_v8  ;;  %v4122_v44 = vsub.f32 %v13069_v27, %v13301_v8 }
 0x58b   :  { %v4179_v15 = vmul.f32 %v4115_v23, %v4115_v23  ;;  %v4180_v53 = vmul.f32 %v4116_v52, %v4116_v52  ;;  %v4181_v32 = vmul.f32 %v4117_v29, %v4117_v29  ;;  %v4182_v46 = vmul.f32 %v4118_v62, %v4118_v62 }
 0x58c   :  { %v4183_v54 = vmul.f32 %v4119_v61, %v4119_v61  ;;  %v4184_v29 = vmul.f32 %v4120_v43, %v4120_v43  ;;  %v4123_v62 = vsub.f32 %v13079_v9, %v13301_v8  ;;  %v4124_v61 = vsub.f32 %v13077_v31, %v13301_v8 }
 0x58d   :  { %v4243_v50 = vsel %vm30_vm0, %v4179_v15, 0.0  ;;  %v4244_v56 = vsel %vm30_vm0, %v4180_v53, 0.0  ;;  %v4246_v23 = vsel %vm30_vm0, %v4181_v32, 0.0  ;;  %v4248_v18 = vsel %vm30_vm0, %v4182_v46, 0.0 }
 0x58e   :  { %v4245_v34 = vadd.f32 %v4244_v56, %v4243_v50  ;;  %v4185_v15 = vmul.f32 %v4121_v35, %v4121_v35  ;;  %v4250_v53 = vsel %vm30_vm0, %v4183_v54, 0.0  ;;  %v4186_v56 = vmul.f32 %v4122_v44, %v4122_v44 }
 0x58f   :  { %v4252_v32 = vsel %vm30_vm0, %v4184_v29, 0.0  ;;  %v4125_v43 = vsub.f32 %v13087_v41, %v13301_v8  ;;  %v4126_v35 = vsub.f32 %v13085_v7, %v13301_v8  ;;  %v4127_v44 = vsub.f32 %v13095_v45, %v13301_v8 }
 0x590   :  { %v4247_v52 = vadd.f32 %v4246_v23, %v4245_v34  ;;  %v4187_v23 = vmul.f32 %v4123_v62, %v4123_v62  ;;  %v4256_v54 = vsel %vm30_vm0, %v4186_v56, 0.0  ;;  %v4128_v62 = vsub.f32 %v13093_v6, %v13301_v8 }
 0x592   :  { %v4249_v10 = vadd.f32 %v4248_v18, %v4247_v52  ;;  %v4254_v18 = vsel %vm30_vm0, %v4185_v15, 0.0  ;;  %v4188_v52 = vmul.f32 %v4124_v61, %v4124_v61  ;;  %v4258_v29 = vsel %vm30_vm0, %v4187_v23, 0.0 }
 0x593   :  { %v4129_v61 = vsub.f32 %v13103_v21, %v13301_v8 }
 0x594   :  { %v4251_v50 = vadd.f32 %v4250_v53, %v4249_v10  ;;  %v4189_v53 = vmul.f32 %v4125_v43, %v4125_v43  ;;  %v4260_v15 = vsel %vm30_vm0, %v4188_v52, 0.0  ;;  %v4130_v43 = vsub.f32 %v13101_v57, %v13301_v8 }
 0x596   :  { %v4253_v34 = vadd.f32 %v4252_v32, %v4251_v50  ;;  %v4190_v32 = vmul.f32 %v4126_v35, %v4126_v35  ;;  %v4262_v56 = vsel %vm30_vm0, %v4189_v53, 0.0  ;;  %v4131_v35 = vsub.f32 %v13111_v2, %v13301_v8 }
 0x598   :  { %v4255_v46 = vadd.f32 %v4254_v18, %v4253_v34  ;;  %v4191_v18 = vmul.f32 %v4127_v44, %v4127_v44  ;;  %v4264_v23 = vsel %vm30_vm0, %v4190_v32, 0.0  ;;  %v4132_v44 = vsub.f32 %v13109_v47, %v13301_v8 }
 0x59a   :  { %v4257_v10 = vadd.f32 %v4256_v54, %v4255_v46  ;;  %v4192_v54 = vmul.f32 %v4128_v62, %v4128_v62  ;;  %v4266_v52 = vsel %vm30_vm0, %v4191_v18, 0.0  ;;  %v4133_v62 = vsub.f32 %v13119_v49, %v13301_v8 }
 0x59c   :  { %v4259_v50 = vadd.f32 %v4258_v29, %v4257_v10  ;;  %v4193_v29 = vmul.f32 %v4129_v61, %v4129_v61  ;;  %v4268_v53 = vsel %vm30_vm0, %v4192_v54, 0.0  ;;  %v4134_v61 = vsub.f32 %v13117_v0, %v13301_v8 }
 0x59e   :  { %v4261_v34 = vadd.f32 %v4260_v15, %v4259_v50  ;;  %v4194_v15 = vmul.f32 %v4130_v43, %v4130_v43  ;;  %v4270_v32 = vsel %vm30_vm0, %v4193_v29, 0.0  ;;  %v4135_v43 = vsub.f32 %v13127_v51, %v13301_v8 }
 0x5a0   :  { %v4263_v46 = vadd.f32 %v4262_v56, %v4261_v34  ;;  %v4195_v56 = vmul.f32 %v4131_v35, %v4131_v35  ;;  %v4272_v18 = vsel %vm30_vm0, %v4194_v15, 0.0  ;;  %v4136_v35 = vsub.f32 %v13125_v24, %v13301_v8 }
 0x5a2   :  { %v4265_v10 = vadd.f32 %v4264_v23, %v4263_v46  ;;  %v4196_v23 = vmul.f32 %v4132_v44, %v4132_v44  ;;  %v4274_v54 = vsel %vm30_vm0, %v4195_v56, 0.0  ;;  %v4137_v44 = vsub.f32 %v13135_v5, %v13301_v8 }
 0x5a4   :  { %v4267_v50 = vadd.f32 %v4266_v52, %v4265_v10  ;;  %v4197_v52 = vmul.f32 %v4133_v62, %v4133_v62  ;;  %v4276_v29 = vsel %vm30_vm0, %v4196_v23, 0.0  ;;  %v4138_v62 = vsub.f32 %v13133_v39, %v13301_v8 }
 0x5a6   :  { %v4269_v34 = vadd.f32 %v4268_v53, %v4267_v50  ;;  %v4198_v53 = vmul.f32 %v4134_v61, %v4134_v61  ;;  %v4278_v15 = vsel %vm30_vm0, %v4197_v52, 0.0  ;;  %v4139_v61 = vsub.f32 %v13143_v38, %v13301_v8 }
 0x5a8   :  { %v4271_v46 = vadd.f32 %v4270_v32, %v4269_v34  ;;  %v4199_v32 = vmul.f32 %v4135_v43, %v4135_v43  ;;  %v4280_v56 = vsel %vm30_vm0, %v4198_v53, 0.0  ;;  %v4140_v43 = vsub.f32 %v13141_v60, %v13301_v8 }
 0x5aa   :  { %v4273_v10 = vadd.f32 %v4272_v18, %v4271_v46  ;;  %v4200_v18 = vmul.f32 %v4136_v35, %v4136_v35  ;;  %v4282_v23 = vsel %vm30_vm0, %v4199_v32, 0.0  ;;  %v4141_v35 = vsub.f32 %v13151_v37, %v13301_v8 }
 0x5ac   :  { %v4275_v50 = vadd.f32 %v4274_v54, %v4273_v10  ;;  %v4201_v54 = vmul.f32 %v4137_v44, %v4137_v44  ;;  %v4284_v52 = vsel %vm30_vm0, %v4200_v18, 0.0  ;;  %v4142_v44 = vsub.f32 %v13149_v12, %v13301_v8 }
 0x5ae   :  { %v4277_v34 = vadd.f32 %v4276_v29, %v4275_v50  ;;  %v4202_v29 = vmul.f32 %v4138_v62, %v4138_v62  ;;  %v4286_v53 = vsel %vm30_vm0, %v4201_v54, 0.0  ;;  %v4143_v62 = vsub.f32 %v13159_v55, %v13301_v8 }
 0x5af   :  { %v4144_v54 = vsub.f32 %v13157_v19, %v13301_v8 }
 0x5b0   :  { %v4279_v46 = vadd.f32 %v4278_v15, %v4277_v34  ;;  %v4203_v15 = vmul.f32 %v4139_v61, %v4139_v61  ;;  %v4288_v32 = vsel %vm30_vm0, %v4202_v29, 0.0  ;;  %v4145_v29 = vsub.f32 %v13167_v20, %v13301_v8 }
 0x5b2   :  { %v4281_v10 = vadd.f32 %v4280_v56, %v4279_v46  ;;  %v4204_v56 = vmul.f32 %v4140_v43, %v4140_v43  ;;  %v4290_v18 = vsel %vm30_vm0, %v4203_v15, 0.0 }
 0x5b4   :  { %v4283_v50 = vadd.f32 %v4282_v23, %v4281_v10  ;;  %v4205_v23 = vmul.f32 %v4141_v35, %v4141_v35 }
 0x5b6   :  { %v4285_v34 = vadd.f32 %v4284_v52, %v4283_v50  ;;  %v4715_v50 = vld [vmem:[#allocation2 + $0x1] sm:$0xff]  ;;  %v4716_v52 = vld [vmem:[#allocation2 + $0x9] sm:$0xff]  ;;  %v4294_v35 = vsel %vm30_vm0, %v4205_v23, 0.0 }
 0x5b7   :  { %v8706_v61 = vpack.i.bf16 %v4716_v52, %v4715_v50 }
 0x5b8   :  { %v4287_v46 = vadd.f32 %v4286_v53, %v4285_v34  ;;  %v4206_v34 = vmul.f32 %v4142_v44, %v4142_v44  ;;  %v4292_v53 = vsel %vm30_vm0, %v4204_v56, 0.0  ;;  %v4147_v44 = vsub.f32 %v13175_v16, %v13301_v8 }
 0x5b9   :  { %8707 = vrot.lane.b32.xlu0 %v8706_v61, %s10139_s29 }
 0x5ba   :  { %v4289_v10 = vadd.f32 %v4288_v32, %v4287_v46  ;;  %v4207_v46 = vmul.f32 %v4143_v62, %v4143_v62  ;;  %v4146_v32 = vsub.f32 %v13165_v11, %v13301_v8  ;;  %v4148_v62 = vsub.f32 %v13173_v4, %v13301_v8 }
 0x5bc   :  { %v4291_v37 = vadd.f32 %v4290_v18, %v4289_v10  ;;  %v4208_v10 = vmul.f32 %v4144_v54, %v4144_v54  ;;  %v4296_v18 = vsel %vm30_vm0, %v4206_v34, 0.0  ;;  %v4298_v56 = vsel %vm30_vm0, %v4207_v46, 0.0 }
 0x5bd   :  { %v4210_v61 = vmul.f32 %v4146_v32, %v4146_v32  ;;  %v4149_v54 = vsub.f32 %v13183_v40, %v13301_v8  ;;  %v4151_v32 = vsub.f32 %v13191_v26, %v13301_v8 }
 0x5be   :  { %v4293_v43 = vadd.f32 %v4292_v53, %v4291_v37  ;;  %v4209_v37 = vmul.f32 %v4145_v29, %v4145_v29  ;;  %v4300_v23 = vsel %vm30_vm0, %v4208_v10, 0.0  ;;  %v4150_v29 = vsub.f32 %v13181_v30, %v13301_v8 }
 0x5bf   :  { %v4304_v46 = vsel %vm30_vm0, %v4210_v61, 0.0 }
 0x5c0   :  { %v4295_v15 = vadd.f32 %v4294_v35, %v4293_v43  ;;  %v4211_v43 = vmul.f32 %v4147_v44, %v4147_v44  ;;  %v4302_v34 = vsel %vm30_vm0, %v4209_v37, 0.0  ;;  %v4152_v44 = vsub.f32 %v13189_v48, %v13301_v8 }
 0x5c2   :  { %v4297_v50 = vadd.f32 %v4296_v18, %v4295_v15  ;;  %v4212_v15 = vmul.f32 %v4148_v62, %v4148_v62  ;;  %v4306_v10 = vsel %vm30_vm0, %v4211_v43, 0.0  ;;  %v4153_v62 = vsub.f32 %v13199_v1, %v13301_v8 }
 0x5c4   :  { %v4299_v52 = vadd.f32 %v4298_v56, %v4297_v50  ;;  %v4213_v50 = vmul.f32 %v4149_v54, %v4149_v54  ;;  %v4308_v37 = vsel %vm30_vm0, %v4212_v15, 0.0  ;;  %v4154_v54 = vsub.f32 %v13197_v28, %v13301_v8 }
 0x5c6   :  { %v4301_v53 = vadd.f32 %v4300_v23, %v4299_v52  ;;  %v4214_v52 = vmul.f32 %v4150_v29, %v4150_v29  ;;  %v4310_v61 = vsel %vm30_vm0, %v4213_v50, 0.0  ;;  %v4155_v29 = vsub.f32 %v13207_v17, %v13301_v8 }
 0x5c8   :  { %v4303_v35 = vadd.f32 %v4302_v34, %v4301_v53  ;;  %v4215_v53 = vmul.f32 %v4151_v32, %v4151_v32  ;;  %v4312_v43 = vsel %vm30_vm0, %v4214_v52, 0.0  ;;  %v4156_v32 = vsub.f32 %v13205_v14, %v13301_v8 }
 0x5ca   :  { %v4305_v18 = vadd.f32 %v4304_v46, %v4303_v35  ;;  %v4216_v35 = vmul.f32 %v4152_v44, %v4152_v44  ;;  %v4314_v15 = vsel %vm30_vm0, %v4215_v53, 0.0  ;;  %v4157_v44 = vsub.f32 %v13215_v42, %v13301_v8 }
 0x5cc   :  { %v4307_v56 = vadd.f32 %v4306_v10, %v4305_v18  ;;  %v4217_v18 = vmul.f32 %v4153_v62, %v4153_v62  ;;  %v4316_v50 = vsel %vm30_vm0, %v4216_v35, 0.0  ;;  %v4158_v62 = vsub.f32 %v13213_v33, %v13301_v8 }
 0x5ce   :  { %v4309_v23 = vadd.f32 %v4308_v37, %v4307_v56  ;;  %v4218_v56 = vmul.f32 %v4154_v54, %v4154_v54  ;;  %v4318_v52 = vsel %vm30_vm0, %v4217_v18, 0.0  ;;  %v4159_v54 = vsub.f32 %v13223_v59, %v13301_v8 }
 0x5d0   :  { %v4311_v34 = vadd.f32 %v4310_v61, %v4309_v23  ;;  %v4219_v23 = vmul.f32 %v4155_v29, %v4155_v29  ;;  %v4320_v53 = vsel %vm30_vm0, %v4218_v56, 0.0  ;;  %v4160_v29 = vsub.f32 %v13221_v13, %v13301_v8 }
 0x5d2   :  { %v4313_v46 = vadd.f32 %v4312_v43, %v4311_v34  ;;  %v4220_v34 = vmul.f32 %v4156_v32, %v4156_v32  ;;  %v4322_v35 = vsel %vm30_vm0, %v4219_v23, 0.0  ;;  %v4161_v32 = vsub.f32 %v13231_v63, %v13301_v8 }
 0x5d4   :  { %v4315_v10 = vadd.f32 %v4314_v15, %v4313_v46  ;;  %v4221_v46 = vmul.f32 %v4157_v44, %v4157_v44  ;;  %v4324_v18 = vsel %vm30_vm0, %v4220_v34, 0.0  ;;  %v4162_v44 = vsub.f32 %v13229_v36, %v13301_v8 }
 0x5d6   :  { %v4317_v37 = vadd.f32 %v4316_v50, %v4315_v10  ;;  %v4222_v10 = vmul.f32 %v4158_v62, %v4158_v62  ;;  %v4326_v56 = vsel %vm30_vm0, %v4221_v46, 0.0  ;;  %v4226_v63 = vmul.f32 %v4162_v44, %v4162_v44 }
 0x5d8   :  { %v4319_v61 = vadd.f32 %v4318_v52, %v4317_v37  ;;  %v4223_v37 = vmul.f32 %v4159_v54, %v4159_v54  ;;  %v4328_v23 = vsel %vm30_vm0, %v4222_v10, 0.0 }
 0x5da   :  { %v4321_v43 = vadd.f32 %v4320_v53, %v4319_v61  ;;  %v4224_v61 = vmul.f32 %v4160_v29, %v4160_v29  ;;  %v4330_v34 = vsel %vm30_vm0, %v4223_v37, 0.0  ;;  %v4336_v37 = vsel %vm30_vm0, %v4226_v63, 0.0 }
 0x5dc   :  { %v4323_v15 = vadd.f32 %v4322_v35, %v4321_v43  ;;  %v16734_v43 = vld [vmem:[#allocation283_spill] sm:$0xff]  ;;  %v4225_v35 = vmul.f32 %v4161_v32, %v4161_v32  ;;  %v4332_v46 = vsel %vm30_vm0, %v4224_v61, 0.0 }
 0x5dd   :  { %v4163_v62 = vsub.f32 %v16734_v43, %v13301_v8 }
 0x5de   :  { %v4325_v50 = vadd.f32 %v4324_v18, %v4323_v15  ;;  %v16735_v18 = vld [vmem:[#allocation53_spill] sm:$0xff]  ;;  %v4334_v10 = vsel %vm30_vm0, %v4225_v35, 0.0 }
 0x5df   :  { %v4164_v54 = vsub.f32 %v16735_v18, %v13301_v8  ;;  %v4227_v36 = vmul.f32 %v4163_v62, %v4163_v62 }
 0x5e0   :  { %v4327_v52 = vadd.f32 %v4326_v56, %v4325_v50  ;;  %v16736_v56 = vld [vmem:[#allocation108_spill] sm:$0xff] }
 0x5e1   :  { %v4165_v29 = vsub.f32 %v16736_v56, %v13301_v8  ;;  %v4228_v43 = vmul.f32 %v4164_v54, %v4164_v54  ;;  %v4338_v61 = vsel %vm30_vm0, %v4227_v36, 0.0 }
 0x5e2   :  { %v4329_v53 = vadd.f32 %v4328_v23, %v4327_v52  ;;  %v16737_v23 = vld [vmem:[#allocation285_spill] sm:$0xff] }
 0x5e3   :  { %v4166_v32 = vsub.f32 %v16737_v23, %v13301_v8  ;;  %v4229_v18 = vmul.f32 %v4165_v29, %v4165_v29  ;;  %v4340_v35 = vsel %vm30_vm0, %v4228_v43, 0.0 }
 0x5e4   :  { %v4331_v15 = vadd.f32 %v4330_v34, %v4329_v53  ;;  %v16738_v34 = vld [vmem:[#allocation343_spill] sm:$0xff] }
 0x5e5   :  { %v4167_v44 = vsub.f32 %v16738_v34, %v13301_v8  ;;  %v4230_v56 = vmul.f32 %v4166_v32, %v4166_v32  ;;  %v4342_v63 = vsel %vm30_vm0, %v4229_v18, 0.0 }
 0x5e6   :  { %v4333_v50 = vadd.f32 %v4332_v46, %v4331_v15  ;;  %v16739_v46 = vld [vmem:[#allocation110_spill] sm:$0xff] }
 0x5e7   :  { %v4168_v62 = vsub.f32 %v16739_v46, %v13301_v8  ;;  %v4231_v23 = vmul.f32 %v4167_v44, %v4167_v44  ;;  %v4344_v36 = vsel %vm30_vm0, %v4230_v56, 0.0 }
 0x5e8   :  { %v4335_v52 = vadd.f32 %v4334_v10, %v4333_v50  ;;  %v16740_v10 = vld [vmem:[#allocation166_spill] sm:$0xff] }
 0x5e9   :  { %v4169_v54 = vsub.f32 %v16740_v10, %v13301_v8  ;;  %v4232_v34 = vmul.f32 %v4168_v62, %v4168_v62  ;;  %v4346_v43 = vsel %vm30_vm0, %v4231_v23, 0.0 }
 0x5ea   :  { %v4337_v53 = vadd.f32 %v4336_v37, %v4335_v52  ;;  %v16741_v37 = vld [vmem:[#allocation346_spill] sm:$0xff] }
 0x5eb   :  { %v4170_v29 = vsub.f32 %v16741_v37, %v13301_v8  ;;  %v4233_v46 = vmul.f32 %v4169_v54, %v4169_v54  ;;  %v4348_v18 = vsel %vm30_vm0, %v4232_v34, 0.0 }
 0x5ec   :  { %v4339_v15 = vadd.f32 %v4338_v61, %v4337_v53  ;;  %v16742_v61 = vld [vmem:[#allocation7_spill] sm:$0xff] }
 0x5ed   :  { %v4171_v32 = vsub.f32 %v16742_v61, %v13301_v8  ;;  %v4234_v10 = vmul.f32 %v4170_v29, %v4170_v29  ;;  %v4350_v56 = vsel %vm30_vm0, %v4233_v46, 0.0 }
 0x5ee   :  { %v4341_v50 = vadd.f32 %v4340_v35, %v4339_v15  ;;  %v16743_v35 = vld [vmem:[#allocation169_spill] sm:$0xff] }
 0x5ef   :  { %v4172_v44 = vsub.f32 %v16743_v35, %v13301_v8  ;;  %v4235_v37 = vmul.f32 %v4171_v32, %v4171_v32  ;;  %v4352_v23 = vsel %vm30_vm0, %v4234_v10, 0.0 }
 0x5f0   :  { %v4343_v52 = vadd.f32 %v4342_v63, %v4341_v50  ;;  %v16744_v63 = vld [vmem:[#allocation228_spill] sm:$0xff] }
 0x5f1   :  { %v4173_v62 = vsub.f32 %v16744_v63, %v13301_v8  ;;  %v4236_v61 = vmul.f32 %v4172_v44, %v4172_v44  ;;  %v4354_v34 = vsel %vm30_vm0, %v4235_v37, 0.0  ;;  %v4177_v44 = vsub.f32 %v13295_v22, %v13301_v8 }
 0x5f2   :  { %v4345_v53 = vadd.f32 %v4344_v36, %v4343_v52  ;;  %v16745_v36 = vld [vmem:[#allocation225_spill] sm:$0xff] }
 0x5f3   :  { %v4174_v54 = vsub.f32 %v16745_v36, %v13301_v8  ;;  %v4237_v35 = vmul.f32 %v4173_v62, %v4173_v62  ;;  %v4356_v46 = vsel %vm30_vm0, %v4236_v61, 0.0  ;;  %v4178_v62 = vsub.f32 %v13293_v3, %v13301_v8 }
 0x5f4   :  { %v4347_v15 = vadd.f32 %v4346_v43, %v4345_v53  ;;  %v16746_v43 = vld [vmem:[#allocation55_spill] sm:$0xff] }
 0x5f5   :  { %v4175_v29 = vsub.f32 %v16746_v43, %v13301_v8  ;;  %v4238_v63 = vmul.f32 %v4174_v54, %v4174_v54  ;;  %v4358_v10 = vsel %vm30_vm0, %v4237_v35, 0.0  ;;  %v4242_v61 = vmul.f32 %v4178_v62, %v4178_v62 }
 0x5f6   :  { %v4349_v50 = vadd.f32 %v4348_v18, %v4347_v15  ;;  %v16747_v18 = vld [vmem:[#allocation52_spill] sm:$0xff] }
 0x5f7   :  { %v4176_v32 = vsub.f32 %v16747_v18, %v13301_v8  ;;  %v4360_v37 = vsel %vm30_vm0, %v4238_v63, 0.0  ;;  %v4368_v35 = vsel %vm30_vm0, %v4242_v61, 0.0 }
 0x5f8   :  { %v4351_v52 = vadd.f32 %v4350_v56, %v4349_v50  ;;  %v4239_v56 = vmul.f32 %v4175_v29, %v4175_v29 }
 0x5fa   :  { %v4353_v53 = vadd.f32 %v4352_v23, %v4351_v52  ;;  %v4240_v23 = vmul.f32 %v4176_v32, %v4176_v32  ;;  %v4362_v54 = vsel %vm30_vm0, %v4239_v56, 0.0  ;;  %v4383_v56 = vlaneseq }
 0x5fc   :  { %v4355_v15 = vadd.f32 %v4354_v34, %v4353_v53  ;;  %v4241_v34 = vmul.f32 %v4177_v44, %v4177_v44  ;;  %v4384_v62 = vshrl.u32 %v4383_v56, 7 }
 0x5fe   :  { %v4357_v50 = vadd.f32 %v4356_v46, %v4355_v15  ;;  %v4364_v15 = vsel %vm30_vm0, %v4240_v23, 0.0  ;;  %v4366_v29 = vsel %vm30_vm0, %v4241_v34, 0.0  ;;  %v4385_v23 = vsub.s32 0, %v4384_v62 }
 0x600   :  { %v4359_v52 = vadd.f32 %v4358_v10, %v4357_v50 }
 0x602   :  { %v4361_v53 = vadd.f32 %v4360_v37, %v4359_v52 }
 0x604   :  { %v4363_v18 = vadd.f32 %v4362_v54, %v4361_v53 }
 0x606   :  { %v4365_v46 = vadd.f32 %v4364_v15, %v4363_v18  ;;  %v3978_v18 = vld [vmem:[%s15867_s3] sm:$0x1] }
 0x608   :  { %v4367_v43 = vadd.f32 %v4366_v29, %v4365_v46  ;;  %v16748_v46 = vld [vmem:[#allocation342_spill] sm:$0xff] }
 0x60a   :  { %v4369_v50 = vadd.f32 %v4368_v35, %v4367_v43  ;;  %v3979_v43 = vld [vmem:[%s15868_s4] sm:$0x1]  ;;  %v16749_v35 = vld [vmem:[#allocation165_spill] sm:$0xff] }
 0x60c   :  { %v4370_v10 = vrot.slane %v4369_v50, 4 }
 0x60e   :  { %v4371_v3 = vadd.f32 %v4370_v10, %v4369_v50 }
 0x610   :  { %v4372_v32 = vrot.slane %v4371_v3, 2 }
 0x612   :  { %v4373_v36 = vadd.f32 %v4372_v32, %v4371_v3  ;;  %v16751_v32 = vld [vmem:[#allocation6_spill] sm:$0xff] }
 0x614   :  { %v4374_v63 = vrot.slane %v4373_v36, 1 }
 0x616   :  { %v4375_v52 = vadd.f32 %v4374_v63, %v4373_v36 }
 0x618   :  { %v4376_v44 = vmul.f32 0.001953125, %v4375_v52 }
 0x61a   :  { %v4377_v37 = vadd.f32 1e-05, %v4376_v44 }
 0x61c   :  { %9990 = vrsqrt.f32 %v4377_v37 }
 0x626   :  { %v9991_v53 = vpop.eup %9990 }
 0x627   :  { %v4379_v34 = vmul.f32 %v9991_v53, %v3978_v18 }
 0x629   :  { %v4380_v3 = vmul.f32 %v4379_v34, %v13301_v8  ;;  %v13503_v54 = vrot.slane %v4379_v34, %v4385_v23  ;;  %v16750_v8 = vld [vmem:[#allocation344_spill] sm:$0xff] }
 0x62a   :  { %v16753_v34 = vld [vmem:[#allocation224_spill] sm:$0xff] }
 0x62b   :  { %v4381_v36 = vsub.f32 %v3979_v43, %v4380_v3  ;;  %v4450_v61 = vmul.f32 %v13503_v54, %v13295_v22  ;;  %v13509_v15 = vmul.f32 %v13503_v54, %v13049_v25  ;;  %v13513_v29 = vmul.f32 %v16748_v46, %v13503_v54  ;;  %v16752_v22 = vld [vmem:[#allocation167_spill] sm:$0xff]  ;;  %v16757_v46 = vld [vmem:[#allocation53_spill] sm:$0xff] }
 0x62c   :  { %v13517_v50 = vmul.f32 %v13503_v54, %v16749_v35  ;;  %v13521_v10 = vmul.f32 %v16750_v8, %v13503_v54  ;;  %v13525_v63 = vmul.f32 %v13503_v54, %v16751_v32  ;;  %v13529_v25 = vmul.f32 %v16752_v22, %v13503_v54  ;;  %v16754_v3 = vld [vmem:[#allocation51_spill] sm:$0xff]  ;;  %v16758_v35 = vld [vmem:[#allocation108_spill] sm:$0xff]  ;;  %v16759_v8 = vld [vmem:[#allocation285_spill] sm:$0xff] }
 0x62d   :  { %v13531_v52 = vrot.slane %v4381_v36, %v4385_v23  ;;  %v13535_v44 = vmul.f32 %v13503_v54, %v13071_v58  ;;  %v13539_v37 = vmul.f32 %v13069_v27, %v13503_v54  ;;  %v13543_v56 = vmul.f32 %v13503_v54, %v13079_v9  ;;  %v16755_v36 = vld [vmem:[#allocation226_spill] sm:$0xff]  ;;  %v16761_v22 = vld [vmem:[#allocation343_spill] sm:$0xff] }
 0x62e   :  { %v13547_v62 = vmul.f32 %v13077_v31, %v13503_v54  ;;  %v13551_v18 = vmul.f32 %v13503_v54, %v13087_v41  ;;  %v13555_v58 = vmul.f32 %v13085_v7, %v13503_v54  ;;  %v13559_v27 = vmul.f32 %v13503_v54, %v13095_v45 }
 0x62f   :  { %v4520_v23 = vadd.f32 %v13531_v52, %v4450_v61  ;;  %v13564_v9 = vmul.f32 %v13093_v6, %v13503_v54  ;;  %v13568_v31 = vmul.f32 %v13503_v54, %v13103_v21  ;;  %v13572_v41 = vmul.f32 %v13101_v57, %v13503_v54  ;;  %v16756_v61 = vld [vmem:[#allocation283_spill] sm:$0xff] }
 0x630   :  { %v13576_v7 = vmul.f32 %v13503_v54, %v13111_v2  ;;  %v13580_v45 = vmul.f32 %v13109_v47, %v13503_v54  ;;  %v13584_v6 = vmul.f32 %v13503_v54, %v13119_v49  ;;  %v13588_v21 = vmul.f32 %v13117_v0, %v13503_v54 }
 0x631   :  { %v4584_v53 = vmax.f32 %v4520_v23, 0.0  ;;  %v13592_v57 = vmul.f32 %v13503_v54, %v13127_v51  ;;  %v13596_v2 = vmul.f32 %v13125_v24, %v13503_v54  ;;  %v13600_v47 = vmul.f32 %v13503_v54, %v13135_v5 }
 0x632   :  { %v13604_v49 = vmul.f32 %v13133_v39, %v13503_v54  ;;  %v13608_v0 = vmul.f32 %v13503_v54, %v13143_v38  ;;  %v13612_v51 = vmul.f32 %v13141_v60, %v13503_v54  ;;  %v13616_v24 = vmul.f32 %v13503_v54, %v16753_v34 }
 0x633   :  { %v13620_v5 = vmul.f32 %v13149_v12, %v13503_v54  ;;  %v13624_v39 = vmul.f32 %v13503_v54, %v13159_v55  ;;  %v13628_v38 = vmul.f32 %v13157_v19, %v13503_v54  ;;  %v13632_v60 = vmul.f32 %v13503_v54, %v13167_v20  ;;  %4648 = vst.msk [vmem:[#allocation2 + $0x331] sm:$0xff] %vm30_vm0, %v4584_v53  ;;  %v16763_v53 = vld [vmem:[#allocation110_spill] sm:$0xff] }
 0x634   :  { %v13637_v43 = vmul.f32 %v13165_v11, %v13503_v54  ;;  %v13641_v12 = vmul.f32 %v13503_v54, %v13175_v16  ;;  %v13645_v55 = vmul.f32 %v13173_v4, %v13503_v54  ;;  %v13649_v19 = vmul.f32 %v13503_v54, %v13183_v40 }
 0x635   :  { %v13653_v20 = vmul.f32 %v13181_v30, %v13503_v54  ;;  %v13657_v11 = vmul.f32 %v13503_v54, %v13191_v26  ;;  %v13661_v16 = vmul.f32 %v13189_v48, %v13503_v54  ;;  %v13665_v4 = vmul.f32 %v13503_v54, %v13199_v1 }
 0x636   :  { %v13669_v40 = vmul.f32 %v13197_v28, %v13503_v54  ;;  %v13673_v30 = vmul.f32 %v13503_v54, %v13207_v17  ;;  %v13677_v26 = vmul.f32 %v13205_v14, %v13503_v54  ;;  %v13681_v48 = vmul.f32 %v13503_v54, %v13215_v42 }
 0x637   :  { %v13685_v1 = vmul.f32 %v13213_v33, %v13503_v54  ;;  %v13689_v28 = vmul.f32 %v13503_v54, %v13223_v59  ;;  %v13693_v17 = vmul.f32 %v13221_v13, %v13503_v54  ;;  %v13697_v14 = vmul.f32 %v13503_v54, %v16754_v3  ;;  %v16765_v3 = vld [vmem:[#allocation166_spill] sm:$0xff] }
 0x638   :  { %v13701_v42 = vmul.f32 %v16755_v36, %v13503_v54  ;;  %v13705_v33 = vmul.f32 %v13503_v54, %v16756_v61  ;;  %v13709_v59 = vmul.f32 %v16757_v46, %v13503_v54  ;;  %v13713_v13 = vmul.f32 %v13503_v54, %v16758_v35  ;;  %v16767_v61 = vld [vmem:[#allocation346_spill] sm:$0xff]  ;;  %v16769_v35 = vld [vmem:[#allocation7_spill] sm:$0xff] }
 0x639   :  { %v13717_v32 = vmul.f32 %v16759_v8, %v13503_v54  ;;  %v13721_v23 = vmul.f32 %v13503_v54, %v16761_v22  ;;  %v13725_v34 = vmul.f32 %v16763_v53, %v13503_v54  ;;  %v13729_v36 = vmul.f32 %v13503_v54, %v16765_v3 }
 0x63a   :  { %v13733_v46 = vmul.f32 %v16767_v61, %v13503_v54  ;;  %v13737_v8 = vmul.f32 %v13503_v54, %v16769_v35 }
 0x63b   :  { %16760 = vst [vmem:[#allocation287_spill] sm:$0xff] %v13717_v32  ;;  %16762 = vst [vmem:[#allocation109_spill] sm:$0xff] %v13721_v23  ;;  %v16771_v32 = vld [vmem:[#allocation169_spill] sm:$0xff]  ;;  %v16772_v23 = vld [vmem:[#allocation228_spill] sm:$0xff] }
 0x63c   :  { %16764 = vst [vmem:[#allocation112_spill] sm:$0xff] %v13725_v34  ;;  %16766 = vst [vmem:[#allocation345_spill] sm:$0xff] %v13729_v36  ;;  %v13741_v22 = vmul.f32 %v16771_v32, %v13503_v54  ;;  %v13745_v53 = vmul.f32 %v13503_v54, %v16772_v23  ;;  %v16773_v34 = vld [vmem:[#allocation225_spill] sm:$0xff]  ;;  %v16774_v36 = vld [vmem:[#allocation55_spill] sm:$0xff]  ;;  %v13765_v23 = vadd.f32 %v13531_v52, %v13509_v15 }
 0x63d   :  { %16768 = vst [vmem:[#allocation348_spill] sm:$0xff] %v13733_v46  ;;  %16770 = vst [vmem:[#allocation168_spill] sm:$0xff] %v13737_v8  ;;  %v13749_v3 = vmul.f32 %v16773_v34, %v13503_v54  ;;  %v13753_v61 = vmul.f32 %v13503_v54, %v16774_v36  ;;  %v16775_v46 = vld [vmem:[#allocation52_spill] sm:$0xff]  ;;  %v13769_v34 = vadd.f32 %v13531_v52, %v13513_v29 }
 0x63e   :  { %v13757_v35 = vmul.f32 %v16775_v46, %v13503_v54  ;;  %v16776_v8 = vld [vmem:[#allocation284_spill] sm:$0xff]  ;;  %v13773_v36 = vadd.f32 %v13531_v52, %v13517_v50  ;;  %v13777_v46 = vadd.f32 %v13531_v52, %v13521_v10  ;;  %v13785_v15 = vadd.f32 %v13531_v52, %v13529_v25 }
 0x63f   :  { %v13761_v32 = vmul.f32 %v16776_v8, %v13503_v54  ;;  %v13781_v54 = vadd.f32 %v13531_v52, %v13525_v63  ;;  %v13789_v29 = vadd.f32 %v13531_v52, %v13535_v44  ;;  %v13793_v50 = vadd.f32 %v13531_v52, %v13539_v37 }
 0x640   :  { %v13797_v10 = vadd.f32 %v13531_v52, %v13543_v56  ;;  %v13801_v63 = vadd.f32 %v13531_v52, %v13547_v62  ;;  %v13805_v25 = vadd.f32 %v13531_v52, %v13551_v18  ;;  %v13809_v44 = vadd.f32 %v13531_v52, %v13555_v58 }
 0x641   :  { %v13813_v37 = vadd.f32 %v13531_v52, %v13559_v27  ;;  %v13817_v56 = vadd.f32 %v13531_v52, %v13564_v9  ;;  %v13821_v62 = vadd.f32 %v13531_v52, %v13568_v31  ;;  %v13825_v18 = vadd.f32 %v13531_v52, %v13572_v41 }
 0x642   :  { %v13829_v58 = vadd.f32 %v13531_v52, %v13576_v7  ;;  %v13833_v27 = vadd.f32 %v13531_v52, %v13580_v45  ;;  %v13837_v9 = vadd.f32 %v13531_v52, %v13584_v6  ;;  %v13841_v31 = vadd.f32 %v13531_v52, %v13588_v21  ;;  %v16782_v8 = vld [vmem:[#allocation287_spill] sm:$0xff] }
 0x643   :  { %v13845_v41 = vadd.f32 %v13531_v52, %v13592_v57  ;;  %v13849_v7 = vadd.f32 %v13531_v52, %v13596_v2  ;;  %v13853_v45 = vadd.f32 %v13531_v52, %v13600_v47  ;;  %v13857_v6 = vadd.f32 %v13531_v52, %v13604_v49 }
 0x644   :  { %v13861_v21 = vadd.f32 %v13531_v52, %v13608_v0  ;;  %v13865_v57 = vadd.f32 %v13531_v52, %v13612_v51  ;;  %v13869_v2 = vadd.f32 %v13531_v52, %v13616_v24  ;;  %v13873_v47 = vadd.f32 %v13531_v52, %v13620_v5 }
 0x645   :  { %v13877_v49 = vadd.f32 %v13531_v52, %v13624_v39  ;;  %v13881_v0 = vadd.f32 %v13531_v52, %v13628_v38  ;;  %v13885_v51 = vadd.f32 %v13531_v52, %v13632_v60  ;;  %v13889_v24 = vadd.f32 %v13531_v52, %v13637_v43 }
 0x646   :  { %v13893_v5 = vadd.f32 %v13531_v52, %v13641_v12  ;;  %v13897_v39 = vadd.f32 %v13531_v52, %v13645_v55  ;;  %v13901_v38 = vadd.f32 %v13531_v52, %v13649_v19  ;;  %v13905_v60 = vadd.f32 %v13531_v52, %v13653_v20 }
 0x647   :  { %v13909_v43 = vadd.f32 %v13531_v52, %v13657_v11  ;;  %v13913_v12 = vadd.f32 %v13531_v52, %v13661_v16  ;;  %v13917_v55 = vadd.f32 %v13531_v52, %v13665_v4  ;;  %v13921_v19 = vadd.f32 %v13531_v52, %v13669_v40 }
 0x648   :  { %v13925_v20 = vadd.f32 %v13531_v52, %v13673_v30  ;;  %v13929_v11 = vadd.f32 %v13531_v52, %v13677_v26  ;;  %v13933_v16 = vadd.f32 %v13531_v52, %v13681_v48  ;;  %v13937_v4 = vadd.f32 %v13531_v52, %v13685_v1 }
 0x649   :  { %v13941_v40 = vadd.f32 %v13531_v52, %v13689_v28  ;;  %v13945_v30 = vadd.f32 %v13531_v52, %v13693_v17  ;;  %v13949_v26 = vadd.f32 %v13531_v52, %v13697_v14  ;;  %v13953_v48 = vadd.f32 %v13531_v52, %v13701_v42 }
 0x64a   :  { %v13957_v1 = vadd.f32 %v13531_v52, %v13705_v33  ;;  %v13961_v28 = vadd.f32 %v13531_v52, %v13709_v59  ;;  %v13965_v17 = vadd.f32 %v13531_v52, %v13713_v13  ;;  %v13969_v14 = vadd.f32 %v13531_v52, %v16782_v8 }
 0x64b   :  { %16777 = vst [vmem:[#allocation171_spill] sm:$0xff] %v13949_v26  ;;  %16778 = vst [vmem:[#allocation8_spill] sm:$0xff] %v13953_v48  ;;  %v16783_v26 = vld [vmem:[#allocation109_spill] sm:$0xff]  ;;  %v16784_v48 = vld [vmem:[#allocation112_spill] sm:$0xff] }
 0x64c   :  { %16779 = vst [vmem:[#allocation227_spill] sm:$0xff] %v13957_v1  ;;  %16780 = vst [vmem:[#allocation230_spill] sm:$0xff] %v13961_v28  ;;  %v13973_v42 = vadd.f32 %v13531_v52, %v16783_v26  ;;  %v13977_v33 = vadd.f32 %v13531_v52, %v16784_v48  ;;  %v16785_v1 = vld [vmem:[#allocation345_spill] sm:$0xff]  ;;  %v16786_v28 = vld [vmem:[#allocation348_spill] sm:$0xff]  ;;  %v13993_v26 = vadd.f32 %v13531_v52, %v13741_v22 }
 0x64d   :  { %16781 = vst [vmem:[#allocation54_spill] sm:$0xff] %v13965_v17  ;;  %v13981_v59 = vadd.f32 %v13531_v52, %v16785_v1  ;;  %v13985_v13 = vadd.f32 %v13531_v52, %v16786_v28  ;;  %v16787_v17 = vld [vmem:[#allocation168_spill] sm:$0xff]  ;;  %v13997_v48 = vadd.f32 %v13531_v52, %v13745_v53  ;;  %v14001_v1 = vadd.f32 %v13531_v52, %v13749_v3 }
 0x64e   :  { %v13989_v8 = vadd.f32 %v13531_v52, %v16787_v17  ;;  %16788 = vst [vmem:[#allocation57_spill] sm:$0xff] %v13993_v26  ;;  %v14005_v28 = vadd.f32 %v13531_v52, %v13753_v61  ;;  %v14009_v17 = vadd.f32 %v13531_v52, %v13757_v35  ;;  %v14013_v22 = vadd.f32 %v13531_v52, %v13761_v32 }
 0x64f   :  { %16789 = vst [vmem:[#allocation286_spill] sm:$0xff] %v13997_v48  ;;  %16790 = vst [vmem:[#allocation289_spill] sm:$0xff] %v14001_v1  ;;  %v4524_v26 = vmax.f32 %v13773_v36, 0.0  ;;  %v4525_v53 = vmax.f32 %v13777_v46, 0.0  ;;  %v4522_v48 = vmax.f32 %v13765_v23, 0.0  ;;  %v4523_v3 = vmax.f32 %v13769_v34, 0.0 }
 0x650   :  { %16791 = vst [vmem:[#allocation111_spill] sm:$0xff] %v14009_v17  ;;  %v4526_v1 = vmax.f32 %v13781_v54, 0.0  ;;  %v4527_v61 = vmax.f32 %v13785_v15, 0.0  ;;  %v4528_v35 = vmax.f32 %v13789_v29, 0.0  ;;  %v4529_v17 = vmax.f32 %v13793_v50, 0.0 }
 0x651   :  { %4588 = vst.msk [vmem:[#allocation2 + $0x31] sm:$0xff] %vm30_vm0, %v4524_v26  ;;  %v4530_v52 = vmax.f32 %v13797_v10, 0.0  ;;  %4589 = vst.msk [vmem:[#allocation2 + $0x39] sm:$0xff] %vm30_vm0, %v4525_v53  ;;  %v4531_v32 = vmax.f32 %v13801_v63, 0.0  ;;  %v4532_v23 = vmax.f32 %v13805_v25, 0.0  ;;  %v4533_v34 = vmax.f32 %v13809_v44, 0.0 }
 0x652   :  { %v4534_v36 = vmax.f32 %v13813_v37, 0.0  ;;  %4586 = vst.msk [vmem:[#allocation2 + $0x19] sm:$0xff] %vm30_vm0, %v4522_v48  ;;  %4587 = vst.msk [vmem:[#allocation2 + $0x21] sm:$0xff] %vm30_vm0, %v4523_v3  ;;  %v4535_v46 = vmax.f32 %v13817_v56, 0.0  ;;  %v4536_v54 = vmax.f32 %v13821_v62, 0.0  ;;  %v4537_v15 = vmax.f32 %v13825_v18, 0.0 }
 0x653   :  { %4590 = vst.msk [vmem:[#allocation2 + $0x49] sm:$0xff] %vm30_vm0, %v4526_v1  ;;  %v4538_v29 = vmax.f32 %v13829_v58, 0.0  ;;  %4591 = vst.msk [vmem:[#allocation2 + $0x51] sm:$0xff] %vm30_vm0, %v4527_v61  ;;  %v4539_v50 = vmax.f32 %v13833_v27, 0.0  ;;  %v4540_v10 = vmax.f32 %v13837_v9, 0.0  ;;  %v4541_v63 = vmax.f32 %v13841_v31, 0.0 }
 0x654   :  { %4592 = vst.msk [vmem:[#allocation2 + $0x61] sm:$0xff] %vm30_vm0, %v4528_v35  ;;  %4593 = vst.msk [vmem:[#allocation2 + $0x69] sm:$0xff] %vm30_vm0, %v4529_v17  ;;  %v4542_v25 = vmax.f32 %v13845_v41, 0.0  ;;  %v4543_v44 = vmax.f32 %v13849_v7, 0.0  ;;  %v4544_v37 = vmax.f32 %v13853_v45, 0.0  ;;  %v4545_v56 = vmax.f32 %v13857_v6, 0.0 }
 0x655   :  { %4594 = vst.msk [vmem:[#allocation2 + $0x79] sm:$0xff] %vm30_vm0, %v4530_v52  ;;  %4595 = vst.msk [vmem:[#allocation2 + $0x81] sm:$0xff] %vm30_vm0, %v4531_v32  ;;  %v4546_v62 = vmax.f32 %v13861_v21, 0.0  ;;  %v4547_v18 = vmax.f32 %v13865_v57, 0.0  ;;  %v4548_v58 = vmax.f32 %v13869_v2, 0.0  ;;  %v4549_v27 = vmax.f32 %v13873_v47, 0.0 }
 0x656   :  { %4596 = vst.msk [vmem:[#allocation2 + $0x91] sm:$0xff] %vm30_vm0, %v4532_v23  ;;  %4597 = vst.msk [vmem:[#allocation2 + $0x99] sm:$0xff] %vm30_vm0, %v4533_v34  ;;  %v4550_v9 = vmax.f32 %v13877_v49, 0.0  ;;  %v4551_v31 = vmax.f32 %v13881_v0, 0.0  ;;  %v4552_v41 = vmax.f32 %v13885_v51, 0.0  ;;  %v4553_v7 = vmax.f32 %v13889_v24, 0.0 }
 0x657   :  { %4598 = vst.msk [vmem:[#allocation2 + $0xa9] sm:$0xff] %vm30_vm0, %v4534_v36  ;;  %4599 = vst.msk [vmem:[#allocation2 + $0xb1] sm:$0xff] %vm30_vm0, %v4535_v46  ;;  %v4554_v45 = vmax.f32 %v13893_v5, 0.0  ;;  %v4555_v21 = vmax.f32 %v13897_v39, 0.0  ;;  %v4556_v57 = vmax.f32 %v13901_v38, 0.0  ;;  %v4557_v2 = vmax.f32 %v13905_v60, 0.0 }
 0x658   :  { %4600 = vst.msk [vmem:[#allocation2 + $0xc1] sm:$0xff] %vm30_vm0, %v4536_v54  ;;  %4601 = vst.msk [vmem:[#allocation2 + $0xc9] sm:$0xff] %vm30_vm0, %v4537_v15  ;;  %v4719_v6 = vld [vmem:[#allocation2 + $0x31] sm:$0xff]  ;;  %v4558_v47 = vmax.f32 %v13909_v43, 0.0  ;;  %v4720_v49 = vld [vmem:[#allocation2 + $0x39] sm:$0xff]  ;;  %v4559_v0 = vmax.f32 %v13913_v12, 0.0 }
 0x659   :  { %4602 = vst.msk [vmem:[#allocation2 + $0xd9] sm:$0xff] %vm30_vm0, %v4538_v29  ;;  %4603 = vst.msk [vmem:[#allocation2 + $0xe1] sm:$0xff] %vm30_vm0, %v4539_v50  ;;  %v4560_v51 = vmax.f32 %v13917_v55, 0.0  ;;  %v4561_v24 = vmax.f32 %v13921_v19, 0.0  ;;  %v4562_v5 = vmax.f32 %v13925_v20, 0.0  ;;  %v8716_v39 = vpack.i.bf16 %v4720_v49, %v4719_v6  ;;  %v16792_v19 = vld [vmem:[#allocation171_spill] sm:$0xff] }
 0x65a   :  { %4604 = vst.msk [vmem:[#allocation2 + $0xf1] sm:$0xff] %vm30_vm0, %v4540_v10  ;;  %4605 = vst.msk [vmem:[#allocation2 + $0xf9] sm:$0xff] %vm30_vm0, %v4541_v63  ;;  %v4563_v38 = vmax.f32 %v13929_v11, 0.0  ;;  %v4564_v60 = vmax.f32 %v13933_v16, 0.0  ;;  %v4565_v43 = vmax.f32 %v13937_v4, 0.0  ;;  %v4566_v12 = vmax.f32 %v13941_v40, 0.0 }
 0x65b   :  { %4606 = vst.msk [vmem:[#allocation2 + $0x109] sm:$0xff] %vm30_vm0, %v4542_v25  ;;  %4607 = vst.msk [vmem:[#allocation2 + $0x111] sm:$0xff] %vm30_vm0, %v4543_v44  ;;  %v4567_v55 = vmax.f32 %v13945_v30, 0.0  ;;  %v4568_v20 = vmax.f32 %v16792_v19, 0.0  ;;  %v16793_v26 = vld [vmem:[#allocation8_spill] sm:$0xff]  ;;  %8717 = vrot.lane.b32.xlu0 %v8716_v39, %s10139_s29  ;;  %v16794_v16 = vld [vmem:[#allocation227_spill] sm:$0xff] }
 0x65c   :  { %4608 = vst.msk [vmem:[#allocation2 + $0x121] sm:$0xff] %vm30_vm0, %v4544_v37  ;;  %4609 = vst.msk [vmem:[#allocation2 + $0x129] sm:$0xff] %vm30_vm0, %v4545_v56  ;;  %v4569_v11 = vmax.f32 %v16793_v26, 0.0  ;;  %v4570_v4 = vmax.f32 %v16794_v16, 0.0  ;;  %v16795_v48 = vld [vmem:[#allocation230_spill] sm:$0xff]  ;;  %v4573_v17 = vmax.f32 %v13969_v14, 0.0 }
 0x65d   :  { %4610 = vst.msk [vmem:[#allocation2 + $0x139] sm:$0xff] %vm30_vm0, %v4546_v62  ;;  %4611 = vst.msk [vmem:[#allocation2 + $0x141] sm:$0xff] %vm30_vm0, %v4547_v18  ;;  %v4571_v40 = vmax.f32 %v16795_v48, 0.0  ;;  %v16796_v1 = vld [vmem:[#allocation54_spill] sm:$0xff]  ;;  %v4717_v53 = vld [vmem:[#allocation2 + $0x19] sm:$0xff]  ;;  %v4574_v61 = vmax.f32 %v13973_v42, 0.0 }
 0x65e   :  { %4612 = vst.msk [vmem:[#allocation2 + $0x151] sm:$0xff] %vm30_vm0, %v4548_v58  ;;  %4613 = vst.msk [vmem:[#allocation2 + $0x159] sm:$0xff] %vm30_vm0, %v4549_v27  ;;  %v4572_v30 = vmax.f32 %v16796_v1, 0.0  ;;  %v4718_v3 = vld [vmem:[#allocation2 + $0x21] sm:$0xff]  ;;  %v4575_v35 = vmax.f32 %v13977_v33, 0.0  ;;  %v4576_v52 = vmax.f32 %v13981_v59, 0.0 }
 0x65f   :  { %4614 = vst.msk [vmem:[#allocation2 + $0x169] sm:$0xff] %vm30_vm0, %v4550_v9  ;;  %4615 = vst.msk [vmem:[#allocation2 + $0x171] sm:$0xff] %vm30_vm0, %v4551_v31  ;;  %v4577_v32 = vmax.f32 %v13985_v13, 0.0  ;;  %v4723_v14 = vld [vmem:[#allocation2 + $0x61] sm:$0xff]  ;;  %v4724_v23 = vld [vmem:[#allocation2 + $0x69] sm:$0xff]  ;;  %v4578_v34 = vmax.f32 %v13989_v8, 0.0  ;;  %v8711_v50 = vpack.i.bf16 %v4718_v3, %v4717_v53 }
 0x660   :  { %4616 = vst.msk [vmem:[#allocation2 + $0x181] sm:$0xff] %vm30_vm0, %v4552_v41  ;;  %4617 = vst.msk [vmem:[#allocation2 + $0x189] sm:$0xff] %vm30_vm0, %v4553_v7  ;;  %v16797_v36 = vld [vmem:[#allocation57_spill] sm:$0xff]  ;;  %v16798_v46 = vld [vmem:[#allocation286_spill] sm:$0xff]  ;;  %v4582_v13 = vmax.f32 %v14005_v28, 0.0  ;;  %v4585_v8 = vmax.f32 %v14013_v22, 0.0  ;;  %v8726_v28 = vpack.i.bf16 %v4724_v23, %v4723_v14 }
 0x661   :  { %4618 = vst.msk [vmem:[#allocation2 + $0x1c9] sm:$0xff] %vm30_vm0, %v4554_v45  ;;  %4619 = vst.msk [vmem:[#allocation2 + $0x1d1] sm:$0xff] %vm30_vm0, %v4555_v21  ;;  %v4579_v42 = vmax.f32 %v16797_v36, 0.0  ;;  %v4580_v33 = vmax.f32 %v16798_v46, 0.0  ;;  %v16799_v54 = vld [vmem:[#allocation289_spill] sm:$0xff]  ;;  %v16800_v15 = vld [vmem:[#allocation111_spill] sm:$0xff]  ;;  %8712 = vrot.lane.b32.xlu1 %v8711_v50, %s10139_s29 }
 0x662   :  { %4620 = vst.msk [vmem:[#allocation2 + $0x1e1] sm:$0xff] %vm30_vm0, %v4556_v57  ;;  %4621 = vst.msk [vmem:[#allocation2 + $0x1e9] sm:$0xff] %vm30_vm0, %v4557_v2  ;;  %v4581_v59 = vmax.f32 %v16799_v54, 0.0  ;;  %v4583_v29 = vmax.f32 %v16800_v15, 0.0  ;;  %v4721_v10 = vld [vmem:[#allocation2 + $0x49] sm:$0xff]  ;;  %v4722_v22 = vld [vmem:[#allocation2 + $0x51] sm:$0xff]  ;;  %8727 = vrot.lane.b32.xlu0 %v8726_v28, %s10139_s29 }
 0x663   :  { %4622 = vst.msk [vmem:[#allocation2 + $0x1f9] sm:$0xff] %vm30_vm0, %v4558_v47  ;;  %4623 = vst.msk [vmem:[#allocation2 + $0x201] sm:$0xff] %vm30_vm0, %v4559_v0  ;;  %v4727_v63 = vld [vmem:[#allocation2 + $0x91] sm:$0xff]  ;;  %v4728_v25 = vld [vmem:[#allocation2 + $0x99] sm:$0xff]  ;;  %v8721_v44 = vpack.i.bf16 %v4722_v22, %v4721_v10 }
 0x664   :  { %4624 = vst.msk [vmem:[#allocation2 + $0x211] sm:$0xff] %vm30_vm0, %v4560_v51  ;;  %4625 = vst.msk [vmem:[#allocation2 + $0x219] sm:$0xff] %vm30_vm0, %v4561_v24  ;;  %v8736_v37 = vpack.i.bf16 %v4728_v25, %v4727_v63  ;;  %v4725_v56 = vld [vmem:[#allocation2 + $0x79] sm:$0xff]  ;;  %v4726_v62 = vld [vmem:[#allocation2 + $0x81] sm:$0xff] }
 0x665   :  { %4626 = vst.msk [vmem:[#allocation2 + $0x229] sm:$0xff] %vm30_vm0, %v4562_v5  ;;  %4627 = vst.msk [vmem:[#allocation2 + $0x231] sm:$0xff] %vm30_vm0, %v4563_v38  ;;  %8722 = vrot.lane.b32.xlu1 %v8721_v44, %s10139_s29  ;;  %v4731_v18 = vld [vmem:[#allocation2 + $0xc1] sm:$0xff]  ;;  %v4732_v58 = vld [vmem:[#allocation2 + $0xc9] sm:$0xff]  ;;  %v8731_v27 = vpack.i.bf16 %v4726_v62, %v4725_v56 }
 0x666   :  { %4628 = vst.msk [vmem:[#allocation2 + $0x241] sm:$0xff] %vm30_vm0, %v4564_v60  ;;  %4629 = vst.msk [vmem:[#allocation2 + $0x249] sm:$0xff] %vm30_vm0, %v4565_v43  ;;  %8737 = vrot.lane.b32.xlu0 %v8736_v37, %s10139_s29  ;;  %v8746_v9 = vpack.i.bf16 %v4732_v58, %v4731_v18  ;;  %v4729_v31 = vld [vmem:[#allocation2 + $0xa9] sm:$0xff]  ;;  %v4730_v41 = vld [vmem:[#allocation2 + $0xb1] sm:$0xff] }
 0x667   :  { %4630 = vst.msk [vmem:[#allocation2 + $0x259] sm:$0xff] %vm30_vm0, %v4566_v12  ;;  %4631 = vst.msk [vmem:[#allocation2 + $0x261] sm:$0xff] %vm30_vm0, %v4567_v55  ;;  %v4735_v7 = vld [vmem:[#allocation2 + $0xf1] sm:$0xff]  ;;  %v4736_v45 = vld [vmem:[#allocation2 + $0xf9] sm:$0xff]  ;;  %v8741_v6 = vpack.i.bf16 %v4730_v41, %v4729_v31 }
 0x668   :  { %4632 = vst.msk [vmem:[#allocation2 + $0x271] sm:$0xff] %vm30_vm0, %v4568_v20  ;;  %4633 = vst.msk [vmem:[#allocation2 + $0x279] sm:$0xff] %vm30_vm0, %v4569_v11  ;;  %v8756_v21 = vpack.i.bf16 %v4736_v45, %v4735_v7  ;;  %v4733_v57 = vld [vmem:[#allocation2 + $0xd9] sm:$0xff]  ;;  %v4734_v2 = vld [vmem:[#allocation2 + $0xe1] sm:$0xff] }
 0x669   :  { %4634 = vst.msk [vmem:[#allocation2 + $0x289] sm:$0xff] %vm30_vm0, %v4570_v4  ;;  %4635 = vst.msk [vmem:[#allocation2 + $0x291] sm:$0xff] %vm30_vm0, %v4571_v40  ;;  %8732 = vrot.lane.b32.xlu1 %v8731_v27, %s10139_s29  ;;  %v4739_v47 = vld [vmem:[#allocation2 + $0x121] sm:$0xff]  ;;  %v4740_v49 = vld [vmem:[#allocation2 + $0x129] sm:$0xff]  ;;  %v8751_v0 = vpack.i.bf16 %v4734_v2, %v4733_v57 }
 0x66a   :  { %4636 = vst.msk [vmem:[#allocation2 + $0x2a1] sm:$0xff] %vm30_vm0, %v4572_v30  ;;  %4637 = vst.msk [vmem:[#allocation2 + $0x2a9] sm:$0xff] %vm30_vm0, %v4573_v17  ;;  %8747 = vrot.lane.b32.xlu0 %v8746_v9, %s10139_s29  ;;  %v8766_v51 = vpack.i.bf16 %v4740_v49, %v4739_v47  ;;  %v4737_v24 = vld [vmem:[#allocation2 + $0x109] sm:$0xff]  ;;  %v4738_v5 = vld [vmem:[#allocation2 + $0x111] sm:$0xff] }
 0x66b   :  { %4638 = vst.msk [vmem:[#allocation2 + $0x2b9] sm:$0xff] %vm30_vm0, %v4574_v61  ;;  %4639 = vst.msk [vmem:[#allocation2 + $0x2c1] sm:$0xff] %vm30_vm0, %v4575_v35  ;;  %v4743_v39 = vld [vmem:[#allocation2 + $0x151] sm:$0xff]  ;;  %v4744_v38 = vld [vmem:[#allocation2 + $0x159] sm:$0xff]  ;;  %v8761_v60 = vpack.i.bf16 %v4738_v5, %v4737_v24 }
 0x66c   :  { %4640 = vst.msk [vmem:[#allocation2 + $0x2d1] sm:$0xff] %vm30_vm0, %v4576_v52  ;;  %4641 = vst.msk [vmem:[#allocation2 + $0x2d9] sm:$0xff] %vm30_vm0, %v4577_v32  ;;  %v4747_v43 = vld [vmem:[#allocation2 + $0x1b1] sm:$0xff]  ;;  %v4748_v12 = vld [vmem:[#allocation2 + $0x1b9] sm:$0xff]  ;;  %v8776_v55 = vpack.i.bf16 %v4744_v38, %v4743_v39 }
 0x66d   :  { %4642 = vst.msk [vmem:[#allocation2 + $0x2e9] sm:$0xff] %vm30_vm0, %v4578_v34  ;;  %4643 = vst.msk [vmem:[#allocation2 + $0x2f1] sm:$0xff] %vm30_vm0, %v4579_v42  ;;  %8742 = vrot.lane.b32.xlu1 %v8741_v6, %s10139_s29  ;;  %v4741_v19 = vld [vmem:[#allocation2 + $0x139] sm:$0xff]  ;;  %v4742_v20 = vld [vmem:[#allocation2 + $0x141] sm:$0xff]  ;;  %v8786_v26 = vpack.i.bf16 %v4748_v12, %v4747_v43 }
 0x66e   :  { %4644 = vst.msk [vmem:[#allocation2 + $0x301] sm:$0xff] %vm30_vm0, %v4580_v33  ;;  %4645 = vst.msk [vmem:[#allocation2 + $0x309] sm:$0xff] %vm30_vm0, %v4581_v59  ;;  %8757 = vrot.lane.b32.xlu0 %v8756_v21, %s10139_s29  ;;  %v8771_v11 = vpack.i.bf16 %v4742_v20, %v4741_v19  ;;  %v4745_v16 = vld [vmem:[#allocation2 + $0x169] sm:$0xff]  ;;  %v4746_v4 = vld [vmem:[#allocation2 + $0x171] sm:$0xff] }
 0x66f   :  { %4646 = vst.msk [vmem:[#allocation2 + $0x319] sm:$0xff] %vm30_vm0, %v4582_v13  ;;  %4647 = vst.msk [vmem:[#allocation2 + $0x321] sm:$0xff] %vm30_vm0, %v4583_v29  ;;  %v4751_v48 = vld [vmem:[#allocation2 + $0x1e1] sm:$0xff]  ;;  %v4752_v40 = vld [vmem:[#allocation2 + $0x1e9] sm:$0xff]  ;;  %v8781_v1 = vpack.i.bf16 %v4746_v4, %v4745_v16 }
 0x670   :  { %4649 = vst.msk [vmem:[#allocation2 + $0x339] sm:$0xff] %vm30_vm0, %v4585_v8  ;;  %v8796_v30 = vpack.i.bf16 %v4752_v40, %v4751_v48  ;;  %v4749_v17 = vld [vmem:[#allocation2 + $0x1c9] sm:$0xff]  ;;  %v4750_v53 = vld [vmem:[#allocation2 + $0x1d1] sm:$0xff]  ;;  %v4756_v61 = vld [vmem:[#allocation2 + $0x219] sm:$0xff] }
 0x671   :  { %8752 = vrot.lane.b32.xlu1 %v8751_v0, %s10139_s29  ;;  %v4755_v3 = vld [vmem:[#allocation2 + $0x211] sm:$0xff]  ;;  %v8791_v35 = vpack.i.bf16 %v4750_v53, %v4749_v17  ;;  %v4753_v32 = vld [vmem:[#allocation2 + $0x1f9] sm:$0xff]  ;;  %v4754_v14 = vld [vmem:[#allocation2 + $0x201] sm:$0xff] }
 0x672   :  { %8767 = vrot.lane.b32.xlu0 %v8766_v51, %s10139_s29  ;;  %v8806_v52 = vpack.i.bf16 %v4756_v61, %v4755_v3  ;;  %v4759_v23 = vld [vmem:[#allocation2 + $0x241] sm:$0xff]  ;;  %v4760_v34 = vld [vmem:[#allocation2 + $0x249] sm:$0xff]  ;;  %v8801_v36 = vpack.i.bf16 %v4754_v14, %v4753_v32  ;;  %v4758_v33 = vld [vmem:[#allocation2 + $0x231] sm:$0xff] }
 0x673   :  { %v8816_v42 = vpack.i.bf16 %v4760_v34, %v4759_v23  ;;  %v4757_v46 = vld [vmem:[#allocation2 + $0x229] sm:$0xff]  ;;  %v4763_v54 = vld [vmem:[#allocation2 + $0x271] sm:$0xff]  ;;  %v4764_v59 = vld [vmem:[#allocation2 + $0x279] sm:$0xff] }
 0x674   :  { %v8811_v13 = vpack.i.bf16 %v4758_v33, %v4757_v46  ;;  %v8826_v15 = vpack.i.bf16 %v4764_v59, %v4763_v54  ;;  %v4761_v29 = vld [vmem:[#allocation2 + $0x259] sm:$0xff]  ;;  %v4762_v8 = vld [vmem:[#allocation2 + $0x261] sm:$0xff]  ;;  %v4768_v28 = vld [vmem:[#allocation2 + $0x2a9] sm:$0xff] }
 0x675   :  { %8762 = vrot.lane.b32.xlu1 %v8761_v60, %s10139_s29  ;;  %v4767_v50 = vld [vmem:[#allocation2 + $0x2a1] sm:$0xff]  ;;  %v8821_v10 = vpack.i.bf16 %v4762_v8, %v4761_v29  ;;  %v4765_v63 = vld [vmem:[#allocation2 + $0x289] sm:$0xff]  ;;  %v4766_v25 = vld [vmem:[#allocation2 + $0x291] sm:$0xff] }
 0x676   :  { %8777 = vrot.lane.b32.xlu0 %v8776_v55, %s10139_s29  ;;  %v8836_v22 = vpack.i.bf16 %v4768_v28, %v4767_v50  ;;  %v4771_v44 = vld [vmem:[#allocation2 + $0x2d1] sm:$0xff]  ;;  %v4772_v37 = vld [vmem:[#allocation2 + $0x2d9] sm:$0xff]  ;;  %v8831_v56 = vpack.i.bf16 %v4766_v25, %v4765_v63  ;;  %v4770_v58 = vld [vmem:[#allocation2 + $0x2c1] sm:$0xff] }
 0x677   :  { %v8846_v62 = vpack.i.bf16 %v4772_v37, %v4771_v44  ;;  %v4769_v18 = vld [vmem:[#allocation2 + $0x2b9] sm:$0xff]  ;;  %v4775_v27 = vld [vmem:[#allocation2 + $0x301] sm:$0xff]  ;;  %v4776_v9 = vld [vmem:[#allocation2 + $0x309] sm:$0xff] }
 0x678   :  { %v8841_v31 = vpack.i.bf16 %v4770_v58, %v4769_v18  ;;  %v4779_v41 = vld [vmem:[#allocation2 + $0x2] sm:$0xff]  ;;  %v4780_v7 = vld [vmem:[#allocation2 + $0xa] sm:$0xff]  ;;  %v8856_v45 = vpack.i.bf16 %v4776_v9, %v4775_v27  ;;  %v4777_v47 = vld [vmem:[#allocation2 + $0x319] sm:$0xff] }
 0x679   :  { %8772 = vrot.lane.b32.xlu1 %v8771_v11, %s10139_s29  ;;  %v4773_v6 = vld [vmem:[#allocation2 + $0x2e9] sm:$0xff]  ;;  %v4774_v21 = vld [vmem:[#allocation2 + $0x2f1] sm:$0xff]  ;;  %v8866_v57 = vpack.i.bf16 %v4780_v7, %v4779_v41  ;;  %v4778_v49 = vld [vmem:[#allocation2 + $0x321] sm:$0xff] }
 0x67a   :  { %8787 = vrot.lane.b32.xlu0 %v8786_v26, %s10139_s29  ;;  %v8851_v2 = vpack.i.bf16 %v4774_v21, %v4773_v6  ;;  %v4783_v0 = vld [vmem:[#allocation2 + $0x32] sm:$0xff]  ;;  %v4784_v51 = vld [vmem:[#allocation2 + $0x3a] sm:$0xff]  ;;  %v8861_v24 = vpack.i.bf16 %v4778_v49, %v4777_v47  ;;  %v4782_v38 = vld [vmem:[#allocation2 + $0x22] sm:$0xff] }
 0x67b   :  { %v8876_v5 = vpack.i.bf16 %v4784_v51, %v4783_v0  ;;  %v4781_v39 = vld [vmem:[#allocation2 + $0x1a] sm:$0xff]  ;;  %v4787_v60 = vld [vmem:[#allocation2 + $0x62] sm:$0xff]  ;;  %v4788_v43 = vld [vmem:[#allocation2 + $0x6a] sm:$0xff] }
 0x67c   :  { %v8871_v12 = vpack.i.bf16 %v4782_v38, %v4781_v39  ;;  %v8886_v55 = vpack.i.bf16 %v4788_v43, %v4787_v60  ;;  %v4785_v19 = vld [vmem:[#allocation2 + $0x4a] sm:$0xff]  ;;  %v4786_v20 = vld [vmem:[#allocation2 + $0x52] sm:$0xff]  ;;  %v4792_v11 = vld [vmem:[#allocation2 + $0x9a] sm:$0xff] }
 0x67d   :  { %8782 = vrot.lane.b32.xlu1 %v8781_v1, %s10139_s29  ;;  %v4791_v26 = vld [vmem:[#allocation2 + $0x92] sm:$0xff]  ;;  %v8881_v16 = vpack.i.bf16 %v4786_v20, %v4785_v19  ;;  %v4789_v48 = vld [vmem:[#allocation2 + $0x7a] sm:$0xff]  ;;  %v4790_v40 = vld [vmem:[#allocation2 + $0x82] sm:$0xff] }
 0x67e   :  { %8797 = vrot.lane.b32.xlu0 %v8796_v30, %s10139_s29  ;;  %v8896_v4 = vpack.i.bf16 %v4792_v11, %v4791_v26  ;;  %v4795_v1 = vld [vmem:[#allocation2 + $0xc2] sm:$0xff]  ;;  %v4796_v30 = vld [vmem:[#allocation2 + $0xca] sm:$0xff]  ;;  %v8891_v17 = vpack.i.bf16 %v4790_v40, %v4789_v48  ;;  %v4794_v61 = vld [vmem:[#allocation2 + $0xb2] sm:$0xff] }
 0x67f   :  { %v8906_v53 = vpack.i.bf16 %v4796_v30, %v4795_v1  ;;  %v4793_v3 = vld [vmem:[#allocation2 + $0xaa] sm:$0xff]  ;;  %v4797_v23 = vld [vmem:[#allocation2 + $0xda] sm:$0xff]  ;;  %v4798_v34 = vld [vmem:[#allocation2 + $0xe2] sm:$0xff] }
 0x680   :  { %v8901_v32 = vpack.i.bf16 %v4794_v61, %v4793_v3  ;;  %v8911_v46 = vpack.i.bf16 %v4798_v34, %v4797_v23  ;;  %v4801_v54 = vld [vmem:[#allocation2 + $0x10a] sm:$0xff]  ;;  %v4802_v59 = vld [vmem:[#allocation2 + $0x112] sm:$0xff]  ;;  %v4812_v50 = vld [vmem:[#allocation2 + $0x1ba] sm:$0xff] }
 0x681   :  { %8792 = vrot.lane.b32.xlu1 %v8791_v35, %s10139_s29  ;;  %v4799_v35 = vld [vmem:[#allocation2 + $0xf2] sm:$0xff]  ;;  %v8921_v29 = vpack.i.bf16 %v4802_v59, %v4801_v54  ;;  %v4809_v44 = vld [vmem:[#allocation2 + $0x16a] sm:$0xff]  ;;  %v4820_v41 = vld [vmem:[#allocation2 + $0x21a] sm:$0xff] }
 0x682   :  { %8807 = vrot.lane.b32.xlu0 %v8806_v52, %s10139_s29  ;;  %v4800_v52 = vld [vmem:[#allocation2 + $0xfa] sm:$0xff]  ;;  %v4811_v8 = vld [vmem:[#allocation2 + $0x1b2] sm:$0xff]  ;;  %v4813_v27 = vld [vmem:[#allocation2 + $0x1ca] sm:$0xff] }
 0x683   :  { %v8916_v14 = vpack.i.bf16 %v4800_v52, %v4799_v35  ;;  %v8946_v63 = vpack.i.bf16 %v4812_v50, %v4811_v8  ;;  %v4810_v37 = vld [vmem:[#allocation2 + $0x172] sm:$0xff]  ;;  %v4817_v6 = vld [vmem:[#allocation2 + $0x1fa] sm:$0xff]  ;;  %v4818_v21 = vld [vmem:[#allocation2 + $0x202] sm:$0xff] }
 0x684   :  { %v8941_v18 = vpack.i.bf16 %v4810_v37, %v4809_v44  ;;  %v4814_v9 = vld [vmem:[#allocation2 + $0x1d2] sm:$0xff]  ;;  %v8961_v47 = vpack.i.bf16 %v4818_v21, %v4817_v6  ;;  %v4821_v0 = vld [vmem:[#allocation2 + $0x22a] sm:$0xff]  ;;  %v4825_v60 = vld [vmem:[#allocation2 + $0x25a] sm:$0xff] }
 0x685   :  { %8802 = vrot.lane.b32.xlu1 %v8801_v36, %s10139_s29  ;;  %v4803_v36 = vld [vmem:[#allocation2 + $0x122] sm:$0xff]  ;;  %v8951_v7 = vpack.i.bf16 %v4814_v9, %v4813_v27  ;;  %v4822_v51 = vld [vmem:[#allocation2 + $0x232] sm:$0xff]  ;;  %v4832_v19 = vld [vmem:[#allocation2 + $0x2aa] sm:$0xff] }
 0x686   :  { %8817 = vrot.lane.b32.xlu0 %v8816_v42, %s10139_s29  ;;  %v4804_v42 = vld [vmem:[#allocation2 + $0x12a] sm:$0xff]  ;;  %v8971_v39 = vpack.i.bf16 %v4822_v51, %v4821_v0  ;;  %v4826_v43 = vld [vmem:[#allocation2 + $0x262] sm:$0xff]  ;;  %v4836_v48 = vld [vmem:[#allocation2 + $0x2da] sm:$0xff] }
 0x687   :  { %v8926_v33 = vpack.i.bf16 %v4804_v42, %v4803_v36  ;;  %v8981_v20 = vpack.i.bf16 %v4826_v43, %v4825_v60  ;;  %v4829_v11 = vld [vmem:[#allocation2 + $0x28a] sm:$0xff]  ;;  %v4839_v3 = vld [vmem:[#allocation2 + $0x302] sm:$0xff]  ;;  %v4838_v34 = vld [vmem:[#allocation2 + $0x2f2] sm:$0xff] }
 0x688   :  { %v4840_v61 = vld [vmem:[#allocation2 + $0x30a] sm:$0xff]  ;;  %v4653_v36 = vld [vmem:[#allocation2 + $0x18] sm:$0xff]  ;;  %v4654_v42 = vld [vmem:[#allocation2 + $0x20] sm:$0xff] }
 0x689   :  { %8812 = vrot.lane.b32.xlu1 %v8811_v13, %s10139_s29  ;;  %v4807_v13 = vld [vmem:[#allocation2 + $0x152] sm:$0xff]  ;;  %v4837_v23 = vld [vmem:[#allocation2 + $0x2ea] sm:$0xff]  ;;  %v9026_v59 = vpack.i.bf16 %v4654_v42, %v4653_v36  ;;  %v4662_v37 = vld [vmem:[#allocation2 + $0x80] sm:$0xff] }
 0x68a   :  { %8827 = vrot.lane.b32.xlu0 %v8826_v15, %s10139_s29  ;;  %v4808_v15 = vld [vmem:[#allocation2 + $0x15a] sm:$0xff]  ;;  %v4658_v8 = vld [vmem:[#allocation2 + $0x50] sm:$0xff]  ;;  %v4673_v60 = vld [vmem:[#allocation2 + $0x108] sm:$0xff] }
 0x68b   :  { %v8936_v28 = vpack.i.bf16 %v4808_v15, %v4807_v13  ;;  %v4841_v13 = vld [vmem:[#allocation2 + $0x31a] sm:$0xff]  ;;  %v4842_v15 = vld [vmem:[#allocation2 + $0x322] sm:$0xff]  ;;  %v4663_v6 = vld [vmem:[#allocation2 + $0x90] sm:$0xff] }
 0x68c   :  { %v4661_v44 = vld [vmem:[#allocation2 + $0x78] sm:$0xff]  ;;  %v4674_v43 = vld [vmem:[#allocation2 + $0x110] sm:$0xff] }
 0x68d   :  { %8822 = vrot.lane.b32.xlu1 %v8821_v10, %s10139_s29  ;;  %v4805_v10 = vld [vmem:[#allocation2 + $0x13a] sm:$0xff]  ;;  %v9046_v9 = vpack.i.bf16 %v4662_v37, %v4661_v44  ;;  %v4679_v36 = vld [vmem:[#allocation2 + $0x150] sm:$0xff] }
 0x68e   :  { %8837 = vrot.lane.b32.xlu0 %v8836_v22, %s10139_s29  ;;  %v4806_v22 = vld [vmem:[#allocation2 + $0x142] sm:$0xff]  ;;  %v4664_v21 = vld [vmem:[#allocation2 + $0x98] sm:$0xff] }
 0x68f   :  { %v8931_v25 = vpack.i.bf16 %v4806_v22, %v4805_v10  ;;  %v4655_v10 = vld [vmem:[#allocation2 + $0x30] sm:$0xff]  ;;  %v4656_v22 = vld [vmem:[#allocation2 + $0x38] sm:$0xff]  ;;  %v9051_v51 = vpack.i.bf16 %v4664_v21, %v4663_v6  ;;  %v4690_v37 = vld [vmem:[#allocation2 + $0x200] sm:$0xff] }
 0x690   :  { %v4680_v42 = vld [vmem:[#allocation2 + $0x158] sm:$0xff]  ;;  %v4693_v6 = vld [vmem:[#allocation2 + $0x228] sm:$0xff]  ;;  %v4694_v21 = vld [vmem:[#allocation2 + $0x230] sm:$0xff] }
 0x691   :  { %8832 = vrot.lane.b32.xlu1 %v8831_v56, %s10139_s29  ;;  %v4815_v56 = vld [vmem:[#allocation2 + $0x1e2] sm:$0xff]  ;;  %v4689_v44 = vld [vmem:[#allocation2 + $0x1f8] sm:$0xff] }
 0x692   :  { %8847 = vrot.lane.b32.xlu0 %v8846_v62, %s10139_s29  ;;  %v4816_v62 = vld [vmem:[#allocation2 + $0x1ea] sm:$0xff] }
 0x693   :  { %v8956_v58 = vpack.i.bf16 %v4816_v62, %v4815_v56  ;;  %v14224_v62 = vpack.i.bf16 %v4656_v22, %v4655_v10  ;;  %v4873_v22 = vld [vmem:[#allocation2 + $0x180] sm:$0xff] }
 0x695   :  { %8842 = vrot.lane.b32.xlu1 %v8841_v31, %s10139_s29  ;;  %v4819_v31 = vld [vmem:[#allocation2 + $0x212] sm:$0xff] }
 0x696   :  { %8857 = vrot.lane.b32.xlu0 %v8856_v45, %s10139_s29  ;;  %v8966_v45 = vpack.i.bf16 %v4820_v41, %v4819_v31  ;;  %v4665_v31 = vld [vmem:[#allocation2 + $0xa8] sm:$0xff]  ;;  %v4666_v41 = vld [vmem:[#allocation2 + $0xb0] sm:$0xff] }
 0x699   :  { %8852 = vrot.lane.b32.xlu1 %v8851_v2, %s10139_s29  ;;  %v4824_v2 = vld [vmem:[#allocation2 + $0x24a] sm:$0xff] }
 0x69a   :  { %8867 = vrot.lane.b32.xlu0 %v8866_v57, %s10140_s19  ;;  %v4823_v57 = vld [vmem:[#allocation2 + $0x242] sm:$0xff] }
 0x69b   :  { %v8976_v49 = vpack.i.bf16 %v4824_v2, %v4823_v57  ;;  %v9056_v2 = vpack.i.bf16 %v4666_v41, %v4665_v31  ;;  %v4688_v31 = vld [vmem:[#allocation2 + $0x1e8] sm:$0xff] }
 0x69d   :  { %8862 = vrot.lane.b32.xlu1 %v8861_v24, %s10139_s29  ;;  %v4827_v24 = vld [vmem:[#allocation2 + $0x272] sm:$0xff] }
 0x69e   :  { %8877 = vrot.lane.b32.xlu0 %v8876_v5, %s10140_s19  ;;  %v4828_v5 = vld [vmem:[#allocation2 + $0x27a] sm:$0xff] }
 0x69f   :  { %v8986_v38 = vpack.i.bf16 %v4828_v5, %v4827_v24  ;;  %v14239_v24 = vld [vmem:[#allocation2 + $0xc0] sm:$0xff]  ;;  %v14241_v5 = vld [vmem:[#allocation2 + $0xc8] sm:$0xff] }
 0x6a1   :  { %8872 = vrot.lane.b32.xlu1 %v8871_v12, %s10140_s19  ;;  %v14194_v12 = vpop.permute.xlu0 %8707 }
 0x6a2   :  { %8887 = vrot.lane.b32.xlu0 %v8886_v55, %s10140_s19  ;;  %v4831_v55 = vld [vmem:[#allocation2 + $0x2a2] sm:$0xff] }
 0x6a3   :  { %v8996_v26 = vpack.i.bf16 %v4832_v19, %v4831_v55  ;;  %v9061_v19 = vpack.i.bf16 %v14241_v5, %v14239_v24 }
 0x6a5   :  { %8882 = vrot.lane.b32.xlu1 %v8881_v16, %s10140_s19  ;;  %v4830_v16 = vld [vmem:[#allocation2 + $0x292] sm:$0xff] }
 0x6a6   :  { %8897 = vrot.lane.b32.xlu0 %v8896_v4, %s10140_s19  ;;  %v4835_v4 = vld [vmem:[#allocation2 + $0x2d2] sm:$0xff]  ;;  %v8991_v1 = vpack.i.bf16 %v4830_v16, %v4829_v11  ;;  %v14253_v16 = vpack.i.bf16 %v4674_v43, %v4673_v60  ;;  %v9126_v60 = vpack.i.bf16 %v4694_v21, %v4693_v6 }
 0x6a7   :  { %v9006_v30 = vpack.i.bf16 %v4836_v48, %v4835_v4  ;;  %v4677_v4 = vld [vmem:[#allocation2 + $0x138] sm:$0xff]  ;;  %v4678_v48 = vld [vmem:[#allocation2 + $0x140] sm:$0xff]  ;;  %v4707_v21 = vld [vmem:[#allocation2 + $0x2d0] sm:$0xff] }
 0x6a8   :  { %v4697_v43 = vld [vmem:[#allocation2 + $0x258] sm:$0xff] }
 0x6a9   :  { %8892 = vrot.lane.b32.xlu1 %v8891_v17, %s10140_s19  ;;  %v4833_v17 = vld [vmem:[#allocation2 + $0x2ba] sm:$0xff] }
 0x6aa   :  { %8907 = vrot.lane.b32.xlu0 %v8906_v53, %s10140_s19  ;;  %v4834_v53 = vld [vmem:[#allocation2 + $0x2c2] sm:$0xff] }
 0x6ab   :  { %v9001_v52 = vpack.i.bf16 %v4834_v53, %v4833_v17  ;;  %v4675_v17 = vld [vmem:[#allocation2 + $0x120] sm:$0xff]  ;;  %v4676_v53 = vld [vmem:[#allocation2 + $0x128] sm:$0xff] }
 0x6ad   :  { %8902 = vrot.lane.b32.xlu1 %v8901_v32, %s10140_s19 }
 0x6ae   :  { %8917 = vrot.lane.b32.xlu0 %v8916_v14, %s10140_s19  ;;  %v9016_v14 = vpack.i.bf16 %v4840_v61, %v4839_v3  ;;  %v9086_v61 = vpack.i.bf16 %v4678_v48, %v4677_v4  ;;  %v4695_v4 = vld [vmem:[#allocation2 + $0x240] sm:$0xff]  ;;  %v4696_v48 = vld [vmem:[#allocation2 + $0x248] sm:$0xff] }
 0x6b1   :  { %8912 = vrot.lane.b32.xlu1 %v8911_v46, %s10140_s19 }
 0x6b2   :  { %8927 = vrot.lane.b32.xlu0 %v8926_v33, %s10140_s19  ;;  %v9011_v33 = vpack.i.bf16 %v4838_v34, %v4837_v23  ;;  %v9081_v34 = vpack.i.bf16 %v4676_v53, %v4675_v17 }
 0x6b5   :  { %8922 = vrot.lane.b32.xlu1 %v8921_v29, %s10140_s19  ;;  %v4657_v29 = vld [vmem:[#allocation2 + $0x48] sm:$0xff] }
 0x6b6   :  { %8937 = vrot.lane.b32.xlu0 %v8936_v28, %s10140_s19  ;;  %v9021_v28 = vpack.i.bf16 %v4842_v15, %v4841_v13  ;;  %v4685_v13 = vld [vmem:[#allocation2 + $0x1c8] sm:$0xff]  ;;  %v4686_v15 = vld [vmem:[#allocation2 + $0x1d0] sm:$0xff] }
 0x6b7   :  { %v9106_v10 = vpack.i.bf16 %v4686_v15, %v4685_v13  ;;  %v4705_v15 = vld [vmem:[#allocation2 + $0x2b8] sm:$0xff] }
 0x6b9   :  { %8932 = vrot.lane.b32.xlu1 %v8931_v25, %s10140_s19  ;;  %v9036_v25 = vpack.i.bf16 %v4658_v8, %v4657_v29  ;;  %v9091_v8 = vpack.i.bf16 %v4680_v42, %v4679_v36  ;;  %v4699_v36 = vld [vmem:[#allocation2 + $0x270] sm:$0xff]  ;;  %v4700_v42 = vld [vmem:[#allocation2 + $0x278] sm:$0xff] }
 0x6ba   :  { %8947 = vrot.lane.b32.xlu0 %v8946_v63, %s10140_s19 }
 0x6bd   :  { %8942 = vrot.lane.b32.xlu1 %v8941_v18, %s10140_s19  ;;  %v4659_v18 = vld [vmem:[#allocation2 + $0x60] sm:$0xff] }
 0x6be   :  { %8957 = vrot.lane.b32.xlu0 %v8956_v58, %s10140_s19  ;;  %v4660_v58 = vld [vmem:[#allocation2 + $0x68] sm:$0xff] }
 0x6c1   :  { %8952 = vrot.lane.b32.xlu1 %v8951_v7, %s10140_s19 }
 0x6c2   :  { %8967 = vrot.lane.b32.xlu0 %v8966_v45, %s10140_s19  ;;  %v9041_v45 = vpack.i.bf16 %v4660_v58, %v4659_v18 }
 0x6c5   :  { %8962 = vrot.lane.b32.xlu1 %v8961_v47, %s10140_s19  ;;  %v4669_v47 = vld [vmem:[#allocation2 + $0xd8] sm:$0xff] }
 0x6c6   :  { %8977 = vrot.lane.b32.xlu0 %v8976_v49, %s10140_s19  ;;  %v4670_v49 = vld [vmem:[#allocation2 + $0xe0] sm:$0xff] }
 0x6c9   :  { %8972 = vrot.lane.b32.xlu1 %v8971_v39, %s10140_s19 }
 0x6ca   :  { %8987 = vrot.lane.b32.xlu0 %v8986_v38, %s10140_s19  ;;  %v9066_v38 = vpack.i.bf16 %v4670_v49, %v4669_v47  ;;  %v4691_v49 = vld [vmem:[#allocation2 + $0x210] sm:$0xff] }
 0x6cd   :  { %8982 = vrot.lane.b32.xlu1 %v8981_v20, %s10140_s19  ;;  %v14200_v40 = vpop.permute.xlu0 %8717  ;;  %v4671_v20 = vld [vmem:[#allocation2 + $0xf0] sm:$0xff] }
 0x6ce   :  { %8997 = vrot.lane.b32.xlu0 %v8996_v26, %s10140_s19  ;;  %v4672_v26 = vld [vmem:[#allocation2 + $0xf8] sm:$0xff] }
 0x6d1   :  { %8992 = vrot.lane.b32.xlu1 %v8991_v1, %s10140_s19 }
 0x6d2   :  { %9007 = vrot.lane.b32.xlu0 %v9006_v30, %s10140_s19  ;;  %v14260_v30 = vpack.i.bf16 %v4672_v26, %v4671_v20 }
 0x6d3   :  { %v14204_v35 = vpop.permute.xlu1 %8712 }
 0x6d4   :  { %v14206_v32 = vpop.permute.xlu0 %8727 }
 0x6d5   :  { %16801 = vst [vmem:[#allocation114_spill] sm:$0xff] %v14206_v32  ;;  %9002 = vrot.lane.b32.xlu1 %v9001_v52, %s10140_s19  ;;  %v4681_v52 = vld [vmem:[#allocation2 + $0x168] sm:$0xff] }
 0x6d6   :  { %9017 = vrot.lane.b32.xlu0 %v9016_v14, %s10140_s19  ;;  %v4682_v14 = vld [vmem:[#allocation2 + $0x170] sm:$0xff] }
 0x6d7   :  { %v14210_v46 = vpop.permute.xlu1 %8722 }
 0x6d8   :  { %v14212_v54 = vpop.permute.xlu0 %8737 }
 0x6d9   :  { %16802 = vst [vmem:[#allocation347_spill] sm:$0xff] %v14212_v54  ;;  %9012 = vrot.lane.b32.xlu1 %v9011_v33, %s10140_s19 }
 0x6da   :  { %9027 = vrot.lane.b32.xlu0 %v9026_v59, %s10141_s0  ;;  %v9096_v59 = vpack.i.bf16 %v4682_v14, %v4681_v52  ;;  %v4702_v52 = vld [vmem:[#allocation2 + $0x290] sm:$0xff] }
 0x6db   :  { %v14216_v50 = vpop.permute.xlu1 %8732 }
 0x6dc   :  { %16803 = vst [vmem:[#allocation350_spill] sm:$0xff] %v14216_v50  ;;  %v14218_v63 = vpop.permute.xlu0 %8747 }
 0x6dd   :  { %9022 = vrot.lane.b32.xlu1 %v9021_v28, %s10140_s19 }
 0x6de   :  { %9037 = vrot.lane.b32.xlu0 %v9036_v25, %s10141_s0  ;;  %v4874_v25 = vld [vmem:[#allocation2 + $0x188] sm:$0xff] }
 0x6df   :  { %v14222_v56 = vpop.permute.xlu1 %8742  ;;  %v9101_v58 = vpack.i.bf16 %v4874_v25, %v4873_v22  ;;  %v9141_v22 = vpack.i.bf16 %v4700_v42, %v4699_v36  ;;  %v4703_v25 = vld [vmem:[#allocation2 + $0x2a0] sm:$0xff] }
 0x6e0   :  { %16804 = vst [vmem:[#allocation170_spill] sm:$0xff] %v14222_v56  ;;  %v14226_v27 = vpop.permute.xlu0 %8757  ;;  %v5048_v56 = vld [vmem:[#allocation2 + $0xc8] sm:$0xff] }
 0x6e1   :  { %9032 = vrot.lane.b32.xlu1 %v14224_v62, %s10141_s0 }
 0x6e2   :  { %9047 = vrot.lane.b32.xlu0 %v9046_v9, %s10141_s0  ;;  %v4687_v9 = vld [vmem:[#allocation2 + $0x1e0] sm:$0xff] }
 0x6e3   :  { %v14231_v7 = vpop.permute.xlu1 %8752  ;;  %v9111_v47 = vpack.i.bf16 %v4688_v31, %v4687_v9  ;;  %v4709_v9 = vld [vmem:[#allocation2 + $0x2e8] sm:$0xff]  ;;  %v4710_v31 = vld [vmem:[#allocation2 + $0x2f0] sm:$0xff] }
 0x6e4   :  { %v14233_v57 = vpop.permute.xlu0 %8767 }
 0x6e5   :  { %16805 = vst [vmem:[#allocation173_spill] sm:$0xff] %v14233_v57  ;;  %9042 = vrot.lane.b32.xlu1 %v9041_v45, %s10141_s0  ;;  %v9116_v45 = vpack.i.bf16 %v4690_v37, %v4689_v44  ;;  %v4704_v44 = vld [vmem:[#allocation2 + $0x2a8] sm:$0xff] }
 0x6e6   :  { %9057 = vrot.lane.b32.xlu0 %v9056_v2, %s10141_s0  ;;  %v9151_v6 = vpack.i.bf16 %v4704_v44, %v4703_v25  ;;  %v4911_v25 = vld [vmem:[#allocation2 + $0x49] sm:$0xff]  ;;  %v4912_v44 = vld [vmem:[#allocation2 + $0x51] sm:$0xff] }
 0x6e7   :  { %v14237_v0 = vpop.permute.xlu1 %8762 }
 0x6e8   :  { %v14243_v39 = vpop.permute.xlu0 %8777 }
 0x6e9   :  { %16806 = vst [vmem:[#allocation9_spill] sm:$0xff] %v14243_v39  ;;  %9052 = vrot.lane.b32.xlu1 %v9051_v51, %s10141_s0  ;;  %v4692_v51 = vld [vmem:[#allocation2 + $0x218] sm:$0xff]  ;;  %v5176_v39 = vld [vmem:[#allocation2 + $0xca] sm:$0xff] }
 0x6ea   :  { %9067 = vrot.lane.b32.xlu0 %v9066_v38, %s10141_s0  ;;  %v9121_v26 = vpack.i.bf16 %v4692_v51, %v4691_v49  ;;  %v9166_v51 = vpack.i.bf16 %v4710_v31, %v4709_v9 }
 0x6eb   :  { %v14247_v55 = vpop.permute.xlu1 %8772 }
 0x6ec   :  { %16807 = vst [vmem:[#allocation229_spill] sm:$0xff] %v14247_v55  ;;  %v14251_v11 = vpop.permute.xlu0 %8787  ;;  %v14555_v55 = vld [vmem:[#allocation2 + $0x291] sm:$0xff] }
 0x6ed   :  { %16808 = vst [vmem:[#allocation232_spill] sm:$0xff] %v14251_v11  ;;  %9062 = vrot.lane.b32.xlu1 %v9061_v19, %s10141_s0  ;;  %v4698_v19 = vld [vmem:[#allocation2 + $0x260] sm:$0xff] }
 0x6ee   :  { %9077 = vrot.lane.b32.xlu0 %v14253_v16, %s10141_s0  ;;  %v9136_v53 = vpack.i.bf16 %v4698_v19, %v4697_v43  ;;  %v4714_v43 = vld [vmem:[#allocation2 + $0x320] sm:$0xff] }
 0x6ef   :  { %v14258_v1 = vpop.permute.xlu1 %8782  ;;  %v5170_v11 = vld [vmem:[#allocation2 + $0x82] sm:$0xff] }
 0x6f0   :  { %16809 = vst [vmem:[#allocation56_spill] sm:$0xff] %v14258_v1  ;;  %v14262_v3 = vpop.permute.xlu0 %8797  ;;  %v5047_v1 = vld [vmem:[#allocation2 + $0xc0] sm:$0xff] }
 0x6f1   :  { %16810 = vst [vmem:[#allocation59_spill] sm:$0xff] %v14262_v3  ;;  %9072 = vrot.lane.b32.xlu1 %v14260_v30, %s10141_s0  ;;  %v5058_v3 = vld [vmem:[#allocation2 + $0x140] sm:$0xff] }
 0x6f2   :  { %9087 = vrot.lane.b32.xlu0 %v9086_v61, %s10141_s0  ;;  %v4701_v61 = vld [vmem:[#allocation2 + $0x288] sm:$0xff] }
 0x6f3   :  { %v14267_v23 = vpop.permute.xlu1 %8792  ;;  %v9146_v13 = vpack.i.bf16 %v4702_v52, %v4701_v61  ;;  %v4907_v52 = vld [vmem:[#allocation2 + $0x19] sm:$0xff] }
 0x6f4   :  { %16811 = vst [vmem:[#allocation288_spill] sm:$0xff] %v14267_v23  ;;  %v14269_v33 = vpop.permute.xlu0 %8807  ;;  %v5042_v23 = vld [vmem:[#allocation2 + $0x80] sm:$0xff] }
 0x6f5   :  { %16812 = vst [vmem:[#allocation291_spill] sm:$0xff] %v14269_v33  ;;  %9082 = vrot.lane.b32.xlu1 %v9081_v34, %s10141_s0  ;;  %v9131_v34 = vpack.i.bf16 %v4696_v48, %v4695_v4  ;;  %v4711_v4 = vld [vmem:[#allocation2 + $0x300] sm:$0xff]  ;;  %v4712_v48 = vld [vmem:[#allocation2 + $0x308] sm:$0xff] }
 0x6f6   :  { %9097 = vrot.lane.b32.xlu0 %v9096_v59, %s10141_s0  ;;  %v9171_v42 = vpack.i.bf16 %v4712_v48, %v4711_v4  ;;  %v4927_v33 = vld [vmem:[#allocation2 + $0x109] sm:$0xff] }
 0x6f7   :  { %v14273_v29 = vpop.permute.xlu1 %8802 }
 0x6f8   :  { %16813 = vst [vmem:[#allocation113_spill] sm:$0xff] %v14273_v29  ;;  %v14275_v28 = vpop.permute.xlu0 %8817  ;;  %v5165_v29 = vld [vmem:[#allocation2 + $0x4a] sm:$0xff] }
 0x6f9   :  { %16814 = vst [vmem:[#allocation116_spill] sm:$0xff] %v14275_v28  ;;  %9092 = vrot.lane.b32.xlu1 %v9091_v8, %s10141_s0  ;;  %v4706_v8 = vld [vmem:[#allocation2 + $0x2c0] sm:$0xff] }
 0x6fa   :  { %9107 = vrot.lane.b32.xlu0 %v9106_v10, %s10141_s0 }
 0x6fb   :  { %v14279_v18 = vpop.permute.xlu1 %8812 }
 0x6fc   :  { %16815 = vst [vmem:[#allocation349_spill] sm:$0xff] %v14279_v18  ;;  %v14281_v41 = vpop.permute.xlu0 %8827 }
 0x6fd   :  { %16816 = vst [vmem:[#allocation352_spill] sm:$0xff] %v14281_v41  ;;  %9102 = vrot.lane.b32.xlu1 %v9101_v58, %s10141_s0  ;;  %v9156_v58 = vpack.i.bf16 %v4706_v8, %v4705_v15  ;;  %v4905_v8 = vld [vmem:[#allocation2 + $0x330] sm:$0xff]  ;;  %v5169_v41 = vld [vmem:[#allocation2 + $0x7a] sm:$0xff] }
 0x6fe   :  { %9117 = vrot.lane.b32.xlu0 %v9116_v45, %s10141_s0 }
 0x6ff   :  { %v14285_v2 = vpop.permute.xlu1 %8822 }
 0x700   :  { %16817 = vst [vmem:[#allocation172_spill] sm:$0xff] %v14285_v2  ;;  %v14287_v38 = vpop.permute.xlu0 %8837  ;;  %v4988_v2 = vld [vmem:[#allocation2 + $0xe2] sm:$0xff] }
 0x701   :  { %16818 = vst [vmem:[#allocation175_spill] sm:$0xff] %v14287_v38  ;;  %9112 = vrot.lane.b32.xlu1 %v9111_v47, %s10141_s0  ;;  %v4708_v47 = vld [vmem:[#allocation2 + $0x2d8] sm:$0xff] }
 0x702   :  { %9127 = vrot.lane.b32.xlu0 %v9126_v60, %s10141_s0  ;;  %v4713_v60 = vld [vmem:[#allocation2 + $0x318] sm:$0xff] }
 0x703   :  { %v14291_v20 = vpop.permute.xlu1 %8832  ;;  %v9176_v61 = vpack.i.bf16 %v4714_v43, %v4713_v60  ;;  %v4916_v60 = vld [vmem:[#allocation2 + $0x81] sm:$0xff]  ;;  %v4931_v38 = vld [vmem:[#allocation2 + $0x139] sm:$0xff] }
 0x704   :  { %16819 = vst [vmem:[#allocation10_spill] sm:$0xff] %v14291_v20  ;;  %v14293_v17 = vpop.permute.xlu0 %8847  ;;  %v5041_v20 = vld [vmem:[#allocation2 + $0x78] sm:$0xff] }
 0x705   :  { %16820 = vst [vmem:[#allocation231_spill] sm:$0xff] %v14293_v17  ;;  %9122 = vrot.lane.b32.xlu1 %v9121_v26, %s10141_s0  ;;  %v9161_v26 = vpack.i.bf16 %v4708_v47, %v4707_v21  ;;  %v4909_v21 = vld [vmem:[#allocation2 + $0x31] sm:$0xff]  ;;  %v4910_v47 = vld [vmem:[#allocation2 + $0x39] sm:$0xff] }
 0x706   :  { %9137 = vrot.lane.b32.xlu0 %v9136_v53, %s10141_s0 }
 0x707   :  { %v14297_v14 = vpop.permute.xlu1 %8842 }
 0x708   :  { %16821 = vst [vmem:[#allocation234_spill] sm:$0xff] %v14297_v14  ;;  %v14299_v59 = vpop.permute.xlu0 %8857 }
 0x709   :  { %16822 = vst [vmem:[#allocation58_spill] sm:$0xff] %v14299_v59  ;;  %9132 = vrot.lane.b32.xlu1 %v9131_v34, %s10141_s0  ;;  %v4908_v34 = vld [vmem:[#allocation2 + $0x21] sm:$0xff] }
 0x70a   :  { %9147 = vrot.lane.b32.xlu0 %v9146_v13, %s10141_s0  ;;  %v9186_v15 = vpack.i.bf16 %v4908_v34, %v4907_v52  ;;  %v4914_v52 = vld [vmem:[#allocation2 + $0x69] sm:$0xff]  ;;  %v4924_v34 = vld [vmem:[#allocation2 + $0xe1] sm:$0xff] }
 0x70b   :  { %v14303_v10 = vpop.permute.xlu1 %8852 }
 0x70c   :  { %16823 = vst [vmem:[#allocation61_spill] sm:$0xff] %v14303_v10  ;;  %v14305_v37 = vpop.permute.xlu0 %8867  ;;  %v5179_v10 = vld [vmem:[#allocation2 + $0xf2] sm:$0xff] }
 0x70d   :  { %9142 = vrot.lane.b32.xlu1 %v9141_v22, %s10141_s0  ;;  %v4906_v22 = vld [vmem:[#allocation2 + $0x338] sm:$0xff] }
 0x70e   :  { %9157 = vrot.lane.b32.xlu0 %v9156_v58, %s10141_s0  ;;  %v9181_v9 = vpack.i.bf16 %v4906_v22, %v4905_v8 }
 0x70f   :  { %v14309_v45 = vpop.permute.xlu1 %8862 }
 0x710   :  { %16824 = vst [vmem:[#allocation290_spill] sm:$0xff] %v14309_v45  ;;  %v14311_v49 = vpop.permute.xlu0 %8877 }
 0x711   :  { %9152 = vrot.lane.b32.xlu1 %v9151_v6, %s10141_s0  ;;  %v14331_v6 = vpack.i.bf16 %v4912_v44, %v4911_v25  ;;  %v14351_v44 = vld [vmem:[#allocation2 + $0x91] sm:$0xff] }
 0x712   :  { %9167 = vrot.lane.b32.xlu0 %v9166_v51, %s10141_s0  ;;  %v4915_v51 = vld [vmem:[#allocation2 + $0x79] sm:$0xff] }
 0x713   :  { %v14315_v19 = vpop.permute.xlu1 %8872  ;;  %v14340_v48 = vpack.i.bf16 %v4916_v60, %v4915_v51 }
 0x714   :  { %v14317_v53 = vpop.permute.xlu0 %8887 }
 0x715   :  { %16825 = vst [vmem:[#allocation293_spill] sm:$0xff] %v14317_v53  ;;  %9162 = vrot.lane.b32.xlu1 %v9161_v26, %s10141_s0  ;;  %v9191_v26 = vpack.i.bf16 %v4910_v47, %v4909_v21  ;;  %v4971_v21 = vld [vmem:[#allocation2 + $0x1a] sm:$0xff]  ;;  %v4972_v47 = vld [vmem:[#allocation2 + $0x22] sm:$0xff] }
 0x716   :  { %9177 = vrot.lane.b32.xlu0 %v9176_v61, %s10141_s0  ;;  %v4913_v61 = vld [vmem:[#allocation2 + $0x61] sm:$0xff] }
 0x717   :  { %v14321_v36 = vpop.permute.xlu1 %8882  ;;  %v14347_v8 = vpack.i.bf16 %v4914_v52, %v4913_v61  ;;  %v9226_v61 = vpack.i.bf16 %v4972_v47, %v4971_v21  ;;  %v4987_v52 = vld [vmem:[#allocation2 + $0xda] sm:$0xff]  ;;  %v5163_v47 = vld [vmem:[#allocation2 + $0x32] sm:$0xff] }
 0x718   :  { %v14323_v13 = vpop.permute.xlu0 %8897  ;;  %v9221_v59 = vpack.i.bf16 %v4988_v2, %v4987_v52  ;;  %v5116_v21 = vld [vmem:[#allocation2 + $0xf9] sm:$0xff] }
 0x719   :  { %16826 = vst [vmem:[#allocation115_spill] sm:$0xff] %v14323_v13  ;;  %9172 = vrot.lane.b32.xlu1 %v9171_v42, %s10141_s0  ;;  %v4925_v42 = vld [vmem:[#allocation2 + $0xf1] sm:$0xff] }
 0x71a   :  { %9187 = vrot.lane.b32.xlu0 %v9186_v15, %s10142_s28  ;;  %v9216_v25 = vpack.i.bf16 %v4925_v42, %v4924_v34  ;;  %v5192_v13 = vld [vmem:[#allocation2 + $0x18a] sm:$0xff] }
 0x71b   :  { %v14327_v58 = vpop.permute.xlu1 %8892 }
 0x71c   :  { %16827 = vst [vmem:[#allocation118_spill] sm:$0xff] %v14327_v58  ;;  %v14329_v31 = vpop.permute.xlu0 %8907  ;;  %v8749_v58 = vunpack.i.l.bf16 %v14218_v63 }
 0x71d   :  { %9182 = vrot.lane.b32.xlu1 %v9181_v9, %s10141_s0  ;;  %v4923_v9 = vld [vmem:[#allocation2 + $0xd9] sm:$0xff] }
 0x71e   :  { %9197 = vrot.lane.b32.xlu0 %v14331_v6, %s10142_s28  ;;  %v9211_v60 = vpack.i.bf16 %v4923_v9, %v14351_v44 }
 0x71f   :  { %v14336_v43 = vpop.permute.xlu1 %8902 }
 0x720   :  { %16828 = vst [vmem:[#allocation351_spill] sm:$0xff] %v14336_v43  ;;  %v14338_v4 = vpop.permute.xlu0 %8917 }
 0x721   :  { %9192 = vrot.lane.b32.xlu1 %v9191_v26, %s10142_s28 }
 0x722   :  { %9207 = vrot.lane.b32.xlu0 %v14340_v48, %s10142_s28 }
 0x723   :  { %v14345_v15 = vpop.permute.xlu1 %8912 }
 0x724   :  { %v14349_v22 = vpop.permute.xlu0 %8927 }
 0x725   :  { %16829 = vst [vmem:[#allocation354_spill] sm:$0xff] %v14349_v22  ;;  %9202 = vrot.lane.b32.xlu1 %v14347_v8, %s10142_s28  ;;  %v8909_v22 = vunpack.i.l.bf16 %v14329_v31 }
 0x726   :  { %9217 = vrot.lane.b32.xlu0 %v9216_v25, %s10142_s28 }
 0x727   :  { %v14356_v51 = vpop.permute.xlu1 %8922 }
 0x728   :  { %v14359_v45 = vpop.permute.xlu0 %8937 }
 0x729   :  { %16830 = vst [vmem:[#allocation174_spill] sm:$0xff] %v14359_v45  ;;  %9212 = vrot.lane.b32.xlu1 %v9211_v60, %s10142_s28  ;;  %v5164_v60 = vld [vmem:[#allocation2 + $0x3a] sm:$0xff]  ;;  %v5175_v45 = vld [vmem:[#allocation2 + $0xc2] sm:$0xff] }
 0x72a   :  { %9227 = vrot.lane.b32.xlu0 %v9226_v61, %s10143_s30  ;;  %v9241_v61 = vpack.i.bf16 %v5116_v21, %v4925_v42  ;;  %v9261_v42 = vpack.i.bf16 %v4927_v33, %v5116_v21 }
 0x72b   :  { %v14363_v34 = vpop.permute.xlu1 %8932 }
 0x72c   :  { %16831 = vst [vmem:[#allocation177_spill] sm:$0xff] %v14363_v34  ;;  %v14365_v28 = vpop.permute.xlu0 %8947  ;;  %v14553_v34 = vld [vmem:[#allocation2 + $0x289] sm:$0xff] }
 0x72d   :  { %16832 = vst [vmem:[#allocation11_spill] sm:$0xff] %v14365_v28  ;;  %9222 = vrot.lane.b32.xlu1 %v9221_v59, %s10143_s30  ;;  %v9256_v59 = vpack.i.bf16 %v5164_v60, %v5163_v47  ;;  %v5118_v60 = vld [vmem:[#allocation2 + $0x111] sm:$0xff]  ;;  %v5186_v28 = vld [vmem:[#allocation2 + $0x142] sm:$0xff] }
 0x72e   :  { %9237 = vrot.lane.b32.xlu0 %v14224_v62, %s10144_s9  ;;  %v5180_v62 = vld [vmem:[#allocation2 + $0xfa] sm:$0xff] }
 0x72f   :  { %v14370_v25 = vpop.permute.xlu1 %8942  ;;  %v9251_v17 = vpack.i.bf16 %v5180_v62, %v5179_v10  ;;  %v9286_v62 = vpack.i.bf16 %v5118_v60, %v4927_v33 }
 0x730   :  { %16833 = vst [vmem:[#allocation233_spill] sm:$0xff] %v14370_v25  ;;  %v14372_v9 = vpop.permute.xlu0 %8957 }
 0x731   :  { %16834 = vst [vmem:[#allocation236_spill] sm:$0xff] %v14372_v9  ;;  %9232 = vrot.lane.b32.xlu1 %v14260_v30, %s10144_s9  ;;  %v5166_v9 = vld [vmem:[#allocation2 + $0x52] sm:$0xff] }
 0x732   :  { %9247 = vrot.lane.b32.xlu0 %v9191_v26, %s10145_s10 }
 0x733   :  { %v14377_v2 = vpop.permute.xlu1 %8952 }
 0x734   :  { %16835 = vst [vmem:[#allocation60_spill] sm:$0xff] %v14377_v2  ;;  %v14379_v52 = vpop.permute.xlu0 %8967  ;;  %v5122_v2 = vld [vmem:[#allocation2 + $0x141] sm:$0xff] }
 0x735   :  { %16836 = vst [vmem:[#allocation63_spill] sm:$0xff] %v14379_v52  ;;  %9242 = vrot.lane.b32.xlu1 %v9241_v61, %s10145_s10  ;;  %v5038_v52 = vld [vmem:[#allocation2 + $0x50] sm:$0xff] }
 0x736   :  { %9257 = vrot.lane.b32.xlu0 %v9256_v59, %s10146_s2 }
 0x737   :  { %v14383_v18 = vpop.permute.xlu1 %8962 }
 0x738   :  { %16837 = vst [vmem:[#allocation292_spill] sm:$0xff] %v14383_v18  ;;  %v14385_v30 = vpop.permute.xlu0 %8977 }
 0x739   :  { %16838 = vst [vmem:[#allocation295_spill] sm:$0xff] %v14385_v30  ;;  %9252 = vrot.lane.b32.xlu1 %v9251_v17, %s10146_s2  ;;  %v5037_v30 = vld [vmem:[#allocation2 + $0x48] sm:$0xff] }
 0x73a   :  { %9267 = vrot.lane.b32.xlu0 %v9251_v17, %s10143_s30  ;;  %v5181_v17 = vld [vmem:[#allocation2 + $0x10a] sm:$0xff] }
 0x73b   :  { %v14389_v26 = vpop.permute.xlu1 %8972 }
 0x73c   :  { %16839 = vst [vmem:[#allocation117_spill] sm:$0xff] %v14389_v26  ;;  %v14391_v47 = vpop.permute.xlu0 %8987  ;;  %v5182_v26 = vld [vmem:[#allocation2 + $0x112] sm:$0xff] }
 0x73d   :  { %16840 = vst [vmem:[#allocation120_spill] sm:$0xff] %v14391_v47  ;;  %9262 = vrot.lane.b32.xlu1 %v9261_v42, %s10142_s28  ;;  %v9281_v42 = vpack.i.bf16 %v5038_v52, %v5037_v30  ;;  %v9296_v14 = vpack.i.bf16 %v5182_v26, %v5181_v17  ;;  %v9301_v30 = vpack.i.bf16 %v5166_v9, %v5165_v29  ;;  %v5040_v17 = vld [vmem:[#allocation2 + $0x68] sm:$0xff] }
 0x73e   :  { %9277 = vrot.lane.b32.xlu0 %v14253_v16, %s10144_s9  ;;  %v4929_v16 = vld [vmem:[#allocation2 + $0x121] sm:$0xff] }
 0x73f   :  { %v14396_v61 = vpop.permute.xlu1 %8982 }
 0x740   :  { %16841 = vst [vmem:[#allocation353_spill] sm:$0xff] %v14396_v61  ;;  %v14398_v10 = vpop.permute.xlu0 %8997 }
 0x741   :  { %16842 = vst [vmem:[#allocation356_spill] sm:$0xff] %v14398_v10  ;;  %9272 = vrot.lane.b32.xlu1 %v9256_v59, %s10143_s30  ;;  %v9306_v59 = vpack.i.bf16 %v4929_v16, %v5118_v60  ;;  %v5184_v10 = vld [vmem:[#allocation2 + $0x12a] sm:$0xff] }
 0x742   :  { %9287 = vrot.lane.b32.xlu0 %v9286_v62, %s10145_s10  ;;  %v5039_v62 = vld [vmem:[#allocation2 + $0x60] sm:$0xff] }
 0x743   :  { %v14402_v21 = vpop.permute.xlu1 %8992 }
 0x744   :  { %16843 = vst [vmem:[#allocation176_spill] sm:$0xff] %v14402_v21  ;;  %v14404_v18 = vpop.permute.xlu0 %9007  ;;  %v9376_v21 = vpack.i.bf16 %v5122_v2, %v4931_v38 }
 0x745   :  { %16844 = vst [vmem:[#allocation179_spill] sm:$0xff] %v14404_v18  ;;  %9282 = vrot.lane.b32.xlu1 %v9281_v42, %s10144_s9  ;;  %v5055_v18 = vld [vmem:[#allocation2 + $0x120] sm:$0xff] }
 0x746   :  { %9297 = vrot.lane.b32.xlu0 %v9296_v14, %s10146_s2 }
 0x747   :  { %v14408_v33 = vpop.permute.xlu1 %9002 }
 0x748   :  { %16845 = vst [vmem:[#allocation12_spill] sm:$0xff] %v14408_v33  ;;  %v14410_v61 = vpop.permute.xlu0 %9017  ;;  %v5168_v33 = vld [vmem:[#allocation2 + $0x6a] sm:$0xff] }
 0x749   :  { %16846 = vst [vmem:[#allocation235_spill] sm:$0xff] %v14410_v61  ;;  %9292 = vrot.lane.b32.xlu1 %v14331_v6, %s10145_s10  ;;  %v9326_v61 = vpack.i.bf16 %v5040_v17, %v5039_v62  ;;  %v5056_v6 = vld [vmem:[#allocation2 + $0x128] sm:$0xff] }
 0x74a   :  { %9307 = vrot.lane.b32.xlu0 %v9306_v59, %s10142_s28  ;;  %v9321_v9 = vpack.i.bf16 %v5056_v6, %v5055_v18 }
 0x74b   :  { %v14415_v52 = vpop.permute.xlu1 %9012 }
 0x74c   :  { %16847 = vst [vmem:[#allocation238_spill] sm:$0xff] %v14415_v52  ;;  %v14417_v26 = vpop.permute.xlu0 %9027  ;;  %v5120_v52 = vld [vmem:[#allocation2 + $0x129] sm:$0xff] }
 0x74d   :  { %9302 = vrot.lane.b32.xlu1 %v9301_v30, %s10146_s2  ;;  %v9331_v17 = vpack.i.bf16 %v5120_v52, %v4929_v16 }
 0x74e   :  { %9317 = vrot.lane.b32.xlu0 %v9301_v30, %s10143_s30  ;;  %v5167_v30 = vld [vmem:[#allocation2 + $0x62] sm:$0xff] }
 0x74f   :  { %v14421_v42 = vpop.permute.xlu1 %9022 }
 0x750   :  { %16848 = vst [vmem:[#allocation62_spill] sm:$0xff] %v14421_v42  ;;  %v14423_v60 = vpop.permute.xlu0 %9037 }
 0x751   :  { %9312 = vrot.lane.b32.xlu1 %v9296_v14, %s10143_s30  ;;  %v9346_v14 = vpack.i.bf16 %v5168_v33, %v5167_v30  ;;  %v9351_v33 = vpack.i.bf16 %v4931_v38, %v5120_v52 }
 0x752   :  { %9327 = vrot.lane.b32.xlu0 %v9326_v61, %s10144_s9  ;;  %v5183_v61 = vld [vmem:[#allocation2 + $0x122] sm:$0xff] }
 0x753   :  { %v14427_v29 = vpop.permute.xlu1 %9032  ;;  %v9341_v6 = vpack.i.bf16 %v5184_v10, %v5183_v61 }
 0x754   :  { %v14429_v59 = vpop.permute.xlu0 %9047 }
 0x755   :  { %16849 = vst [vmem:[#allocation65_spill] sm:$0xff] %v14429_v59  ;;  %9322 = vrot.lane.b32.xlu1 %v9321_v9, %s10144_s9 }
 0x756   :  { %9337 = vrot.lane.b32.xlu0 %v14347_v8, %s10145_s10  ;;  %v5057_v8 = vld [vmem:[#allocation2 + $0x138] sm:$0xff] }
 0x757   :  { %v14434_v62 = vpop.permute.xlu1 %9042 }
 0x758   :  { %v14436_v42 = vpop.permute.xlu0 %9057 }
 0x759   :  { %16850 = vst [vmem:[#allocation294_spill] sm:$0xff] %v14436_v42  ;;  %9332 = vrot.lane.b32.xlu1 %v9331_v17, %s10145_s10  ;;  %v9366_v17 = vpack.i.bf16 %v5058_v3, %v5057_v8  ;;  %v9371_v3 = vpack.i.bf16 %v5042_v23, %v5041_v20  ;;  %v5191_v42 = vld [vmem:[#allocation2 + $0x182] sm:$0xff] }
 0x75a   :  { %9347 = vrot.lane.b32.xlu0 %v9346_v14, %s10146_s2 }
 0x75b   :  { %v14440_v18 = vpop.permute.xlu1 %9052 }
 0x75c   :  { %16851 = vst [vmem:[#allocation297_spill] sm:$0xff] %v14440_v18  ;;  %v14442_v9 = vpop.permute.xlu0 %9067  ;;  %v14542_v18 = vld [vmem:[#allocation2 + $0xd8] sm:$0xff] }
 0x75d   :  { %9342 = vrot.lane.b32.xlu1 %v9341_v6, %s10146_s2 }
 0x75e   :  { %9357 = vrot.lane.b32.xlu0 %v9341_v6, %s10143_s30  ;;  %v5185_v6 = vld [vmem:[#allocation2 + $0x13a] sm:$0xff] }
 0x75f   :  { %v14446_v16 = vpop.permute.xlu1 %9062 }
 0x760   :  { %16852 = vst [vmem:[#allocation119_spill] sm:$0xff] %v14446_v16  ;;  %v14448_v30 = vpop.permute.xlu0 %9077  ;;  %v5059_v16 = vld [vmem:[#allocation2 + $0x150] sm:$0xff] }
 0x761   :  { %9352 = vrot.lane.b32.xlu1 %v9351_v33, %s10142_s28  ;;  %v9386_v33 = vpack.i.bf16 %v5186_v28, %v5185_v6  ;;  %v9391_v28 = vpack.i.bf16 %v5170_v11, %v5169_v41  ;;  %v5044_v6 = vld [vmem:[#allocation2 + $0x98] sm:$0xff] }
 0x762   :  { %9367 = vrot.lane.b32.xlu0 %v9366_v17, %s10144_s9  ;;  %v4933_v17 = vld [vmem:[#allocation2 + $0x151] sm:$0xff] }
 0x763   :  { %v14452_v10 = vpop.permute.xlu1 %9072 }
 0x764   :  { %v14454_v61 = vpop.permute.xlu0 %9087 }
 0x765   :  { %16853 = vst [vmem:[#allocation122_spill] sm:$0xff] %v14454_v61  ;;  %9362 = vrot.lane.b32.xlu1 %v9346_v14, %s10143_s30  ;;  %v9396_v14 = vpack.i.bf16 %v4933_v17, %v5122_v2  ;;  %v14558_v61 = vpack.i.bf16 %v5192_v13, %v5191_v42  ;;  %v9030_v13 = vunpack.i.h.bf16 %v14417_v26  ;;  %v9029_v42 = vunpack.i.l.bf16 %v14417_v26 }
 0x766   :  { %9377 = vrot.lane.b32.xlu0 %v9376_v21, %s10145_s10  ;;  %v5043_v21 = vld [vmem:[#allocation2 + $0x90] sm:$0xff] }
 0x767   :  { %v14458_v52 = vpop.permute.xlu1 %9082 }
 0x768   :  { %v14460_v8 = vpop.permute.xlu0 %9097 }
 0x769   :  { %16854 = vst [vmem:[#allocation355_spill] sm:$0xff] %v14460_v8  ;;  %9372 = vrot.lane.b32.xlu1 %v9371_v3, %s10144_s9  ;;  %v5112_v8 = vld [vmem:[#allocation2 + $0xc9] sm:$0xff] }
 0x76a   :  { %9387 = vrot.lane.b32.xlu0 %v9386_v33, %s10146_s2 }
 0x76b   :  { %v14464_v38 = vpop.permute.xlu1 %9092 }
 0x76c   :  { %16855 = vst [vmem:[#allocation358_spill] sm:$0xff] %v14464_v38  ;;  %v14466_v47 = vpop.permute.xlu0 %9107 }
 0x76d   :  { %16856 = vst [vmem:[#allocation178_spill] sm:$0xff] %v14466_v47  ;;  %9382 = vrot.lane.b32.xlu1 %v14340_v48, %s10145_s10  ;;  %v9416_v47 = vpack.i.bf16 %v5044_v6, %v5043_v21  ;;  %v5060_v48 = vld [vmem:[#allocation2 + $0x158] sm:$0xff] }
 0x76e   :  { %9397 = vrot.lane.b32.xlu0 %v9396_v14, %s10142_s28  ;;  %v5108_v14 = vld [vmem:[#allocation2 + $0x99] sm:$0xff]  ;;  %v9411_v41 = vpack.i.bf16 %v5060_v48, %v5059_v16 }
 0x76f   :  { %v14471_v23 = vpop.permute.xlu1 %9102  ;;  %v9426_v43 = vpack.i.bf16 %v5108_v14, %v14351_v44 }
 0x770   :  { %16857 = vst [vmem:[#allocation181_spill] sm:$0xff] %v14471_v23  ;;  %v14473_v20 = vpop.permute.xlu0 %9117  ;;  %v5187_v23 = vld [vmem:[#allocation2 + $0x152] sm:$0xff] }
 0x771   :  { %16858 = vst [vmem:[#allocation13_spill] sm:$0xff] %v14473_v20  ;;  %9392 = vrot.lane.b32.xlu1 %v9391_v28, %s10146_s2 }
 0x772   :  { %9407 = vrot.lane.b32.xlu0 %v9391_v28, %s10143_s30  ;;  %v5124_v28 = vld [vmem:[#allocation2 + $0x159] sm:$0xff] }
 0x773   :  { %v14477_v3 = vpop.permute.xlu1 %9112 }
 0x774   :  { %16859 = vst [vmem:[#allocation237_spill] sm:$0xff] %v14477_v3  ;;  %v14479_v2 = vpop.permute.xlu0 %9127  ;;  %v5171_v3 = vld [vmem:[#allocation2 + $0x92] sm:$0xff] }
 0x775   :  { %16860 = vst [vmem:[#allocation240_spill] sm:$0xff] %v14479_v2  ;;  %9402 = vrot.lane.b32.xlu1 %v9386_v33, %s10143_s30  ;;  %v5172_v2 = vld [vmem:[#allocation2 + $0x9a] sm:$0xff]  ;;  %v9421_v33 = vpack.i.bf16 %v5124_v28, %v4933_v17 }
 0x776   :  { %9417 = vrot.lane.b32.xlu0 %v9416_v47, %s10144_s9  ;;  %v9436_v47 = vpack.i.bf16 %v5172_v2, %v5171_v3  ;;  %v9441_v3 = vpack.i.bf16 %v5108_v14, %v5124_v28  ;;  %v5190_v14 = vld [vmem:[#allocation2 + $0x172] sm:$0xff] }
 0x777   :  { %v14483_v11 = vpop.permute.xlu1 %9122 }
 0x778   :  { %16861 = vst [vmem:[#allocation64_spill] sm:$0xff] %v14483_v11  ;;  %v14485_v20 = vpop.permute.xlu0 %9137  ;;  %v5188_v11 = vld [vmem:[#allocation2 + $0x15a] sm:$0xff] }
 0x779   :  { %16862 = vst [vmem:[#allocation67_spill] sm:$0xff] %v14485_v20  ;;  %9412 = vrot.lane.b32.xlu1 %v9411_v41, %s10144_s9  ;;  %v9431_v16 = vpack.i.bf16 %v5188_v11, %v5187_v23  ;;  %v5062_v41 = vld [vmem:[#allocation2 + $0x170] sm:$0xff] }
 0x77a   :  { %9427 = vrot.lane.b32.xlu0 %v9426_v43, %s10145_s10  ;;  %v5061_v43 = vld [vmem:[#allocation2 + $0x168] sm:$0xff] }
 0x77b   :  { %v14490_v21 = vpop.permute.xlu1 %9132  ;;  %v9456_v20 = vpack.i.bf16 %v5062_v41, %v5061_v43 }
 0x77c   :  { %16863 = vst [vmem:[#allocation296_spill] sm:$0xff] %v14490_v21  ;;  %v14492_v6 = vpop.permute.xlu0 %9147  ;;  %v5126_v21 = vld [vmem:[#allocation2 + $0x171] sm:$0xff] }
 0x77d   :  { %16864 = vst [vmem:[#allocation299_spill] sm:$0xff] %v14492_v6  ;;  %9422 = vrot.lane.b32.xlu1 %v9421_v33, %s10145_s10  ;;  %v5125_v33 = vld [vmem:[#allocation2 + $0x169] sm:$0xff] }
 0x77e   :  { %9437 = vrot.lane.b32.xlu0 %v9436_v47, %s10146_s2  ;;  %v5046_v6 = vld [vmem:[#allocation2 + $0xb0] sm:$0xff] }
 0x77f   :  { %v14496_v44 = vpop.permute.xlu1 %9142 }
 0x780   :  { %16865 = vst [vmem:[#allocation121_spill] sm:$0xff] %v14496_v44  ;;  %v14498_v48 = vpop.permute.xlu0 %9157  ;;  %v9466_v44 = vpack.i.bf16 %v5126_v21, %v5125_v33 }
 0x781   :  { %16866 = vst [vmem:[#allocation124_spill] sm:$0xff] %v14498_v48  ;;  %9432 = vrot.lane.b32.xlu1 %v9431_v16, %s10146_s2  ;;  %v5045_v48 = vld [vmem:[#allocation2 + $0xa8] sm:$0xff] }
 0x782   :  { %9447 = vrot.lane.b32.xlu0 %v9431_v16, %s10143_s30  ;;  %v5189_v16 = vld [vmem:[#allocation2 + $0x16a] sm:$0xff]  ;;  %v9461_v43 = vpack.i.bf16 %v5046_v6, %v5045_v48 }
 0x783   :  { %v14502_v17 = vpop.permute.xlu1 %9152 }
 0x784   :  { %16867 = vst [vmem:[#allocation357_spill] sm:$0xff] %v14502_v17  ;;  %v14504_v2 = vpop.permute.xlu0 %9167  ;;  %v8710_v17 = vunpack.i.h.bf16 %v14194_v12 }
 0x785   :  { %16868 = vst [vmem:[#allocation360_spill] sm:$0xff] %v14504_v2  ;;  %9442 = vrot.lane.b32.xlu1 %v9441_v3, %s10142_s28  ;;  %v9476_v3 = vpack.i.bf16 %v5190_v14, %v5189_v16  ;;  %v5110_v2 = vld [vmem:[#allocation2 + $0xb1] sm:$0xff]  ;;  %v5063_v14 = vld [vmem:[#allocation2 + $0x180] sm:$0xff] }
 0x786   :  { %9457 = vrot.lane.b32.xlu0 %v9456_v20, %s10144_s9  ;;  %v5109_v20 = vld [vmem:[#allocation2 + $0xa9] sm:$0xff] }
 0x787   :  { %v14508_v23 = vpop.permute.xlu1 %9162  ;;  %v9471_v33 = vpack.i.bf16 %v5110_v2, %v5109_v20  ;;  %v4652_v2 = vld [vmem:[#allocation2 + $0x8] sm:$0xff]  ;;  %v4651_v20 = vld [vmem:[#allocation2] sm:$0xff] }
 0x788   :  { %16869 = vst [vmem:[#allocation180_spill] sm:$0xff] %v14508_v23  ;;  %v14510_v11 = vpop.permute.xlu0 %9177  ;;  %v5174_v23 = vld [vmem:[#allocation2 + $0xb2] sm:$0xff] }
 0x789   :  { %16870 = vst [vmem:[#allocation183_spill] sm:$0xff] %v14510_v11  ;;  %9452 = vrot.lane.b32.xlu1 %v9436_v47, %s10143_s30  ;;  %v5173_v11 = vld [vmem:[#allocation2 + $0xaa] sm:$0xff] }
 0x78a   :  { %9467 = vrot.lane.b32.xlu0 %v9466_v44, %s10145_s10  ;;  %v9481_v48 = vpack.i.bf16 %v5174_v23, %v5173_v11  ;;  %v5128_v11 = vld [vmem:[#allocation2 + $0x189] sm:$0xff] }
 0x78b   :  { %v14514_v28 = vpop.permute.xlu1 %9172 }
 0x78c   :  { %16871 = vst [vmem:[#allocation14_spill] sm:$0xff] %v14514_v28  ;;  %v14516_v41 = vpop.permute.xlu0 %9187  ;;  %v5127_v28 = vld [vmem:[#allocation2 + $0x181] sm:$0xff] }
 0x78d   :  { %9462 = vrot.lane.b32.xlu1 %v9461_v43, %s10144_s9  ;;  %v5064_v43 = vld [vmem:[#allocation2 + $0x188] sm:$0xff]  ;;  %v9516_v38 = vpack.i.bf16 %v5128_v11, %v5127_v28  ;;  %v8750_v28 = vunpack.i.h.bf16 %v14218_v63  ;;  %v8869_v11 = vunpack.i.l.bf16 %v14305_v37  ;;  %v9190_v63 = vunpack.i.h.bf16 %v14516_v41 }
 0x78e   :  { %9477 = vrot.lane.b32.xlu0 %v9476_v3, %s10146_s2  ;;  %v9506_v23 = vpack.i.bf16 %v5064_v43, %v5063_v14  ;;  %v14546_v14 = vld [vmem:[#allocation2 + $0xd9] sm:$0xff]  ;;  %v7276_v43 = vsel %vm30_vm0, %v4652_v2, %v8710_v17  ;;  %v14562_v17 = vpack.i.bf16 %v5176_v39, %v5175_v45  ;;  %v9070_v45 = vunpack.i.h.bf16 %v14442_v9 }
 0x78f   :  { %v14520_v21 = vpop.permute.xlu1 %9182  ;;  %v14564_v2 = vld [vmem:[#allocation2 + $0xda] sm:$0xff]  ;;  %v9069_v39 = vunpack.i.l.bf16 %v14442_v9 }
 0x790   :  { %16872 = vst [vmem:[#allocation239_spill] sm:$0xff] %v14520_v21  ;;  %v14522_v47 = vpop.permute.xlu0 %9197 }
 0x791   :  { %9472 = vrot.lane.b32.xlu1 %v9471_v33, %s10145_s10 }
 0x792   :  { %9487 = vrot.lane.b32.xlu0 %v9466_v44, %s10142_s28  ;;  %v8709_v44 = vunpack.i.l.bf16 %v14194_v12  ;;  %v14544_v12 = vld [vmem:[#allocation2 + $0xe0] sm:$0xff] }
 0x793   :  { %v14526_v6 = vpop.permute.xlu1 %9192 }
 0x794   :  { %v14528_v16 = vpop.permute.xlu0 %9207 }
 0x795   :  { %16873 = vst [vmem:[#allocation242_spill] sm:$0xff] %v14528_v16  ;;  %9482 = vrot.lane.b32.xlu1 %v9481_v48, %s10146_s2  ;;  %v9511_v16 = vpack.i.bf16 %v5048_v56, %v5047_v1  ;;  %v8910_v56 = vunpack.i.h.bf16 %v14329_v31  ;;  %v14586_v31 = vld [vmem:[#allocation2 + $0x198] sm:$0xff] }
 0x796   :  { %9497 = vrot.lane.b32.xlu0 %v9476_v3, %s10143_s30  ;;  %v5111_v3 = vld [vmem:[#allocation2 + $0xc1] sm:$0xff] }
 0x797   :  { %v14532_v21 = vpop.permute.xlu1 %9202  ;;  %v14560_v59 = vpack.i.bf16 %v5112_v8, %v5111_v3 }
 0x798   :  { %16874 = vst [vmem:[#allocation66_spill] sm:$0xff] %v14532_v21  ;;  %v14536_v25 = vpop.permute.xlu0 %9217 }
 0x799   :  { %9492 = vrot.lane.b32.xlu1 %v9471_v33, %s10142_s28  ;;  %v7275_v33 = vsel %vm30_vm0, %v4651_v20, %v8709_v44  ;;  %v14566_v20 = vld [vmem:[#allocation2 + $0xe2] sm:$0xff]  ;;  %v8870_v44 = vunpack.i.h.bf16 %v14305_v37  ;;  %v7291_v37 = vsel %vm30_vm0, %v14239_v24, %v8749_v58  ;;  %v9189_v24 = vunpack.i.l.bf16 %v14516_v41 }
 0x79a   :  { %9507 = vrot.lane.b32.xlu0 %v9506_v23, %s10144_s9  ;;  %v14551_v23 = vld [vmem:[#allocation2 + $0xe1] sm:$0xff]  ;;  %v7292_v58 = vsel %vm30_vm0, %v14241_v5, %v8750_v28  ;;  %v7339_v53 = vsel %vm2936_vm4, %v7275_v33, %v8869_v11  ;;  %v7355_v57 = vsel %vm2936_vm4, %v7291_v37, %v8909_v22 }
 0x79b   :  { %v14540_v54 = vpop.permute.xlu1 %9212  ;;  %v7340_v26 = vsel %vm2936_vm4, %v7276_v43, %v8870_v44  ;;  %v7356_v9 = vsel %vm2936_vm4, %v7292_v58, %v8910_v56  ;;  %v7403_v5 = vsel %vm3001_vm5, %v7339_v53, %v9029_v42  ;;  %v7419_v44 = vsel %vm3001_vm5, %v7355_v57, %v9069_v39 }
 0x79c   :  { %16875 = vst [vmem:[#allocation69_spill] sm:$0xff] %v14540_v54  ;;  %v9228_v50 = vpop.permute.xlu0 %9227  ;;  %v7420_v22 = vsel %vm3001_vm5, %v7356_v9, %v9070_v45  ;;  %v7467_v11 = vsel %vm3066_vm6, %v7403_v5, %v9189_v24  ;;  %v9215_v37 = vunpack.i.h.bf16 %v14540_v54 }
 0x79d   :  { %9502 = vrot.lane.b32.xlu1 %v9481_v48, %s10143_s30  ;;  %v14588_v48 = vld [vmem:[#allocation2 + $0x1a0] sm:$0xff]  ;;  %v9230_v3 = vunpack.i.h.bf16 %v9228_v50  ;;  %v9229_v32 = vunpack.i.l.bf16 %v9228_v50  ;;  %v9219_v50 = vunpack.i.l.bf16 %v14536_v25 }
 0x79e   :  { %9517 = vrot.lane.b32.xlu0 %v9516_v38, %s10145_s10 }
 0x79f   :  { %v14574_v1 = vpop.permute.xlu1 %9222  ;;  %v7531_v42 = vsel %vm3131_vm7, %v7467_v11, %v9229_v32  ;;  %v14636_v11 = vld [vmem:[#allocation2 + $0x1c9] sm:$0xff] }
 0x7a0   :  { %v9238_v8 = vpop.permute.xlu0 %9237  ;;  %v9225_v57 = vunpack.i.h.bf16 %v14574_v1  ;;  %v9224_v39 = vunpack.i.l.bf16 %v14574_v1  ;;  %v7484_v1 = vsel %vm3066_vm6, %v7420_v22, %v9219_v50 }
 0x7a1   :  { %9512 = vrot.lane.b32.xlu1 %v9511_v16, %s10144_s9  ;;  %v7404_v16 = vsel %vm3001_vm5, %v7340_v26, %v9030_v13  ;;  %v9240_v43 = vunpack.i.h.bf16 %v9238_v8  ;;  %v9239_v28 = vunpack.i.l.bf16 %v9238_v8 }
 0x7a2   :  { %9527 = vrot.lane.b32.xlu0 %v14558_v61, %s10146_s2  ;;  %v7468_v56 = vsel %vm3066_vm6, %v7404_v16, %v9190_v63 }
 0x7a3   :  { %v9233_v21 = vpop.permute.xlu1 %9232  ;;  %v7532_v45 = vsel %vm3131_vm7, %v7468_v56, %v9230_v3  ;;  %v7595_v8 = vsel %vm3196_vm8, %v7531_v42, %v9239_v28  ;;  %v14626_v3 = vld [vmem:[#allocation2 + $0x28a] sm:$0xff]  ;;  %v7483_v28 = vsel %vm3066_vm6, %v7419_v44, %v9215_v37  ;;  %v14640_v42 = vld [vmem:[#allocation2 + $0x2a0] sm:$0xff] }
 0x7a4   :  { %v9248_v33 = vpop.permute.xlu0 %9247  ;;  %v7596_v24 = vsel %vm3196_vm8, %v7532_v45, %v9240_v43  ;;  %v9235_v58 = vunpack.i.h.bf16 %v9233_v21  ;;  %v9234_v26 = vunpack.i.l.bf16 %v9233_v21  ;;  %v14638_v56 = vld [vmem:[#allocation2 + $0x1d1] sm:$0xff]  ;;  %v7548_v45 = vsel %vm3131_vm7, %v7484_v1, %v9225_v57  ;;  %v5130_v37 = vld [vmem:[#allocation2 + $0x1a1] sm:$0xff] }
 0x7a5   :  { %9522 = vrot.lane.b32.xlu1 %v14560_v59, %s10145_s10  ;;  %v9250_v13 = vunpack.i.h.bf16 %v9248_v33  ;;  %v9249_v53 = vunpack.i.l.bf16 %v9248_v33  ;;  %v14628_v33 = vld [vmem:[#allocation2 + $0x292] sm:$0xff]  ;;  %v14652_v57 = vld [vmem:[#allocation2 + $0x1ca] sm:$0xff]  ;;  %v5147_v1 = vld [vmem:[#allocation2 + $0x2a1] sm:$0xff] }
 0x7a6   :  { %9537 = vrot.lane.b32.xlu0 %v9516_v38, %s10142_s28  ;;  %v7612_v41 = vsel %vm3196_vm8, %v7548_v45, %v9235_v58  ;;  %v14665_v58 = vld [vmem:[#allocation2 + $0x1e8] sm:$0xff]  ;;  %v16876_v45 = vpack.i.bf16 %v14588_v48, %v14586_v31  ;;  %v5193_v48 = vld [vmem:[#allocation2 + $0x19a] sm:$0xff] }
 0x7a7   :  { %v9243_v63 = vpop.permute.xlu1 %9242  ;;  %v7659_v21 = vsel %vm3261_vm9, %v7595_v8, %v9249_v53  ;;  %v7660_v43 = vsel %vm3261_vm9, %v7596_v24, %v9250_v13  ;;  %v14646_v53 = vld [vmem:[#allocation2 + $0x2a8] sm:$0xff] }
 0x7a8   :  { %v9258_v9 = vpop.permute.xlu0 %9257  ;;  %v9245_v16 = vunpack.i.h.bf16 %v9243_v63  ;;  %v9244_v5 = vunpack.i.l.bf16 %v9243_v63  ;;  %v7547_v63 = vsel %vm3131_vm7, %v7483_v28, %v9224_v39  ;;  %v14654_v39 = vld [vmem:[#allocation2 + $0x1d2] sm:$0xff] }
 0x7a9   :  { %9532 = vrot.lane.b32.xlu1 %v14562_v17, %s10146_s2  ;;  %v9260_v32 = vunpack.i.h.bf16 %v9258_v9  ;;  %v9259_v38 = vunpack.i.l.bf16 %v9258_v9  ;;  %v7611_v9 = vsel %vm3196_vm8, %v7547_v63, %v9234_v26  ;;  %v5148_v26 = vld [vmem:[#allocation2 + $0x2a9] sm:$0xff] }
 0x7aa   :  { %9547 = vrot.lane.b32.xlu0 %v14558_v61, %s10143_s30  ;;  %v5129_v61 = vld [vmem:[#allocation2 + $0x199] sm:$0xff]  ;;  %v7676_v28 = vsel %vm3261_vm9, %v7612_v41, %v9245_v16 }
 0x7ab   :  { %v9253_v22 = vpop.permute.xlu1 %9252  ;;  %v7723_v44 = vsel %vm3326_vm10, %v7659_v21, %v9259_v38  ;;  %v7724_v50 = vsel %vm3326_vm10, %v7660_v43, %v9260_v32  ;;  %v8755_v38 = vunpack.i.h.bf16 %v14231_v7  ;;  %v7675_v32 = vsel %vm3261_vm9, %v7611_v9, %v9244_v5  ;;  %v14663_v43 = vld [vmem:[#allocation2 + $0x1e0] sm:$0xff]  ;;  %v5212_v9 = vld [vmem:[#allocation2 + $0x2aa] sm:$0xff] }
 0x7ac   :  { %v9255_v13 = vunpack.i.h.bf16 %v9253_v22  ;;  %v9254_v8 = vunpack.i.l.bf16 %v9253_v22  ;;  %v14648_v24 = vpop.permute.xlu0 %9267  ;;  %v8602_v16 = vpack.c.bf16 %v7724_v50, %v7723_v44  ;;  %v9566_v5 = vpack.i.bf16 %v5130_v37, %v5129_v61  ;;  %v5211_v22 = vld [vmem:[#allocation2 + $0x2a2] sm:$0xff] }
 0x7ad   :  { %9542 = vrot.lane.b32.xlu1 %v14560_v59, %s10142_s28  ;;  %v8915_v21 = vunpack.i.h.bf16 %v14345_v15  ;;  %v9075_v44 = vunpack.i.h.bf16 %v14452_v10  ;;  %v14690_v37 = vpack.i.bf16 %v5148_v26, %v5147_v1  ;;  %v10054_v61 = vld [vmem:[#allocation2 + $0xe0] sm:$0xff]  ;;  %v8715_v26 = vunpack.i.h.bf16 %v14204_v35 }
 0x7ae   :  { %9557 = vrot.lane.b32.xlu0 %v16876_v45, %s10144_s9  ;;  %v7739_v63 = vsel %vm3326_vm10, %v7675_v32, %v9254_v8  ;;  %v7740_v59 = vsel %vm3326_vm10, %v7676_v28, %v9255_v13  ;;  %v5194_v45 = vld [vmem:[#allocation2 + $0x1a2] sm:$0xff]  ;;  %v8754_v32 = vunpack.i.l.bf16 %v14231_v7  ;;  %v8914_v28 = vunpack.i.l.bf16 %v14345_v15  ;;  %v10055_v13 = vld [vmem:[#allocation2 + $0xd8] sm:$0xff] }
 0x7af   :  { %v14680_v54 = vpop.permute.xlu1 %9262  ;;  %v8599_v31 = vpack.c.bf16 %v7740_v59, %v7739_v63  ;;  %v14700_v59 = vpack.i.bf16 %v5212_v9, %v5211_v22  ;;  %v8714_v8 = vunpack.i.l.bf16 %v14204_v35  ;;  %v7294_v1 = vsel %vm30_vm0, %v10054_v61, %v8755_v38 }
 0x7b0   :  { %v9278_v50 = vpop.permute.xlu0 %9277  ;;  %v9264_v63 = vunpack.i.l.bf16 %v14680_v54  ;;  %v9074_v15 = vunpack.i.l.bf16 %v14452_v10  ;;  %v7358_v22 = vsel %vm2936_vm4, %v7294_v1, %v8915_v21  ;;  %v9220_v9 = vunpack.i.h.bf16 %v14536_v25  ;;  %v10056_v1 = vld [vmem:[#allocation2 + $0x18] sm:$0xff] }
 0x7b1   :  { %9552 = vrot.lane.b32.xlu1 %v14562_v17, %s10143_s30  ;;  %8601 = vmatprep.subr.msk.bf16.mxu1 %vm14675_vm12, %v8599_v31  ;;  %v9576_v17 = vpack.i.bf16 %v5194_v45, %v5193_v48  ;;  %v8874_v31 = vunpack.i.l.bf16 %v14315_v19  ;;  %v7293_v38 = vsel %vm30_vm0, %v10055_v13, %v8754_v32  ;;  %v7422_v10 = vsel %vm3001_vm5, %v7358_v22, %v9075_v44 }
 0x7b2   :  { %8604 = vmatpush3.bf16.xpose.msk.msra.mxu1 %vm14675_vm12, %v8602_v16  ;;  %9567 = vrot.lane.b32.xlu0 %v9566_v5, %s10145_s10  ;;  %v9270_v16 = vunpack.i.h.bf16 %v14648_v24  ;;  %v9269_v5 = vunpack.i.l.bf16 %v14648_v24  ;;  %v7357_v35 = vsel %vm2936_vm4, %v7293_v38, %v8914_v28  ;;  %v7486_v45 = vsel %vm3066_vm6, %v7422_v10, %v9264_v63  ;;  %v10057_v24 = vld [vmem:[#allocation2 + $0x20] sm:$0xff] }
 0x7b3   :  { %v14712_v7 = vpop.permute.xlu1 %9272  ;;  %v9280_v61 = vunpack.i.h.bf16 %v9278_v50  ;;  %v9279_v21 = vunpack.i.l.bf16 %v9278_v50  ;;  %v16879_v25 = vpack.i.bf16 %v14544_v12, %v14542_v18  ;;  %v7277_v13 = vsel %vm30_vm0, %v10056_v1, %v8714_v8  ;;  %v5131_v1 = vld [vmem:[#allocation2 + $0x1e1] sm:$0xff] }
 0x7b4   :  { %v9288_v48 = vpop.permute.xlu0 %9287  ;;  %v7421_v32 = vsel %vm3001_vm5, %v7357_v35, %v9074_v15  ;;  %v7278_v28 = vsel %vm30_vm0, %v10057_v24, %v8715_v26  ;;  %v8875_v63 = vunpack.i.h.bf16 %v14315_v19  ;;  %v7341_v50 = vsel %vm2936_vm4, %v7277_v13, %v8874_v31 }
 0x7b5   :  { %9562 = vrot.lane.b32.xlu1 %v16879_v25, %s10144_s9  ;;  %v9290_v44 = vunpack.i.h.bf16 %v9288_v48  ;;  %v9289_v22 = vunpack.i.l.bf16 %v9288_v48  ;;  %v7485_v38 = vsel %vm3066_vm6, %v7421_v32, %v9220_v9  ;;  %v9035_v12 = vunpack.i.h.bf16 %v14427_v29 }
 0x7b6   :  { %9577 = vrot.lane.b32.xlu0 %v9576_v17, %s10146_s2  ;;  %v9034_v8 = vunpack.i.l.bf16 %v14427_v29  ;;  %v7549_v15 = vsel %vm3131_vm7, %v7485_v38, %v9269_v5  ;;  %v7550_v10 = vsel %vm3131_vm7, %v7486_v45, %v9270_v16  ;;  %v16880_v19 = vpack.i.bf16 %v14551_v23, %v14546_v14 }
 0x7b7   :  { %v9283_v18 = vpop.permute.xlu1 %9282  ;;  %v7613_v17 = vsel %vm3196_vm8, %v7549_v15, %v9279_v21  ;;  %v7614_v26 = vsel %vm3196_vm8, %v7550_v10, %v9280_v61  ;;  %v9195_v35 = vunpack.i.h.bf16 %v14526_v6  ;;  %v9194_v29 = vunpack.i.l.bf16 %v14526_v6  ;;  %v5132_v6 = vld [vmem:[#allocation2 + $0x1e9] sm:$0xff] }
 0x7b8   :  { %v9298_v48 = vpop.permute.xlu0 %9297  ;;  %v7677_v5 = vsel %vm3261_vm9, %v7613_v17, %v9289_v22  ;;  %v7678_v16 = vsel %vm3261_vm9, %v7614_v26, %v9290_v44  ;;  %v16881_v45 = vpack.i.bf16 %v14555_v55, %v14553_v34  ;;  %v9275_v61 = vunpack.i.h.bf16 %v14712_v7 }
 0x7b9   :  { %9572 = vrot.lane.b32.xlu1 %v16880_v19, %s10145_s10  ;;  %v9300_v31 = vunpack.i.h.bf16 %v9298_v48  ;;  %v9299_v9 = vunpack.i.l.bf16 %v9298_v48  ;;  %v9274_v14 = vunpack.i.l.bf16 %v14712_v7  ;;  %v7342_v13 = vsel %vm2936_vm4, %v7278_v28, %v8875_v63  ;;  %v5195_v19 = vld [vmem:[#allocation2 + $0x1e2] sm:$0xff] }
 0x7ba   :  { %9587 = vrot.lane.b32.xlu0 %v16881_v45, %s10142_s28  ;;  %v9285_v32 = vunpack.i.h.bf16 %v9283_v18  ;;  %v9284_v44 = vunpack.i.l.bf16 %v9283_v18  ;;  %v7405_v55 = vsel %vm3001_vm5, %v7341_v50, %v9034_v8  ;;  %v7406_v34 = vsel %vm3001_vm5, %v7342_v13, %v9035_v12 }
 0x7bb   :  { %v7741_v23 = vsel %vm3326_vm10, %v7677_v5, %v9299_v9  ;;  %v7742_v21 = vsel %vm3326_vm10, %v7678_v16, %v9300_v31  ;;  %v9293_v25 = vpop.permute.xlu1 %9292  ;;  %v16882_v15 = vpack.i.bf16 %v14566_v20, %v14564_v2  ;;  %v7469_v10 = vsel %vm3066_vm6, %v7405_v55, %v9194_v29  ;;  %v5196_v31 = vld [vmem:[#allocation2 + $0x1ea] sm:$0xff] }
 0x7bc   :  { %v14754_v22 = vpop.permute.xlu0 %9307  ;;  %v8605_v24 = vpack.c.bf16 %v7742_v21, %v7741_v23  ;;  %v9295_v38 = vunpack.i.h.bf16 %v9293_v25  ;;  %v9294_v7 = vunpack.i.l.bf16 %v9293_v25  ;;  %v7470_v28 = vsel %vm3066_vm6, %v7406_v34, %v9195_v35 }
 0x7bd   :  { %9582 = vrot.lane.b32.xlu1 %v16882_v15, %s10146_s2  ;;  %v16883_v63 = vpack.i.bf16 %v14628_v33, %v14626_v3  ;;  %v14770_v50 = vpack.i.bf16 %v5132_v6, %v5131_v1  ;;  %v8720_v18 = vunpack.i.h.bf16 %v14200_v40  ;;  %v8719_v12 = vunpack.i.l.bf16 %v14200_v40  ;;  %v10058_v1 = vld [vmem:[#allocation2 + $0x30] sm:$0xff]  ;;  %v10059_v6 = vld [vmem:[#allocation2 + $0x38] sm:$0xff] }
 0x7be   :  { %8607 = vmatprep.subr.msk.bf16.mxu1 %vm14675_vm12, %v8605_v24  ;;  %v7533_v2 = vsel %vm3131_vm7, %v7469_v10, %v9274_v14  ;;  %v7534_v20 = vsel %vm3131_vm7, %v7470_v28, %v9275_v61  ;;  %v8760_v9 = vunpack.i.h.bf16 %v14226_v27  ;;  %v8759_v35 = vunpack.i.l.bf16 %v14226_v27 }
 0x7bf   :  { %9597 = vrot.lane.b32.xlu0 %v16883_v63, %s10143_s30  ;;  %v9303_v8 = vpop.permute.xlu1 %9302  ;;  %v7597_v48 = vsel %vm3196_vm8, %v7533_v2, %v9284_v44  ;;  %v7598_v17 = vsel %vm3196_vm8, %v7534_v20, %v9285_v32  ;;  %v16884_v5 = vpack.i.bf16 %v14638_v56, %v14636_v11  ;;  %v8880_v16 = vunpack.i.h.bf16 %v14311_v49 }
 0x7c0   :  { %v9305_v3 = vunpack.i.h.bf16 %v9303_v8  ;;  %v9304_v33 = vunpack.i.l.bf16 %v9303_v8  ;;  %v9318_v26 = vpop.permute.xlu0 %9317  ;;  %v7661_v40 = vsel %vm3261_vm9, %v7597_v48, %v9294_v7  ;;  %v7662_v29 = vsel %vm3261_vm9, %v7598_v17, %v9295_v38  ;;  %v10060_v38 = vld [vmem:[#allocation2 + $0xf8] sm:$0xff]  ;;  %v10061_v7 = vld [vmem:[#allocation2 + $0xf0] sm:$0xff] }
 0x7c1   :  { %9592 = vrot.lane.b32.xlu1 %v16884_v5, %s10142_s28  ;;  %v8879_v45 = vunpack.i.l.bf16 %v14311_v49  ;;  %v16885_v27 = vpack.i.bf16 %v14646_v53, %v14640_v42  ;;  %v8920_v23 = vunpack.i.h.bf16 %v14338_v4  ;;  %v8919_v21 = vunpack.i.l.bf16 %v14338_v4 }
 0x7c2   :  { %v7725_v61 = vsel %vm3326_vm10, %v7661_v40, %v9304_v33  ;;  %v7726_v14 = vsel %vm3326_vm10, %v7662_v29, %v9305_v3  ;;  %v14798_v56 = vpack.i.bf16 %v5196_v31, %v5195_v19  ;;  %v7279_v49 = vsel %vm30_vm0, %v10058_v1, %v8719_v12  ;;  %v4650_v40 = vld [vmem:[%s15869_s5] sm:$0xf] }
 0x7c3   :  { %9607 = vrot.lane.b32.xlu0 %v16885_v27, %s10144_s9  ;;  %v14796_v25 = vpop.permute.xlu1 %9312  ;;  %v8608_v11 = vpack.c.bf16 %v7726_v14, %v7725_v61  ;;  %v7280_v13 = vsel %vm30_vm0, %v10059_v6, %v8720_v18  ;;  %v9040_v32 = vunpack.i.h.bf16 %v14423_v60  ;;  %v9039_v42 = vunpack.i.l.bf16 %v14423_v60  ;;  %8449 = vmatprep.mubr.msk.f32.mxu1 %vm3396_vm11, %v4650_v40 }
 0x7c4   :  { %v9328_v53 = vpop.permute.xlu0 %9327  ;;  %v9080_v44 = vunpack.i.h.bf16 %v14448_v30  ;;  %v9079_v4 = vunpack.i.l.bf16 %v14448_v30  ;;  %v9200_v24 = vunpack.i.h.bf16 %v14522_v47  ;;  %v9199_v55 = vunpack.i.l.bf16 %v14522_v47 }
 0x7c5   :  { %v16886_v34 = vpack.i.bf16 %v14654_v39, %v14652_v57  ;;  %8610 = vmatpush3.bf16.xpose.msk.msra.mxu1 %vm14675_vm12, %v8608_v11  ;;  %v7296_v60 = vsel %vm30_vm0, %v10060_v38, %v8760_v9  ;;  %v7295_v15 = vsel %vm30_vm0, %v10061_v7, %v8759_v35  ;;  %v7343_v30 = vsel %vm2936_vm4, %v7279_v49, %v8879_v45  ;;  %v14848_v49 = vld [vmem:[#allocation2 + $0x2b8] sm:$0xff]  ;;  %v14862_v7 = vld [vmem:[#allocation2 + $0x200] sm:$0xff] }
 0x7c6   :  { %v7344_v10 = vsel %vm2936_vm4, %v7280_v13, %v8880_v16  ;;  %v7359_v47 = vsel %vm2936_vm4, %v7295_v15, %v8919_v21  ;;  %v7360_v57 = vsel %vm2936_vm4, %v7296_v60, %v8920_v23  ;;  %v9320_v39 = vunpack.i.h.bf16 %v9318_v26  ;;  %v14860_v60 = vld [vmem:[#allocation2 + $0x1f8] sm:$0xff] }
 0x7c7   :  { %9602 = vrot.lane.b32.xlu1 %v16886_v34, %s10143_s30  ;;  %9617 = vrot.lane.b32.xlu0 %v14690_v37, %s10145_s10  ;;  %v9319_v28 = vunpack.i.l.bf16 %v9318_v26  ;;  %v9323_v63 = vpop.permute.xlu1 %9322  ;;  %v7408_v18 = vsel %vm3001_vm5, %v7344_v10, %v9040_v32  ;;  %v7407_v12 = vsel %vm3001_vm5, %v7343_v30, %v9039_v42  ;;  %v9330_v2 = vunpack.i.h.bf16 %v9328_v53  ;;  %v5086_v42 = vld [vmem:[#allocation2 + $0x2c0] sm:$0xff] }
 0x7c8   :  { %v9329_v20 = vunpack.i.l.bf16 %v9328_v53  ;;  %v9338_v8 = vpop.permute.xlu0 %9337  ;;  %v7424_v48 = vsel %vm3001_vm5, %v7360_v57, %v9080_v44  ;;  %v7423_v17 = vsel %vm3001_vm5, %v7359_v47, %v9079_v4  ;;  %v7471_v3 = vsel %vm3066_vm6, %v7407_v12, %v9199_v55  ;;  %v5149_v53 = vld [vmem:[#allocation2 + $0x2b9] sm:$0xff]  ;;  %v5150_v44 = vld [vmem:[#allocation2 + $0x2c1] sm:$0xff] }
 0x7c9   :  { %v7472_v33 = vsel %vm3066_vm6, %v7408_v18, %v9200_v24  ;;  %v16887_v26 = vpack.i.bf16 %v14665_v58, %v14663_v43  ;;  %v9265_v19 = vunpack.i.h.bf16 %v14680_v54  ;;  %v9309_v31 = vunpack.i.l.bf16 %v14754_v22  ;;  %v5213_v15 = vld [vmem:[#allocation2 + $0x2ba] sm:$0xff] }
 0x7ca   :  { %v9340_v9 = vunpack.i.h.bf16 %v9338_v8  ;;  %v9339_v35 = vunpack.i.l.bf16 %v9338_v8  ;;  %v7535_v29 = vsel %vm3131_vm7, %v7471_v3, %v9319_v28  ;;  %v7536_v5 = vsel %vm3131_vm7, %v7472_v33, %v9320_v39  ;;  %v5214_v39 = vld [vmem:[#allocation2 + $0x2c2] sm:$0xff]  ;;  %v5133_v28 = vld [vmem:[#allocation2 + $0x1f9] sm:$0xff] }
 0x7cb   :  { %9612 = vrot.lane.b32.xlu1 %v16887_v26, %s10144_s9  ;;  %9627 = vrot.lane.b32.xlu0 %v14700_v59, %s10146_s2  ;;  %v9315_v43 = vunpack.i.h.bf16 %v14796_v25  ;;  %v9314_v58 = vunpack.i.l.bf16 %v14796_v25  ;;  %v9333_v54 = vpop.permute.xlu1 %9332  ;;  %v7599_v16 = vsel %vm3196_vm8, %v7535_v29, %v9329_v20  ;;  %v7600_v45 = vsel %vm3196_vm8, %v7536_v5, %v9330_v2  ;;  %v5197_v8 = vld [vmem:[#allocation2 + $0x1fa] sm:$0xff] }
 0x7cc   :  { %v9325_v61 = vunpack.i.h.bf16 %v9323_v63  ;;  %v9324_v14 = vunpack.i.l.bf16 %v9323_v63  ;;  %v9348_v27 = vpop.permute.xlu0 %9347  ;;  %v9335_v23 = vunpack.i.h.bf16 %v9333_v54  ;;  %v9334_v21 = vunpack.i.l.bf16 %v9333_v54  ;;  %v5134_v63 = vld [vmem:[#allocation2 + $0x201] sm:$0xff]  ;;  %v14891_v54 = vld [vmem:[#allocation2 + $0x210] sm:$0xff] }
 0x7cd   :  { %v9350_v11 = vunpack.i.h.bf16 %v9348_v27  ;;  %v9349_v1 = vunpack.i.l.bf16 %v9348_v27  ;;  %v7487_v25 = vsel %vm3066_vm6, %v7423_v17, %v9265_v19  ;;  %v7488_v6 = vsel %vm3066_vm6, %v7424_v48, %v9309_v31  ;;  %v5198_v48 = vld [vmem:[#allocation2 + $0x202] sm:$0xff]  ;;  %v14875_v17 = vld [vmem:[#allocation2 + $0x2d0] sm:$0xff]  ;;  %v14882_v31 = vld [vmem:[#allocation2 + $0x2d8] sm:$0xff] }
 0x7ce   :  { %v7663_v13 = vsel %vm3261_vm9, %v7599_v16, %v9339_v35  ;;  %v7664_v32 = vsel %vm3261_vm9, %v7600_v45, %v9340_v9  ;;  %v7552_v4 = vsel %vm3131_vm7, %v7488_v6, %v9315_v43  ;;  %v7551_v24 = vsel %vm3131_vm7, %v7487_v25, %v9314_v58  ;;  %v5151_v9 = vld [vmem:[#allocation2 + $0x2d1] sm:$0xff]  ;;  %v5152_v35 = vld [vmem:[#allocation2 + $0x2d9] sm:$0xff] }
 0x7cf   :  { %9622 = vrot.lane.b32.xlu1 %v14770_v50, %s10145_s10  ;;  %9637 = vrot.lane.b32.xlu0 %v14690_v37, %s10142_s28  ;;  %v7727_v55 = vsel %vm3326_vm10, %v7663_v13, %v9349_v1  ;;  %v7728_v34 = vsel %vm3326_vm10, %v7664_v32, %v9350_v11  ;;  %v9343_v38 = vpop.permute.xlu1 %9342  ;;  %v7615_v30 = vsel %vm3196_vm8, %v7551_v24, %v9324_v14  ;;  %v8765_v3 = vunpack.i.h.bf16 %v14237_v0  ;;  %v14893_v16 = vld [vmem:[#allocation2 + $0x218] sm:$0xff] }
 0x7d0   :  { %v7616_v37 = vsel %vm3196_vm8, %v7552_v4, %v9325_v61  ;;  %v9345_v10 = vunpack.i.h.bf16 %v9343_v38  ;;  %v9344_v47 = vunpack.i.l.bf16 %v9343_v38  ;;  %v14866_v57 = vpop.permute.xlu0 %9357  ;;  %v7679_v18 = vsel %vm3261_vm9, %v7615_v30, %v9334_v21 }
 0x7d1   :  { %v7680_v12 = vsel %vm3261_vm9, %v7616_v37, %v9335_v23  ;;  %v9656_v2 = vpack.i.bf16 %v5086_v42, %v14848_v49  ;;  %v14873_v20 = vpack.i.bf16 %v5150_v44, %v5149_v53  ;;  %v8614_v19 = vpack.c.bf16 %v7728_v34, %v7727_v55  ;;  %v10062_v49 = vld [vmem:[#allocation2 + $0x110] sm:$0xff]  ;;  %v10063_v44 = vld [vmem:[#allocation2 + $0x108] sm:$0xff] }
 0x7d2   :  { %v7743_v33 = vsel %vm3326_vm10, %v7679_v18, %v9344_v47  ;;  %v7744_v26 = vsel %vm3326_vm10, %v7680_v12, %v9345_v10  ;;  %v8925_v40 = vunpack.i.h.bf16 %v14356_v51  ;;  %v9661_v43 = vpack.i.bf16 %v14862_v7, %v14860_v60  ;;  %v10065_v47 = vld [vmem:[#allocation2 + $0x50] sm:$0xff] }
 0x7d3   :  { %9632 = vrot.lane.b32.xlu1 %v14798_v56, %s10146_s2  ;;  %9647 = vrot.lane.b32.xlu0 %v14700_v59, %s10143_s30  ;;  %v14885_v29 = vpop.permute.xlu1 %9352  ;;  %v8611_v5 = vpack.c.bf16 %v7744_v26, %v7743_v33  ;;  %v14889_v58 = vpack.i.bf16 %v5214_v39, %v5213_v15  ;;  %v8764_v59 = vunpack.i.l.bf16 %v14237_v0  ;;  %v9085_v45 = vunpack.i.h.bf16 %v14458_v52 }
 0x7d4   :  { %v9368_v61 = vpop.permute.xlu0 %9367  ;;  %v14897_v14 = vpack.i.bf16 %v5134_v63, %v5133_v28  ;;  %v14899_v27 = vpack.i.bf16 %v5198_v48, %v5197_v8  ;;  %v8924_v23 = vunpack.i.l.bf16 %v14356_v51  ;;  %v9354_v21 = vunpack.i.l.bf16 %v14885_v29 }
 0x7d5   :  { %8613 = vmatprep.subr.msk.bf16.mxu1 %vm14675_vm12, %v8611_v5  ;;  %v9706_v0 = vpack.i.bf16 %v14882_v31, %v14875_v17  ;;  %v14909_v11 = vpack.i.bf16 %v5152_v35, %v5151_v9  ;;  %v8724_v1 = vunpack.i.l.bf16 %v14210_v46  ;;  %v7298_v25 = vsel %vm30_vm0, %v10062_v49, %v8765_v3 }
 0x7d6   :  { %v9084_v51 = vunpack.i.l.bf16 %v14458_v52  ;;  %8616 = vmatpush3.bf16.xpose.msk.msra.mxu1 %vm14675_vm12, %v8614_v19  ;;  %v8725_v6 = vunpack.i.h.bf16 %v14210_v46  ;;  %v8884_v13 = vunpack.i.l.bf16 %v14321_v36  ;;  %v7362_v32 = vsel %vm2936_vm4, %v7298_v25, %v8925_v40  ;;  %v16888_v19 = vld [vmem:[#allocation66_spill] sm:$0xff] }
 0x7d7   :  { %9642 = vrot.lane.b32.xlu1 %v14770_v50, %s10142_s28  ;;  %9657 = vrot.lane.b32.xlu0 %v9656_v2, %s10144_s9  ;;  %v9711_v50 = vpack.i.bf16 %v14893_v16, %v14891_v54  ;;  %v9310_v42 = vunpack.i.h.bf16 %v14754_v22  ;;  %v14923_v53 = vpop.permute.xlu1 %9362  ;;  %v7297_v52 = vsel %vm30_vm0, %v10063_v44, %v8764_v59  ;;  %v7426_v4 = vsel %vm3001_vm5, %v7362_v32, %v9085_v45  ;;  %v10064_v22 = vld [vmem:[#allocation2 + $0x48] sm:$0xff] }
 0x7d8   :  { %v9360_v24 = vunpack.i.h.bf16 %v14866_v57  ;;  %v9359_v55 = vunpack.i.l.bf16 %v14866_v57  ;;  %v9378_v34 = vpop.permute.xlu0 %9377  ;;  %v7361_v46 = vsel %vm2936_vm4, %v7297_v52, %v8924_v23  ;;  %v7490_v38 = vsel %vm3066_vm6, %v7426_v4, %v9354_v21  ;;  %v5215_v23 = vld [vmem:[#allocation2 + $0x2d2] sm:$0xff]  ;;  %v5216_v21 = vld [vmem:[#allocation2 + $0x2da] sm:$0xff] }
 0x7d9   :  { %v9370_v60 = vunpack.i.h.bf16 %v9368_v61  ;;  %v9369_v7 = vunpack.i.l.bf16 %v9368_v61  ;;  %v7281_v15 = vsel %vm30_vm0, %v10064_v22, %v8724_v1  ;;  %v7425_v30 = vsel %vm3001_vm5, %v7361_v46, %v9084_v51 }
 0x7da   :  { %v9380_v37 = vunpack.i.h.bf16 %v9378_v34  ;;  %v9379_v10 = vunpack.i.l.bf16 %v9378_v34  ;;  %v7282_v57 = vsel %vm30_vm0, %v10065_v47, %v8725_v6  ;;  %v8885_v39 = vunpack.i.h.bf16 %v14321_v36  ;;  %v16890_v47 = vld [vmem:[#allocation173_spill] sm:$0xff] }
 0x7db   :  { %9652 = vrot.lane.b32.xlu1 %v14798_v56, %s10143_s30  ;;  %9667 = vrot.lane.b32.xlu0 %v14873_v20, %s10145_s10  ;;  %v7345_v28 = vsel %vm2936_vm4, %v7281_v15, %v8884_v13  ;;  %v7489_v63 = vsel %vm3066_vm6, %v7425_v30, %v9310_v42  ;;  %v9373_v56 = vpop.permute.xlu1 %9372  ;;  %v9045_v18 = vunpack.i.h.bf16 %v14434_v62  ;;  %v9044_v12 = vunpack.i.l.bf16 %v14434_v62 }
 0x7dc   :  { %v7553_v2 = vsel %vm3131_vm7, %v7489_v63, %v9359_v55  ;;  %v7554_v8 = vsel %vm3131_vm7, %v7490_v38, %v9360_v24  ;;  %v9388_v48 = vpop.permute.xlu0 %9387  ;;  %v9205_v9 = vunpack.i.h.bf16 %v16888_v19  ;;  %v9204_v35 = vunpack.i.l.bf16 %v16888_v19  ;;  %v16889_v24 = vld [vmem:[#allocation114_spill] sm:$0xff] }
 0x7dd   :  { %v7617_v3 = vsel %vm3196_vm8, %v7553_v2, %v9369_v7  ;;  %v7618_v33 = vsel %vm3196_vm8, %v7554_v8, %v9370_v60  ;;  %v9390_v36 = vunpack.i.h.bf16 %v9388_v48  ;;  %v9389_v26 = vunpack.i.l.bf16 %v9388_v48  ;;  %v16892_v48 = vld [vmem:[#allocation354_spill] sm:$0xff] }
 0x7de   :  { %v7681_v40 = vsel %vm3261_vm9, %v7617_v3, %v9379_v10  ;;  %v7682_v62 = vsel %vm3261_vm9, %v7618_v33, %v9380_v37  ;;  %v9365_v5 = vunpack.i.h.bf16 %v14923_v53  ;;  %v9364_v59 = vunpack.i.l.bf16 %v14923_v53  ;;  %v5135_v37 = vld [vmem:[#allocation2 + $0x211] sm:$0xff]  ;;  %v5136_v10 = vld [vmem:[#allocation2 + $0x219] sm:$0xff] }
 0x7df   :  { %9662 = vrot.lane.b32.xlu1 %v9661_v43, %s10144_s9  ;;  %9677 = vrot.lane.b32.xlu0 %v14889_v58, %s10146_s2  ;;  %v7745_v45 = vsel %vm3326_vm10, %v7681_v40, %v9389_v26  ;;  %v7746_v43 = vsel %vm3326_vm10, %v7682_v62, %v9390_v36  ;;  %v9383_v61 = vpop.permute.xlu1 %9382  ;;  %v7346_v1 = vsel %vm2936_vm4, %v7282_v57, %v8885_v39  ;;  %v9375_v49 = vunpack.i.h.bf16 %v9373_v56  ;;  %v10067_v40 = vld [vmem:[#allocation2 + $0x60] sm:$0xff] }
 0x7e0   :  { %v9374_v25 = vunpack.i.l.bf16 %v9373_v56  ;;  %v14959_v51 = vpop.permute.xlu0 %9397  ;;  %v8617_v6 = vpack.c.bf16 %v7746_v43, %v7745_v45  ;;  %v7409_v13 = vsel %vm3001_vm5, %v7345_v28, %v9044_v12  ;;  %v7410_v32 = vsel %vm3001_vm5, %v7346_v1, %v9045_v18  ;;  %v16891_v56 = vld [vmem:[#allocation293_spill] sm:$0xff]  ;;  %v16894_v43 = vld [vmem:[#allocation122_spill] sm:$0xff] }
 0x7e1   :  { %v9385_v42 = vunpack.i.h.bf16 %v9383_v61  ;;  %v9384_v53 = vunpack.i.l.bf16 %v9383_v61  ;;  %v7473_v44 = vsel %vm3066_vm6, %v7409_v13, %v9204_v35  ;;  %v7474_v52 = vsel %vm3066_vm6, %v7410_v32, %v9205_v9  ;;  %v10066_v9 = vld [vmem:[#allocation2 + $0x68] sm:$0xff]  ;;  %v10069_v13 = vld [vmem:[#allocation2 + $0x120] sm:$0xff] }
 0x7e2   :  { %8619 = vmatprep.subr.msk.bf16.mxu1 %vm14675_vm12, %v8617_v6  ;;  %v14971_v4 = vpack.i.bf16 %v5216_v21, %v5215_v23  ;;  %v8730_v55 = vunpack.i.h.bf16 %v16889_v24  ;;  %v8729_v34 = vunpack.i.l.bf16 %v16889_v24  ;;  %v7537_v46 = vsel %vm3131_vm7, %v7473_v44, %v9364_v59  ;;  %v16895_v21 = vld [vmem:[#allocation242_spill] sm:$0xff] }
 0x7e3   :  { %9672 = vrot.lane.b32.xlu1 %v14897_v14, %s10145_s10  ;;  %9687 = vrot.lane.b32.xlu0 %v14873_v20, %s10142_s28  ;;  %v7538_v38 = vsel %vm3131_vm7, %v7474_v52, %v9365_v5  ;;  %v9393_v60 = vpop.permute.xlu1 %9392  ;;  %v7601_v7 = vsel %vm3196_vm8, %v7537_v46, %v9374_v25  ;;  %v8770_v57 = vunpack.i.h.bf16 %v16890_v47  ;;  %v8769_v39 = vunpack.i.l.bf16 %v16890_v47  ;;  %v16893_v5 = vld [vmem:[#allocation65_spill] sm:$0xff] }
 0x7e4   :  { %v7602_v22 = vsel %vm3196_vm8, %v7538_v38, %v9375_v49  ;;  %v9395_v15 = vunpack.i.h.bf16 %v9393_v60  ;;  %v9394_v20 = vunpack.i.l.bf16 %v9393_v60  ;;  %v9408_v30 = vpop.permute.xlu0 %9407  ;;  %v7665_v28 = vsel %vm3261_vm9, %v7601_v7, %v9384_v53  ;;  %v10068_v25 = vld [vmem:[#allocation2 + $0x128] sm:$0xff] }
 0x7e5   :  { %v7666_v63 = vsel %vm3261_vm9, %v7602_v22, %v9385_v42  ;;  %v8890_v18 = vunpack.i.h.bf16 %v16891_v56  ;;  %v8889_v12 = vunpack.i.l.bf16 %v16891_v56  ;;  %v8930_v3 = vunpack.i.h.bf16 %v16892_v48 }
 0x7e6   :  { %v7729_v2 = vsel %vm3326_vm10, %v7665_v28, %v9394_v20  ;;  %v7730_v8 = vsel %vm3326_vm10, %v7666_v63, %v9395_v15  ;;  %v8929_v33 = vunpack.i.l.bf16 %v16892_v48  ;;  %v14995_v19 = vpack.i.bf16 %v5136_v10, %v5135_v37 }
 0x7e7   :  { %9682 = vrot.lane.b32.xlu1 %v14899_v27, %s10146_s2  ;;  %9697 = vrot.lane.b32.xlu0 %v14889_v58, %s10143_s30  ;;  %v14993_v36 = vpop.permute.xlu1 %9402  ;;  %v8620_v26 = vpack.c.bf16 %v7730_v8, %v7729_v2  ;;  %v7284_v35 = vsel %vm30_vm0, %v10066_v9, %v8730_v55  ;;  %v7283_v62 = vsel %vm30_vm0, %v10067_v40, %v8729_v34  ;;  %v9050_v59 = vunpack.i.h.bf16 %v16893_v5 }
 0x7e8   :  { %v9049_v45 = vunpack.i.l.bf16 %v16893_v5  ;;  %v9418_v58 = vpop.permute.xlu0 %9417  ;;  %v9090_v61 = vunpack.i.h.bf16 %v16894_v43  ;;  %v9089_v23 = vunpack.i.l.bf16 %v16894_v43  ;;  %v9210_v1 = vunpack.i.h.bf16 %v16895_v21  ;;  %v5200_v43 = vld [vmem:[#allocation2 + $0x21a] sm:$0xff] }
 0x7e9   :  { %v9209_v49 = vunpack.i.l.bf16 %v16895_v21  ;;  %8622 = vmatpush3.bf16.xpose.msk.msra.mxu1 %vm14675_vm12, %v8620_v26  ;;  %v7300_v6 = vsel %vm30_vm0, %v10068_v25, %v8770_v57  ;;  %v7299_v32 = vsel %vm30_vm0, %v10069_v13, %v8769_v39  ;;  %v7347_v42 = vsel %vm2936_vm4, %v7283_v62, %v8889_v12  ;;  %v5089_v21 = vld [vmem:[#allocation2 + $0x2e8] sm:$0xff] }
 0x7ea   :  { %v7348_v53 = vsel %vm2936_vm4, %v7284_v35, %v8890_v18  ;;  %v7364_v44 = vsel %vm2936_vm4, %v7300_v6, %v8930_v3  ;;  %v9410_v52 = vunpack.i.h.bf16 %v9408_v30  ;;  %v9409_v24 = vunpack.i.l.bf16 %v9408_v30  ;;  %v16896_v25 = vld [vmem:[#allocation229_spill] sm:$0xff] }
 0x7eb   :  { %9692 = vrot.lane.b32.xlu1 %v14897_v14, %s10142_s28  ;;  %9707 = vrot.lane.b32.xlu0 %v9706_v0, %s10144_s9  ;;  %v7363_v14 = vsel %vm2936_vm4, %v7299_v32, %v8929_v33  ;;  %v9413_v55 = vpop.permute.xlu1 %9412  ;;  %v7412_v34 = vsel %vm3001_vm5, %v7348_v53, %v9050_v59  ;;  %v7411_v46 = vsel %vm3001_vm5, %v7347_v42, %v9049_v45  ;;  %v9420_v38 = vunpack.i.h.bf16 %v9418_v58  ;;  %v5154_v53 = vld [vmem:[#allocation2 + $0x2f1] sm:$0xff] }
 0x7ec   :  { %v9419_v60 = vunpack.i.l.bf16 %v9418_v58  ;;  %v9428_v7 = vpop.permute.xlu0 %9427  ;;  %v7428_v22 = vsel %vm3001_vm5, %v7364_v44, %v9090_v61  ;;  %v7427_v15 = vsel %vm3001_vm5, %v7363_v14, %v9089_v23  ;;  %v7475_v17 = vsel %vm3066_vm6, %v7411_v46, %v9209_v49  ;;  %v5199_v58 = vld [vmem:[#allocation2 + $0x212] sm:$0xff]  ;;  %v5153_v49 = vld [vmem:[#allocation2 + $0x2e9] sm:$0xff] }
 0x7ed   :  { %v7476_v31 = vsel %vm3066_vm6, %v7412_v34, %v9210_v1  ;;  %v9355_v0 = vunpack.i.h.bf16 %v14885_v29  ;;  %v9399_v20 = vunpack.i.l.bf16 %v14959_v51  ;;  %v9430_v30 = vunpack.i.h.bf16 %v9428_v7  ;;  %v5090_v1 = vld [vmem:[#allocation2 + $0x2f0] sm:$0xff]  ;;  %v15064_v14 = vld [vmem:[#allocation2 + $0x228] sm:$0xff] }
 0x7ee   :  { %v9429_v37 = vunpack.i.l.bf16 %v9428_v7  ;;  %v7539_v10 = vsel %vm3131_vm7, %v7475_v17, %v9409_v24  ;;  %v7540_v47 = vsel %vm3131_vm7, %v7476_v31, %v9410_v52  ;;  %v9405_v57 = vunpack.i.h.bf16 %v14993_v36  ;;  %v15066_v44 = vld [vmem:[#allocation2 + $0x230] sm:$0xff]  ;;  %v16897_v52 = vld [vmem:[#allocation177_spill] sm:$0xff] }
 0x7ef   :  { %9702 = vrot.lane.b32.xlu1 %v14899_v27, %s10143_s30  ;;  %9717 = vrot.lane.b32.xlu0 %v14909_v11, %s10145_s10  ;;  %v9404_v39 = vunpack.i.l.bf16 %v14993_v36  ;;  %v9423_v28 = vpop.permute.xlu1 %9422  ;;  %v7603_v27 = vsel %vm3196_vm8, %v7539_v10, %v9419_v60  ;;  %v7604_v29 = vsel %vm3196_vm8, %v7540_v47, %v9420_v38  ;;  %v9415_v63 = vunpack.i.h.bf16 %v9413_v55  ;;  %v5217_v38 = vld [vmem:[#allocation2 + $0x2ea] sm:$0xff]  ;;  %v5218_v60 = vld [vmem:[#allocation2 + $0x2f2] sm:$0xff]  ;;  %v10070_v47 = vld [vmem:[#allocation2 + $0x140] sm:$0xff] }
 0x7f0   :  { %v9414_v56 = vunpack.i.l.bf16 %v9413_v55  ;;  %v9438_v18 = vpop.permute.xlu0 %9437  ;;  %v9425_v12 = vunpack.i.h.bf16 %v9423_v28  ;;  %v9424_v2 = vunpack.i.l.bf16 %v9423_v28  ;;  %v7491_v3 = vsel %vm3066_vm6, %v7427_v15, %v9355_v0 }
 0x7f1   :  { %v9440_v8 = vunpack.i.h.bf16 %v9438_v18  ;;  %v9439_v48 = vunpack.i.l.bf16 %v9438_v18  ;;  %v7492_v33 = vsel %vm3066_vm6, %v7428_v22, %v9399_v20  ;;  %v7667_v36 = vsel %vm3261_vm9, %v7603_v27, %v9429_v37  ;;  %v16898_v22 = vld [vmem:[#allocation358_spill] sm:$0xff] }
 0x7f2   :  { %v7668_v26 = vsel %vm3261_vm9, %v7604_v29, %v9430_v30  ;;  %v7556_v9 = vsel %vm3131_vm7, %v7492_v33, %v9405_v57  ;;  %v7555_v35 = vsel %vm3131_vm7, %v7491_v3, %v9404_v39  ;;  %v8775_v6 = vunpack.i.h.bf16 %v16896_v25  ;;  %v16899_v37 = vld [vmem:[#allocation350_spill] sm:$0xff] }
 0x7f3   :  { %9712 = vrot.lane.b32.xlu1 %v9711_v50, %s10144_s9  ;;  %9727 = vrot.lane.b32.xlu0 %v14971_v4, %s10146_s2  ;;  %v7731_v54 = vsel %vm3326_vm10, %v7667_v36, %v9439_v48  ;;  %v7732_v16 = vsel %vm3326_vm10, %v7668_v26, %v9440_v8  ;;  %v9433_v50 = vpop.permute.xlu1 %9432  ;;  %v7619_v40 = vsel %vm3196_vm8, %v7555_v35, %v9414_v56  ;;  %v8935_v24 = vunpack.i.h.bf16 %v16897_v52  ;;  %v16900_v29 = vld [vmem:[#allocation118_spill] sm:$0xff] }
 0x7f4   :  { %v7620_v62 = vsel %vm3196_vm8, %v7556_v9, %v9415_v63  ;;  %v9435_v5 = vunpack.i.h.bf16 %v9433_v50  ;;  %v9434_v59 = vunpack.i.l.bf16 %v9433_v50  ;;  %v15053_v45 = vpop.permute.xlu0 %9447  ;;  %v7683_v61 = vsel %vm3261_vm9, %v7619_v40, %v9424_v2  ;;  %v10071_v2 = vld [vmem:[#allocation2 + $0x138] sm:$0xff] }
 0x7f5   :  { %v7684_v23 = vsel %vm3261_vm9, %v7620_v62, %v9425_v12  ;;  %v8626_v42 = vpack.c.bf16 %v7732_v16, %v7731_v54  ;;  %v9731_v34 = vpack.i.bf16 %v5200_v43, %v5199_v58  ;;  %v8774_v7 = vunpack.i.l.bf16 %v16896_v25  ;;  %v10073_v62 = vld [vmem:[#allocation2 + $0x80] sm:$0xff] }
 0x7f6   :  { %v7747_v13 = vsel %vm3326_vm10, %v7683_v61, %v9434_v59  ;;  %v7748_v32 = vsel %vm3326_vm10, %v7684_v23, %v9435_v5  ;;  %v9095_v15 = vunpack.i.h.bf16 %v16898_v22  ;;  %v8934_v31 = vunpack.i.l.bf16 %v16897_v52 }
 0x7f7   :  { %9722 = vrot.lane.b32.xlu1 %v14995_v19, %s10145_s10  ;;  %9737 = vrot.lane.b32.xlu0 %v14909_v11, %s10142_s28  ;;  %v15069_v55 = vpop.permute.xlu1 %9442  ;;  %v8623_v46 = vpack.c.bf16 %v7748_v32, %v7747_v13  ;;  %v9756_v11 = vpack.i.bf16 %v5090_v1, %v5089_v21  ;;  %v15078_v20 = vpack.i.bf16 %v5154_v53, %v5153_v49  ;;  %v8734_v10 = vunpack.i.l.bf16 %v16899_v37 }
 0x7f8   :  { %v9458_v17 = vpop.permute.xlu0 %9457  ;;  %v9444_v0 = vunpack.i.l.bf16 %v15069_v55  ;;  %v9761_v30 = vpack.i.bf16 %v15066_v44, %v15064_v14  ;;  %v7302_v57 = vsel %vm30_vm0, %v10070_v47, %v8775_v6  ;;  %v9094_v39 = vunpack.i.l.bf16 %v16898_v22 }
 0x7f9   :  { %8625 = vmatprep.subr.msk.bf16.mxu1 %vm14675_vm12, %v8623_v46  ;;  %v15089_v28 = vpack.i.bf16 %v5218_v60, %v5217_v38  ;;  %v8735_v27 = vunpack.i.h.bf16 %v16899_v37  ;;  %v8894_v63 = vunpack.i.l.bf16 %v16900_v29  ;;  %v7366_v56 = vsel %vm2936_vm4, %v7302_v57, %v8935_v24 }
 0x7fa   :  { %8628 = vmatpush3.bf16.xpose.msk.msra.mxu1 %vm14675_vm12, %v8626_v42  ;;  %v9400_v18 = vunpack.i.h.bf16 %v14959_v51  ;;  %v7301_v8 = vsel %vm30_vm0, %v10071_v2, %v8774_v7  ;;  %v7430_v48 = vsel %vm3001_vm5, %v7366_v56, %v9095_v15  ;;  %v9450_v3 = vunpack.i.h.bf16 %v15053_v45  ;;  %v10072_v51 = vld [vmem:[#allocation2 + $0x78] sm:$0xff]  ;;  %v16902_v42 = vld [vmem:[#allocation69_spill] sm:$0xff] }
 0x7fb   :  { %9732 = vrot.lane.b32.xlu1 %v9731_v34, %s10146_s2  ;;  %9747 = vrot.lane.b32.xlu0 %v14971_v4, %s10143_s30  ;;  %v15095_v12 = vpop.permute.xlu1 %9452  ;;  %v9449_v4 = vunpack.i.l.bf16 %v15053_v45  ;;  %v7365_v36 = vsel %vm2936_vm4, %v7301_v8, %v8934_v31  ;;  %v7494_v26 = vsel %vm3066_vm6, %v7430_v48, %v9444_v0  ;;  %v9460_v9 = vunpack.i.h.bf16 %v9458_v17  ;;  %v5137_v31 = vld [vmem:[#allocation2 + $0x229] sm:$0xff]  ;;  %v5138_v0 = vld [vmem:[#allocation2 + $0x231] sm:$0xff] }
 0x7fc   :  { %v9468_v33 = vpop.permute.xlu0 %9467  ;;  %v9459_v35 = vunpack.i.l.bf16 %v9458_v17  ;;  %v7285_v54 = vsel %vm30_vm0, %v10072_v51, %v8734_v10  ;;  %v7429_v16 = vsel %vm3001_vm5, %v7365_v36, %v9094_v39  ;;  %v7286_v5 = vsel %vm30_vm0, %v10073_v62, %v8735_v27  ;;  %v5201_v48 = vld [vmem:[#allocation2 + $0x22a] sm:$0xff]  ;;  %v5091_v36 = vld [vmem:[#allocation2 + $0x300] sm:$0xff] }
 0x7fd   :  { %v9470_v50 = vunpack.i.h.bf16 %v9468_v33  ;;  %v9469_v40 = vunpack.i.l.bf16 %v9468_v33  ;;  %v8895_v59 = vunpack.i.h.bf16 %v16900_v29  ;;  %v7349_v45 = vsel %vm2936_vm4, %v7285_v54, %v8894_v63  ;;  %v15160_v62 = vld [vmem:[#allocation2 + $0x248] sm:$0xff] }
 0x7fe   :  { %v7493_v58 = vsel %vm3066_vm6, %v7429_v16, %v9400_v18  ;;  %v7558_v1 = vsel %vm3131_vm7, %v7494_v26, %v9450_v3  ;;  %v9214_v53 = vunpack.i.l.bf16 %v16902_v42  ;;  %v9445_v52 = vunpack.i.h.bf16 %v15069_v55  ;;  %v5202_v3 = vld [vmem:[#allocation2 + $0x232] sm:$0xff]  ;;  %v5092_v26 = vld [vmem:[#allocation2 + $0x308] sm:$0xff] }
 0x7ff   :  { %9742 = vrot.lane.b32.xlu1 %v14995_v19, %s10142_s28  ;;  %9757 = vrot.lane.b32.xlu0 %v9756_v11, %s10144_s9  ;;  %v9463_v43 = vpop.permute.xlu1 %9462  ;;  %v16901_v19 = vld [vmem:[#allocation297_spill] sm:$0xff]  ;;  %v7557_v21 = vsel %vm3131_vm7, %v7493_v58, %v9449_v4  ;;  %v7622_v6 = vsel %vm3196_vm8, %v7558_v1, %v9460_v9  ;;  %v9455_v38 = vunpack.i.h.bf16 %v15095_v12  ;;  %v9454_v60 = vunpack.i.l.bf16 %v15095_v12  ;;  %v10074_v42 = vld [vmem:[#allocation2 + $0x98] sm:$0xff] }
 0x800   :  { %v9055_v61 = vunpack.i.h.bf16 %v16901_v19  ;;  %v9054_v23 = vunpack.i.l.bf16 %v16901_v19  ;;  %v9478_v49 = vpop.permute.xlu0 %9477  ;;  %v7621_v25 = vsel %vm3196_vm8, %v7557_v21, %v9459_v35  ;;  %v7686_v46 = vsel %vm3261_vm9, %v7622_v6, %v9470_v50  ;;  %v5155_v9 = vld [vmem:[#allocation2 + $0x301] sm:$0xff]  ;;  %v16903_v35 = vld [vmem:[#allocation347_spill] sm:$0xff]  ;;  %v5156_v50 = vld [vmem:[#allocation2 + $0x309] sm:$0xff] }
 0x801   :  { %v9480_v13 = vunpack.i.h.bf16 %v9478_v49  ;;  %v9479_v32 = vunpack.i.l.bf16 %v9478_v49  ;;  %v7685_v24 = vsel %vm3261_vm9, %v7621_v25, %v9469_v40  ;;  %v7350_v15 = vsel %vm2936_vm4, %v7286_v5, %v8895_v59  ;;  %v15158_v40 = vld [vmem:[#allocation2 + $0x240] sm:$0xff]  ;;  %v5220_v19 = vld [vmem:[#allocation2 + $0x30a] sm:$0xff] }
 0x802   :  { %v9465_v17 = vunpack.i.h.bf16 %v9463_v43  ;;  %v9464_v55 = vunpack.i.l.bf16 %v9463_v43  ;;  %v7413_v10 = vsel %vm3001_vm5, %v7349_v45, %v9054_v23  ;;  %v7414_v47 = vsel %vm3001_vm5, %v7350_v15, %v9055_v61  ;;  %v5219_v43 = vld [vmem:[#allocation2 + $0x302] sm:$0xff] }
 0x803   :  { %9752 = vrot.lane.b32.xlu1 %v9731_v34, %s10143_s30  ;;  %9767 = vrot.lane.b32.xlu0 %v15078_v20, %s10145_s10  ;;  %v7749_v7 = vsel %vm3326_vm10, %v7685_v24, %v9479_v32  ;;  %v7750_v34 = vsel %vm3326_vm10, %v7686_v46, %v9480_v13  ;;  %v9473_v22 = vpop.permute.xlu1 %9472  ;;  %v7477_v27 = vsel %vm3066_vm6, %v7413_v10, %v9214_v53  ;;  %v8740_v51 = vunpack.i.h.bf16 %v16903_v35  ;;  %v16904_v61 = vld [vmem:[#allocation9_spill] sm:$0xff] }
 0x804   :  { %v15130_v11 = vpop.permute.xlu0 %9487  ;;  %v8629_v37 = vpack.c.bf16 %v7750_v34, %v7749_v7  ;;  %v9475_v57 = vunpack.i.h.bf16 %v9473_v22  ;;  %v9474_v39 = vunpack.i.l.bf16 %v9473_v22  ;;  %v7478_v29 = vsel %vm3066_vm6, %v7414_v47, %v9445_v52  ;;  %v16906_v52 = vld [vmem:[#allocation355_spill] sm:$0xff] }
 0x805   :  { %v7541_v63 = vsel %vm3131_vm7, %v7477_v27, %v9454_v60  ;;  %v7542_v56 = vsel %vm3131_vm7, %v7478_v29, %v9455_v38  ;;  %v9771_v12 = vpack.i.bf16 %v5138_v0, %v5137_v31  ;;  %v8739_v5 = vunpack.i.l.bf16 %v16903_v35  ;;  %v10075_v60 = vld [vmem:[#allocation2 + $0x90] sm:$0xff]  ;;  %v16907_v34 = vld [vmem:[#allocation115_spill] sm:$0xff] }
 0x806   :  { %8631 = vmatprep.subr.msk.bf16.mxu1 %vm14675_vm12, %v8629_v37  ;;  %v7605_v2 = vsel %vm3196_vm8, %v7541_v63, %v9464_v55  ;;  %v7606_v14 = vsel %vm3196_vm8, %v7542_v56, %v9465_v17  ;;  %v9781_v45 = vpack.i.bf16 %v5202_v3, %v5201_v48  ;;  %v8780_v23 = vunpack.i.h.bf16 %v16904_v61  ;;  %v10076_v31 = vld [vmem:[#allocation2 + $0x158] sm:$0xff]  ;;  %v10077_v37 = vld [vmem:[#allocation2 + $0x150] sm:$0xff] }
 0x807   :  { %9762 = vrot.lane.b32.xlu1 %v9761_v30, %s10144_s9  ;;  %9777 = vrot.lane.b32.xlu0 %v15089_v28, %s10146_s2  ;;  %v9483_v18 = vpop.permute.xlu1 %9482  ;;  %v7669_v4 = vsel %vm3261_vm9, %v7605_v2, %v9474_v39  ;;  %v7670_v33 = vsel %vm3261_vm9, %v7606_v14, %v9475_v57  ;;  %v8779_v21 = vunpack.i.l.bf16 %v16904_v61  ;;  %v9806_v49 = vpack.i.bf16 %v5092_v26, %v5091_v36  ;;  %v16908_v3 = vld [vmem:[#allocation294_spill] sm:$0xff] }
 0x808   :  { %v9485_v44 = vunpack.i.h.bf16 %v9483_v18  ;;  %v9484_v30 = vunpack.i.l.bf16 %v9483_v18  ;;  %v15148_v8 = vpop.permute.xlu0 %9497  ;;  %v15172_v13 = vpack.i.bf16 %v5156_v50, %v5155_v9  ;;  %v9811_v32 = vpack.i.bf16 %v15160_v62, %v15158_v40 }
 0x809   :  { %v7288_v53 = vsel %vm30_vm0, %v10074_v42, %v8740_v51  ;;  %v9100_v24 = vunpack.i.h.bf16 %v16906_v52  ;;  %v9099_v46 = vunpack.i.l.bf16 %v16906_v52  ;;  %v15181_v38 = vpack.i.bf16 %v5220_v19, %v5219_v43 }
 0x80a   :  { %v7733_v54 = vsel %vm3326_vm10, %v7669_v4, %v9484_v30  ;;  %v7734_v16 = vsel %vm3326_vm10, %v7670_v33, %v9485_v44  ;;  %v7287_v7 = vsel %vm30_vm0, %v10075_v60, %v8739_v5  ;;  %v8899_v22 = vunpack.i.l.bf16 %v16907_v34 }
 0x80b   :  { %9772 = vrot.lane.b32.xlu1 %v9771_v12, %s10145_s10  ;;  %9787 = vrot.lane.b32.xlu0 %v15078_v20, %s10142_s28  ;;  %v15163_v59 = vpop.permute.xlu1 %9492  ;;  %v8632_v58 = vpack.c.bf16 %v7734_v16, %v7733_v54  ;;  %v16905_v20 = vld [vmem:[#allocation174_spill] sm:$0xff]  ;;  %v9490_v15 = vunpack.i.h.bf16 %v15130_v11  ;;  %v9489_v17 = vunpack.i.l.bf16 %v15130_v11  ;;  %v7304_v0 = vsel %vm30_vm0, %v10076_v31, %v8780_v23  ;;  %v5203_v31 = vld [vmem:[#allocation2 + $0x242] sm:$0xff] }
 0x80c   :  { %v9508_v1 = vpop.permute.xlu0 %9507  ;;  %v8940_v25 = vunpack.i.h.bf16 %v16905_v20  ;;  %v8939_v6 = vunpack.i.l.bf16 %v16905_v20  ;;  %v7303_v10 = vsel %vm30_vm0, %v10077_v37, %v8779_v21  ;;  %v9499_v47 = vunpack.i.l.bf16 %v15148_v8 }
 0x80d   :  { %8634 = vmatpush3.bf16.xpose.msk.msra.mxu1 %vm14675_vm12, %v8632_v58  ;;  %v9510_v29 = vunpack.i.h.bf16 %v9508_v1  ;;  %v9509_v63 = vunpack.i.l.bf16 %v9508_v1  ;;  %v8900_v14 = vunpack.i.h.bf16 %v16907_v34  ;;  %v7351_v44 = vsel %vm2936_vm4, %v7287_v7, %v8899_v22 }
 0x80e   :  { %v7367_v39 = vsel %vm2936_vm4, %v7303_v10, %v8939_v6  ;;  %v7368_v27 = vsel %vm2936_vm4, %v7304_v0, %v8940_v25  ;;  %v9060_v4 = vunpack.i.h.bf16 %v16908_v3  ;;  %v9495_v16 = vunpack.i.h.bf16 %v15163_v59  ;;  %v5139_v25 = vld [vmem:[#allocation2 + $0x241] sm:$0xff]  ;;  %v5140_v6 = vld [vmem:[#allocation2 + $0x249] sm:$0xff] }
 0x80f   :  { %9782 = vrot.lane.b32.xlu1 %v9781_v45, %s10146_s2  ;;  %9797 = vrot.lane.b32.xlu0 %v15089_v28, %s10143_s30  ;;  %v9503_v55 = vpop.permute.xlu1 %9502  ;;  %v9500_v28 = vunpack.i.h.bf16 %v15148_v8  ;;  %v7432_v11 = vsel %vm3001_vm5, %v7368_v27, %v9100_v24  ;;  %v7431_v56 = vsel %vm3001_vm5, %v7367_v39, %v9099_v46  ;;  %v9494_v50 = vunpack.i.l.bf16 %v15163_v59  ;;  %v5204_v0 = vld [vmem:[#allocation2 + $0x24a] sm:$0xff] }
 0x810   :  { %v9518_v57 = vpop.permute.xlu0 %9517  ;;  %v7495_v30 = vsel %vm3066_vm6, %v7431_v56, %v9489_v17  ;;  %v7496_v8 = vsel %vm3066_vm6, %v7432_v11, %v9490_v15  ;;  %v9505_v43 = vunpack.i.h.bf16 %v9503_v55  ;;  %v9504_v19 = vunpack.i.l.bf16 %v9503_v55  ;;  %v16909_v39 = vld [vmem:[#allocation170_spill] sm:$0xff]  ;;  %v5158_v11 = vld [vmem:[#allocation2 + $0x321] sm:$0xff]  ;;  %v15245_v56 = vld [vmem:[#allocation2 + $0x258] sm:$0xff] }
 0x811   :  { %v9520_v18 = vunpack.i.h.bf16 %v9518_v57  ;;  %v9519_v2 = vunpack.i.l.bf16 %v9518_v57  ;;  %v7559_v33 = vsel %vm3131_vm7, %v7495_v30, %v9499_v47  ;;  %v7560_v36 = vsel %vm3131_vm7, %v7496_v8, %v9500_v28  ;;  %v5093_v28 = vld [vmem:[#allocation2 + $0x318] sm:$0xff]  ;;  %v5094_v47 = vld [vmem:[#allocation2 + $0x320] sm:$0xff] }
 0x812   :  { %v7623_v9 = vsel %vm3196_vm8, %v7559_v33, %v9509_v63  ;;  %v7624_v35 = vsel %vm3196_vm8, %v7560_v36, %v9510_v29  ;;  %v7352_v21 = vsel %vm2936_vm4, %v7288_v53, %v8900_v14  ;;  %v9821_v15 = vpack.i.bf16 %v5140_v6, %v5139_v25  ;;  %v5157_v57 = vld [vmem:[#allocation2 + $0x319] sm:$0xff]  ;;  %v10081_v6 = vld [vmem:[#allocation2 + $0x168] sm:$0xff] }
 0x813   :  { %9792 = vrot.lane.b32.xlu1 %v9771_v12, %s10142_s28  ;;  %9807 = vrot.lane.b32.xlu0 %v9806_v49, %s10144_s9  ;;  %v9513_v48 = vpop.permute.xlu1 %9512  ;;  %v9059_v12 = vunpack.i.l.bf16 %v16908_v3  ;;  %v7687_v5 = vsel %vm3261_vm9, %v7623_v9, %v9519_v2  ;;  %v7688_v58 = vsel %vm3261_vm9, %v7624_v35, %v9520_v18  ;;  %v7416_v42 = vsel %vm3001_vm5, %v7352_v21, %v9060_v4  ;;  %v15247_v18 = vld [vmem:[#allocation2 + $0x260] sm:$0xff] }
 0x814   :  { %v9528_v26 = vpop.permute.xlu0 %9527  ;;  %v9515_v1 = vunpack.i.h.bf16 %v9513_v48  ;;  %v9514_v49 = vunpack.i.l.bf16 %v9513_v48  ;;  %v7480_v53 = vsel %vm3066_vm6, %v7416_v42, %v9495_v16  ;;  %v8745_v27 = vunpack.i.h.bf16 %v16909_v39  ;;  %v5221_v8 = vld [vmem:[#allocation2 + $0x31a] sm:$0xff]  ;;  %v5222_v48 = vld [vmem:[#allocation2 + $0x322] sm:$0xff] }
 0x815   :  { %v9530_v51 = vunpack.i.h.bf16 %v9528_v26  ;;  %v9529_v54 = vunpack.i.l.bf16 %v9528_v26  ;;  %v7415_v52 = vsel %vm3001_vm5, %v7351_v44, %v9059_v12  ;;  %v7544_v34 = vsel %vm3131_vm7, %v7480_v53, %v9505_v43  ;;  %v16910_v3 = vld [vmem:[#allocation56_spill] sm:$0xff] }
 0x816   :  { %v7479_v60 = vsel %vm3066_vm6, %v7415_v52, %v9494_v50  ;;  %v7608_v40 = vsel %vm3196_vm8, %v7544_v34, %v9515_v1  ;;  %v8744_v2 = vunpack.i.l.bf16 %v16909_v39  ;;  %v9831_v30 = vpack.i.bf16 %v5204_v0, %v5203_v31  ;;  %v16912_v50 = vld [vmem:[#allocation181_spill] sm:$0xff]  ;;  %v16914_v0 = vld [vmem:[#allocation119_spill] sm:$0xff] }
 0x817   :  { %9802 = vrot.lane.b32.xlu1 %v9781_v45, %s10143_s30  ;;  %9817 = vrot.lane.b32.xlu0 %v15172_v13, %s10145_s10  ;;  %v7751_v61 = vsel %vm3326_vm10, %v7687_v5, %v9529_v54  ;;  %v7752_v23 = vsel %vm3326_vm10, %v7688_v58, %v9530_v51  ;;  %v9523_v45 = vpop.permute.xlu1 %9522  ;;  %v7543_v7 = vsel %vm3131_vm7, %v7479_v60, %v9504_v19  ;;  %v8785_v4 = vunpack.i.h.bf16 %v16910_v3  ;;  %v10078_v54 = vld [vmem:[#allocation2 + $0xb0] sm:$0xff]  ;;  %v10079_v19 = vld [vmem:[#allocation2 + $0xa8] sm:$0xff] }
 0x818   :  { %v8635_v20 = vpack.c.bf16 %v7752_v23, %v7751_v61  ;;  %v15217_v59 = vpop.permute.xlu0 %9537  ;;  %v9525_v24 = vunpack.i.h.bf16 %v9523_v45  ;;  %v9524_v46 = vunpack.i.l.bf16 %v9523_v45  ;;  %v7607_v17 = vsel %vm3196_vm8, %v7543_v7, %v9514_v49  ;;  %v16913_v23 = vld [vmem:[#allocation351_spill] sm:$0xff] }
 0x819   :  { %v8784_v12 = vunpack.i.l.bf16 %v16910_v3  ;;  %v9856_v36 = vpack.i.bf16 %v5094_v47, %v5093_v28  ;;  %v15259_v35 = vpack.i.bf16 %v5158_v11, %v5157_v57  ;;  %v9861_v51 = vpack.i.bf16 %v15247_v18, %v15245_v56 }
 0x81a   :  { %8637 = vmatprep.subr.msk.bf16.mxu1 %vm14675_vm12, %v8635_v20  ;;  %v7671_v37 = vsel %vm3261_vm9, %v7607_v17, %v9524_v46  ;;  %v7672_v10 = vsel %vm3261_vm9, %v7608_v40, %v9525_v24  ;;  %v7290_v16 = vsel %vm30_vm0, %v10078_v54, %v8745_v27  ;;  %v9105_v5 = vunpack.i.h.bf16 %v16912_v50  ;;  %v10080_v20 = vld [vmem:[#allocation2 + $0x170] sm:$0xff] }
 0x81b   :  { %9812 = vrot.lane.b32.xlu1 %v9811_v32, %s10144_s9  ;;  %9827 = vrot.lane.b32.xlu0 %v15181_v38, %s10146_s2  ;;  %v9533_v22 = vpop.permute.xlu1 %9532  ;;  %v9104_v58 = vunpack.i.l.bf16 %v16912_v50  ;;  %v15268_v43 = vpack.i.bf16 %v5222_v48, %v5221_v8  ;;  %v7289_v61 = vsel %vm30_vm0, %v10079_v19, %v8744_v2  ;;  %v8904_v45 = vunpack.i.l.bf16 %v16913_v23 }
 0x81c   :  { %v9535_v62 = vunpack.i.h.bf16 %v9533_v22  ;;  %v9534_v32 = vunpack.i.l.bf16 %v9533_v22  ;;  %v15235_v55 = vpop.permute.xlu0 %9547  ;;  %v9540_v21 = vunpack.i.h.bf16 %v15217_v59  ;;  %v9539_v1 = vunpack.i.l.bf16 %v15217_v59 }
 0x81d   :  { %v7306_v25 = vsel %vm30_vm0, %v10080_v20, %v8785_v4  ;;  %v7305_v42 = vsel %vm30_vm0, %v10081_v6, %v8784_v12  ;;  %v9549_v52 = vunpack.i.l.bf16 %v15235_v55  ;;  %v8905_v40 = vunpack.i.h.bf16 %v16913_v23  ;;  %v5205_v20 = vld [vmem:[#allocation2 + $0x25a] sm:$0xff] }
 0x81e   :  { %v7735_v29 = vsel %vm3326_vm10, %v7671_v37, %v9534_v32  ;;  %v7736_v63 = vsel %vm3326_vm10, %v7672_v10, %v9535_v62  ;;  %v7353_v62 = vsel %vm2936_vm4, %v7289_v61, %v8904_v45  ;;  %v9065_v37 = vunpack.i.h.bf16 %v16914_v0 }
 0x81f   :  { %9822 = vrot.lane.b32.xlu1 %v9821_v15, %s10145_s10  ;;  %9837 = vrot.lane.b32.xlu0 %v15172_v13, %s10142_s28  ;;  %v8638_v14 = vpack.c.bf16 %v7736_v63, %v7735_v29  ;;  %v15250_v44 = vpop.permute.xlu1 %9542  ;;  %v16911_v13 = vld [vmem:[#allocation233_spill] sm:$0xff]  ;;  %v7354_v12 = vsel %vm2936_vm4, %v7290_v16, %v8905_v40 }
 0x820   :  { %v9558_v33 = vpop.permute.xlu0 %9557  ;;  %v8945_v26 = vunpack.i.h.bf16 %v16911_v13  ;;  %v8944_v9 = vunpack.i.l.bf16 %v16911_v13  ;;  %v9545_v63 = vunpack.i.h.bf16 %v15250_v44  ;;  %v9544_v11 = vunpack.i.l.bf16 %v15250_v44 }
 0x821   :  { %8640 = vmatpush3.bf16.xpose.msk.msra.mxu1 %vm14675_vm12, %v8638_v14  ;;  %v9560_v60 = vunpack.i.h.bf16 %v9558_v33  ;;  %v9559_v7 = vunpack.i.l.bf16 %v9558_v33  ;;  %v7418_v50 = vsel %vm3001_vm5, %v7354_v12, %v9065_v37  ;;  %v4683_v37 = vld [vmem:[#allocation2 + $0x1b0] sm:$0xff] }
 0x822   :  { %v7369_v46 = vsel %vm2936_vm4, %v7305_v42, %v8944_v9  ;;  %v7370_v53 = vsel %vm2936_vm4, %v7306_v25, %v8945_v26  ;;  %v5141_v26 = vld [vmem:[#allocation2 + $0x259] sm:$0xff]  ;;  %v5142_v9 = vld [vmem:[#allocation2 + $0x261] sm:$0xff]  ;;  %v7482_v19 = vsel %vm3066_vm6, %v7418_v50, %v9545_v63 }
 0x823   :  { %9832 = vrot.lane.b32.xlu1 %v9831_v30, %s10146_s2  ;;  %9847 = vrot.lane.b32.xlu0 %v15181_v38, %s10143_s30  ;;  %v9553_v49 = vpop.permute.xlu1 %9552  ;;  %v9550_v38 = vunpack.i.h.bf16 %v15235_v55  ;;  %v7433_v59 = vsel %vm3001_vm5, %v7369_v46, %v9104_v58  ;;  %v7434_v34 = vsel %vm3001_vm5, %v7370_v53, %v9105_v5  ;;  %v5206_v25 = vld [vmem:[#allocation2 + $0x262] sm:$0xff] }
 0x824   :  { %v9568_v24 = vpop.permute.xlu0 %9567  ;;  %v7497_v32 = vsel %vm3066_vm6, %v7433_v59, %v9539_v1  ;;  %v7498_v55 = vsel %vm3066_vm6, %v7434_v34, %v9540_v21  ;;  %v9555_v8 = vunpack.i.h.bf16 %v9553_v49  ;;  %v9554_v48 = vunpack.i.l.bf16 %v9553_v49  ;;  %v16915_v46 = vld [vmem:[#allocation232_spill] sm:$0xff]  ;;  %v15332_v34 = vld [vmem:[#allocation2 + $0x270] sm:$0xff] }
 0x825   :  { %v9570_v22 = vunpack.i.h.bf16 %v9568_v24  ;;  %v9569_v17 = vunpack.i.l.bf16 %v9568_v24  ;;  %v7561_v10 = vsel %vm3131_vm7, %v7497_v32, %v9549_v52  ;;  %v7562_v28 = vsel %vm3131_vm7, %v7498_v55, %v9550_v38  ;;  %v5095_v38 = vld [vmem:[#allocation2 + $0x330] sm:$0xff]  ;;  %v5096_v52 = vld [vmem:[#allocation2 + $0x338] sm:$0xff] }
 0x826   :  { %v7625_v57 = vsel %vm3196_vm8, %v7561_v10, %v9559_v7  ;;  %v7626_v39 = vsel %vm3196_vm8, %v7562_v28, %v9560_v60  ;;  %v7546_v23 = vsel %vm3131_vm7, %v7482_v19, %v9555_v8  ;;  %v9871_v21 = vpack.i.bf16 %v5142_v9, %v5141_v26  ;;  %v5159_v24 = vld [vmem:[#allocation2 + $0x331] sm:$0xff]  ;;  %v5160_v59 = vld [vmem:[#allocation2 + $0x339] sm:$0xff] }
 0x827   :  { %9842 = vrot.lane.b32.xlu1 %v9821_v15, %s10142_s28  ;;  %9857 = vrot.lane.b32.xlu0 %v9856_v36, %s10144_s9  ;;  %v9563_v31 = vpop.permute.xlu1 %9562  ;;  %v9064_v15 = vunpack.i.l.bf16 %v16914_v0  ;;  %v7689_v2 = vsel %vm3261_vm9, %v7625_v57, %v9569_v17  ;;  %v7690_v14 = vsel %vm3261_vm9, %v7626_v39, %v9570_v22  ;;  %v8790_v53 = vunpack.i.h.bf16 %v16915_v46  ;;  %v15334_v22 = vld [vmem:[#allocation2 + $0x278] sm:$0xff]  ;;  %v16917_v57 = vld [vmem:[#allocation120_spill] sm:$0xff]  ;;  %v10083_v9 = vld [vmem:[#allocation2 + $0x270] sm:$0xff] }
 0x828   :  { %v9578_v47 = vpop.permute.xlu0 %9577  ;;  %v9565_v33 = vunpack.i.h.bf16 %v9563_v31  ;;  %v9564_v36 = vunpack.i.l.bf16 %v9563_v31  ;;  %v4684_v17 = vld [vmem:[#allocation2 + $0x1b8] sm:$0xff]  ;;  %v8789_v40 = vunpack.i.l.bf16 %v16915_v46  ;;  %v9881_v55 = vpack.i.bf16 %v5206_v25, %v5205_v20  ;;  %v16920_v25 = vld [vmem:[#allocation178_spill] sm:$0xff] }
 0x829   :  { %v9580_v27 = vunpack.i.h.bf16 %v9578_v47  ;;  %v9579_v29 = vunpack.i.l.bf16 %v9578_v47  ;;  %v7417_v54 = vsel %vm3001_vm5, %v7353_v62, %v9064_v15  ;;  %v5223_v31 = vld [vmem:[#allocation2 + $0x332] sm:$0xff]  ;;  %v5224_v0 = vld [vmem:[#allocation2 + $0x33a] sm:$0xff]  ;;  %v9906_v47 = vpack.i.bf16 %v5096_v52, %v5095_v38 }
 0x82a   :  { %v7481_v16 = vsel %vm3066_vm6, %v7417_v54, %v9544_v11  ;;  %v7610_v56 = vsel %vm3196_vm8, %v7546_v23, %v9565_v33  ;;  %v16916_v15 = vld [vmem:[#allocation352_spill] sm:$0xff]  ;;  %v8990_v39 = vunpack.i.h.bf16 %v16917_v57  ;;  %v9911_v63 = vpack.i.bf16 %v15334_v22, %v15332_v34 }
 0x82b   :  { %9852 = vrot.lane.b32.xlu1 %v9831_v30, %s10143_s30  ;;  %9867 = vrot.lane.b32.xlu0 %v15259_v35, %s10145_s10  ;;  %v7753_v3 = vsel %vm3326_vm10, %v7689_v2, %v9579_v29  ;;  %v7754_v4 = vsel %vm3326_vm10, %v7690_v14, %v9580_v27  ;;  %v9573_v30 = vpop.permute.xlu1 %9572  ;;  %v7545_v61 = vsel %vm3131_vm7, %v7481_v16, %v9554_v48  ;;  %v8830_v10 = vunpack.i.h.bf16 %v16916_v15  ;;  %v16918_v2 = vld [vmem:[#allocation299_spill] sm:$0xff] }
 0x82c   :  { %v8641_v13 = vpack.c.bf16 %v7754_v4, %v7753_v3  ;;  %v15304_v44 = vpop.permute.xlu0 %9587  ;;  %v9575_v5 = vunpack.i.h.bf16 %v9573_v30  ;;  %v9574_v58 = vunpack.i.l.bf16 %v9573_v30  ;;  %v7609_v1 = vsel %vm3196_vm8, %v7545_v61, %v9564_v36  ;;  %v16919_v4 = vld [vmem:[#allocation11_spill] sm:$0xff] }
 0x82d   :  { %v8829_v28 = vunpack.i.l.bf16 %v16916_v15  ;;  %v8989_v27 = vunpack.i.l.bf16 %v16917_v57  ;;  %v15346_v29 = vpack.i.bf16 %v5160_v59, %v5159_v24  ;;  %v7308_v11 = vsel %vm30_vm0, %v4684_v17, %v8790_v53  ;;  %v10084_v24 = vld [vmem:[%s15869_s5] sm:$0xf]  ;;  %v5143_v57 = vld [vmem:[#allocation2 + $0x271] sm:$0xff] }
 0x82e   :  { %8643 = vmatprep.subr.msk.bf16.mxu1 %vm14675_vm12, %v8641_v13  ;;  %v7673_v6 = vsel %vm3261_vm9, %v7609_v1, %v9574_v58  ;;  %v7674_v42 = vsel %vm3261_vm9, %v7610_v56, %v9575_v5  ;;  %v9150_v14 = vunpack.i.h.bf16 %v16918_v2  ;;  %v9149_v8 = vunpack.i.l.bf16 %v16918_v2  ;;  %v10082_v13 = vld [vmem:[#allocation2 + $0x278] sm:$0xff] }
 0x82f   :  { %9862 = vrot.lane.b32.xlu1 %v9861_v51, %s10144_s9  ;;  %9877 = vrot.lane.b32.xlu0 %v15268_v43, %s10146_s2  ;;  %v9583_v45 = vpop.permute.xlu1 %9582  ;;  %v15355_v48 = vpack.i.bf16 %v5224_v0, %v5223_v31  ;;  %v7307_v3 = vsel %vm30_vm0, %v4683_v37, %v8789_v40  ;;  %v8949_v30 = vunpack.i.l.bf16 %v16919_v4  ;;  %v9590_v12 = vunpack.i.h.bf16 %v15304_v44 }
 0x830   :  { %v9585_v18 = vunpack.i.h.bf16 %v9583_v45  ;;  %v9584_v51 = vunpack.i.l.bf16 %v9583_v45  ;;  %v9589_v33 = vunpack.i.l.bf16 %v15304_v44  ;;  %v7324_v26 = vsel %vm30_vm0, %v10082_v13, %v8830_v10 }
 0x831   :  { %v15322_v49 = vpop.permute.xlu0 %9597  ;;  %v7323_v54 = vsel %vm30_vm0, %v10083_v9, %v8829_v28  ;;  %v7388_v16 = vsel %vm2936_vm4, %v7324_v26, %v8990_v39  ;;  %v8950_v56 = vunpack.i.h.bf16 %v16919_v4  ;;  %v5144_v39 = vld [vmem:[#allocation2 + $0x279] sm:$0xff] }
 0x832   :  { %v7737_v60 = vsel %vm3326_vm10, %v7673_v6, %v9584_v51  ;;  %v7738_v7 = vsel %vm3326_vm10, %v7674_v42, %v9585_v18  ;;  %v9599_v50 = vunpack.i.l.bf16 %v15322_v49  ;;  %v7387_v58 = vsel %vm2936_vm4, %v7323_v54, %v8989_v27  ;;  %v5207_v26 = vld [vmem:[#allocation2 + $0x272] sm:$0xff]  ;;  %v5208_v9 = vld [vmem:[#allocation2 + $0x27a] sm:$0xff] }
 0x833   :  { %9872 = vrot.lane.b32.xlu1 %v9871_v21, %s10145_s10  ;;  %9887 = vrot.lane.b32.xlu0 %v15259_v35, %s10142_s28  ;;  %v8644_v62 = vpack.c.bf16 %v7738_v7, %v7737_v60  ;;  %v15337_v32 = vpop.permute.xlu1 %9592  ;;  %v7452_v44 = vsel %vm3001_vm5, %v7388_v16, %v9150_v14  ;;  %v7451_v23 = vsel %vm3001_vm5, %v7387_v58, %v9149_v8  ;;  %v9110_v6 = vunpack.i.h.bf16 %v16920_v25  ;;  %v16921_v54 = vld [vmem:[#allocation288_spill] sm:$0xff]  ;;  %v16922_v16 = vld [vmem:[#allocation10_spill] sm:$0xff] }
 0x834   :  { %v7371_v18 = vsel %vm2936_vm4, %v7307_v3, %v8949_v30  ;;  %v7515_v51 = vsel %vm3066_vm6, %v7451_v23, %v9589_v33  ;;  %v9595_v59 = vunpack.i.h.bf16 %v15337_v32  ;;  %v9594_v17 = vunpack.i.l.bf16 %v15337_v32  ;;  %v15430_v23 = vld [vmem:[#allocation2 + $0x288] sm:$0xff] }
 0x835   :  { %v9608_v35 = vpop.permute.xlu0 %9607  ;;  %8646 = vmatpush3.bf16.xpose.msk.msra.mxu1 %vm14675_vm12, %v8644_v62  ;;  %v7579_v42 = vsel %vm3131_vm7, %v7515_v51, %v9599_v50  ;;  %v7372_v10 = vsel %vm2936_vm4, %v7308_v11, %v8950_v56  ;;  %v9921_v33 = vpack.i.bf16 %v5144_v39, %v5143_v57  ;;  %v8794_v58 = vunpack.i.l.bf16 %v16921_v54 }
 0x836   :  { %v9610_v19 = vunpack.i.h.bf16 %v9608_v35  ;;  %v9609_v61 = vunpack.i.l.bf16 %v9608_v35  ;;  %v7436_v27 = vsel %vm3001_vm5, %v7372_v10, %v9110_v6  ;;  %v9931_v51 = vpack.i.bf16 %v5208_v9, %v5207_v26 }
 0x837   :  { %9882 = vrot.lane.b32.xlu1 %v9881_v55, %s10146_s2  ;;  %9897 = vrot.lane.b32.xlu0 %v15268_v43, %s10143_s30  ;;  %v9600_v43 = vunpack.i.h.bf16 %v15322_v49  ;;  %v7516_v49 = vsel %vm3066_vm6, %v7452_v44, %v9590_v12  ;;  %v7500_v11 = vsel %vm3066_vm6, %v7436_v27, %v9595_v59 }
 0x838   :  { %v7643_v46 = vsel %vm3196_vm8, %v7579_v42, %v9609_v61  ;;  %v10085_v42 = vld [vmem:[#allocation2 + $0x1d0] sm:$0xff] }
 0x839   :  { %v15361_v36 = vpop.permute.xlu1 %9602  ;;  %v9618_v5 = vpop.permute.xlu0 %9617  ;;  %v7580_v38 = vsel %vm3131_vm7, %v7516_v49, %v9600_v43  ;;  %v8795_v43 = vunpack.i.h.bf16 %v16921_v54  ;;  %v5097_v49 = vld [vmem:[#allocation2 + $0x348] sm:$0xff] }
 0x83a   :  { %v9620_v45 = vunpack.i.h.bf16 %v9618_v5  ;;  %v9619_v1 = vunpack.i.l.bf16 %v9618_v5  ;;  %v7644_v53 = vsel %vm3196_vm8, %v7580_v38, %v9610_v19  ;;  %v9605_v31 = vunpack.i.h.bf16 %v15361_v36 }
 0x83b   :  { %9892 = vrot.lane.b32.xlu1 %v9871_v21, %s10142_s28  ;;  %9907 = vrot.lane.b32.xlu0 %v9906_v47, %s10144_s9  ;;  %v9109_v21 = vunpack.i.l.bf16 %v16920_v25  ;;  %v9604_v0 = vunpack.i.l.bf16 %v15361_v36  ;;  %v8835_v19 = vunpack.i.h.bf16 %v16922_v16  ;;  %v16923_v25 = vld [vmem:[#allocation176_spill] sm:$0xff]  ;;  %v15439_v38 = vsel %vm30_vm0, %v10085_v42, %v8795_v43 }
 0x83c   :  { %8450 = vmatmul.mubr.msk.f32.vlgmr.msra.gmra.mrb[0].mxu1 %vm3396_vm11, %v10084_v24  ;;  %v7707_v40 = vsel %vm3261_vm9, %v7643_v46, %v9619_v1  ;;  %v7708_v62 = vsel %vm3261_vm9, %v7644_v53, %v9620_v45  ;;  %v7564_v30 = vsel %vm3131_vm7, %v7500_v11, %v9605_v31  ;;  %v15432_v45 = vld [vmem:[#allocation2 + $0x290] sm:$0xff]  ;;  %v8834_v1 = vunpack.i.l.bf16 %v16922_v16  ;;  %v10086_v53 = vld [vmem:[#allocation2 + $0x1c8] sm:$0xff] }
 0x83d   :  { %v9613_v20 = vpop.permute.xlu1 %9612  ;;  %v9628_v52 = vpop.permute.xlu0 %9627  ;;  %8483 = vmatprep.mubr.msk.f32.mxu1 %vm3396_vm11, %v10084_v24  ;;  %v7435_v2 = vsel %vm3001_vm5, %v7371_v18, %v9109_v21  ;;  %v8994_v6 = vunpack.i.l.bf16 %v16923_v25  ;;  %v9961_v46 = vpack.i.bf16 %v15432_v45, %v15430_v23 }
 0x83e   :  { %v9630_v60 = vunpack.i.h.bf16 %v9628_v52  ;;  %v9629_v7 = vunpack.i.l.bf16 %v9628_v52  ;;  %v9615_v28 = vunpack.i.h.bf16 %v9613_v20  ;;  %v9614_v32 = vunpack.i.l.bf16 %v9613_v20  ;;  %v5098_v20 = vld [vmem:[#allocation2 + $0x350] sm:$0xff]  ;;  %v16924_v52 = vld [vmem:[#allocation357_spill] sm:$0xff] }
 0x83f   :  { %9902 = vrot.lane.b32.xlu1 %v9881_v55, %s10143_s30  ;;  %9917 = vrot.lane.b32.xlu0 %v15346_v29, %s10145_s10  ;;  %v7499_v3 = vsel %vm3066_vm6, %v7435_v2, %v9594_v17  ;;  %v9154_v24 = vunpack.i.l.bf16 %v16924_v52  ;;  %v9155_v17 = vunpack.i.h.bf16 %v16924_v52 }
 0x840   :  { %v7771_v55 = vsel %vm3326_vm10, %v7707_v40, %v9629_v7  ;;  %v7772_v37 = vsel %vm3326_vm10, %v7708_v62, %v9630_v60  ;;  %v7563_v4 = vsel %vm3131_vm7, %v7499_v3, %v9604_v0  ;;  %v7628_v34 = vsel %vm3196_vm8, %v7564_v30, %v9615_v28  ;;  %v10087_v7 = vld [vmem:[#allocation2 + $0x290] sm:$0xff]  ;;  %v10088_v62 = vld [vmem:[#allocation2 + $0x288] sm:$0xff]  ;;  %v16925_v0 = vld [vmem:[#allocation60_spill] sm:$0xff] }
 0x841   :  { %v9623_v15 = vpop.permute.xlu1 %9622  ;;  %v8647_v35 = vpack.c.bf16 %v7772_v37, %v7771_v55  ;;  %v15400_v47 = vpop.permute.xlu0 %9637  ;;  %v7627_v36 = vsel %vm3196_vm8, %v7563_v4, %v9614_v32  ;;  %v7309_v60 = vsel %vm30_vm0, %v10086_v53, %v8794_v58  ;;  %v7326_v59 = vsel %vm30_vm0, %v10087_v7, %v8835_v19  ;;  %v5161_v28 = vld [vmem:[#allocation2 + $0x349] sm:$0xff]  ;;  %v5162_v32 = vld [vmem:[#allocation2 + $0x351] sm:$0xff] }
 0x842   :  { %v9625_v14 = vunpack.i.h.bf16 %v9623_v15  ;;  %v9624_v8 = vunpack.i.l.bf16 %v9623_v15  ;;  %v9956_v40 = vpack.i.bf16 %v5098_v20, %v5097_v49  ;;  %v7325_v31 = vsel %vm30_vm0, %v10088_v62, %v8834_v1  ;;  %v5226_v3 = vld [vmem:[#allocation2 + $0x352] sm:$0xff]  ;;  %v5145_v53 = vld [vmem:[#allocation2 + $0x289] sm:$0xff] }
 0x843   :  { %9912 = vrot.lane.b32.xlu1 %v9911_v63, %s10144_s9  ;;  %9927 = vrot.lane.b32.xlu0 %v15355_v48, %s10146_s2  ;;  %v8954_v55 = vunpack.i.l.bf16 %v16925_v0  ;;  %v9640_v37 = vunpack.i.h.bf16 %v15400_v47  ;;  %v9639_v15 = vunpack.i.l.bf16 %v15400_v47  ;;  %v7389_v57 = vsel %vm2936_vm4, %v7325_v31, %v8994_v6  ;;  %v5225_v47 = vld [vmem:[#allocation2 + $0x34a] sm:$0xff] }
 0x844   :  { %8649 = vmatprep.subr.msk.bf16.mxu1 %vm14675_vm12, %v8647_v35  ;;  %v7691_v50 = vsel %vm3261_vm9, %v7627_v36, %v9624_v8  ;;  %v7692_v5 = vsel %vm3261_vm9, %v7628_v34, %v9625_v14  ;;  %v8955_v35 = vunpack.i.h.bf16 %v16925_v0  ;;  %v7453_v14 = vsel %vm3001_vm5, %v7389_v57, %v9154_v24 }
 0x845   :  { %v9633_v12 = vpop.permute.xlu1 %9632  ;;  %v15418_v13 = vpop.permute.xlu0 %9647  ;;  %v9966_v36 = vpack.i.bf16 %v5162_v32, %v5161_v28  ;;  %v7373_v34 = vsel %vm2936_vm4, %v7309_v60, %v8954_v55  ;;  %v5146_v60 = vld [vmem:[#allocation2 + $0x291] sm:$0xff] }
 0x846   :  { %v9635_v22 = vunpack.i.h.bf16 %v9633_v12  ;;  %v9634_v63 = vunpack.i.l.bf16 %v9633_v12  ;;  %v9649_v39 = vunpack.i.l.bf16 %v15418_v13  ;;  %v7374_v42 = vsel %vm2936_vm4, %v15439_v38, %v8955_v35  ;;  %v5209_v28 = vld [vmem:[#allocation2 + $0x28a] sm:$0xff]  ;;  %v5210_v32 = vld [vmem:[#allocation2 + $0x292] sm:$0xff] }
 0x847   :  { %9922 = vrot.lane.b32.xlu1 %v9921_v33, %s10145_s10  ;;  %9937 = vrot.lane.b32.xlu0 %v15346_v29, %s10142_s28  ;;  %v8995_v29 = vunpack.i.h.bf16 %v16923_v25 }
 0x848   :  { %v7755_v61 = vsel %vm3326_vm10, %v7691_v50, %v9634_v63  ;;  %v7756_v44 = vsel %vm3326_vm10, %v7692_v5, %v9635_v22  ;;  %v16926_v22 = vld [vmem:[#allocation237_spill] sm:$0xff]  ;;  %v9976_v5 = vpack.i.bf16 %v5226_v3, %v5225_v47  ;;  %v9981_v47 = vpack.i.bf16 %v5210_v32, %v5209_v28  ;;  %v16928_v3 = vld [vmem:[#allocation175_spill] sm:$0xff] }
 0x849   :  { %v8650_v56 = vpack.c.bf16 %v7756_v44, %v7755_v61  ;;  %v15435_v18 = vpop.permute.xlu1 %9642  ;;  %v9658_v21 = vpop.permute.xlu0 %9657  ;;  %v7390_v2 = vsel %vm2936_vm4, %v7326_v59, %v8995_v29  ;;  %v9115_v63 = vunpack.i.h.bf16 %v16926_v22 }
 0x84a   :  { %v9660_v8 = vunpack.i.h.bf16 %v9658_v21  ;;  %v9659_v11 = vunpack.i.l.bf16 %v9658_v21  ;;  %v7454_v4 = vsel %vm3001_vm5, %v7390_v2, %v9155_v17  ;;  %v9645_v44 = vunpack.i.h.bf16 %v15435_v18 }
 0x84b   :  { %9932 = vrot.lane.b32.xlu1 %v9931_v51, %s10146_s2  ;;  %8652 = vmatpush3.bf16.xpose.msk.msra.mxu1 %vm14675_vm12, %v8650_v56  ;;  %v7518_v26 = vsel %vm3066_vm6, %v7454_v4, %v9640_v37  ;;  %v9644_v1 = vunpack.i.l.bf16 %v15435_v18  ;;  %v7438_v59 = vsel %vm3001_vm5, %v7374_v42, %v9115_v63  ;;  %v9971_v37 = vpack.i.bf16 %v5146_v60, %v5145_v53  ;;  %v10089_v63 = vld [vmem:[#allocation2 + $0x1e8] sm:$0xff] }
 0x84c   :  { %9947 = vrot.lane.b32.xlu0 %v15355_v48, %s10143_s30  ;;  %v9650_v48 = vunpack.i.h.bf16 %v15418_v13  ;;  %v7517_v13 = vsel %vm3066_vm6, %v7453_v14, %v9639_v15  ;;  %v7502_v62 = vsel %vm3066_vm6, %v7438_v59, %v9645_v44  ;;  %v8840_v4 = vunpack.i.h.bf16 %v16928_v3 }
 0x84d   :  { %v15457_v10 = vpop.permute.xlu1 %9652  ;;  %v9668_v27 = vpop.permute.xlu0 %9667  ;;  %v7581_v54 = vsel %vm3131_vm7, %v7517_v13, %v9649_v39 }
 0x84e   :  { %v9670_v30 = vunpack.i.h.bf16 %v9668_v27  ;;  %v9669_v12 = vunpack.i.l.bf16 %v9668_v27  ;;  %v7582_v43 = vsel %vm3131_vm7, %v7518_v26, %v9650_v48  ;;  %v7645_v58 = vsel %vm3196_vm8, %v7581_v54, %v9659_v11  ;;  %v16927_v48 = vld [vmem:[#allocation59_spill] sm:$0xff]  ;;  %v16930_v26 = vld [vmem:[#allocation124_spill] sm:$0xff] }
 0x84f   :  { %9942 = vrot.lane.b32.xlu1 %v9921_v33, %s10142_s28  ;;  %v9114_v33 = vunpack.i.l.bf16 %v16926_v22  ;;  %v7646_v16 = vsel %vm3196_vm8, %v7582_v43, %v9660_v8  ;;  %v9655_v20 = vunpack.i.h.bf16 %v15457_v10  ;;  %v9654_v25 = vunpack.i.l.bf16 %v15457_v10  ;;  %v10090_v54 = vld [vmem:[#allocation2 + $0x1e0] sm:$0xff] }
 0x850   :  { %9957 = vrot.lane.b32.xlu0 %v9956_v40, %s10144_s9  ;;  %v7709_v56 = vsel %vm3261_vm9, %v7645_v58, %v9669_v12  ;;  %v7710_v49 = vsel %vm3261_vm9, %v7646_v16, %v9670_v30  ;;  %v8800_v39 = vunpack.i.h.bf16 %v16927_v48  ;;  %v8799_v14 = vunpack.i.l.bf16 %v16927_v48 }
 0x851   :  { %v9663_v9 = vpop.permute.xlu1 %9662  ;;  %v9678_v50 = vpop.permute.xlu0 %9677  ;;  %v7437_v7 = vsel %vm3001_vm5, %v7373_v34, %v9114_v33  ;;  %v7566_v0 = vsel %vm3131_vm7, %v7502_v62, %v9655_v20  ;;  %v8839_v30 = vunpack.i.l.bf16 %v16928_v3  ;;  %v9159_v33 = vunpack.i.l.bf16 %v16930_v26 }
 0x852   :  { %v9680_v19 = vunpack.i.h.bf16 %v9678_v50  ;;  %v9679_v61 = vunpack.i.l.bf16 %v9678_v50  ;;  %v9665_v29 = vunpack.i.h.bf16 %v9663_v9  ;;  %v9664_v18 = vunpack.i.l.bf16 %v9663_v9  ;;  %v16931_v50 = vld [vmem:[#allocation236_spill] sm:$0xff] }
 0x853   :  { %9952 = vrot.lane.b32.xlu1 %v9931_v51, %s10143_s30  ;;  %v7501_v38 = vsel %vm3066_vm6, %v7437_v7, %v9644_v1  ;;  %v7312_v13 = vsel %vm30_vm0, %v10089_v63, %v8800_v39  ;;  %v9160_v9 = vunpack.i.h.bf16 %v16930_v26  ;;  %v7311_v43 = vsel %vm30_vm0, %v10090_v54, %v8799_v14  ;;  %v10092_v1 = vld [vmem:[#allocation2 + $0x2a0] sm:$0xff] }
 0x854   :  { %9967 = vrot.lane.b32.xlu0 %v9966_v36, %s10145_s10  ;;  %v7773_v6 = vsel %vm3326_vm10, %v7709_v56, %v9679_v61  ;;  %v7774_v51 = vsel %vm3326_vm10, %v7710_v49, %v9680_v19  ;;  %v7565_v31 = vsel %vm3131_vm7, %v7501_v38, %v9654_v25  ;;  %v7630_v23 = vsel %vm3196_vm8, %v7566_v0, %v9665_v29  ;;  %v16929_v36 = vld [vmem:[#allocation356_spill] sm:$0xff]  ;;  %v10091_v61 = vld [vmem:[#allocation2 + $0x2a8] sm:$0xff] }
 0x855   :  { %v9673_v21 = vpop.permute.xlu1 %9672  ;;  %v8653_v52 = vpack.c.bf16 %v7774_v51, %v7773_v6  ;;  %v15489_v24 = vpop.permute.xlu0 %9687  ;;  %v7629_v15 = vsel %vm3196_vm8, %v7565_v31, %v9664_v18  ;;  %v9000_v34 = vunpack.i.h.bf16 %v16929_v36  ;;  %v8999_v22 = vunpack.i.l.bf16 %v16929_v36 }
 0x856   :  { %v9675_v17 = vunpack.i.h.bf16 %v9673_v21  ;;  %v9674_v40 = vunpack.i.l.bf16 %v9673_v21  ;;  %v9690_v58 = vunpack.i.h.bf16 %v15489_v24  ;;  %v9689_v16 = vunpack.i.l.bf16 %v15489_v24 }
 0x857   :  { %9962 = vrot.lane.b32.xlu1 %v9961_v46, %s10144_s9  ;;  %8655 = vmatprep.subr.msk.bf16.mxu1 %vm14675_vm12, %v8653_v52  ;;  %v7328_v44 = vsel %vm30_vm0, %v10091_v61, %v8840_v4  ;;  %v7327_v56 = vsel %vm30_vm0, %v10092_v1, %v8839_v30  ;;  %v8960_v53 = vunpack.i.h.bf16 %v16931_v50 }
 0x858   :  { %9977 = vrot.lane.b32.xlu0 %v9976_v5, %s10146_s2  ;;  %v7693_v35 = vsel %vm3261_vm9, %v7629_v15, %v9674_v40  ;;  %v7694_v57 = vsel %vm3261_vm9, %v7630_v23, %v9675_v17  ;;  %v8959_v5 = vunpack.i.l.bf16 %v16931_v50  ;;  %v7391_v6 = vsel %vm2936_vm4, %v7327_v56, %v8999_v22  ;;  %v16932_v40 = vld [vmem:[#allocation13_spill] sm:$0xff] }
 0x859   :  { %v9683_v55 = vpop.permute.xlu1 %9682  ;;  %v9698_v10 = vpop.permute.xlu0 %9697  ;;  %v7392_v51 = vsel %vm2936_vm4, %v7328_v44, %v9000_v34  ;;  %v7455_v18 = vsel %vm3001_vm5, %v7391_v6, %v9159_v33  ;;  %v9120_v38 = vunpack.i.h.bf16 %v16932_v40  ;;  %v9119_v62 = vunpack.i.l.bf16 %v16932_v40 }
 0x85a   :  { %v9685_v45 = vunpack.i.h.bf16 %v9683_v55  ;;  %v9684_v46 = vunpack.i.l.bf16 %v9683_v55  ;;  %v9700_v49 = vunpack.i.h.bf16 %v9698_v10  ;;  %v9699_v20 = vunpack.i.l.bf16 %v9698_v10 }
 0x85b   :  { %9972 = vrot.lane.b32.xlu1 %v9971_v37, %s10145_s10  ;;  %v7456_v29 = vsel %vm3001_vm5, %v7392_v51, %v9160_v9  ;;  %v7375_v60 = vsel %vm2936_vm4, %v7311_v43, %v8959_v5  ;;  %v7519_v7 = vsel %vm3066_vm6, %v7455_v18, %v9689_v16  ;;  %v16935_v51 = vld [vmem:[#allocation12_spill] sm:$0xff] }
 0x85c   :  { %v7757_v27 = vsel %vm3326_vm10, %v7693_v35, %v9684_v46  ;;  %v7758_v2 = vsel %vm3326_vm10, %v7694_v57, %v9685_v45  ;;  %v7520_v59 = vsel %vm3066_vm6, %v7456_v29, %v9690_v58  ;;  %v7583_v31 = vsel %vm3131_vm7, %v7519_v7, %v9699_v20  ;;  %v16933_v58 = vld [vmem:[#allocation113_spill] sm:$0xff]  ;;  %v10093_v29 = vld [vmem:[#allocation2 + $0x200] sm:$0xff] }
 0x85d   :  { %v8656_v8 = vpack.c.bf16 %v7758_v2, %v7757_v27  ;;  %v15513_v11 = vpop.permute.xlu1 %9692  ;;  %v9708_v12 = vpop.permute.xlu0 %9707  ;;  %v7584_v0 = vsel %vm3131_vm7, %v7520_v59, %v9700_v49  ;;  %v7376_v2 = vsel %vm2936_vm4, %v7312_v13, %v8960_v53  ;;  %v8805_v16 = vunpack.i.h.bf16 %v16933_v58  ;;  %v16934_v49 = vld [vmem:[#allocation234_spill] sm:$0xff]  ;;  %v16937_v59 = vld [vmem:[#allocation292_spill] sm:$0xff] }
 0x85e   :  { %v9710_v21 = vunpack.i.h.bf16 %v9708_v12  ;;  %v9709_v42 = vunpack.i.l.bf16 %v9708_v12  ;;  %v9695_v46 = vunpack.i.h.bf16 %v15513_v11  ;;  %v9694_v10 = vunpack.i.l.bf16 %v15513_v11 }
 0x85f   :  { %9982 = vrot.lane.b32.xlu1 %v9981_v47, %s10146_s2  ;;  %8658 = vmatpush3.bf16.xpose.msk.msra.mxu1 %vm14675_vm12, %v8656_v8  ;;  %v7440_v4 = vsel %vm3001_vm5, %v7376_v2, %v9120_v38  ;;  %v7439_v11 = vsel %vm3001_vm5, %v7375_v60, %v9119_v62  ;;  %v8804_v44 = vunpack.i.l.bf16 %v16933_v58  ;;  %v8845_v20 = vunpack.i.h.bf16 %v16934_v49  ;;  %v10094_v60 = vld [vmem:[#allocation2 + $0x1f8] sm:$0xff] }
 0x860   :  { %v7647_v37 = vsel %vm3196_vm8, %v7583_v31, %v9709_v42  ;;  %v7648_v15 = vsel %vm3196_vm8, %v7584_v0, %v9710_v21  ;;  %v7504_v36 = vsel %vm3066_vm6, %v7440_v4, %v9695_v46  ;;  %v7503_v34 = vsel %vm3066_vm6, %v7439_v11, %v9694_v10  ;;  %v10095_v31 = vld [vmem:[#allocation2 + $0x2c0] sm:$0xff] }
 0x861   :  { %v9703_v19 = vpop.permute.xlu1 %9702  ;;  %v9718_v25 = vpop.permute.xlu0 %9717  ;;  %v9005_v21 = vunpack.i.h.bf16 %v16935_v51  ;;  %v9004_v42 = vunpack.i.l.bf16 %v16935_v51  ;;  %v7314_v18 = vsel %vm30_vm0, %v10093_v29, %v8805_v16  ;;  %v7313_v7 = vsel %vm30_vm0, %v10094_v60, %v8804_v44 }
 0x862   :  { %v9720_v52 = vunpack.i.h.bf16 %v9718_v25  ;;  %v9719_v24 = vunpack.i.l.bf16 %v9718_v25  ;;  %v9705_v35 = vunpack.i.h.bf16 %v9703_v19  ;;  %v9704_v57 = vunpack.i.l.bf16 %v9703_v19 }
 0x863   :  { %v8844_v25 = vunpack.i.l.bf16 %v16934_v49  ;;  %v7330_v0 = vsel %vm30_vm0, %v10095_v31, %v8845_v20 }
 0x864   :  { %v7711_v28 = vsel %vm3261_vm9, %v7647_v37, %v9719_v24  ;;  %v7712_v32 = vsel %vm3261_vm9, %v7648_v15, %v9720_v52  ;;  %v7567_v22 = vsel %vm3131_vm7, %v7503_v34, %v9704_v57  ;;  %v7568_v63 = vsel %vm3131_vm7, %v7504_v36, %v9705_v35  ;;  %v16936_v52 = vld [vmem:[#allocation180_spill] sm:$0xff] }
 0x865   :  { %v9713_v17 = vpop.permute.xlu1 %9712  ;;  %v9728_v55 = vpop.permute.xlu0 %9727  ;;  %v9165_v24 = vunpack.i.h.bf16 %v16936_v52  ;;  %v9164_v53 = vunpack.i.l.bf16 %v16936_v52  ;;  %v7394_v10 = vsel %vm2936_vm4, %v7330_v0, %v9005_v21 }
 0x866   :  { %v9730_v23 = vunpack.i.h.bf16 %v9728_v55  ;;  %v9729_v45 = vunpack.i.l.bf16 %v9728_v55  ;;  %v9715_v14 = vunpack.i.h.bf16 %v9713_v17  ;;  %v9714_v8 = vunpack.i.l.bf16 %v9713_v17  ;;  %v10096_v55 = vld [vmem:[#allocation2 + $0x2b8] sm:$0xff] }
 0x867   :  { %v8964_v17 = vunpack.i.l.bf16 %v16937_v59  ;;  %v7329_v37 = vsel %vm30_vm0, %v10096_v55, %v8844_v25  ;;  %v7458_v57 = vsel %vm3001_vm5, %v7394_v10, %v9165_v24  ;;  %v16941_v10 = vld [vmem:[#allocation179_spill] sm:$0xff] }
 0x868   :  { %v7775_v48 = vsel %vm3326_vm10, %v7711_v28, %v9729_v45  ;;  %v7776_v39 = vsel %vm3326_vm10, %v7712_v32, %v9730_v23  ;;  %v7631_v26 = vsel %vm3196_vm8, %v7567_v22, %v9714_v8  ;;  %v7632_v9 = vsel %vm3196_vm8, %v7568_v63, %v9715_v14 }
 0x869   :  { %v9723_v27 = vpop.permute.xlu1 %9722  ;;  %v8659_v47 = vpack.c.bf16 %v7776_v39, %v7775_v48  ;;  %v9738_v3 = vpop.permute.xlu0 %9737  ;;  %v7393_v46 = vsel %vm2936_vm4, %v7329_v37, %v9004_v42  ;;  %v7377_v2 = vsel %vm2936_vm4, %v7313_v7, %v8964_v17 }
 0x86a   :  { %v9725_v30 = vunpack.i.h.bf16 %v9723_v27  ;;  %v9724_v12 = vunpack.i.l.bf16 %v9723_v27  ;;  %v9740_v40 = vunpack.i.h.bf16 %v9738_v3  ;;  %v9739_v38 = vunpack.i.l.bf16 %v9738_v3  ;;  %v16938_v3 = vld [vmem:[#allocation64_spill] sm:$0xff] }
 0x86b   :  { %8661 = vmatprep.subr.msk.bf16.mxu1 %vm14675_vm12, %v8659_v47  ;;  %v7457_v35 = vsel %vm3001_vm5, %v7393_v46, %v9164_v53  ;;  %v8965_v27 = vunpack.i.h.bf16 %v16937_v59  ;;  %v9125_v4 = vunpack.i.h.bf16 %v16938_v3  ;;  %v9124_v11 = vunpack.i.l.bf16 %v16938_v3 }
 0x86c   :  { %v7695_v50 = vsel %vm3261_vm9, %v7631_v26, %v9724_v12  ;;  %v7696_v5 = vsel %vm3261_vm9, %v7632_v9, %v9725_v30  ;;  %v7521_v14 = vsel %vm3066_vm6, %v7457_v35, %v9739_v38  ;;  %v7522_v8 = vsel %vm3066_vm6, %v7458_v57, %v9740_v40  ;;  %v16939_v40 = vld [vmem:[#allocation291_spill] sm:$0xff] }
 0x86d   :  { %v9733_v13 = vpop.permute.xlu1 %9732  ;;  %v9748_v43 = vpop.permute.xlu0 %9747  ;;  %v7441_v20 = vsel %vm3001_vm5, %v7377_v2, %v9124_v11  ;;  %v8810_v38 = vunpack.i.h.bf16 %v16939_v40  ;;  %v8809_v0 = vunpack.i.l.bf16 %v16939_v40  ;;  %v10097_v35 = vld [vmem:[#allocation2 + $0x218] sm:$0xff]  ;;  %v10098_v2 = vld [vmem:[#allocation2 + $0x210] sm:$0xff] }
 0x86e   :  { %v9735_v33 = vunpack.i.h.bf16 %v9733_v13  ;;  %v9734_v54 = vunpack.i.l.bf16 %v9733_v13  ;;  %v9750_v15 = vunpack.i.h.bf16 %v9748_v43  ;;  %v9749_v23 = vunpack.i.l.bf16 %v9748_v43 }
 0x86f   :  { %v7316_v57 = vsel %vm30_vm0, %v10097_v35, %v8810_v38 }
 0x870   :  { %v7759_v19 = vsel %vm3326_vm10, %v7695_v50, %v9734_v54  ;;  %v7760_v61 = vsel %vm3326_vm10, %v7696_v5, %v9735_v33  ;;  %v7585_v30 = vsel %vm3131_vm7, %v7521_v14, %v9749_v23  ;;  %v7586_v12 = vsel %vm3131_vm7, %v7522_v8, %v9750_v15  ;;  %v16940_v15 = vld [vmem:[#allocation231_spill] sm:$0xff] }
 0x871   :  { %v8662_v1 = vpack.c.bf16 %v7760_v61, %v7759_v19  ;;  %v15568_v56 = vpop.permute.xlu1 %9742  ;;  %v9758_v6 = vpop.permute.xlu0 %9757  ;;  %v7378_v19 = vsel %vm2936_vm4, %v7314_v18, %v8965_v27  ;;  %v8850_v23 = vunpack.i.h.bf16 %v16940_v15  ;;  %v7315_v14 = vsel %vm30_vm0, %v10098_v2, %v8809_v0  ;;  %v16943_v8 = vld [vmem:[#allocation63_spill] sm:$0xff] }
 0x872   :  { %v9760_v28 = vunpack.i.h.bf16 %v9758_v6  ;;  %v9759_v32 = vunpack.i.l.bf16 %v9758_v6  ;;  %v9745_v26 = vunpack.i.h.bf16 %v15568_v56  ;;  %v9744_v9 = vunpack.i.l.bf16 %v15568_v56 }
 0x873   :  { %8664 = vmatpush3.bf16.xpose.msk.msra.mxu1 %vm14675_vm12, %v8662_v1  ;;  %v7442_v56 = vsel %vm3001_vm5, %v7378_v19, %v9125_v4 }
 0x874   :  { %v7649_v34 = vsel %vm3196_vm8, %v7585_v30, %v9759_v32  ;;  %v7650_v22 = vsel %vm3196_vm8, %v7586_v12, %v9760_v28  ;;  %v7505_v51 = vsel %vm3066_vm6, %v7441_v20, %v9744_v9  ;;  %v7506_v21 = vsel %vm3066_vm6, %v7442_v56, %v9745_v26  ;;  %v10099_v30 = vld [vmem:[#allocation2 + $0x2d8] sm:$0xff] }
 0x875   :  { %v9753_v62 = vpop.permute.xlu1 %9752  ;;  %v9768_v45 = vpop.permute.xlu0 %9767  ;;  %v9010_v28 = vunpack.i.h.bf16 %v16941_v10  ;;  %v9009_v32 = vunpack.i.l.bf16 %v16941_v10  ;;  %v7332_v12 = vsel %vm30_vm0, %v10099_v30, %v8850_v23 }
 0x876   :  { %v9770_v48 = vunpack.i.h.bf16 %v9768_v45  ;;  %v9769_v39 = vunpack.i.l.bf16 %v9768_v45  ;;  %v9755_v43 = vunpack.i.h.bf16 %v9753_v62  ;;  %v9754_v50 = vunpack.i.l.bf16 %v9753_v62 }
 0x877   :  { %v8849_v45 = vunpack.i.l.bf16 %v16940_v15  ;;  %v7396_v9 = vsel %vm2936_vm4, %v7332_v12, %v9010_v28 }
 0x878   :  { %v7713_v33 = vsel %vm3261_vm9, %v7649_v34, %v9769_v39  ;;  %v7714_v54 = vsel %vm3261_vm9, %v7650_v22, %v9770_v48  ;;  %v7569_v42 = vsel %vm3131_vm7, %v7505_v51, %v9754_v50  ;;  %v7570_v29 = vsel %vm3131_vm7, %v7506_v21, %v9755_v43  ;;  %v16942_v48 = vld [vmem:[#allocation360_spill] sm:$0xff] }
 0x879   :  { %v9763_v47 = vpop.permute.xlu1 %9762  ;;  %v9778_v36 = vpop.permute.xlu0 %9777  ;;  %v9170_v39 = vunpack.i.h.bf16 %v16942_v48  ;;  %v9169_v27 = vunpack.i.l.bf16 %v16942_v48 }
 0x87a   :  { %v9780_v63 = vunpack.i.h.bf16 %v9778_v36  ;;  %v9779_v13 = vunpack.i.l.bf16 %v9778_v36  ;;  %v9765_v61 = vunpack.i.h.bf16 %v9763_v47  ;;  %v9764_v44 = vunpack.i.l.bf16 %v9763_v47  ;;  %v10100_v36 = vld [vmem:[#allocation2 + $0x2d0] sm:$0xff] }
 0x87b   :  { %v8969_v47 = vunpack.i.l.bf16 %v16943_v8  ;;  %v7331_v34 = vsel %vm30_vm0, %v10100_v36, %v8849_v45  ;;  %v7460_v43 = vsel %vm3001_vm5, %v7396_v9, %v9170_v39  ;;  %v16947_v9 = vld [vmem:[#allocation238_spill] sm:$0xff] }
 0x87c   :  { %v7777_v5 = vsel %vm3326_vm10, %v7713_v33, %v9779_v13  ;;  %v7778_v58 = vsel %vm3326_vm10, %v7714_v54, %v9780_v63  ;;  %v7633_v52 = vsel %vm3196_vm8, %v7569_v42, %v9764_v44  ;;  %v7634_v24 = vsel %vm3196_vm8, %v7570_v29, %v9765_v61 }
 0x87d   :  { %v9773_v16 = vpop.permute.xlu1 %9772  ;;  %v8665_v1 = vpack.c.bf16 %v7778_v58, %v7777_v5  ;;  %v9788_v49 = vpop.permute.xlu0 %9787  ;;  %v7395_v26 = vsel %vm2936_vm4, %v7331_v34, %v9009_v32  ;;  %v7379_v19 = vsel %vm2936_vm4, %v7315_v14, %v8969_v47 }
 0x87e   :  { %v9775_v25 = vunpack.i.h.bf16 %v9773_v16  ;;  %v9774_v6 = vunpack.i.l.bf16 %v9773_v16  ;;  %v9790_v3 = vunpack.i.h.bf16 %v9788_v49  ;;  %v9789_v4 = vunpack.i.l.bf16 %v9788_v49  ;;  %v16944_v49 = vld [vmem:[#allocation240_spill] sm:$0xff] }
 0x87f   :  { %8667 = vmatprep.subr.msk.bf16.mxu1 %vm14675_vm12, %v8665_v1  ;;  %v7459_v50 = vsel %vm3001_vm5, %v7395_v26, %v9169_v27  ;;  %v8970_v16 = vunpack.i.h.bf16 %v16943_v8  ;;  %v9130_v20 = vunpack.i.h.bf16 %v16944_v49  ;;  %v9129_v56 = vunpack.i.l.bf16 %v16944_v49 }
 0x880   :  { %v7697_v59 = vsel %vm3261_vm9, %v7633_v52, %v9774_v6  ;;  %v7698_v17 = vsel %vm3261_vm9, %v7634_v24, %v9775_v25  ;;  %v7523_v61 = vsel %vm3066_vm6, %v7459_v50, %v9789_v4  ;;  %v7524_v44 = vsel %vm3066_vm6, %v7460_v43, %v9790_v3  ;;  %v16945_v3 = vld [vmem:[#allocation349_spill] sm:$0xff]  ;;  %v10101_v43 = vld [vmem:[#allocation2 + $0x230] sm:$0xff] }
 0x881   :  { %v9783_v18 = vpop.permute.xlu1 %9782  ;;  %v9798_v7 = vpop.permute.xlu0 %9797  ;;  %v8815_v4 = vunpack.i.h.bf16 %v16945_v3  ;;  %v8814_v12 = vunpack.i.l.bf16 %v16945_v3 }
 0x882   :  { %v9785_v53 = vunpack.i.h.bf16 %v9783_v18  ;;  %v9784_v60 = vunpack.i.l.bf16 %v9783_v18  ;;  %v9800_v22 = vunpack.i.h.bf16 %v9798_v7  ;;  %v9799_v63 = vunpack.i.l.bf16 %v9798_v7 }
 0x883   :  { %v7318_v50 = vsel %vm30_vm0, %v10101_v43, %v8815_v4 }
 0x884   :  { %v7761_v62 = vsel %vm3326_vm10, %v7697_v59, %v9784_v60  ;;  %v7762_v31 = vsel %vm3326_vm10, %v7698_v17, %v9785_v53  ;;  %v7587_v25 = vsel %vm3131_vm7, %v7523_v61, %v9799_v63  ;;  %v7588_v6 = vsel %vm3131_vm7, %v7524_v44, %v9800_v22  ;;  %v16946_v22 = vld [vmem:[#allocation61_spill] sm:$0xff] }
 0x885   :  { %v8668_v55 = vpack.c.bf16 %v7762_v31, %v7761_v62  ;;  %v15620_v37 = vpop.permute.xlu1 %9792  ;;  %v9808_v46 = vpop.permute.xlu0 %9807  ;;  %v7380_v62 = vsel %vm2936_vm4, %v7316_v57, %v8970_v16  ;;  %v8855_v63 = vunpack.i.h.bf16 %v16946_v22  ;;  %v16949_v44 = vld [vmem:[#allocation117_spill] sm:$0xff] }
 0x886   :  { %v9810_v33 = vunpack.i.h.bf16 %v9808_v46  ;;  %v9809_v54 = vunpack.i.l.bf16 %v9808_v46  ;;  %v9795_v52 = vunpack.i.h.bf16 %v15620_v37  ;;  %v9794_v24 = vunpack.i.l.bf16 %v15620_v37 }
 0x887   :  { %8670 = vmatpush3.bf16.xpose.msk.msra.mxu1 %vm14675_vm12, %v8668_v55  ;;  %v7444_v23 = vsel %vm3001_vm5, %v7380_v62, %v9130_v20  ;;  %v7443_v37 = vsel %vm3001_vm5, %v7379_v19, %v9129_v56  ;;  %v10102_v19 = vld [vmem:[#allocation2 + $0x228] sm:$0xff] }
 0x888   :  { %v7651_v21 = vsel %vm3196_vm8, %v7587_v25, %v9809_v54  ;;  %v7652_v42 = vsel %vm3196_vm8, %v7588_v6, %v9810_v33  ;;  %v7508_v10 = vsel %vm3066_vm6, %v7444_v23, %v9795_v52  ;;  %v7507_v28 = vsel %vm3066_vm6, %v7443_v37, %v9794_v24  ;;  %v10103_v25 = vld [vmem:[#allocation2 + $0x2f0] sm:$0xff] }
 0x889   :  { %v9803_v11 = vpop.permute.xlu1 %9802  ;;  %v9818_v13 = vpop.permute.xlu0 %9817  ;;  %v9015_v33 = vunpack.i.h.bf16 %v16947_v9  ;;  %v9014_v54 = vunpack.i.l.bf16 %v16947_v9  ;;  %v7317_v61 = vsel %vm30_vm0, %v10102_v19, %v8814_v12  ;;  %v7334_v6 = vsel %vm30_vm0, %v10103_v25, %v8855_v63 }
 0x88a   :  { %v9820_v5 = vunpack.i.h.bf16 %v9818_v13  ;;  %v9819_v58 = vunpack.i.l.bf16 %v9818_v13  ;;  %v9805_v7 = vunpack.i.h.bf16 %v9803_v11  ;;  %v9804_v59 = vunpack.i.l.bf16 %v9803_v11 }
 0x88b   :  { %v8854_v13 = vunpack.i.l.bf16 %v16946_v22  ;;  %v7398_v24 = vsel %vm2936_vm4, %v7334_v6, %v9015_v33 }
 0x88c   :  { %v7715_v53 = vsel %vm3261_vm9, %v7651_v21, %v9819_v58  ;;  %v7716_v60 = vsel %vm3261_vm9, %v7652_v42, %v9820_v5  ;;  %v7571_v32 = vsel %vm3131_vm7, %v7507_v28, %v9804_v59  ;;  %v7572_v35 = vsel %vm3131_vm7, %v7508_v10, %v9805_v7  ;;  %v16948_v5 = vld [vmem:[#allocation14_spill] sm:$0xff] }
 0x88d   :  { %v9813_v1 = vpop.permute.xlu1 %9812  ;;  %v9828_v51 = vpop.permute.xlu0 %9827  ;;  %v9175_v58 = vunpack.i.h.bf16 %v16948_v5  ;;  %v9174_v16 = vunpack.i.l.bf16 %v16948_v5 }
 0x88e   :  { %v9830_v29 = vunpack.i.h.bf16 %v9828_v51  ;;  %v9829_v18 = vunpack.i.l.bf16 %v9828_v51  ;;  %v9815_v31 = vunpack.i.h.bf16 %v9813_v1  ;;  %v9814_v0 = vunpack.i.l.bf16 %v9813_v1  ;;  %v10104_v51 = vld [vmem:[#allocation2 + $0x2e8] sm:$0xff] }
 0x88f   :  { %v8974_v1 = vunpack.i.l.bf16 %v16949_v44  ;;  %v7333_v21 = vsel %vm30_vm0, %v10104_v51, %v8854_v13  ;;  %v7462_v59 = vsel %vm3001_vm5, %v7398_v24, %v9175_v58  ;;  %v16953_v24 = vld [vmem:[#allocation235_spill] sm:$0xff] }
 0x890   :  { %v7779_v17 = vsel %vm3326_vm10, %v7715_v53, %v9829_v18  ;;  %v7780_v40 = vsel %vm3326_vm10, %v7716_v60, %v9830_v29  ;;  %v7635_v48 = vsel %vm3196_vm8, %v7571_v32, %v9814_v0  ;;  %v7636_v39 = vsel %vm3196_vm8, %v7572_v35, %v9815_v31 }
 0x891   :  { %v9823_v38 = vpop.permute.xlu1 %9822  ;;  %v8671_v55 = vpack.c.bf16 %v7780_v40, %v7779_v17  ;;  %v9838_v15 = vpop.permute.xlu0 %9837  ;;  %v7397_v52 = vsel %vm2936_vm4, %v7333_v21, %v9014_v54  ;;  %v7381_v62 = vsel %vm2936_vm4, %v7317_v61, %v8974_v1 }
 0x892   :  { %v9825_v45 = vunpack.i.h.bf16 %v9823_v38  ;;  %v9824_v46 = vunpack.i.l.bf16 %v9823_v38  ;;  %v9840_v49 = vunpack.i.h.bf16 %v9838_v15  ;;  %v9839_v20 = vunpack.i.l.bf16 %v9838_v15  ;;  %v16950_v15 = vld [vmem:[#allocation296_spill] sm:$0xff] }
 0x893   :  { %8673 = vmatprep.subr.msk.bf16.mxu1 %vm14675_vm12, %v8671_v55  ;;  %v7461_v7 = vsel %vm3001_vm5, %v7397_v52, %v9174_v16  ;;  %v8975_v38 = vunpack.i.h.bf16 %v16949_v44  ;;  %v9135_v23 = vunpack.i.h.bf16 %v16950_v15  ;;  %v9134_v37 = vunpack.i.l.bf16 %v16950_v15 }
 0x894   :  { %v7699_v8 = vsel %vm3261_vm9, %v7635_v48, %v9824_v46  ;;  %v7700_v47 = vsel %vm3261_vm9, %v7636_v39, %v9825_v45  ;;  %v7525_v31 = vsel %vm3066_vm6, %v7461_v7, %v9839_v20  ;;  %v7526_v0 = vsel %vm3066_vm6, %v7462_v59, %v9840_v49  ;;  %v16951_v49 = vld [vmem:[#allocation116_spill] sm:$0xff]  ;;  %v10105_v7 = vld [vmem:[#allocation2 + $0x248] sm:$0xff] }
 0x895   :  { %v9833_v57 = vpop.permute.xlu1 %9832  ;;  %v9848_v14 = vpop.permute.xlu0 %9847  ;;  %v7445_v63 = vsel %vm3001_vm5, %v7381_v62, %v9134_v37  ;;  %v8820_v20 = vunpack.i.h.bf16 %v16951_v49  ;;  %v8819_v6 = vunpack.i.l.bf16 %v16951_v49  ;;  %v10106_v62 = vld [vmem:[#allocation2 + $0x240] sm:$0xff] }
 0x896   :  { %v9835_v27 = vunpack.i.h.bf16 %v9833_v57  ;;  %v9834_v2 = vunpack.i.l.bf16 %v9833_v57  ;;  %v9850_v42 = vunpack.i.h.bf16 %v9848_v14  ;;  %v9849_v29 = vunpack.i.l.bf16 %v9848_v14 }
 0x897   :  { %v7320_v59 = vsel %vm30_vm0, %v10105_v7, %v8820_v20 }
 0x898   :  { %v7763_v11 = vsel %vm3326_vm10, %v7699_v8, %v9834_v2  ;;  %v7764_v30 = vsel %vm3326_vm10, %v7700_v47, %v9835_v27  ;;  %v7589_v45 = vsel %vm3131_vm7, %v7525_v31, %v9849_v29  ;;  %v7590_v46 = vsel %vm3131_vm7, %v7526_v0, %v9850_v42  ;;  %v16952_v42 = vld [vmem:[#allocation58_spill] sm:$0xff]  ;;  %v16955_v0 = vld [vmem:[#allocation295_spill] sm:$0xff] }
 0x899   :  { %v8674_v36 = vpack.c.bf16 %v7764_v30, %v7763_v11  ;;  %v15672_v34 = vpop.permute.xlu1 %9842  ;;  %v9858_v26 = vpop.permute.xlu0 %9857  ;;  %v7382_v11 = vsel %vm2936_vm4, %v7318_v50, %v8975_v38  ;;  %v8860_v29 = vunpack.i.h.bf16 %v16952_v42  ;;  %v7319_v31 = vsel %vm30_vm0, %v10106_v62, %v8819_v6 }
 0x89a   :  { %v9860_v53 = vunpack.i.h.bf16 %v9858_v26  ;;  %v9859_v60 = vunpack.i.l.bf16 %v9858_v26  ;;  %v9845_v48 = vunpack.i.h.bf16 %v15672_v34  ;;  %v9844_v39 = vunpack.i.l.bf16 %v15672_v34 }
 0x89b   :  { %8676 = vmatpush3.bf16.xpose.msk.msra.mxu1 %vm14675_vm12, %v8674_v36  ;;  %v7446_v34 = vsel %vm3001_vm5, %v7382_v11, %v9135_v23 }
 0x89c   :  { %v7653_v28 = vsel %vm3196_vm8, %v7589_v45, %v9859_v60  ;;  %v7654_v32 = vsel %vm3196_vm8, %v7590_v46, %v9860_v53  ;;  %v7509_v9 = vsel %vm3066_vm6, %v7445_v63, %v9844_v39  ;;  %v7510_v33 = vsel %vm3066_vm6, %v7446_v34, %v9845_v48  ;;  %v10107_v45 = vld [vmem:[#allocation2 + $0x308] sm:$0xff] }
 0x89d   :  { %v9853_v56 = vpop.permute.xlu1 %9852  ;;  %v9868_v18 = vpop.permute.xlu0 %9867  ;;  %v9020_v53 = vunpack.i.h.bf16 %v16953_v24  ;;  %v9019_v60 = vunpack.i.l.bf16 %v16953_v24  ;;  %v7336_v46 = vsel %vm30_vm0, %v10107_v45, %v8860_v29 }
 0x89e   :  { %v9870_v17 = vunpack.i.h.bf16 %v9868_v18  ;;  %v9869_v40 = vunpack.i.l.bf16 %v9868_v18  ;;  %v9855_v14 = vunpack.i.h.bf16 %v9853_v56  ;;  %v9854_v8 = vunpack.i.l.bf16 %v9853_v56 }
 0x89f   :  { %v8859_v18 = vunpack.i.l.bf16 %v16952_v42  ;;  %v7400_v39 = vsel %vm2936_vm4, %v7336_v46, %v9020_v53 }
 0x8a0   :  { %v7717_v27 = vsel %vm3261_vm9, %v7653_v28, %v9869_v40  ;;  %v7718_v2 = vsel %vm3261_vm9, %v7654_v32, %v9870_v17  ;;  %v7573_v54 = vsel %vm3131_vm7, %v7509_v9, %v9854_v8  ;;  %v7574_v43 = vsel %vm3131_vm7, %v7510_v33, %v9855_v14  ;;  %v16954_v17 = vld [vmem:[#allocation183_spill] sm:$0xff] }
 0x8a1   :  { %v9863_v55 = vpop.permute.xlu1 %9862  ;;  %v9878_v10 = vpop.permute.xlu0 %9877  ;;  %v9180_v40 = vunpack.i.h.bf16 %v16954_v17  ;;  %v9179_v38 = vunpack.i.l.bf16 %v16954_v17 }
 0x8a2   :  { %v9880_v35 = vunpack.i.h.bf16 %v9878_v10  ;;  %v9879_v57 = vunpack.i.l.bf16 %v9878_v10  ;;  %v9865_v30 = vunpack.i.h.bf16 %v9863_v55  ;;  %v9864_v12 = vunpack.i.l.bf16 %v9863_v55  ;;  %v10108_v10 = vld [vmem:[#allocation2 + $0x300] sm:$0xff] }
 0x8a3   :  { %v8979_v55 = vunpack.i.l.bf16 %v16955_v0  ;;  %v7335_v28 = vsel %vm30_vm0, %v10108_v10, %v8859_v18  ;;  %v7464_v14 = vsel %vm3001_vm5, %v7400_v39, %v9180_v40  ;;  %v16959_v39 = vld [vmem:[#allocation62_spill] sm:$0xff] }
 0x8a4   :  { %v7781_v47 = vsel %vm3326_vm10, %v7717_v27, %v9879_v57  ;;  %v7782_v3 = vsel %vm3326_vm10, %v7718_v2, %v9880_v35  ;;  %v7637_v5 = vsel %vm3196_vm8, %v7573_v54, %v9864_v12  ;;  %v7638_v58 = vsel %vm3196_vm8, %v7574_v43, %v9865_v30 }
 0x8a5   :  { %v9873_v4 = vpop.permute.xlu1 %9872  ;;  %v8677_v36 = vpack.c.bf16 %v7782_v3, %v7781_v47  ;;  %v9888_v22 = vpop.permute.xlu0 %9887  ;;  %v7399_v48 = vsel %vm2936_vm4, %v7335_v28, %v9019_v60  ;;  %v7383_v11 = vsel %vm2936_vm4, %v7319_v31, %v8979_v55 }
 0x8a6   :  { %v9875_v13 = vunpack.i.h.bf16 %v9873_v4  ;;  %v9874_v26 = vunpack.i.l.bf16 %v9873_v4  ;;  %v9890_v15 = vunpack.i.h.bf16 %v9888_v22  ;;  %v9889_v23 = vunpack.i.l.bf16 %v9888_v22  ;;  %v16956_v22 = vld [vmem:[#allocation67_spill] sm:$0xff] }
 0x8a7   :  { %8679 = vmatprep.subr.msk.bf16.mxu1 %vm14675_vm12, %v8677_v36  ;;  %v7463_v8 = vsel %vm3001_vm5, %v7399_v48, %v9179_v38  ;;  %v8980_v4 = vunpack.i.h.bf16 %v16955_v0  ;;  %v9140_v63 = vunpack.i.h.bf16 %v16956_v22  ;;  %v9139_v34 = vunpack.i.l.bf16 %v16956_v22 }
 0x8a8   :  { %v7701_v44 = vsel %vm3261_vm9, %v7637_v5, %v9874_v26  ;;  %v7702_v1 = vsel %vm3261_vm9, %v7638_v58, %v9875_v13  ;;  %v7527_v30 = vsel %vm3066_vm6, %v7463_v8, %v9889_v23  ;;  %v7528_v12 = vsel %vm3066_vm6, %v7464_v14, %v9890_v15  ;;  %v16957_v15 = vld [vmem:[#allocation172_spill] sm:$0xff] }
 0x8a9   :  { %v9883_v50 = vpop.permute.xlu1 %9882  ;;  %v9898_v61 = vpop.permute.xlu0 %9897  ;;  %v8825_v23 = vunpack.i.h.bf16 %v16957_v15  ;;  %v8824_v46 = vunpack.i.l.bf16 %v16957_v15  ;;  %v10109_v14 = vld [vmem:[#allocation2 + $0x260] sm:$0xff] }
 0x8aa   :  { %v9885_v16 = vunpack.i.h.bf16 %v9883_v50  ;;  %v9884_v19 = vunpack.i.l.bf16 %v9883_v50  ;;  %v9900_v32 = vunpack.i.h.bf16 %v9898_v61  ;;  %v9899_v35 = vunpack.i.l.bf16 %v9898_v61 }
 0x8ab   :  { %v7322_v8 = vsel %vm30_vm0, %v10109_v14, %v8825_v23 }
 0x8ac   :  { %v7765_v56 = vsel %vm3326_vm10, %v7701_v44, %v9884_v19  ;;  %v7766_v25 = vsel %vm3326_vm10, %v7702_v1, %v9885_v16  ;;  %v7591_v13 = vsel %vm3131_vm7, %v7527_v30, %v9899_v35  ;;  %v7592_v26 = vsel %vm3131_vm7, %v7528_v12, %v9900_v32  ;;  %v16958_v32 = vld [vmem:[#allocation290_spill] sm:$0xff]  ;;  %v16961_v12 = vld [vmem:[#allocation353_spill] sm:$0xff] }
 0x8ad   :  { %v8680_v51 = vpack.c.bf16 %v7766_v25, %v7765_v56  ;;  %v15724_v21 = vpop.permute.xlu1 %9892  ;;  %v9908_v52 = vpop.permute.xlu0 %9907  ;;  %v7384_v56 = vsel %vm2936_vm4, %v7320_v59, %v8980_v4  ;;  %v8865_v35 = vunpack.i.h.bf16 %v16958_v32 }
 0x8ae   :  { %v9910_v27 = vunpack.i.h.bf16 %v9908_v52  ;;  %v9909_v2 = vunpack.i.l.bf16 %v9908_v52  ;;  %v9895_v5 = vunpack.i.h.bf16 %v15724_v21  ;;  %v9894_v58 = vunpack.i.l.bf16 %v15724_v21 }
 0x8af   :  { %8682 = vmatpush3.bf16.xpose.msk.msra.mxu1 %vm14675_vm12, %v8680_v51  ;;  %v7448_v29 = vsel %vm3001_vm5, %v7384_v56, %v9140_v63  ;;  %v7447_v21 = vsel %vm3001_vm5, %v7383_v11, %v9139_v34  ;;  %v10110_v11 = vld [vmem:[#allocation2 + $0x258] sm:$0xff] }
 0x8b0   :  { %v7655_v33 = vsel %vm3196_vm8, %v7591_v13, %v9909_v2  ;;  %v7656_v54 = vsel %vm3196_vm8, %v7592_v26, %v9910_v27  ;;  %v7512_v24 = vsel %vm3066_vm6, %v7448_v29, %v9895_v5  ;;  %v7511_v53 = vsel %vm3066_vm6, %v7447_v21, %v9894_v58  ;;  %v10111_v13 = vld [vmem:[#allocation2 + $0x320] sm:$0xff] }
 0x8b1   :  { %v9903_v37 = vpop.permute.xlu1 %9902  ;;  %v9918_v57 = vpop.permute.xlu0 %9917  ;;  %v9025_v27 = vunpack.i.h.bf16 %v16959_v39  ;;  %v9024_v2 = vunpack.i.l.bf16 %v16959_v39  ;;  %v7321_v30 = vsel %vm30_vm0, %v10110_v11, %v8824_v46  ;;  %v7338_v26 = vsel %vm30_vm0, %v10111_v13, %v8865_v35 }
 0x8b2   :  { %v9920_v47 = vunpack.i.h.bf16 %v9918_v57  ;;  %v9919_v3 = vunpack.i.l.bf16 %v9918_v57  ;;  %v9905_v61 = vunpack.i.h.bf16 %v9903_v37  ;;  %v9904_v44 = vunpack.i.l.bf16 %v9903_v37 }
 0x8b3   :  { %v8864_v57 = vunpack.i.l.bf16 %v16958_v32  ;;  %v7402_v58 = vsel %vm2936_vm4, %v7338_v26, %v9025_v27 }
 0x8b4   :  { %v7719_v16 = vsel %vm3261_vm9, %v7655_v33, %v9919_v3  ;;  %v7720_v19 = vsel %vm3261_vm9, %v7656_v54, %v9920_v47  ;;  %v7575_v60 = vsel %vm3131_vm7, %v7511_v53, %v9904_v44  ;;  %v7576_v7 = vsel %vm3131_vm7, %v7512_v24, %v9905_v61  ;;  %v16960_v47 = vld [vmem:[#allocation239_spill] sm:$0xff] }
 0x8b5   :  { %v9913_v36 = vpop.permute.xlu1 %9912  ;;  %v9928_v9 = vpop.permute.xlu0 %9927  ;;  %v9185_v3 = vunpack.i.h.bf16 %v16960_v47  ;;  %v9184_v4 = vunpack.i.l.bf16 %v16960_v47 }
 0x8b6   :  { %v9930_v43 = vunpack.i.h.bf16 %v9928_v9  ;;  %v9929_v50 = vunpack.i.l.bf16 %v9928_v9  ;;  %v9915_v25 = vunpack.i.h.bf16 %v9913_v36  ;;  %v9914_v6 = vunpack.i.l.bf16 %v9913_v36  ;;  %v10112_v9 = vld [vmem:[#allocation2 + $0x318] sm:$0xff] }
 0x8b7   :  { %v8984_v36 = vunpack.i.l.bf16 %v16961_v12  ;;  %v7337_v33 = vsel %vm30_vm0, %v10112_v9, %v8864_v57  ;;  %v7466_v44 = vsel %vm3001_vm5, %v7402_v58, %v9185_v3 }
 0x8b8   :  { %v7783_v1 = vsel %vm3326_vm10, %v7719_v16, %v9929_v50  ;;  %v7784_v49 = vsel %vm3326_vm10, %v7720_v19, %v9930_v43  ;;  %v7639_v17 = vsel %vm3196_vm8, %v7575_v60, %v9914_v6  ;;  %v7640_v40 = vsel %vm3196_vm8, %v7576_v7, %v9915_v25 }
 0x8b9   :  { %v9923_v20 = vpop.permute.xlu1 %9922  ;;  %v8683_v51 = vpack.c.bf16 %v7784_v49, %v7783_v1  ;;  %v9938_v42 = vpop.permute.xlu0 %9937  ;;  %v7401_v5 = vsel %vm2936_vm4, %v7337_v33, %v9024_v2  ;;  %v7385_v56 = vsel %vm2936_vm4, %v7321_v30, %v8984_v36 }
 0x8ba   :  { %v9925_v18 = vunpack.i.h.bf16 %v9923_v20  ;;  %v9924_v52 = vunpack.i.l.bf16 %v9923_v20  ;;  %v9940_v22 = vunpack.i.h.bf16 %v9938_v42  ;;  %v9939_v63 = vunpack.i.l.bf16 %v9938_v42  ;;  %v16962_v42 = vld [vmem:[#allocation121_spill] sm:$0xff] }
 0x8bb   :  { %8685 = vmatprep.subr.msk.bf16.mxu1 %vm14675_vm12, %v8683_v51  ;;  %v7465_v61 = vsel %vm3001_vm5, %v7401_v5, %v9184_v4  ;;  %v8985_v20 = vunpack.i.h.bf16 %v16961_v12  ;;  %v9145_v29 = vunpack.i.h.bf16 %v16962_v42  ;;  %v9144_v21 = vunpack.i.l.bf16 %v16962_v42 }
 0x8bc   :  { %v7703_v0 = vsel %vm3261_vm9, %v7639_v17, %v9924_v52  ;;  %v7704_v55 = vsel %vm3261_vm9, %v7640_v40, %v9925_v18  ;;  %v7529_v25 = vsel %vm3066_vm6, %v7465_v61, %v9939_v63  ;;  %v7530_v6 = vsel %vm3066_vm6, %v7466_v44, %v9940_v22  ;;  %v10113_v63 = vld [vmem:[%s15869_s5] sm:$0xf] }
 0x8bd   :  { %v9933_v59 = vpop.permute.xlu1 %9932  ;;  %v7449_v32 = vsel %vm3001_vm5, %v7385_v56, %v9144_v21 }
 0x8be   :  { %v9935_v38 = vunpack.i.h.bf16 %v9933_v59  ;;  %v9934_v62 = vunpack.i.l.bf16 %v9933_v59  ;;  %v9948_v31 = vpop.permute.xlu0 %9947 }
 0x8bf   :  { %v9950_v54 = vunpack.i.h.bf16 %v9948_v31  ;;  %v9949_v43 = vunpack.i.l.bf16 %v9948_v31 }
 0x8c0   :  { %v7767_v37 = vsel %vm3326_vm10, %v7703_v0, %v9934_v62  ;;  %v7768_v45 = vsel %vm3326_vm10, %v7704_v55, %v9935_v38 }
 0x8c1   :  { %v8686_v10 = vpack.c.bf16 %v7768_v45, %v7767_v37  ;;  %v15776_v28 = vpop.permute.xlu1 %9942  ;;  %v7593_v18 = vsel %vm3131_vm7, %v7529_v25, %v9949_v43  ;;  %v7594_v52 = vsel %vm3131_vm7, %v7530_v6, %v9950_v54  ;;  %v7386_v37 = vsel %vm2936_vm4, %v7322_v8, %v8985_v20 }
 0x8c2   :  { %v9958_v48 = vpop.permute.xlu0 %9957  ;;  %v9945_v17 = vunpack.i.h.bf16 %v15776_v28  ;;  %v9944_v40 = vunpack.i.l.bf16 %v15776_v28  ;;  %v7450_v28 = vsel %vm3001_vm5, %v7386_v37, %v9145_v29 }
 0x8c3   :  { %8688 = vmatpush3.bf16.xpose.msk.msra.mxu1 %vm14675_vm12, %v8686_v10  ;;  %v9960_v16 = vunpack.i.h.bf16 %v9958_v48  ;;  %v9959_v19 = vunpack.i.l.bf16 %v9958_v48 }
 0x8c4   :  { %v7513_v48 = vsel %vm3066_vm6, %v7449_v32, %v9944_v40  ;;  %v7514_v39 = vsel %vm3066_vm6, %v7450_v28, %v9945_v17  ;;  %v8124_v17 = vld [vmem:[%s15870_s6] sm:$0xf]  ;;  %s10148_s6 = smov [#allocation3]  }
 0x8c5   :  { %v9953_v34 = vpop.permute.xlu1 %9952  ;;  %v7657_v53 = vsel %vm3196_vm8, %v7593_v18, %v9959_v19  ;;  %v7658_v60 = vsel %vm3196_vm8, %v7594_v52, %v9960_v16 }
 0x8c6   :  { %v9968_v50 = vpop.permute.xlu0 %9967  ;;  %v9955_v31 = vunpack.i.h.bf16 %v9953_v34  ;;  %v9954_v0 = vunpack.i.l.bf16 %v9953_v34 }
 0x8c7   :  { %v9970_v1 = vunpack.i.h.bf16 %v9968_v50  ;;  %v9969_v49 = vunpack.i.l.bf16 %v9968_v50 }
 0x8c8   :  { %v7577_v27 = vsel %vm3131_vm7, %v7513_v48, %v9954_v0  ;;  %v7578_v2 = vsel %vm3131_vm7, %v7514_v39, %v9955_v31 }
 0x8c9   :  { %v9963_v51 = vpop.permute.xlu1 %9962  ;;  %v7721_v38 = vsel %vm3261_vm9, %v7657_v53, %v9969_v49  ;;  %v7722_v62 = vsel %vm3261_vm9, %v7658_v60, %v9970_v1  ;;  %v10147_v53 = vmov 0  }
 0x8ca   :  { %v9978_v24 = vpop.permute.xlu0 %9977  ;;  %v9965_v45 = vunpack.i.h.bf16 %v9963_v51  ;;  %v9964_v46 = vunpack.i.l.bf16 %v9963_v51  ;;  %9986 = vset.pattern.permute.xlu0 %v10147_v53  ;;  %9987 = vset.pattern.permute.xlu1 %v10147_v53 }
 0x8cb   :  { %v9980_v7 = vunpack.i.h.bf16 %v9978_v24  ;;  %v9979_v59 = vunpack.i.l.bf16 %v9978_v24 }
 0x8cc   :  { %v7641_v8 = vsel %vm3196_vm8, %v7577_v27, %v9964_v46  ;;  %v7642_v47 = vsel %vm3196_vm8, %v7578_v2, %v9965_v45 }
 0x8cd   :  { %v7785_v55 = vsel %vm3326_vm10, %v7721_v38, %v9979_v59  ;;  %v7786_v15 = vsel %vm3326_vm10, %v7722_v62, %v9980_v7  ;;  %v9973_v23 = vpop.permute.xlu1 %9972  ;;  %v8125_v62 = vld [vmem:[%s15871_s7] sm:$0xf]  ;;  %s8209_s7 = sshll.u32 %s10148_s6, 4  ;;  %s8210_s7 = int_to_ptr.vmem [resolvable:$true] %s8209_s7 }
 0x8ce   :  { %v8689_v10 = vpack.c.bf16 %v7786_v15, %v7785_v55  ;;  %v9975_v35 = vunpack.i.h.bf16 %v9973_v23  ;;  %v9974_v57 = vunpack.i.l.bf16 %v9973_v23  ;;  %v8177_v55 = vld [vmem:[%s15865_s1] sm:$0xff]  ;;  %v8178_v15 = vld [vmem:[%s15865_s1 + $0x8] sm:$0xff]  ;;  %s10114_s1 = scalar_lea.vmem %s8210_s7, 256  ;;  %p10119_p1 = scmp.lt.s32.totalorder %s8210_s7, %s8210_s7 }
 0x8cf   :  { %v8181_v37 = vcombine.high %v8177_v55, %v8177_v55  ;;  %v8182_v45 = vcombine.high %v8178_v15, %v8178_v15  ;;  %p10115_p0 = scmp.ne.s32.totalorder %s8210_s7, %s10114_s1  ;;  %p10120_p2 = scmp.lt.s32.totalorder %s10114_s1, %s10114_s1 }
 0x8d0   :  { %8691 = vmatprep.subr.msk.bf16.mxu1 %vm14675_vm12, %v8689_v10  ;;  %v7705_v11 = vsel %vm3261_vm9, %v7641_v8, %v9974_v57  ;;  %v7706_v30 = vsel %vm3261_vm9, %v7642_v47, %v9975_v35 }
 0x8d1   :  { %v9983_v14 = vpop.permute.xlu1 %9982  ;;  %p10121_p3 = por %p10120_p2, %p10119_p1 }
 0x8d2   :  { %v9985_v3 = vunpack.i.h.bf16 %v9983_v14  ;;  %v9984_v4 = vunpack.i.l.bf16 %v9983_v14 }
 0x8d3   :  { %p10122_p4 = pnand %p10121_p3, %p10115_p0 }
 0x8d4   :  { %v7769_v12 = vsel %vm3326_vm10, %v7705_v11, %v9984_v4  ;;  %v7770_v36 = vsel %vm3326_vm10, %v7706_v30, %v9985_v3 }
 0x8d5   :  { %v8692_v22 = vpack.c.bf16 %v7770_v36, %v7769_v12 }
 0x8d7   :  { %8694 = vmatpush3.bf16.xpose.msk.msra.mxu1 %vm14675_vm12, %v8692_v22 }
 0x8de   :  { %8484 = vmatmul.mubr.msk.f32.vlgmr.msra.gmra.mrb[2].mxu1 %vm3396_vm11, %v10113_v63 }
 0x90f   :  { %v8048_v34 = vpop.f32.mrb[0].mxu1 }
 0x910   :  { %v8126_v13 = vsel %vm3589_vm3, %v8048_v34, 0.0  ;;  %v8050_v26 = vpop.f32.mrb[1].mxu1 }
 0x911   :  { %v8127_v9 = vsel %vm3589_vm3, %v8050_v26, 0.0 }
 0x912   :  { %v8128_v33 = vadd.f32 %v8127_v9, %v8126_v13 }
 0x9b1   :  { %v8119_v54 = vpop.f32.mrb[2].mxu1 }
 0x9b2   :  { %v8129_v43 = vsel %vm3589_vm3, %v8119_v54, 0.0  ;;  %v8121_v50 = vpop.f32.mrb[3].mxu1 }
 0x9b3   :  { %v8130_v5 = vadd.f32 %v8129_v43, %v8128_v33  ;;  %v8131_v41 = vsel %vm3589_vm3, %v8121_v50, 0.0 }
 0x9b5   :  { %v8132_v58 = vadd.f32 %v8131_v41, %v8130_v5 }
 0x9b7   :  { %8133 = vadd.xlane.f32.xlu0 %v8132_v58 }
 0xa44   :  { %v8134_v16 = vpop.xlane.xlu0 %8133 }
 0xa45   :  { %v8135_v19 = vmul.f32 0.001953125, %v8134_v16 }
 0xa47   :  { %v8136_v61 = vsub.f32 %v8048_v34, %v8135_v19  ;;  %v8137_v44 = vsub.f32 %v8050_v26, %v8135_v19  ;;  %v8138_v1 = vsub.f32 %v8119_v54, %v8135_v19  ;;  %v8139_v49 = vsub.f32 %v8121_v50, %v8135_v19 }
 0xa49   :  { %v8140_v20 = vmul.f32 %v8136_v61, %v8136_v61  ;;  %v8141_v56 = vmul.f32 %v8137_v44, %v8137_v44  ;;  %v8142_v25 = vmul.f32 %v8138_v1, %v8138_v1  ;;  %v8143_v6 = vmul.f32 %v8139_v49, %v8139_v49 }
 0xa4b   :  { %v8144_v51 = vsel %vm3589_vm3, %v8140_v20, 0.0  ;;  %v8145_v42 = vsel %vm3589_vm3, %v8141_v56, 0.0  ;;  %v8147_v21 = vsel %vm3589_vm3, %v8142_v25, 0.0  ;;  %v8149_v52 = vsel %vm3589_vm3, %v8143_v6, 0.0 }
 0xa4c   :  { %v8146_v29 = vadd.f32 %v8145_v42, %v8144_v51 }
 0xa4e   :  { %v8148_v18 = vadd.f32 %v8147_v21, %v8146_v29 }
 0xa50   :  { %v8150_v24 = vadd.f32 %v8149_v52, %v8148_v18 }
 0xa52   :  { %8151 = vadd.xlane.f32.xlu1 %v8150_v24 }
 0xadf   :  { %v8152_v60 = vpop.xlane.xlu1 %8151 }
 0xae0   :  { %v8153_v7 = vmul.f32 0.001953125, %v8152_v60 }
 0xae2   :  { %v8154_v59 = vadd.f32 1e-05, %v8153_v7 }
 0xae4   :  { %9992 = vrsqrt.f32 %v8154_v59 }
 0xaee   :  { %v9993_v40 = vpop.eup %9992 }
 0xaef   :  { %v8156_v38 = vmul.f32 %v9993_v40, %v8124_v17 }
 0xaf1   :  { %8161 = vperm.xlu0 %9986, %v8156_v38   ;;  %v8157_v31 = vmul.f32 %v8156_v38, %v8135_v19 }
 0xaf3   :  { %v8158_v0 = vsub.f32 %v8125_v62, %v8157_v31 }
 0xaf5   :  { %8170 = vperm.xlu1 %9987, %v8158_v0  }
 0xb70   :  { %v8162_v23 = vpop.permute.xlu0 %8161 }
 0xb71   :  { %v8164_v46 = vmul.f32 %v8162_v23, %v8048_v34  ;;  %v8165_v10 = vmul.f32 %v8162_v23, %v8050_v26  ;;  %v8166_v32 = vmul.f32 %v8162_v23, %v8119_v54  ;;  %v8167_v28 = vmul.f32 %v8162_v23, %v8121_v50 }
 0xb74   :  { %v8171_v35 = vpop.permute.xlu1 %8170 }
 0xb75   :  { %v8173_v57 = vadd.f32 %v8171_v35, %v8164_v46  ;;  %v8174_v48 = vadd.f32 %v8171_v35, %v8165_v10  ;;  %v8175_v39 = vadd.f32 %v8171_v35, %v8166_v32  ;;  %v8176_v27 = vadd.f32 %v8171_v35, %v8167_v28 }
 0xb77   :  { %v8185_v2 = vadd.f32 %v8177_v55, %v8173_v57  ;;  %v8186_v14 = vadd.f32 %v8181_v37, %v8174_v48  ;;  %v8187_v8 = vadd.f32 %v8178_v15, %v8175_v39  ;;  %v8188_v47 = vadd.f32 %v8182_v45, %v8176_v27 }
 0xb79   :  { %v8189_v3 = vmax.f32 %v8185_v2, 0.0  ;;  %v8190_v4 = vmax.f32 %v8186_v14, 0.0  ;;  %v8191_v11 = vmax.f32 %v8187_v8, 0.0  ;;  %v8192_v30 = vmax.f32 %v8188_v47, 0.0 }
 0xb7b   :  { %v8197_v12 = vcombine.low %v8189_v3, %v8190_v4  ;;  %v8198_v36 = vcombine.low %v8191_v11, %v8192_v30 }
 0xb7d   :  { %8201 = vst [vmem:[#allocation3] sm:$0xff] %v8197_v12  ;;  %8202 = vst [vmem:[#allocation3 + $0x8] sm:$0xff] %v8198_v36 }
 0xb7e   :  { %10125 = shalt.err (!%p10122_p4)
}
 0xb7f   :  { %s10126_s15 = scalar_lea.hbm %s15872_s8, 256 }
 0xb80   :  { %p10127_p5 = scmp.ne.s32.totalorder %s15872_s8, %s10126_s15  ;;  %p10130_p6 = scmp.lt.u32.totalorder %s10126_s15, %s15872_s8 }
 0xb82   :  { %p10132_p7 = pnand %p10130_p6, %p10127_p5 }
 0xb84   :  { %10135 = shalt.err (!%p10132_p7)
}
 0xb85   :  { %8212 = dma.vmem_to_hbm [thread:$0]  %s8210_s7, 256, %s15872_s8, [#allocation4]  }
 0xb86   :  { %10136 = dma.done.wait [#allocation4], 256  }
 0xb87   :  { %10137 = vsyncadd [#allocation4], 4294967040 }
 0xb88   :  { %8216 = vsyncpa [#allocation4], 1 }

</bundles_post_ra>
